<compile_context>
chip_gen: v7x
topology: tpu7x:2x2x1
jax: 0.10.0
libtpu: 0.0.40
codegen_flags: <defaults>
</compile_context>

<pallas_src>
import functools

import jax
import jax.numpy as jnp
from jax import lax
from jax.experimental import pallas as pl
from jax.experimental.pallas import tpu as pltpu


def _round_up(x, m):
    return (x + m - 1) // m * m


def _pick_batch_block(B, max_bb=8):
    """Largest divisor of B (<= max_bb) that still leaves >= 2 grid steps."""
    cands = [d for d in range(1, min(B, max_bb) + 1) if B % d == 0]
    two_step = [d for d in cands if B // d >= 2]
    return max(two_step) if two_step else max(cands)


# ----------------------------------------------------------------------------
# Pallas kernel: one batch block (bb elements) per grid step.
# ----------------------------------------------------------------------------
def _color_hist_kernel(x_ref, o_ref, *, bb, T, HW, L, LPAD, pad, sim_dtype):
    # x_ref : (bb, 3, T*HW) uint8  -- R/G/B planes, pixel axis lane-dense
    # o_ref : (bb, T, LPAD) f32    -- diagonal similarity band (zero tail)
    THW = T * HW

    # Upcast once; 9-bit RGB bin id per pixel, values in [0, 512).
    x = x_ref[...].astype(jnp.int32)                                # (bb,3,THW)
    r, g, b = x[:, 0, :], x[:, 1, :], x[:, 2, :]
    bins = ((r >> 5) << 6) + ((g >> 5) << 3) + (b >> 5)             # (bb, THW)

    # Constants shared across the batch block (hoisted out of the b-loop).
    bin_iota = lax.broadcasted_iota(jnp.int32, (512, THW), 0)       # bin ids
    pix = lax.broadcasted_iota(jnp.int32, (THW, T), 0)
    flo = lax.broadcasted_iota(jnp.int32, (THW, T), 1) * HW
    sel = ((pix >= flo) & (pix < flo + HW)).astype(jnp.bfloat16)    # (THW, T)
    eye = (lax.broadcasted_iota(jnp.int32, (T, T), 0) ==
           lax.broadcasted_iota(jnp.int32, (T, T), 1)).astype(jnp.float32)
    zl = jnp.zeros((T, pad), jnp.float32)
    zr = jnp.zeros((T, pad + LPAD - L), jnp.float32)

    for i in range(bb):                                             # small, static
        # One-hot of every pixel's bin id (0/1 -> exact in bf16).
        onehot = (bin_iota == bins[i:i + 1, :]).astype(jnp.bfloat16)   # (512,THW)

        # Histogram on the MXU: hist_t[c, t] = #pixels of frame t in bin c.
        hist_t = jnp.dot(onehot, sel,
                         preferred_element_type=jnp.float32)           # (512, T)

        # Raw (un-normalized) frame-to-frame similarities on the MXU.
        hmm = hist_t.astype(sim_dtype)
        sim_raw = lax.dot_general(hmm, hmm, (((0,), (0,)), ((), ())),
                                  preferred_element_type=jnp.float32)  # (T, T)

        # Post-matmul L2 normalization: scale by rsqrt of the diagonal.
        diag_col = jnp.sum(sim_raw * eye, axis=1, keepdims=True)       # (T, 1)
        diag_row = jnp.sum(sim_raw * eye, axis=0, keepdims=True)       # (1, T)
        inv_col = lax.rsqrt(jnp.maximum(diag_col, 1e-24))
        inv_row = lax.rsqrt(jnp.maximum(diag_row, 1e-24))
        sim = sim_raw * inv_col * inv_row                              # (T, T)

        # Diagonal band: out[t, l] = sim_padded[t, t + l]  (width LPAD >= L).
        pieces = []
        if pad > 0:
            pieces.append(zl)
        pieces.append(sim)
        if pad + LPAD - L > 0:
            pieces.append(zr)
        simp = jnp.concatenate(pieces, axis=1)                         # (T, T-1+LPAD)
        band = jnp.concatenate(
            [simp[t:t + 1, t:t + LPAD] for t in range(T)], axis=0)     # (T, LPAD)
        o_ref[i] = band


def color_histograms_forward(frames, lookup_window=101, max_batch_block=8):
    """frames: (B, T, H, W, 3) integer RGB values (0..255). Returns (B, T, L)."""
    assert lookup_window % 2 == 1, "`lookup_window` must be odd integer"
    B, T, H, W, C = frames.shape
    assert C == 3
    HW = H * W
    THW = T * HW
    pad = (lookup_window - 1) // 2
    LPAD = _round_up(lookup_window, 128)
    bb = _pick_batch_block(B, max_batch_block)

    # uint8 channel planes, pixel axis lane-dense: (B, 3, T*H*W).
    planes = jnp.transpose(frames.astype(jnp.uint8).reshape(B, THW, 3),
                           (0, 2, 1))

    # bf16 operands for the sim matmul are exact only while counts <= 256.
    sim_dtype = jnp.bfloat16 if HW <= 256 else jnp.float32

    kernel = functools.partial(_color_hist_kernel, bb=bb, T=T, HW=HW,
                               L=lookup_window, LPAD=LPAD, pad=pad,
                               sim_dtype=sim_dtype)
    out = pl.pallas_call(
        kernel,
        out_shape=jax.ShapeDtypeStruct((B, T, LPAD), jnp.float32),
        grid=(B // bb,),
        in_specs=[pl.BlockSpec((bb, 3, THW), lambda n: (n, 0, 0))],
        out_specs=pl.BlockSpec((bb, T, LPAD), lambda n: (n, 0, 0)),
        compiler_params=pltpu.CompilerParams(
            dimension_semantics=("parallel",)),
    )(planes)
    # TODO(synk): optional fc head (output_dim is not None) is disabled by the
    # module's default constructor args and therefore not implemented here.
    return out[..., :lookup_window]


# ----------------------------------------------------------------------------
# Pure-JAX reference (scatter-add histogram + gather), for correctness check.
# ----------------------------------------------------------------------------
def reference_forward(frames, lookup_window=101):
    B, T, H, W, _ = frames.shape
    f = frames.astype(jnp.int32)
    r, g, b = f[..., 0], f[..., 1], f[..., 2]
    bins = ((r >> 5) << 6) + ((g >> 5) << 3) + (b >> 5)            # (B,T,H,W)
    bins = bins.reshape(B * T, H * W)
    prefix = (jnp.arange(B * T, dtype=jnp.int32) << 9)[:, None]
    flat = (bins + prefix).reshape(-1)
    hist = jnp.zeros((B * T * 512,), jnp.int32).at[flat].add(1)
    hist = hist.reshape(B, T, 512).astype(jnp.float32)
    norm = jnp.sqrt(jnp.sum(hist * hist, axis=2, keepdims=True))
    hn = hist / jnp.maximum(norm, 1e-12)
    sim = jnp.einsum('btd,bsd->bts', hn, hn)
    pad_w = (lookup_window - 1) // 2
    simp = jnp.pad(sim, ((0, 0), (0, 0), (pad_w, pad_w)))
    idx = jnp.arange(T)[:, None] + jnp.arange(lookup_window)[None, :]
    idx = jnp.broadcast_to(idx[None], (B, T, lookup_window))
    return jnp.take_along_axis(simp, idx, axis=2)


if __name__ == "__main__":
    # ColorHistograms(lookup_window=101, output_dim=None)
    B, T, H, W = 2, 8, 16, 16
    lookup_window = 101

    key = jax.random.PRNGKey(0)
    frames = jax.random.randint(key, (B, T, H, W, 3), 0, 256, dtype=jnp.int32)

    out = jax.block_until_ready(color_histograms_forward(frames, lookup_window))
    ref = jax.block_until_ready(reference_forward(frames, lookup_window))

    assert out.shape == (B, T, lookup_window), out.shape
    assert bool(jnp.allclose(out, ref, atol=2e-3, rtol=1e-3)), \
        float(jnp.max(jnp.abs(out - ref)))

    print("KERNEL_OK")
</pallas_src>

<mosaic_0001>
module attributes {stable_mosaic.version = 11 : i64} {
  func.func @_color_hist_kernel(%arg0: i32, %arg1: memref<1x3x2048xi8, #tpu.memory_space<vmem>>, %arg2: memref<1x8x128xf32, #tpu.memory_space<vmem>>) attributes {dimension_semantics = [#tpu.dimension_semantics<parallel>], iteration_bounds = array<i64: 2>, scalar_prefetch = 0 : i64, scratch_operands = 0 : i64, tpu.core_type = #tpu.core_type<tc>, window_params = [{transform_indices = @transform_0, window_bounds = array<i64: 1, 3, 2048>}, {transform_indices = @transform_1, window_bounds = array<i64: 1, 8, 128>}]} {
    %c0 = arith.constant 0 : index
    %c0_0 = arith.constant 0 : index
    %c0_1 = arith.constant 0 : index
    %0 = vector.load %arg1[%c0, %c0_0, %c0_1] : memref<1x3x2048xi8, #tpu.memory_space<vmem>>, vector<1x3x2048xi8>
    %1 = arith.extui %0 : vector<1x3x2048xi8> to vector<1x3x2048xi32>
    %2 = vector.extract_strided_slice %1 {offsets = [0, 0, 0], sizes = [1, 1, 2048], strides = [1, 1, 1]} : vector<1x3x2048xi32> to vector<1x1x2048xi32>
    %3 = vector.shape_cast %2 : vector<1x1x2048xi32> to vector<1x2048xi32>
    %4 = vector.extract_strided_slice %1 {offsets = [0, 1, 0], sizes = [1, 1, 2048], strides = [1, 1, 1]} : vector<1x3x2048xi32> to vector<1x1x2048xi32>
    %5 = vector.shape_cast %4 : vector<1x1x2048xi32> to vector<1x2048xi32>
    %6 = vector.extract_strided_slice %1 {offsets = [0, 2, 0], sizes = [1, 1, 2048], strides = [1, 1, 1]} : vector<1x3x2048xi32> to vector<1x1x2048xi32>
    %7 = vector.shape_cast %6 : vector<1x1x2048xi32> to vector<1x2048xi32>
    %c5_i32 = arith.constant 5 : i32
    %8 = vector.broadcast %c5_i32 : i32 to vector<1x2048xi32>
    %9 = arith.shrsi %3, %8 : vector<1x2048xi32>
    %c6_i32 = arith.constant 6 : i32
    %10 = vector.broadcast %c6_i32 : i32 to vector<1x2048xi32>
    %11 = arith.shli %9, %10 : vector<1x2048xi32>
    %c5_i32_2 = arith.constant 5 : i32
    %12 = vector.broadcast %c5_i32_2 : i32 to vector<1x2048xi32>
    %13 = arith.shrsi %5, %12 : vector<1x2048xi32>
    %c3_i32 = arith.constant 3 : i32
    %14 = vector.broadcast %c3_i32 : i32 to vector<1x2048xi32>
    %15 = arith.shli %13, %14 : vector<1x2048xi32>
    %16 = arith.addi %11, %15 : vector<1x2048xi32>
    %c5_i32_3 = arith.constant 5 : i32
    %17 = vector.broadcast %c5_i32_3 : i32 to vector<1x2048xi32>
    %18 = arith.shrsi %7, %17 : vector<1x2048xi32>
    %19 = arith.addi %16, %18 : vector<1x2048xi32>
    %20 = tpu.iota {dimensions = array<i32: 0>} : vector<512x2048xi32>
    %21 = tpu.iota {dimensions = array<i32: 0>} : vector<2048x8xi32>
    %22 = tpu.iota {dimensions = array<i32: 1>} : vector<2048x8xi32>
    %c256_i32 = arith.constant 256 : i32
    %23 = vector.broadcast %c256_i32 : i32 to vector<2048x8xi32>
    %24 = arith.muli %22, %23 : vector<2048x8xi32>
    %25 = arith.cmpi sge, %21, %24 : vector<2048x8xi32>
    %c256_i32_4 = arith.constant 256 : i32
    %26 = vector.broadcast %c256_i32_4 : i32 to vector<2048x8xi32>
    %27 = arith.addi %24, %26 : vector<2048x8xi32>
    %28 = arith.cmpi slt, %21, %27 : vector<2048x8xi32>
    %29 = arith.andi %25, %28 : vector<2048x8xi1>
    %30 = arith.extui %29 : vector<2048x8xi1> to vector<2048x8xi32>
    %31 = arith.sitofp %30 : vector<2048x8xi32> to vector<2048x8xf32>
    %32 = arith.truncf %31 : vector<2048x8xf32> to vector<2048x8xbf16>
    %33 = tpu.iota {dimensions = array<i32: 0>} : vector<8x8xi32>
    %34 = tpu.iota {dimensions = array<i32: 1>} : vector<8x8xi32>
    %35 = arith.cmpi eq, %33, %34 : vector<8x8xi32>
    %36 = arith.extui %35 : vector<8x8xi1> to vector<8x8xi32>
    %37 = arith.sitofp %36 : vector<8x8xi32> to vector<8x8xf32>
    %cst = arith.constant 0.000000e+00 : f32
    %38 = vector.broadcast %cst : f32 to vector<8x50xf32>
    %cst_5 = arith.constant 0.000000e+00 : f32
    %39 = vector.broadcast %cst_5 : f32 to vector<8x77xf32>
    %40 = vector.broadcast %19 : vector<1x2048xi32> to vector<512x2048xi32>
    %41 = arith.cmpi eq, %20, %40 : vector<512x2048xi32>
    %42 = arith.extui %41 : vector<512x2048xi1> to vector<512x2048xi32>
    %43 = arith.sitofp %42 : vector<512x2048xi32> to vector<512x2048xf32>
    %44 = arith.truncf %43 : vector<512x2048xf32> to vector<512x2048xbf16>
    %cst_6 = arith.constant dense<0.000000e+00> : vector<512x8xf32>
    %45 = tpu.matmul %44, %32, %cst_6 {dimension_numbers = #tpu.dot_dimension_numbers<[1], [0], [0], [1], [0, 0, 1, 1], [], []>} : vector<512x2048xbf16>, vector<2048x8xbf16>, vector<512x8xf32> -> vector<512x8xf32>
    %46 = arith.truncf %45 : vector<512x8xf32> to vector<512x8xbf16>
    %cst_7 = arith.constant dense<0.000000e+00> : vector<8x8xf32>
    %47 = tpu.matmul %46, %46, %cst_7 {dimension_numbers = #tpu.dot_dimension_numbers<[0], [0], [1], [1], [0, 1, 1, 1], [], []>} : vector<512x8xbf16>, vector<512x8xbf16>, vector<8x8xf32> -> vector<8x8xf32>
    %48 = arith.mulf %47, %37 : vector<8x8xf32>
    %cst_8 = arith.constant dense<0.000000e+00> : vector<8xf32>
    %49 = vector.multi_reduction <add>, %48, %cst_8 [1] : vector<8x8xf32> to vector<8xf32>
    %50 = vector.shape_cast %49 : vector<8xf32> to vector<8x1xf32>
    %51 = arith.mulf %47, %37 : vector<8x8xf32>
    %cst_9 = arith.constant dense<0.000000e+00> : vector<8xf32>
    %52 = vector.multi_reduction <add>, %51, %cst_9 [0] : vector<8x8xf32> to vector<8xf32>
    %53 = vector.shape_cast %52 : vector<8xf32> to vector<1x8xf32>
    %cst_10 = arith.constant 1.000000e-24 : f32
    %54 = vector.broadcast %cst_10 : f32 to vector<8x1xf32>
    %55 = arith.maximumf %50, %54 : vector<8x1xf32>
    %56 = math.rsqrt %55 : vector<8x1xf32>
    %cst_11 = arith.constant 1.000000e-24 : f32
    %57 = vector.broadcast %cst_11 : f32 to vector<1x8xf32>
    %58 = arith.maximumf %53, %57 : vector<1x8xf32>
    %59 = math.rsqrt %58 : vector<1x8xf32>
    %60 = vector.broadcast %56 : vector<8x1xf32> to vector<8x8xf32>
    %61 = arith.mulf %47, %60 : vector<8x8xf32>
    %62 = vector.broadcast %59 : vector<1x8xf32> to vector<8x8xf32>
    %63 = arith.mulf %61, %62 : vector<8x8xf32>
    %64 = tpu.concatenate %38, %63, %39 in 1 : vector<8x50xf32>, vector<8x8xf32>, vector<8x77xf32> -> vector<8x135xf32>
    %65 = vector.extract_strided_slice %64 {offsets = [0, 0], sizes = [1, 128], strides = [1, 1]} : vector<8x135xf32> to vector<1x128xf32>
    %66 = vector.extract_strided_slice %64 {offsets = [1, 1], sizes = [1, 128], strides = [1, 1]} : vector<8x135xf32> to vector<1x128xf32>
    %67 = vector.extract_strided_slice %64 {offsets = [2, 2], sizes = [1, 128], strides = [1, 1]} : vector<8x135xf32> to vector<1x128xf32>
    %68 = vector.extract_strided_slice %64 {offsets = [3, 3], sizes = [1, 128], strides = [1, 1]} : vector<8x135xf32> to vector<1x128xf32>
    %69 = vector.extract_strided_slice %64 {offsets = [4, 4], sizes = [1, 128], strides = [1, 1]} : vector<8x135xf32> to vector<1x128xf32>
    %70 = vector.extract_strided_slice %64 {offsets = [5, 5], sizes = [1, 128], strides = [1, 1]} : vector<8x135xf32> to vector<1x128xf32>
    %71 = vector.extract_strided_slice %64 {offsets = [6, 6], sizes = [1, 128], strides = [1, 1]} : vector<8x135xf32> to vector<1x128xf32>
    %72 = vector.extract_strided_slice %64 {offsets = [7, 7], sizes = [1, 128], strides = [1, 1]} : vector<8x135xf32> to vector<1x128xf32>
    %73 = tpu.concatenate %65, %66, %67, %68, %69, %70, %71, %72 in 0 : vector<1x128xf32>, vector<1x128xf32>, vector<1x128xf32>, vector<1x128xf32>, vector<1x128xf32>, vector<1x128xf32>, vector<1x128xf32>, vector<1x128xf32> -> vector<8x128xf32>
    %c0_12 = arith.constant 0 : index
    %c0_13 = arith.constant 0 : index
    %c0_14 = arith.constant 0 : index
    %74 = vector.load %arg2[%c0_12, %c0_13, %c0_14] : memref<1x8x128xf32, #tpu.memory_space<vmem>>, vector<1x8x128xf32>
    %75 = vector.shape_cast %74 : vector<1x8x128xf32> to vector<8x128xf32>
    %76 = vector.shape_cast %73 : vector<8x128xf32> to vector<1x8x128xf32>
    tpu.vector_store %arg2[%c0_12, %c0_13, %c0_14], %76 {strides = array<i32>} : memref<1x8x128xf32, #tpu.memory_space<vmem>>, vector<1x8x128xf32>,
    return
  }
  func.func @transform_0(%arg0: i32) -> (i32, i32, i32) {
    %c0_i32 = arith.constant 0 : i32
    %c0_i32_0 = arith.constant 0 : i32
    %c0_i32_1 = arith.constant 0 : i32
    return %arg0, %c0_i32, %c0_i32_0 : i32, i32, i32
  }
  func.func @transform_1(%arg0: i32) -> (i32, i32, i32) {
    %c0_i32 = arith.constant 0 : i32
    %c0_i32_0 = arith.constant 0 : i32
    %c0_i32_1 = arith.constant 0 : i32
    return %arg0, %c0_i32, %c0_i32_0 : i32, i32, i32
  }
}

</mosaic_0001>

<bundles_post_ra>
// kernel: tpu_custom_call.1
= control target key start
LH: loop header
LB: loop body
LE: loop exit
PB: predicated region body
PF: predicated region fallthrough
CT: control target
= control target key end

     0   :  { %6 = vsyncpa [#allocation3], 0  ;;  %s18809_s0 = inlined_call_operand.hbm [shape: u8[2,3,2048], index: 0, kind: input, shape index: {}]   ;;  %s18810_s1 = inlined_call_operand.hbm [shape: f32[2,8,128], index: 1, kind: output, shape index: {}]  }
   0x1   :  { %8 = vsyncpa [#allocation3 + $0x1], 0 }
   0x2   :  { %9 = vsyncpa [#allocation4], 0 }
   0x3   :  { %11 = vsyncpa [#allocation4 + $0x1], 0  ;;  %s11894_s6 = smov 0   ;;  %s11896_s7 = smov 0  }
   0x4   :  { %s11898_s8 = smov 0   ;;  %s11900_s9 = smov 0  }
   0x5 LB: > { %s11915_s10 = sadd.s32 4294967295, %s11869_s9   ;;  %s8271_s11 = sadd.s32 4294967294, %s11869_s9   ;;  %s11869_s9 = sphi %s11900_s9, %s20032_s9   ;;  %s11865_s8 = sphi %s11898_s8, %s20031_s8   ;;  %s11861_s7 = sphi %s11896_s7, %s20030_s7   ;;  %s11857_s6 = sphi %s11894_s6, %s20029_s6  }
   0x6   : > { %s11919_s12 = sadd.s32 1, %s11869_s9   ;;  %s24_s13 = sadd.s32 1, %s11865_s8 }
   0x7   : > { %s21_s14 = ssub.s32 %s11869_s9, %s11919_s12  ;;  %p31_p0 = scmp.ne.s32.totalorder %s11865_s8, %s11861_s7 }
   0x8   : > { %p22_p1 = scmp.eq.s32.totalorder %s21_s14, 0  ;;  %p32_p2 = scmp.eq.s32.totalorder %s11869_s9, 0 }
   0x9   : > { %p37_p3 = scmp.ne.s32.totalorder %s11861_s7, %s11857_s6  ;;  %p38_p4 = scmp.eq.s32.totalorder %s11915_s10, 0 }
   0xa   : > { %s11931_s15 = scalar_select %p22_p1, %s11865_s8, %s24_s13  }
   0xb   : > { %p11933_p5 = por %p32_p2, %p31_p0  ;;  %p11937_p6 = por %p38_p4, %p37_p3 }
   0xc   : > { %p61_p7 = scmp.eq.s32.totalorder %s11915_s10, 1  ;;  %p67_p8 = scmp.eq.s32.totalorder %s8271_s11, 1 }
   0xd   : > { %p11724_p10 = scmp.lt.s32.totalorder %s11869_s9, 2  ;;  %s87_s20 = sand.u32 1, %s11865_s8  }
   0xe   : > { %p11944_p11 = por %p61_p7, %p31_p0  ;;  %p11948_p12 = por %p67_p8, %p37_p3 }
   0xf   : > { %s10861_s21 = sshll.u32 %s11869_s9, 8  ;;  %s8274_s22 = sshll.u32 %s87_s20, 4 }
  0x10   : > { %s18989_s18 = scalar_select %p11944_p11, 1, 0 }
  0x11   : > { %s18990_s19 = scalar_select %p11948_p12, 1, 0 }
  0x12   : > { %s11957_s25 = scalar_lea.hbm %s18809_s0, %s10861_s21  ;;  %s91_s26 = scalar_lea.vmem [#allocation2], %s8274_s22 }
  0x13   : > { %s99_s27 = sshll.u32 %s91_s26, 4  ;;  %p11961_p13 = pnand %p11724_p10, %p11933_p5  ;;  %s11965_s27 = int_to_ptr.vmem [resolvable:$true] %s99_s27 }
  0x14   : > { %s88_s29 = scalar_lea.sflag [#allocation3], %s87_s20  ;;  %s11773_s30 = scalar_lea.hbm %s11957_s25, 256 }
  0x15   : > { %p11774_p2 = scmp.ne.s32.totalorder %s11957_s25, %s11773_s30  ;;  %p11775_p3 = pneg %p11961_p13 }
  0x16   : > { %s11778_s4 = scalar_lea.hbm %s18809_s0, 512  ;;  %p11779_p5 = scmp.lt.u32.totalorder %s11957_s25, %s18809_s0 }
  0x17   : > { %p11776_p4 = pnand %p11775_p3, %p11774_p2  ;;  %p11780_p8 = scmp.lt.u32.totalorder %s11778_s4, %s11773_s30 }
  0x18   : > { %p11782_p9 = scmp.lt.u32.totalorder %s11773_s30, %s11957_s25 }
  0x19   : > { %p11777_p7 = pneg %p11776_p4  ;;  %p11781_p10 = por %p11780_p8, %p11779_p5 }
  0x1b   : > { %p11783_p0 = por %p11782_p9, %p11781_p10 }
  0x1d   : > { %p11784_p1 = pnand %p11783_p0, %p11777_p7 }
  0x1f   : > { %11787 = shalt.err (!%p11784_p1)
}
  0x20   : > { %s11788_s13 = scalar_lea.vmem %s11965_s27, 256  ;;  %s11871_s14 = smov [#allocation2]  }
  0x21   : > { %p11789_p2 = scmp.ne.s32.totalorder %s11965_s27, %s11788_s13  ;;  %s11793_s16 = sshll.u32 %s11871_s14, 4  ;;  %s11794_s16 = int_to_ptr.vmem [resolvable:$false] %s11793_s16 }
  0x22   : > { %s11795_s20 = scalar_lea.vmem %s11794_s16, 512  ;;  %p11796_p11 = scmp.lt.s32.totalorder %s11965_s27, %s11794_s16 }
  0x23   : > { %p11791_p4 = pnand %p11789_p2, %p11775_p3  ;;  %p11797_p5 = scmp.lt.s32.totalorder %s11795_s20, %s11788_s13 }
  0x25   : > { %p11792_p12 = pneg %p11791_p4  ;;  %p11798_p8 = por %p11797_p5, %p11796_p11 }
  0x27   : > { %p11799_p9 = pnand %p11798_p8, %p11792_p12 }
  0x29   : > { %11802 = shalt.err (!%p11799_p9)
}
  0x2a   : > { %11719 = dma.hbm_to_vmem [thread:$0]  (!%p11961_p13), %s11957_s25, 256, %s11965_s27, %s88_s29  }
  0x2b   : > { %p18992_p0 = scmp.lt.s32.totalorder %s11869_s9, 3  ;;  %p18993_p1 = scmp.ge.s32.totalorder %s11869_s9, 1 }
  0x2d   : > { %p105_p3 = pnand %p18993_p1, %p18992_p0 }
  0x2f   : > { %108 = sbr.rel (%p105_p3) target bundleno = 2259 (0x8d3), region = 24 }
  0x36   : > { %s11999_s21 = sand.u32 1, %s11861_s7   ;;  %v224_v0 = vlaneseq }
  0x37   : > { %s8278_s22 = sshll.u32 %s11999_s21, 4  ;;  %s111_s23 = scalar_lea.sflag [#allocation3], %s11999_s21 }
  0x38   : > { %s12003_s24 = scalar_lea.vmem [#allocation2], %s8278_s22 }
  0x39   : > { %11848 = dma.done.wait (%p11937_p6), %s111_s23, 256  }
  0x3a   : > { %11850 = vsyncadd (%p11937_p6), %s111_s23, 4294967040  ;;  %v18814_v1 = vmov 0   ;;  %v12011_v2 = vshrl.u32 %v224_v0, 7  ;;  %v12013_v3 = vand.u32 127, %v224_v0  ;;  %v18812_v12 = vmov 1.0|1.0  }
  0x3b   : > { %5608 = vmatprep.subr.bf16.mxu1 %v18814_v1  ;;  %6475 = vmatprep.subr.bf16.mxu0 %v18814_v1  ;;  %v12179_v32 = vld [vmem:[%s12003_s24] sm:$0xff]  ;;  %v135_v33 = vld [vmem:[%s12003_s24 + $0x8] sm:$0xff]  ;;  %s11875_s17 = smov 126   ;;  %s11876_s25 = smov 50  }
  0x3c   : > { %18994 = vst [vmem:[#allocation8_spill] sm:$0xff] %v12013_v3  ;;  %v12016_v4 = vadd.s32 8, %v12011_v2  ;;  %v12019_v5 = vmul.u32 256, %v12013_v3  ;;  %v321_v6 = vadd.s32 768, %v12011_v2  ;;  %v322_v8 = vadd.s32 776, %v12011_v2  ;;  %s11877_s26 = smov 123  }
  0x3d   : > { %v12035_v9 = vadd.s32 16, %v12011_v2  ;;  %v12040_v10 = vadd.s32 24, %v12011_v2  ;;  %v323_v11 = vadd.s32 784, %v12011_v2  ;;  %v324_v13 = vadd.s32 792, %v12011_v2  ;;  %s11878_s27 = smov 127   ;;  %s11879_s28 = smov 122  }
  0x3e   : > { %vm484_vm0 = vcmp.ge.s32.totalorder %v12011_v2, %v12019_v5  ;;  %v12025_v7 = vadd.s32 256, %v12019_v5  ;;  %vm485_vm1 = vcmp.ge.s32.totalorder %v12016_v4, %v12019_v5  ;;  %vm580_vm5 = vcmp.ge.s32.totalorder %v321_v6, %v12019_v5  ;;  %s11880_s29 = smov 125   ;;  %s11881_s30 = smov 121  }
  0x3f   : > { %vm581_vm8 = vcmp.ge.s32.totalorder %v322_v8, %v12019_v5  ;;  %vm486_vm12 = vcmp.ge.s32.totalorder %v12035_v9, %v12019_v5  ;;  %vm487_vm15 = vcmp.ge.s32.totalorder %v12040_v10, %v12019_v5  ;;  %v12057_v14 = vadd.s32 32, %v12011_v2  ;;  %s11882_s2 = smov 124   ;;  %s8279_s3 = sshll.u32 %s11999_s21, 3 }
  0x40   : > { %vm741_vm2 = vcmp.lt.s32.totalorder %v12011_v2, %v12025_v7  ;;  %vm742_vm3 = vcmp.lt.s32.totalorder %v12016_v4, %v12025_v7  ;;  %vm837_vm6 = vcmp.lt.s32.totalorder %v321_v6, %v12025_v7  ;;  %vm838_vm9 = vcmp.lt.s32.totalorder %v322_v8, %v12025_v7  ;;  %s10858_s4 = sshll.u32 %s11915_s10, 7  ;;  %s132_s5 = scalar_lea.vmem [#allocation5], %s8279_s3 }
  0x41   : > { %vm997_vm4 = vmand %vm484_vm0, %vm741_vm2  ;;  %vm743_vm13 = vcmp.lt.s32.totalorder %v12035_v9, %v12025_v7  ;;  %vm744_vm0 = vcmp.lt.s32.totalorder %v12040_v10, %v12025_v7  ;;  %v12063_v15 = vadd.s32 40, %v12011_v2  ;;  %v325_v16 = vadd.s32 800, %v12011_v2  ;;  %s8201_s11 = sshll.u32 %s132_s5, 4  ;;  %s18765_s16 = scalar_lea.hbm %s18810_s1, %s10858_s4  ;;  %s18767_s11 = int_to_ptr.vmem [resolvable:$true] %s8201_s11 }
  0x42   : > { %vm998_vm7 = vmand %vm485_vm1, %vm742_vm3  ;;  %vm582_vm3 = vcmp.ge.s32.totalorder %v323_v11, %v12019_v5  ;;  %v326_v17 = vadd.s32 808, %v12011_v2  ;;  %v12081_v18 = vadd.s32 48, %v12011_v2  ;;  %v12087_v19 = vadd.s32 56, %v12011_v2  ;;  %s8188_s10 = scalar_lea.sflag [#allocation4], %s11999_s21  ;;  %s11803_s20 = scalar_lea.vmem %s18767_s11, 128 }
  0x43   : > { %vm9577_vm10 = vmpackc.low %vm998_vm7, %vm997_vm4  ;;  %vm839_vm4 = vcmp.lt.s32.totalorder %v323_v11, %v12025_v7  ;;  %vm840_vm7 = vcmp.lt.s32.totalorder %v324_v13, %v12025_v7  ;;  %v327_v20 = vadd.s32 816, %v12011_v2  ;;  %v328_v21 = vadd.s32 824, %v12011_v2  ;;  %p11804_p6 = scmp.ne.s32.totalorder %s18767_s11, %s11803_s20  ;;  %p20026_p11 = scmp.ne.s32.totalorder %s18989_s18, 0 }
  0x44   : > { %9578 = vmatpush1.bf16.msk.msra.mxu1 %vm9577_vm10, %v18812_v12  ;;  %vm1093_vm11 = vmand %vm580_vm5, %vm837_vm6  ;;  %vm583_vm6 = vcmp.ge.s32.totalorder %v324_v13, %v12019_v5  ;;  %vm488_vm10 = vcmp.ge.s32.totalorder %v12057_v14, %v12019_v5  ;;  %v12095_v22 = vadd.s32 64, %v12011_v2  ;;  %v12098_v23 = vadd.s32 72, %v12011_v2  ;;  %s11883_s22 = smov [#allocation5]  }
  0x45   : > { %vm1094_vm14 = vmand %vm581_vm8, %vm838_vm9  ;;  %5610 = vmatprep.subr.bf16.mxu1 %v18814_v1  ;;  %v12110_v25 = vadd.s32 832, %v12011_v2  ;;  %v12113_v26 = vadd.s32 840, %v12011_v2  ;;  %v12122_v27 = vadd.s32 80, %v12011_v2  ;;  %v12130_v28 = vadd.s32 88, %v12011_v2  ;;  %p11805_p12 = pnand %p11804_p6, %p20026_p11  ;;  %s11807_s23 = sshll.u32 %s11883_s22, 4  ;;  %s11808_s23 = int_to_ptr.vmem [resolvable:$false] %s11807_s23 }
  0x46   : > { %vm10057_vm1 = vmpackc.low %vm1094_vm14, %vm1093_vm11  ;;  %vm745_vm11 = vcmp.lt.s32.totalorder %v12057_v14, %v12025_v7  ;;  %vm746_vm14 = vcmp.lt.s32.totalorder %v12063_v15, %v12025_v7  ;;  %v12150_v30 = vadd.s32 848, %v12011_v2  ;;  %v12166_v31 = vadd.s32 856, %v12011_v2  ;;  %s11809_s24 = scalar_lea.vmem %s11808_s23, 256  ;;  %p11810_p7 = scmp.lt.s32.totalorder %s18767_s11, %s11808_s23 }
  0x47   : > { %10058 = vmatpush1.bf16.msk.msra.mxu0 %vm10057_vm1, %v18812_v12  ;;  %vm999_vm2 = vmand %vm486_vm12, %vm743_vm13  ;;  %vm489_vm13 = vcmp.ge.s32.totalorder %v12063_v15, %v12019_v5  ;;  %vm584_vm1 = vcmp.ge.s32.totalorder %v325_v16, %v12019_v5  ;;  %v12194_v35 = vadd.s32 96, %v12011_v2  ;;  %v137_v36 = vunpack.c.1.s8 %v12179_v32  ;;  %p11806_p13 = pneg %p11805_p12  ;;  %p11811_p10 = scmp.lt.s32.totalorder %s11809_s24, %s11803_s20 }
  0x48   : > { %6477 = vmatprep.subr.bf16.mxu0 %v18814_v1  ;;  %vm1000_vm5 = vmand %vm487_vm15, %vm744_vm0  ;;  %v138_v37 = vunpack.c.2.s8 %v12179_v32  ;;  %v12208_v38 = vadd.s32 104, %v12011_v2  ;;  %v12211_v39 = vadd.s32 864, %v12011_v2  ;;  %v140_v40 = vunpack.c.0.s8 %v135_v33 }
  0x49   : > { %vm9579_vm8 = vmpackc.low %vm1000_vm5, %vm999_vm2  ;;  %vm841_vm2 = vcmp.lt.s32.totalorder %v325_v16, %v12025_v7  ;;  %vm842_vm5 = vcmp.lt.s32.totalorder %v326_v17, %v12025_v7  ;;  %v141_v41 = vunpack.c.1.s8 %v135_v33  ;;  %v142_v42 = vunpack.c.2.s8 %v135_v33  ;;  %p11812_p2 = por %p11811_p10, %p11810_p7 }
  0x4a   : > { %9580 = vmatpush1.bf16.msk.msra.mxu1 %vm9579_vm8, %v18812_v12  ;;  %vm1095_vm9 = vmand %vm582_vm3, %vm839_vm4  ;;  %vm585_vm4 = vcmp.ge.s32.totalorder %v326_v17, %v12019_v5  ;;  %vm490_vm8 = vcmp.ge.s32.totalorder %v12081_v18, %v12019_v5  ;;  %v143_v44 = vunpack.c.3.s8 %v135_v33  ;;  %v145_v45 = vand.u32 255, %v137_v36 }
  0x4b   : > { %vm1096_vm12 = vmand %vm583_vm6, %vm840_vm7  ;;  %5612 = vmatprep.subr.bf16.mxu1 %v18814_v1  ;;  %v146_v46 = vand.u32 255, %v138_v37  ;;  %v12244_v47 = vadd.s32 872, %v12011_v2  ;;  %v148_v48 = vand.u32 255, %v140_v40  ;;  %v149_v49 = vand.u32 255, %v141_v41  ;;  %p11813_p4 = pnand %p11812_p2, %p11806_p13 }
  0x4c   : > { %vm10059_vm15 = vmpackc.low %vm1096_vm12, %vm1095_vm9  ;;  %vm747_vm9 = vcmp.lt.s32.totalorder %v12081_v18, %v12025_v7  ;;  %vm748_vm12 = vcmp.lt.s32.totalorder %v12087_v19, %v12025_v7  ;;  %v150_v50 = vand.u32 255, %v142_v42  ;;  %v151_v51 = vand.u32 255, %v143_v44 }
  0x4d   : > { %10060 = vmatpush1.bf16.msk.msra.mxu0 %vm10059_vm15, %v18812_v12  ;;  %vm1001_vm0 = vmand %vm488_vm10, %vm745_vm11  ;;  %vm491_vm11 = vcmp.ge.s32.totalorder %v12087_v19, %v12019_v5  ;;  %vm587_vm15 = vcmp.ge.s32.totalorder %v328_v21, %v12019_v5  ;;  %v12252_v52 = vshra.s32 %v145_v45, 5  ;;  %v12254_v53 = vshra.s32 %v146_v46, 5 }
  0x4e   : > { %6479 = vmatprep.subr.bf16.mxu0 %v18814_v1  ;;  %vm1002_vm3 = vmand %vm489_vm13, %vm746_vm14  ;;  %vm586_vm13 = vcmp.ge.s32.totalorder %v327_v20, %v12019_v5  ;;  %v12268_v55 = vadd.s32 112, %v12011_v2  ;;  %v12270_v56 = vshra.s32 %v148_v48, 5  ;;  %v12272_v57 = vshra.s32 %v149_v49, 5 }
  0x4f   : > { %vm9581_vm6 = vmpackc.low %vm1002_vm3, %vm1001_vm0  ;;  %vm843_vm0 = vcmp.lt.s32.totalorder %v327_v20, %v12025_v7  ;;  %vm492_vm3 = vcmp.ge.s32.totalorder %v12095_v22, %v12019_v5  ;;  %v12274_v58 = vshra.s32 %v150_v50, 5  ;;  %v12288_v59 = vadd.s32 120, %v12011_v2 }
  0x50   : > { %9582 = vmatpush1.bf16.msk.msra.mxu1 %vm9581_vm6, %v18812_v12  ;;  %vm12101_vm7 = vmand %vm584_vm1, %vm841_vm2  ;;  %vm844_vm1 = vcmp.lt.s32.totalorder %v328_v21, %v12025_v7  ;;  %19006 = vst [vmem:[#allocation9_spill] sm:$0xff] %v12268_v55  ;;  %v12291_v60 = vadd.s32 880, %v12011_v2  ;;  %v12294_v61 = vadd.s32 888, %v12011_v2  ;;  %v12296_v62 = vshra.s32 %v151_v51, 5 }
  0x51   : > { %vm1098_vm10 = vmand %vm585_vm4, %vm842_vm5  ;;  %5614 = vmatprep.subr.bf16.mxu1 %v18814_v1  ;;  %vm493_vm4 = vcmp.ge.s32.totalorder %v12098_v23, %v12019_v5  ;;  %vm749_vm5 = vcmp.lt.s32.totalorder %v12095_v22, %v12025_v7  ;;  %19007 = vst [vmem:[#allocation10_spill] sm:$0xff] %v12288_v59  ;;  %v12305_v63 = vadd.s32 128, %v12011_v2  ;;  %v161_v0 = vshll.u32 %v12252_v52, 6 }
  0x52   : > { %vm10061_vm14 = vmpackc.low %vm1098_vm10, %vm12101_vm7  ;;  %vm750_vm7 = vcmp.lt.s32.totalorder %v12098_v23, %v12025_v7  ;;  %v162_v8 = vshll.u32 %v12254_v53, 6  ;;  %v164_v11 = vshll.u32 %v12270_v56, 6  ;;  %v169_v13 = vshll.u32 %v12252_v52, 3 }
  0x53   : > { %10062 = vmatpush1.bf16.msk.msra.mxu0 %vm10061_vm14, %v18812_v12  ;;  %vm12139_vm2 = vmand %vm490_vm8, %vm747_vm9  ;;  %vm589_vm9 = vcmp.ge.s32.totalorder %v12113_v26, %v12019_v5  ;;  %vm845_vm14 = vcmp.lt.s32.totalorder %v12110_v25, %v12025_v7  ;;  %vm751_vm8 = vcmp.lt.s32.totalorder %v12122_v27, %v12025_v7  ;;  %19008 = vst [vmem:[#allocation11_spill] sm:$0xff] %v12305_v63  ;;  %v170_v16 = vshll.u32 %v12254_v53, 3 }
  0x54   : > { %6481 = vmatprep.subr.bf16.mxu0 %v18814_v1  ;;  %vm1004_vm6 = vmand %vm491_vm11, %vm748_vm12  ;;  %vm846_vm11 = vcmp.lt.s32.totalorder %v12113_v26, %v12025_v7  ;;  %vm494_vm12 = vcmp.ge.s32.totalorder %v12122_v27, %v12019_v5  ;;  %v165_v17 = vshll.u32 %v12272_v57, 6  ;;  %v172_v20 = vshll.u32 %v12270_v56, 3 }
  0x55   : > { %vm9583_vm10 = vmpackc.low %vm1004_vm6, %vm12139_vm2  ;;  %v173_v21 = vshll.u32 %v12272_v57, 3  ;;  %v174_v24 = vshll.u32 %v12274_v58, 3  ;;  %v175_v26 = vshll.u32 %v12296_v62, 3  ;;  %v8281_v29 = vrot.slane %v169_v13, 9 }
  0x56   : > { %9584 = vmatpush1.bf16.msk.msra.mxu1 %vm9583_vm10, %v18812_v12  ;;  %vm12187_vm2 = vmand %vm586_vm13, %vm843_vm0  ;;  %vm752_vm13 = vcmp.lt.s32.totalorder %v12130_v28, %v12025_v7  ;;  %v8282_v33 = vrot.slane %v170_v16, 9  ;;  %v167_v36 = vshll.u32 %v12296_v62, 6  ;;  %v8284_v37 = vrot.slane %v172_v20, 9 }
  0x57   : > { %vm1100_vm10 = vmand %vm587_vm15, %vm844_vm1  ;;  %5616 = vmatprep.subr.bf16.mxu1 %v18814_v1  ;;  %vm847_vm1 = vcmp.lt.s32.totalorder %v12150_v30, %v12025_v7  ;;  %vm497_vm15 = vcmp.ge.s32.totalorder %v12208_v38, %v12019_v5  ;;  %v8285_v40 = vrot.slane %v173_v21, 9  ;;  %v8286_v41 = vrot.slane %v174_v24, 9 }
  0x58   : > { %vm10063_vm6 = vmpackc.low %vm1100_vm10, %vm12187_vm2  ;;  %vm848_vm2 = vcmp.lt.s32.totalorder %v12166_v31, %v12025_v7  ;;  %v193_v42 = vadd.s32 %v8281_v29, %v161_v0  ;;  %v196_v43 = vadd.s32 %v8284_v37, %v164_v11  ;;  %v8289_v48 = vrot.slane %v12252_v52, 10 }
  0x59   : > { %10064 = vmatpush1.bf16.msk.msra.mxu0 %vm10063_vm6, %v18812_v12  ;;  %vm12226_vm0 = vmand %vm492_vm3, %vm749_vm5  ;;  %vm496_vm3 = vcmp.ge.s32.totalorder %v12194_v35, %v12019_v5  ;;  %vm753_vm5 = vcmp.lt.s32.totalorder %v12194_v35, %v12025_v7  ;;  %v197_v45 = vadd.s32 %v8285_v40, %v165_v17  ;;  %v8290_v49 = vrot.slane %v12254_v53, 10 }
  0x5a   : > { %6483 = vmatprep.subr.bf16.mxu0 %v18814_v1  ;;  %vm1006_vm6 = vmand %vm493_vm4, %vm750_vm7  ;;  %vm754_vm4 = vcmp.lt.s32.totalorder %v12208_v38, %v12025_v7  ;;  %vm19003_vm7 = vcmp.ge.s32.totalorder %v12110_v25, %v12019_v5  ;;  %v166_v25 = vshll.u32 %v12274_v58, 6  ;;  %v8292_v51 = vrot.slane %v12270_v56, 10 }
  0x5b   : > { %vm9585_vm10 = vmpackc.low %vm1006_vm6, %vm12226_vm0  ;;  %v8293_v54 = vrot.slane %v12272_v57, 10  ;;  %v8294_v0 = vrot.slane %v12274_v58, 10  ;;  %v8295_v52 = vrot.slane %v12296_v62, 10  ;;  %v217_v53 = vadd.s32 %v8289_v48, %v193_v42 }
  0x5c   : > { %9586 = vmatpush1.bf16.msk.msra.mxu1 %vm9585_vm10, %v18812_v12  ;;  %vm12263_vm0 = vmand %vm19003_vm7, %vm845_vm14  ;;  %vm592_vm14 = vcmp.ge.s32.totalorder %v12211_v39, %v12019_v5  ;;  %vm849_vm10 = vcmp.lt.s32.totalorder %v12211_v39, %v12025_v7  ;;  %vm850_vm7 = vcmp.lt.s32.totalorder %v12244_v47, %v12025_v7  ;;  %v198_v46 = vadd.s32 %v8286_v41, %v166_v25 }
  0x5d   : > { %vm1102_vm6 = vmand %vm589_vm9, %vm846_vm11  ;;  %5618 = vmatprep.subr.bf16.mxu1 %v18814_v1  ;;  %vm756_vm11 = vcmp.lt.s32.totalorder %v12288_v59, %v12025_v7  ;;  %v12411_v57 = vadd.s32 136, %v12011_v2  ;;  %v337_v58 = vadd.s32 896, %v12011_v2  ;;  %v12421_v39 = vadd.s32 %v8292_v51, %v196_v43 }
  0x5e   : > { %vm10065_vm9 = vmpackc.low %vm1102_vm6, %vm12263_vm0  ;;  %vm19011_vm6 = vcmp.ge.s32.totalorder %v12130_v28, %v12019_v5  ;;  %v221_v6 = vadd.s32 %v8293_v54, %v197_v45  ;;  %v12427_v11 = vsub.s32 4, %v12011_v2  ;;  %v338_v17 = vadd.s32 904, %v12011_v2 }
  0x5f   : > { %10066 = vmatpush1.bf16.msk.msra.mxu0 %vm10065_vm9, %v18812_v12  ;;  %vm12315_vm0 = vmand %vm494_vm12, %vm751_vm8  ;;  %19020 = vst [vmem:[#allocation12_spill] sm:$0xff] %v12411_v57  ;;  %v339_v54 = vadd.s32 912, %v12011_v2  ;;  %v136_v56 = vunpack.c.0.s8 %v12179_v32  ;;  %v19085_v3 = vmov 1.0|1.0  }
  0x60   : > { %6485 = vmatprep.subr.bf16.mxu0 %v18814_v1  ;;  %vm1008_vm8 = vmand %vm19011_vm6, %vm752_vm13  ;;  %vm19012_vm13 = vcmp.ge.s32.totalorder %v12150_v30, %v12019_v5  ;;  %v8287_v30 = vrot.slane %v175_v26, 9  ;;  %v1911_v21 = vrot.slane %v217_v53, %v12427_v11  ;;  %v1935_v26 = vrot.slane %v12421_v39, %v12427_v11 }
  0x61   : > { %vm9587_vm12 = vmpackc.low %vm1008_vm8, %vm12315_vm0  ;;  %vm19015_vm0 = vcmp.ge.s32.totalorder %v12166_v31, %v12019_v5  ;;  %vm755_vm8 = vcmp.lt.s32.totalorder %v12268_v55, %v12025_v7  ;;  %v194_v31 = vadd.s32 %v8282_v33, %v162_v8  ;;  %v12424_v8 = vsub.s32 0, %v12011_v2 }
  0x62   : > { %9588 = vmatpush1.bf16.msk.msra.mxu1 %vm9587_vm12, %v18812_v12  ;;  %vm12345_vm9 = vmand %vm19012_vm13, %vm847_vm1  ;;  %vm498_vm1 = vcmp.ge.s32.totalorder %v12268_v55, %v12019_v5  ;;  %vm499_vm13 = vcmp.ge.s32.totalorder %v12288_v59, %v12019_v5  ;;  %v199_v50 = vadd.s32 %v8287_v30, %v167_v36  ;;  %v1943_v33 = vrot.slane %v221_v6, %v12427_v11 }
  0x63   : > { %vm1104_vm6 = vmand %vm19015_vm0, %vm848_vm2  ;;  %5620 = vmatprep.subr.bf16.mxu1 %v18814_v1  ;;  %vm595_vm0 = vcmp.ge.s32.totalorder %v12294_v61, %v12019_v5  ;;  %v218_v62 = vadd.s32 %v8290_v49, %v194_v31  ;;  %v1907_v20 = vrot.slane %v217_v53, %v12424_v8  ;;  %v1939_v29 = vrot.slane %v221_v6, %v12424_v8 }
  0x64   : > { %vm10067_vm12 = vmpackc.low %vm1104_vm6, %vm12345_vm9  ;;  %vm19021_vm6 = vcmp.ge.s32.totalorder %v12244_v47, %v12019_v5  ;;  %v222_v47 = vadd.s32 %v8294_v0, %v198_v46  ;;  %v223_v13 = vadd.s32 %v8295_v52, %v199_v50  ;;  %v12499_v30 = vrot.slane %v1911_v21, %v12424_v8 }
  0x65   : > { %10068 = vmatpush1.bf16.msk.msra.mxu0 %vm10067_vm12, %v18812_v12  ;;  %vm12374_vm2 = vmand %vm496_vm3, %vm753_vm5  ;;  %vm594_vm5 = vcmp.ge.s32.totalorder %v12291_v60, %v12019_v5  ;;  %v1915_v24 = vrot.slane %v218_v62, %v12424_v8  ;;  %v1919_v25 = vrot.slane %v218_v62, %v12427_v11  ;;  %v12511_v31 = vadd.s32 144, %v12011_v2 }
  0x66   : > { %6487 = vmatprep.subr.bf16.mxu0 %v18814_v1  ;;  %vm1010_vm9 = vmand %vm497_vm15, %vm754_vm4  ;;  %vm851_vm4 = vcmp.lt.s32.totalorder %v12291_v60, %v12025_v7  ;;  %v1947_v36 = vrot.slane %v222_v47, %v12424_v8  ;;  %v1951_v37 = vrot.slane %v222_v47, %v12427_v11  ;;  %v1955_v40 = vrot.slane %v223_v13, %v12424_v8 }
  0x67   : > { %vm9589_vm3 = vmpackc.low %vm1010_vm9, %vm12374_vm2  ;;  %vm757_vm9 = vcmp.lt.s32.totalorder %v12305_v63, %v12025_v7  ;;  %v1959_v41 = vrot.slane %v223_v13, %v12427_v11  ;;  %v12496_v60 = vrot.slane %v1907_v20, %v12424_v8  ;;  %v12508_v42 = vrot.slane %v1919_v25, %v12424_v8  ;;  %19028 = vst [vmem:[#allocation15_spill] sm:$0xff] %v12511_v31 }
  0x68   : > { %9590 = vmatpush1.bf16.msk.msra.mxu1 %vm9589_vm3, %v18812_v12  ;;  %vm12404_vm15 = vmand %vm592_vm14, %vm849_vm10  ;;  %vm852_vm10 = vcmp.lt.s32.totalorder %v12294_v61, %v12025_v7  ;;  %vm758_vm3 = vcmp.lt.s32.totalorder %v12411_v57, %v12025_v7  ;;  %v12505_v61 = vrot.slane %v1915_v24, %v12424_v8  ;;  %v12521_v43 = vrot.slane %v1935_v26, %v12424_v8 }
  0x69   : > { %vm1106_vm12 = vmand %vm19021_vm6, %vm850_vm7  ;;  %5622 = vmatprep.subr.bf16.mxu1 %v18814_v1  ;;  %vm500_vm7 = vcmp.ge.s32.totalorder %v12305_v63, %v12019_v5  ;;  %vm596_vm6 = vcmp.ge.s32.totalorder %v337_v58, %v12019_v5  ;;  %19027 = vst [vmem:[#allocation14_spill] sm:$0xff] %v12508_v42  ;;  %v12524_v44 = vrot.slane %v1939_v29, %v12424_v8  ;;  %v12530_v46 = vadd.s32 152, %v12011_v2 }
  0x6a   : > { %vm10069_vm14 = vmpackc.low %vm1106_vm12, %vm12404_vm15  ;;  %19026 = vst [vmem:[#allocation13_spill] sm:$0xff] %v12505_v61  ;;  %v12527_v45 = vrot.slane %v1943_v33, %v12424_v8  ;;  %v12540_v48 = vrot.slane %v1947_v36, %v12424_v8  ;;  %v12543_v49 = vrot.slane %v1951_v37, %v12424_v8  ;;  %v12546_v50 = vrot.slane %v1955_v40, %v12424_v8 }
  0x6b   : > { %10070 = vmatpush1.bf16.msk.msra.mxu0 %vm10069_vm14, %v18812_v12  ;;  %vm12442_vm2 = vmand %vm498_vm1, %vm755_vm8  ;;  %vm501_vm8 = vcmp.ge.s32.totalorder %v12411_v57, %v12019_v5  ;;  %vm854_vm14 = vcmp.lt.s32.totalorder %v338_v17, %v12025_v7  ;;  %19029 = vst [vmem:[#allocation16_spill] sm:$0xff] %v12524_v44  ;;  %v12549_v51 = vrot.slane %v1959_v41, %v12424_v8  ;;  %v340_v0 = vadd.s32 920, %v12011_v2 }
  0x6c   : > { %6489 = vmatprep.subr.bf16.mxu0 %v18814_v1  ;;  %vm1012_vm1 = vmand %vm499_vm13, %vm756_vm11  ;;  %19030 = vst [vmem:[#allocation17_spill] sm:$0xff] %v12527_v45  ;;  %v12572_v52 = vadd.s32 160, %v12011_v2  ;;  %v12578_v53 = vadd.s32 168, %v12011_v2  ;;  %v139_v62 = vunpack.c.3.s8 %v12179_v32  ;;  %v342_v6 = vadd.s32 936, %v12011_v2 }
  0x6d   : > { %vm9591_vm15 = vmpackc.low %vm1012_vm1, %vm12442_vm2  ;;  %19031 = vst [vmem:[#allocation18_spill] sm:$0xff] %v12530_v46  ;;  %vm759_vm1 = vcmp.lt.s32.totalorder %v12511_v31, %v12025_v7  ;;  %v12598_v32 = vadd.s32 176, %v12011_v2  ;;  %v144_v47 = vand.u32 255, %v136_v56  ;;  %v12604_v13 = vadd.s32 184, %v12011_v2 }
  0x6e   : > { %9592 = vmatpush1.bf16.msk.msra.mxu1 %vm9591_vm15, %v18812_v12  ;;  %vm12478_vm11 = vmand %vm594_vm5, %vm851_vm4  ;;  %vm597_vm5 = vcmp.ge.s32.totalorder %v338_v17, %v12019_v5  ;;  %vm853_vm4 = vcmp.lt.s32.totalorder %v337_v58, %v12025_v7  ;;  %19032 = vst [vmem:[#allocation19_spill] sm:$0xff] %v12540_v48  ;;  %vm760_vm15 = vcmp.lt.s32.totalorder %v12530_v46, %v12025_v7  ;;  %v341_v58 = vadd.s32 928, %v12011_v2 }
  0x6f   : > { %vm1108_vm13 = vmand %vm595_vm0, %vm852_vm10  ;;  %5624 = vmatprep.subr.bf16.mxu1 %v18814_v1  ;;  %19033 = vst [vmem:[#allocation20_spill] sm:$0xff] %v12543_v49  ;;  %v147_v16 = vand.u32 255, %v139_v62  ;;  %v343_v17 = vadd.s32 944, %v12011_v2  ;;  %v344_v20 = vadd.s32 952, %v12011_v2  ;;  %v12616_v21 = vshra.s32 %v144_v47, 5 }
  0x70   : > { %vm10071_vm12 = vmpackc.low %vm1108_vm13, %vm12478_vm11  ;;  %19034 = vst [vmem:[#allocation21_spill] sm:$0xff] %v12546_v50  ;;  %vm598_vm13 = vcmp.ge.s32.totalorder %v339_v54, %v12019_v5  ;;  %v12626_v25 = vadd.s32 192, %v12011_v2  ;;  %v12632_v26 = vadd.s32 200, %v12011_v2  ;;  %v345_v33 = vadd.s32 960, %v12011_v2 }
  0x71   : > { %10072 = vmatpush1.bf16.msk.msra.mxu0 %vm10071_vm12, %v18812_v12  ;;  %vm1013_vm0 = vmand %vm500_vm7, %vm757_vm9  ;;  %19035 = vst [vmem:[#allocation22_spill] sm:$0xff] %v12549_v51  ;;  %vm502_vm9 = vcmp.ge.s32.totalorder %v12511_v31, %v12019_v5  ;;  %vm599_vm12 = vcmp.ge.s32.totalorder %v340_v0, %v12019_v5  ;;  %v12623_v24 = vshra.s32 %v147_v16, 5  ;;  %v168_v29 = vshll.u32 %v12616_v21, 3 }
  0x72   : > { %6491 = vmatprep.subr.bf16.mxu0 %v18814_v1  ;;  %vm1014_vm10 = vmand %vm501_vm8, %vm758_vm3  ;;  %vm503_vm3 = vcmp.ge.s32.totalorder %v12530_v46, %v12019_v5  ;;  %19036 = vst [vmem:[#allocation23_spill] sm:$0xff] %v12572_v52  ;;  %v346_v36 = vadd.s32 968, %v12011_v2  ;;  %v160_v37 = vshll.u32 %v12616_v21, 6  ;;  %v12653_v40 = vadd.s32 208, %v12011_v2 }
  0x73   : > { %vm9593_vm7 = vmpackc.low %vm1014_vm10, %vm1013_vm0  ;;  %19037 = vst [vmem:[#allocation24_spill] sm:$0xff] %v12578_v53  ;;  %v171_v34 = vshll.u32 %v12623_v24, 3  ;;  %v163_v41 = vshll.u32 %v12623_v24, 6  ;;  %v348_v62 = vadd.s32 984, %v12011_v2  ;;  %v8288_v16 = vrot.slane %v12616_v21, 10 }
  0x74   : > { %9594 = vmatpush1.bf16.msk.msra.mxu1 %vm9593_vm7, %v18812_v12  ;;  %vm1109_vm2 = vmand %vm596_vm6, %vm853_vm4  ;;  %vm855_vm4 = vcmp.lt.s32.totalorder %v339_v54, %v12025_v7  ;;  %vm504_vm7 = vcmp.ge.s32.totalorder %v12572_v52, %v12019_v5  ;;  %19038 = vst [vmem:[#allocation25_spill] sm:$0xff] %v12598_v32  ;;  %v12660_v54 = vadd.s32 216, %v12011_v2  ;;  %v349_v21 = vadd.s32 992, %v12011_v2 }
  0x75   : > { %vm1110_vm8 = vmand %vm597_vm5, %vm854_vm14  ;;  %5626 = vmatprep.subr.bf16.mxu1 %v18814_v1  ;;  %vm856_vm14 = vcmp.lt.s32.totalorder %v340_v0, %v12025_v7  ;;  %19039 = vst [vmem:[#allocation26_spill] sm:$0xff] %v12604_v13  ;;  %v8280_v0 = vrot.slane %v168_v29, 9  ;;  %v8283_v56 = vrot.slane %v171_v34, 9  ;;  %v12686_v29 = vadd.s32 232, %v12011_v2 }
  0x76   : > { %vm10073_vm6 = vmpackc.low %vm1110_vm8, %vm1109_vm2  ;;  %vm761_vm2 = vcmp.lt.s32.totalorder %v12572_v52, %v12025_v7  ;;  %vm762_vm8 = vcmp.lt.s32.totalorder %v12578_v53, %v12025_v7  ;;  %19040 = vst [vmem:[#allocation27_spill] sm:$0xff] %v12626_v25  ;;  %v19094_v48 = vmov 0  ;;  %v13274_v49 = vadd.s32 288, %v12011_v2 }
  0x77   : > { %10074 = vmatpush1.bf16.msk.msra.mxu0 %vm10073_vm6, %v18812_v12  ;;  %vm1015_vm11 = vmand %vm502_vm9, %vm759_vm1  ;;  %vm505_vm1 = vcmp.ge.s32.totalorder %v12578_v53, %v12019_v5  ;;  %vm600_vm6 = vcmp.ge.s32.totalorder %v341_v58, %v12019_v5  ;;  %19041 = vst [vmem:[#allocation28_spill] sm:$0xff] %v12632_v26  ;;  %v195_v47 = vadd.s32 %v8283_v56, %v163_v41  ;;  %v351_v56 = vadd.s32 1008, %v12011_v2 }
  0x78   : > { %6493 = vmatprep.subr.bf16.mxu0 %v18814_v1  ;;  %vm1016_vm5 = vmand %vm503_vm3, %vm760_vm15  ;;  %19042 = vst [vmem:[#allocation29_spill] sm:$0xff] %v12653_v40  ;;  %v13292_v51 = vadd.s32 296, %v12011_v2  ;;  %v19119_v50 = vmov 0  ;;  %v19125_v61 = vmov 0  ;;  %v13468_v42 = vadd.s32 344, %v12011_v2 }
  0x79   : > { %vm9595_vm0 = vmpackc.low %vm1016_vm5, %vm1015_vm11  ;;  %vm857_vm11 = vcmp.lt.s32.totalorder %v341_v58, %v12025_v7  ;;  %vm858_vm5 = vcmp.lt.s32.totalorder %v342_v6, %v12025_v7  ;;  %19043 = vst [vmem:[#allocation30_spill] sm:$0xff] %v12660_v54  ;;  %v347_v58 = vadd.s32 976, %v12011_v2  ;;  %v13579_v45 = vadd.s32 368, %v12011_v2 }
  0x7a   : > { %9596 = vmatpush1.bf16.msk.msra.mxu1 %vm9595_vm0, %v18812_v12  ;;  %vm1111_vm10 = vmand %vm598_vm13, %vm855_vm4  ;;  %vm601_vm4 = vcmp.ge.s32.totalorder %v342_v6, %v12019_v5  ;;  %vm506_vm0 = vcmp.ge.s32.totalorder %v12598_v32, %v12019_v5  ;;  %v192_v6 = vadd.s32 %v8280_v0, %v160_v37  ;;  %19045 = vst [vmem:[#allocation32_spill] sm:$0xff] %v12686_v29  ;;  %v12710_v37 = vadd.s32 248, %v12011_v2 }
  0x7b   : > { %vm1112_vm9 = vmand %vm599_vm12, %vm856_vm14  ;;  %5628 = vmatprep.subr.bf16.mxu1 %v18814_v1  ;;  %19096 = vst [vmem:[#allocation39_spill] sm:$0xff] %v13274_v49  ;;  %v367_v44 = vadd.s32 1136, %v12011_v2 }
  0x7c   : > { %vm10075_vm3 = vmpackc.low %vm1112_vm9, %vm1111_vm10  ;;  %vm763_vm10 = vcmp.lt.s32.totalorder %v12598_v32, %v12025_v7  ;;  %vm764_vm9 = vcmp.lt.s32.totalorder %v12604_v13, %v12025_v7  ;;  %19047 = vst [vmem:[#allocation34_spill] sm:$0xff] %v12710_v37 }
  0x7d   : > { %10076 = vmatpush1.bf16.msk.msra.mxu0 %vm10075_vm3, %v18812_v12  ;;  %vm1017_vm15 = vmand %vm504_vm7, %vm761_vm2  ;;  %vm507_vm2 = vcmp.ge.s32.totalorder %v12604_v13, %v12019_v5  ;;  %vm602_vm3 = vcmp.ge.s32.totalorder %v343_v17, %v12019_v5  ;;  %19100 = vst [vmem:[#allocation40_spill] sm:$0xff] %v13292_v51 }
  0x7e   : > { %6495 = vmatprep.subr.bf16.mxu0 %v18814_v1  ;;  %vm1018_vm13 = vmand %vm505_vm1, %vm762_vm8  ;;  %19134 = vst [vmem:[#allocation46_spill] sm:$0xff] %v13468_v42 }
  0x7f   : > { %vm9597_vm12 = vmpackc.low %vm1018_vm13, %vm1017_vm15  ;;  %vm859_vm15 = vcmp.lt.s32.totalorder %v343_v17, %v12025_v7  ;;  %vm860_vm13 = vcmp.lt.s32.totalorder %v344_v20, %v12025_v7  ;;  %v12679_v17 = vadd.s32 224, %v12011_v2  ;;  %19153 = vst [vmem:[#allocation49_spill] sm:$0xff] %v13579_v45 }
  0x80   : > { %9598 = vmatpush1.bf16.msk.msra.mxu1 %vm9597_vm12, %v18812_v12  ;;  %vm1113_vm14 = vmand %vm600_vm6, %vm857_vm11  ;;  %vm603_vm11 = vcmp.ge.s32.totalorder %v344_v20, %v12019_v5  ;;  %vm508_vm12 = vcmp.ge.s32.totalorder %v12626_v25, %v12019_v5  ;;  %v8291_v20 = vrot.slane %v12623_v24, 10  ;;  %v216_v24 = vadd.s32 %v8288_v16, %v192_v6 }
  0x81   : > { %vm1114_vm7 = vmand %vm601_vm4, %vm858_vm5  ;;  %5630 = vmatprep.subr.bf16.mxu1 %v18814_v1  ;;  %19044 = vst [vmem:[#allocation31_spill] sm:$0xff] %v12679_v17 }
  0x82   : > { %vm10077_vm1 = vmpackc.low %vm1114_vm7, %vm1113_vm14  ;;  %vm765_vm14 = vcmp.lt.s32.totalorder %v12626_v25, %v12025_v7  ;;  %vm766_vm7 = vcmp.lt.s32.totalorder %v12632_v26, %v12025_v7  ;;  %v219_v34 = vadd.s32 %v8291_v20, %v195_v47  ;;  %v1903_v41 = vrot.slane %v216_v24, %v12427_v11 }
  0x83   : > { %10078 = vmatpush1.bf16.msk.msra.mxu0 %vm10077_vm1, %v18812_v12  ;;  %vm1019_vm8 = vmand %vm506_vm0, %vm763_vm10  ;;  %vm509_vm10 = vcmp.ge.s32.totalorder %v12632_v26, %v12019_v5  ;;  %vm604_vm1 = vcmp.ge.s32.totalorder %v345_v33, %v12019_v5 }
  0x84   : > { %6497 = vmatprep.subr.bf16.mxu0 %v18814_v1  ;;  %vm1020_vm6 = vmand %vm507_vm2, %vm764_vm9  ;;  %v1927_v0 = vrot.slane %v219_v34, %v12427_v11  ;;  %v1923_v6 = vrot.slane %v219_v34, %v12424_v8  ;;  %v12732_v11 = vrot.slane %v1903_v41, %v12424_v8  ;;  %v356_v34 = vadd.s32 1048, %v12011_v2 }
  0x85   : > { %vm9599_vm4 = vmpackc.low %vm1020_vm6, %vm1019_vm8  ;;  %vm861_vm8 = vcmp.lt.s32.totalorder %v345_v33, %v12025_v7  ;;  %vm862_vm6 = vcmp.lt.s32.totalorder %v346_v36, %v12025_v7  ;;  %v350_v33 = vadd.s32 1000, %v12011_v2  ;;  %v357_v41 = vadd.s32 1056, %v12011_v2 }
  0x86   : > { %9600 = vmatpush1.bf16.msk.msra.mxu1 %vm9599_vm4, %v18812_v12  ;;  %vm1115_vm5 = vmand %vm602_vm3, %vm859_vm15  ;;  %vm605_vm15 = vcmp.ge.s32.totalorder %v346_v36, %v12019_v5  ;;  %vm510_vm4 = vcmp.ge.s32.totalorder %v12653_v40, %v12019_v5  ;;  %v12704_v36 = vadd.s32 240, %v12011_v2  ;;  %v12735_v47 = vrot.slane %v1927_v0, %v12424_v8 }
  0x87   : > { %vm1116_vm0 = vmand %vm603_vm11, %vm860_vm13  ;;  %5632 = vmatprep.subr.bf16.mxu1 %v18814_v1  ;;  %v12747_v20 = vrot.slane %v1923_v6, %v12424_v8  ;;  %v358_v0 = vadd.s32 1064, %v12011_v2  ;;  %v360_v6 = vadd.s32 1080, %v12011_v2 }
  0x88   : > { %vm10079_vm2 = vmpackc.low %vm1116_vm0, %vm1115_vm5  ;;  %vm767_vm5 = vcmp.lt.s32.totalorder %v12653_v40, %v12025_v7  ;;  %vm768_vm0 = vcmp.lt.s32.totalorder %v12660_v54, %v12025_v7  ;;  %19046 = vst [vmem:[#allocation33_spill] sm:$0xff] %v12704_v36 }
  0x89   : > { %10080 = vmatpush1.bf16.msk.msra.mxu0 %vm10079_vm2, %v18812_v12  ;;  %vm1021_vm9 = vmand %vm508_vm12, %vm765_vm14  ;;  %vm511_vm14 = vcmp.ge.s32.totalorder %v12660_v54, %v12019_v5  ;;  %vm606_vm2 = vcmp.ge.s32.totalorder %v347_v58, %v12019_v5 }
  0x8a   : > { %6499 = vmatprep.subr.bf16.mxu0 %v18814_v1  ;;  %vm1022_vm3 = vmand %vm509_vm10, %vm766_vm7 }
  0x8b   : > { %vm9601_vm11 = vmpackc.low %vm1022_vm3, %vm1021_vm9  ;;  %vm863_vm9 = vcmp.lt.s32.totalorder %v347_v58, %v12025_v7  ;;  %vm864_vm3 = vcmp.lt.s32.totalorder %v348_v62, %v12025_v7  ;;  %v1899_v58 = vrot.slane %v216_v24, %v12424_v8  ;;  %v354_v24 = vadd.s32 1032, %v12011_v2 }
  0x8c   : > { %9602 = vmatpush1.bf16.msk.msra.mxu1 %vm9601_vm11, %v18812_v12  ;;  %vm1117_vm13 = vmand %vm604_vm1, %vm861_vm8  ;;  %vm607_vm8 = vcmp.ge.s32.totalorder %v348_v62, %v12019_v5  ;;  %vm512_vm11 = vcmp.ge.s32.totalorder %v12679_v17, %v12019_v5  ;;  %v352_v62 = vadd.s32 1016, %v12011_v2 }
  0x8d   : > { %vm1118_vm12 = vmand %vm605_vm15, %vm862_vm6  ;;  %5634 = vmatprep.subr.bf16.mxu1 %v18814_v1  ;;  %v12741_v16 = vrot.slane %v1899_v58, %v12424_v8  ;;  %v19050_v58 = vmov 0 }
  0x8e   : > { %vm10081_vm10 = vmpackc.low %vm1118_vm12, %vm1117_vm13  ;;  %vm769_vm13 = vcmp.lt.s32.totalorder %v12679_v17, %v12025_v7  ;;  %vm770_vm12 = vcmp.lt.s32.totalorder %v12686_v29, %v12025_v7 }
  0x8f   : > { %10082 = vmatpush1.bf16.msk.msra.mxu0 %vm10081_vm10, %v18812_v12  ;;  %vm1023_vm7 = vmand %vm510_vm4, %vm767_vm5  ;;  %vm513_vm5 = vcmp.ge.s32.totalorder %v12686_v29, %v12019_v5  ;;  %vm608_vm10 = vcmp.ge.s32.totalorder %v349_v21, %v12019_v5 }
  0x90   : > { %6501 = vmatprep.subr.bf16.mxu0 %v18814_v1  ;;  %vm1024_vm1 = vmand %vm511_vm14, %vm768_vm0 }
  0x91   : > { %vm9603_vm15 = vmpackc.low %vm1024_vm1, %vm1023_vm7  ;;  %vm865_vm7 = vcmp.lt.s32.totalorder %v349_v21, %v12025_v7  ;;  %vm866_vm1 = vcmp.lt.s32.totalorder %v350_v33, %v12025_v7  ;;  %v353_v21 = vadd.s32 1024, %v12011_v2 }
  0x92   : > { %9604 = vmatpush1.bf16.msk.msra.mxu1 %vm9603_vm15, %v18812_v12  ;;  %vm1119_vm6 = vmand %vm606_vm2, %vm863_vm9  ;;  %vm609_vm9 = vcmp.ge.s32.totalorder %v350_v33, %v12019_v5  ;;  %vm514_vm15 = vcmp.ge.s32.totalorder %v12704_v36, %v12019_v5  ;;  %v355_v33 = vadd.s32 1040, %v12011_v2 }
  0x93   : > { %vm1120_vm4 = vmand %vm607_vm8, %vm864_vm3  ;;  %5636 = vmatprep.subr.bf16.mxu1 %v18814_v1 }
  0x94   : > { %vm10083_vm14 = vmpackc.low %vm1120_vm4, %vm1119_vm6  ;;  %vm771_vm6 = vcmp.lt.s32.totalorder %v12704_v36, %v12025_v7  ;;  %vm772_vm4 = vcmp.lt.s32.totalorder %v12710_v37, %v12025_v7 }
  0x95   : > { %10084 = vmatpush1.bf16.msk.msra.mxu0 %vm10083_vm14, %v18812_v12  ;;  %vm1025_vm0 = vmand %vm512_vm11, %vm769_vm13  ;;  %vm515_vm13 = vcmp.ge.s32.totalorder %v12710_v37, %v12019_v5  ;;  %vm610_vm14 = vcmp.ge.s32.totalorder %v351_v56, %v12019_v5 }
  0x96   : > { %6503 = vmatprep.subr.bf16.mxu0 %v18814_v1  ;;  %vm1026_vm2 = vmand %vm513_vm5, %vm770_vm12 }
  0x97   : > { %vm9605_vm8 = vmpackc.low %vm1026_vm2, %vm1025_vm0  ;;  %vm867_vm0 = vcmp.lt.s32.totalorder %v351_v56, %v12025_v7  ;;  %vm868_vm2 = vcmp.lt.s32.totalorder %v352_v62, %v12025_v7  ;;  %v19079_v56 = vmov 0 }
  0x98   : > { %9606 = vmatpush1.bf16.msk.msra.mxu1 %vm9605_vm8, %v18812_v12  ;;  %vm1121_vm3 = vmand %vm608_vm10, %vm865_vm7  ;;  %vm611_vm7 = vcmp.ge.s32.totalorder %v352_v62, %v12019_v5  ;;  %vm2025_vm8 = vcmp.eq.s32.totalorder %v12011_v2, %v12732_v11  ;;  %v359_v62 = vadd.s32 1072, %v12011_v2 }
  0x99   : > { %vm1122_vm11 = vmand %vm609_vm9, %vm866_vm1  ;;  %5638 = vmatprep.subr.bf16.mxu1 %v18814_v1 }
  0x9a   : > { %vm10085_vm5 = vmpackc.low %vm1122_vm11, %vm1121_vm3  ;;  %vm2041_vm3 = vcmp.eq.s32.totalorder %v12016_v4, %v12732_v11  ;;  %vm2047_vm11 = vcmp.eq.s32.totalorder %v12016_v4, %v12735_v47 }
  0x9b   : > { %10086 = vmatpush1.bf16.msk.msra.mxu0 %vm10085_vm5, %v18812_v12  ;;  %vm1027_vm12 = vmand %vm514_vm15, %vm771_vm6  ;;  %vm2031_vm6 = vcmp.eq.s32.totalorder %v12011_v2, %v12735_v47  ;;  %vm2040_vm5 = vcmp.eq.s32.totalorder %v12016_v4, %v12741_v16 }
  0x9c   : > { %6505 = vmatprep.subr.bf16.mxu0 %v18814_v1  ;;  %vm1028_vm10 = vmand %vm515_vm13, %vm772_vm4  ;;  %vm2024_vm4 = vcmp.eq.s32.totalorder %v12011_v2, %v12741_v16 }
  0x9d   : > { %vm9607_vm9 = vmpackc.low %vm1028_vm10, %vm1027_vm12 }
  0x9e   : > { %9608 = vmatpush1.bf16.msk.msra.mxu1 %vm9607_vm9, %v18812_v12  ;;  %vm1123_vm1 = vmand %vm610_vm14, %vm867_vm0  ;;  %vm2030_vm14 = vcmp.eq.s32.totalorder %v12011_v2, %v12747_v20  ;;  %vm2046_vm0 = vcmp.eq.s32.totalorder %v12016_v4, %v12747_v20 }
  0x9f   : > { %vm1124_vm15 = vmand %vm611_vm7, %vm868_vm2  ;;  %5897 = vmatprep.subr.bf16.mxu1 %v18814_v1  ;;  %vm2057_vm7 = vcmp.eq.s32.totalorder %v12035_v9, %v12732_v11  ;;  %vm2073_vm2 = vcmp.eq.s32.totalorder %v12040_v10, %v12732_v11 }
  0xa0   : > { %vm10087_vm13 = vmpackc.low %vm1124_vm15, %vm1123_vm1  ;;  %vm2063_vm1 = vcmp.eq.s32.totalorder %v12035_v9, %v12735_v47 }
  0xa1   : > { %10088 = vmatpush1.bf16.msk.msra.mxu0 %vm10087_vm13, %v18812_v12  ;;  %vm9609_vm12 = vmpackc.low %vm2041_vm3, %vm2025_vm8  ;;  %vm2079_vm8 = vcmp.eq.s32.totalorder %v12040_v10, %v12735_v47 }
  0xa2   : > { %9610 = vmatprep.mubr.msk.bf16.mxu1 %vm9609_vm12, %v18812_v12  ;;  %vm10089_vm10 = vmpackc.low %vm2047_vm11, %vm2031_vm6  ;;  %vm2056_vm6 = vcmp.eq.s32.totalorder %v12035_v9, %v12741_v16  ;;  %vm2072_vm11 = vcmp.eq.s32.totalorder %v12040_v10, %v12741_v16  ;;  %6764 = vmatprep.subr.bf16.mxu0 %v18814_v1  ;;  %vm2089_vm12 = vcmp.eq.s32.totalorder %v12057_v14, %v12732_v11 }
  0xa3   : > { %10090 = vmatprep.mubr.msk.bf16.mxu0 %vm10089_vm10, %v18812_v12  ;;  %vm9611_vm9 = vmpackc.low %vm2040_vm5, %vm2024_vm4  ;;  %vm2062_vm4 = vcmp.eq.s32.totalorder %v12035_v9, %v12747_v20  ;;  %vm2078_vm5 = vcmp.eq.s32.totalorder %v12040_v10, %v12747_v20  ;;  %vm2095_vm10 = vcmp.eq.s32.totalorder %v12057_v14, %v12735_v47 }
  0xa4   : > { %9612 = vmatmul.mubr.msk.bf16.vlgmr.msra.gmra.mrb[0].mxu1 %vm9611_vm9, %v18812_v12  ;;  %vm10091_vm3 = vmpackc.low %vm2046_vm0, %vm2030_vm14  ;;  %vm2105_vm14 = vcmp.eq.s32.totalorder %v12063_v15, %v12732_v11 }
  0xa5   : > { %10092 = vmatmul.mubr.msk.bf16.vlgmr.msra.gmra.mrb[0].mxu0 %vm10091_vm3, %v18812_v12  ;;  %vm9613_vm15 = vmpackc.low %vm2073_vm2, %vm2057_vm7  ;;  %vm2111_vm7 = vcmp.eq.s32.totalorder %v12063_v15, %v12735_v47  ;;  %vm2104_vm3 = vcmp.eq.s32.totalorder %v12063_v15, %v12741_v16 }
  0xa6   : > { %9614 = vmatprep.mubr.msk.bf16.mxu1 %vm9613_vm15, %v18812_v12  ;;  %vm10093_vm13 = vmpackc.low %vm2079_vm8, %vm2063_vm1  ;;  %vm2088_vm8 = vcmp.eq.s32.totalorder %v12057_v14, %v12741_v16  ;;  %vm2094_vm15 = vcmp.eq.s32.totalorder %v12057_v14, %v12747_v20 }
  0xa7   : > { %10094 = vmatprep.mubr.msk.bf16.mxu0 %vm10093_vm13, %v18812_v12  ;;  %vm9615_vm0 = vmpackc.low %vm2072_vm11, %vm2056_vm6  ;;  %vm2110_vm6 = vcmp.eq.s32.totalorder %v12063_v15, %v12747_v20  ;;  %vm2121_vm11 = vcmp.eq.s32.totalorder %v12081_v18, %v12732_v11  ;;  %vm2137_vm13 = vcmp.eq.s32.totalorder %v12087_v19, %v12732_v11 }
  0xa8   : > { %vm10095_vm2 = vmpackc.low %vm2078_vm5, %vm2062_vm4  ;;  %vm2127_vm5 = vcmp.eq.s32.totalorder %v12081_v18, %v12735_v47 }
  0xa9   : > { %vm9617_vm9 = vmpackc.low %vm2105_vm14, %vm2089_vm12  ;;  %vm2143_vm12 = vcmp.eq.s32.totalorder %v12087_v19, %v12735_v47 }
  0xaa   : > { %vm10097_vm1 = vmpackc.low %vm2111_vm7, %vm2095_vm10  ;;  %vm2120_vm7 = vcmp.eq.s32.totalorder %v12081_v18, %v12741_v16 }
  0xab   : > { %vm9619_vm4 = vmpackc.low %vm2104_vm3, %vm2088_vm8  ;;  %vm2153_vm8 = vcmp.eq.s32.totalorder %v12095_v22, %v12732_v11  ;;  %vm2169_vm3 = vcmp.eq.s32.totalorder %v12098_v23, %v12732_v11 }
  0xac   : > { %9616 = vmatmul.mubr.msk.bf16.gmra.mrb[4].mxu1 %vm9615_vm0, %v18812_v12  ;;  %vm10099_vm14 = vmpackc.low %vm2110_vm6, %vm2094_vm15  ;;  %vm2159_vm6 = vcmp.eq.s32.totalorder %v12095_v22, %v12735_v47 }
  0xad   : > { %10096 = vmatmul.mubr.msk.bf16.gmra.mrb[4].mxu0 %vm10095_vm2, %v18812_v12  ;;  %9618 = vmatprep.mubr.msk.bf16.mxu1 %vm9617_vm9, %v18812_v12  ;;  %vm9621_vm0 = vmpackc.low %vm2137_vm13, %vm2121_vm11  ;;  %vm2136_vm2 = vcmp.eq.s32.totalorder %v12087_v19, %v12741_v16  ;;  %vm2126_vm9 = vcmp.eq.s32.totalorder %v12081_v18, %v12747_v20  ;;  %vm2175_vm11 = vcmp.eq.s32.totalorder %v12098_v23, %v12735_v47 }
  0xae   : > { %10098 = vmatprep.mubr.msk.bf16.mxu0 %vm10097_vm1, %v18812_v12  ;;  %vm10101_vm10 = vmpackc.low %vm2143_vm12, %vm2127_vm5  ;;  %vm2142_vm1 = vcmp.eq.s32.totalorder %v12087_v19, %v12747_v20  ;;  %vm2152_vm12 = vcmp.eq.s32.totalorder %v12095_v22, %v12741_v16 }
  0xaf   : > { %vm9623_vm15 = vmpackc.low %vm2136_vm2, %vm2120_vm7  ;;  %vm2185_vm7 = vcmp.eq.s32.totalorder %v12122_v27, %v12732_v11  ;;  %vm2201_vm2 = vcmp.eq.s32.totalorder %v12130_v28, %v12732_v11 }
  0xb0   : > { %vm10103_vm13 = vmpackc.low %vm2142_vm1, %vm2126_vm9  ;;  %vm2191_vm1 = vcmp.eq.s32.totalorder %v12122_v27, %v12735_v47 }
  0xb1   : > { %vm10105_vm5 = vmpackc.low %vm2175_vm11, %vm2159_vm6  ;;  %vm2184_vm11 = vcmp.eq.s32.totalorder %v12122_v27, %v12741_v16 }
  0xb4   : > { %9620 = vmatmul.mubr.msk.bf16.gmra.mrb[8].mxu1 %vm9619_vm4, %v18812_v12  ;;  %vm9625_vm4 = vmpackc.low %vm2169_vm3, %vm2153_vm8  ;;  %vm2207_vm8 = vcmp.eq.s32.totalorder %v12130_v28, %v12735_v47 }
  0xb5   : > { %10100 = vmatmul.mubr.msk.bf16.gmra.mrb[8].mxu0 %vm10099_vm14, %v18812_v12  ;;  %9622 = vmatprep.mubr.msk.bf16.mxu1 %vm9621_vm0, %v18812_v12  ;;  %vm2168_vm14 = vcmp.eq.s32.totalorder %v12098_v23, %v12741_v16  ;;  %vm2158_vm0 = vcmp.eq.s32.totalorder %v12095_v22, %v12747_v20  ;;  %vm10109_vm6 = vmpackc.low %vm2207_vm8, %vm2191_vm1  ;;  %vm2216_vm8 = vcmp.eq.s32.totalorder %v12194_v35, %v12741_v16 }
  0xb6   : > { %10102 = vmatprep.mubr.msk.bf16.mxu0 %vm10101_vm10, %v18812_v12  ;;  %vm2174_vm10 = vcmp.eq.s32.totalorder %v12098_v23, %v12747_v20  ;;  %vm9627_vm9 = vmpackc.low %vm2168_vm14, %vm2152_vm12  ;;  %vm2217_vm12 = vcmp.eq.s32.totalorder %v12194_v35, %v12732_v11  ;;  %vm2233_vm14 = vcmp.eq.s32.totalorder %v12208_v38, %v12732_v11 }
  0xb7   : > { %vm10107_vm3 = vmpackc.low %vm2174_vm10, %vm2158_vm0  ;;  %vm2223_vm10 = vcmp.eq.s32.totalorder %v12194_v35, %v12735_v47 }
  0xbc   : > { %9624 = vmatmul.mubr.msk.bf16.gmra.mrb[12].mxu1 %vm9623_vm15, %v18812_v12  ;;  %vm9629_vm15 = vmpackc.low %vm2201_vm2, %vm2185_vm7  ;;  %vm2239_vm7 = vcmp.eq.s32.totalorder %v12208_v38, %v12735_v47 }
  0xbd   : > { %10104 = vmatmul.mubr.msk.bf16.gmra.mrb[12].mxu0 %vm10103_vm13, %v18812_v12  ;;  %9626 = vmatprep.mubr.msk.bf16.mxu1 %vm9625_vm4, %v18812_v12  ;;  %vm2200_vm13 = vcmp.eq.s32.totalorder %v12130_v28, %v12741_v16  ;;  %vm2190_vm4 = vcmp.eq.s32.totalorder %v12122_v27, %v12747_v20  ;;  %vm10113_vm1 = vmpackc.low %vm2239_vm7, %vm2223_vm10  ;;  %vm2248_vm7 = vcmp.eq.s32.totalorder %v12268_v55, %v12741_v16 }
  0xbe   : > { %10106 = vmatprep.mubr.msk.bf16.mxu0 %vm10105_vm5, %v18812_v12  ;;  %vm2206_vm5 = vcmp.eq.s32.totalorder %v12130_v28, %v12747_v20  ;;  %vm9631_vm0 = vmpackc.low %vm2200_vm13, %vm2184_vm11  ;;  %vm2249_vm11 = vcmp.eq.s32.totalorder %v12268_v55, %v12732_v11  ;;  %vm2265_vm13 = vcmp.eq.s32.totalorder %v12288_v59, %v12732_v11 }
  0xbf   : > { %vm10111_vm2 = vmpackc.low %vm2206_vm5, %vm2190_vm4  ;;  %vm2255_vm5 = vcmp.eq.s32.totalorder %v12268_v55, %v12735_v47 }
  0xc4   : > { %9628 = vmatmul.mubr.msk.bf16.gmra.mrb[16].mxu1 %vm9627_vm9, %v18812_v12  ;;  %vm9633_vm9 = vmpackc.low %vm2233_vm14, %vm2217_vm12  ;;  %vm2271_vm12 = vcmp.eq.s32.totalorder %v12288_v59, %v12735_v47 }
  0xc5   : > { %10108 = vmatmul.mubr.msk.bf16.gmra.mrb[16].mxu0 %vm10107_vm3, %v18812_v12  ;;  %9630 = vmatprep.mubr.msk.bf16.mxu1 %vm9629_vm15, %v18812_v12  ;;  %vm2232_vm3 = vcmp.eq.s32.totalorder %v12208_v38, %v12741_v16  ;;  %vm2222_vm15 = vcmp.eq.s32.totalorder %v12194_v35, %v12747_v20  ;;  %vm10117_vm10 = vmpackc.low %vm2271_vm12, %vm2255_vm5  ;;  %vm2280_vm5 = vcmp.eq.s32.totalorder %v12305_v63, %v12741_v16 }
  0xc6   : > { %10110 = vmatprep.mubr.msk.bf16.mxu0 %vm10109_vm6, %v18812_v12  ;;  %vm2238_vm6 = vcmp.eq.s32.totalorder %v12208_v38, %v12747_v20  ;;  %vm9635_vm4 = vmpackc.low %vm2232_vm3, %vm2216_vm8  ;;  %vm2281_vm8 = vcmp.eq.s32.totalorder %v12305_v63, %v12732_v11  ;;  %vm2297_vm3 = vcmp.eq.s32.totalorder %v12411_v57, %v12732_v11  ;;  %vm2296_vm12 = vcmp.eq.s32.totalorder %v12411_v57, %v12741_v16 }
  0xc7   : > { %vm10115_vm14 = vmpackc.low %vm2238_vm6, %vm2222_vm15  ;;  %vm2287_vm6 = vcmp.eq.s32.totalorder %v12305_v63, %v12735_v47 }
  0xcc   : > { %9632 = vmatmul.mubr.msk.bf16.gmra.mrb[20].mxu1 %vm9631_vm0, %v18812_v12  ;;  %vm9637_vm0 = vmpackc.low %vm2265_vm13, %vm2249_vm11  ;;  %vm2303_vm11 = vcmp.eq.s32.totalorder %v12411_v57, %v12735_v47 }
  0xcd   : > { %10112 = vmatmul.mubr.msk.bf16.gmra.mrb[20].mxu0 %vm10111_vm2, %v18812_v12  ;;  %9634 = vmatprep.mubr.msk.bf16.mxu1 %vm9633_vm9, %v18812_v12  ;;  %vm2264_vm2 = vcmp.eq.s32.totalorder %v12288_v59, %v12741_v16  ;;  %vm2254_vm9 = vcmp.eq.s32.totalorder %v12268_v55, %v12747_v20 }
  0xce   : > { %10114 = vmatprep.mubr.msk.bf16.mxu0 %vm10113_vm1, %v18812_v12  ;;  %vm2270_vm1 = vcmp.eq.s32.totalorder %v12288_v59, %v12747_v20  ;;  %vm9639_vm15 = vmpackc.low %vm2264_vm2, %vm2248_vm7  ;;  %vm2313_vm7 = vcmp.eq.s32.totalorder %v12511_v31, %v12732_v11  ;;  %vm2329_vm2 = vcmp.eq.s32.totalorder %v12530_v46, %v12732_v11 }
  0xcf   : > { %vm10119_vm13 = vmpackc.low %vm2270_vm1, %vm2254_vm9  ;;  %vm2319_vm1 = vcmp.eq.s32.totalorder %v12511_v31, %v12735_v47 }
  0xd0   : > { %vm9643_vm9 = vmpackc.low %vm2296_vm12, %vm2280_vm5 }
  0xd4   : > { %9636 = vmatmul.mubr.msk.bf16.gmra.mrb[24].mxu1 %vm9635_vm4, %v18812_v12  ;;  %vm9641_vm4 = vmpackc.low %vm2297_vm3, %vm2281_vm8  ;;  %vm2335_vm8 = vcmp.eq.s32.totalorder %v12530_v46, %v12735_v47 }
  0xd5   : > { %10116 = vmatmul.mubr.msk.bf16.gmra.mrb[24].mxu0 %vm10115_vm14, %v18812_v12  ;;  %9638 = vmatprep.mubr.msk.bf16.mxu1 %vm9637_vm0, %v18812_v12  ;;  %vm10121_vm14 = vmpackc.low %vm2303_vm11, %vm2287_vm6  ;;  %vm2286_vm0 = vcmp.eq.s32.totalorder %v12305_v63, %v12747_v20  ;;  %vm869_vm6 = vcmp.lt.s32.totalorder %v353_v21, %v12025_v7 }
  0xd6   : > { %10118 = vmatprep.mubr.msk.bf16.mxu0 %vm10117_vm10, %v18812_v12  ;;  %vm2302_vm10 = vcmp.eq.s32.totalorder %v12411_v57, %v12747_v20  ;;  %vm9645_vm11 = vmpackc.low %vm2329_vm2, %vm2313_vm7  ;;  %vm2328_vm7 = vcmp.eq.s32.totalorder %v12530_v46, %v12741_v16  ;;  %vm2318_vm2 = vcmp.eq.s32.totalorder %v12511_v31, %v12747_v20 }
  0xd7   : > { %vm10123_vm3 = vmpackc.low %vm2302_vm10, %vm2286_vm0  ;;  %vm2312_vm10 = vcmp.eq.s32.totalorder %v12511_v31, %v12741_v16 }
  0xd8   : > { %vm10125_vm5 = vmpackc.low %vm2335_vm8, %vm2319_vm1  ;;  %vm2345_vm1 = vcmp.eq.s32.totalorder %v12572_v52, %v12732_v11  ;;  %vm2361_vm8 = vcmp.eq.s32.totalorder %v12578_v53, %v12732_v11 }
  0xdc   : > { %9640 = vmatmul.mubr.msk.bf16.gmra.mrb[28].mxu1 %vm9639_vm15, %v18812_v12  ;;  %vm612_vm15 = vcmp.ge.s32.totalorder %v353_v21, %v12019_v5  ;;  %v13136_v21 = vadd.s32 256, %v12011_v2 }
  0xdd   : > { %10120 = vmatmul.mubr.msk.bf16.gmra.mrb[28].mxu0 %vm10119_vm13, %v18812_v12  ;;  %9642 = vmatprep.mubr.msk.bf16.mxu1 %vm9641_vm4, %v18812_v12  ;;  %vm613_vm13 = vcmp.ge.s32.totalorder %v354_v24, %v12019_v5  ;;  %vm870_vm4 = vcmp.lt.s32.totalorder %v354_v24, %v12025_v7  ;;  %vm1125_vm12 = vmand %vm612_vm15, %vm869_vm6  ;;  %vm2351_vm15 = vcmp.eq.s32.totalorder %v12572_v52, %v12735_v47  ;;  %v13139_v24 = vadd.s32 264, %v12011_v2 }
  0xde   : > { %10122 = vmatprep.mubr.msk.bf16.mxu0 %vm10121_vm14, %v18812_v12  ;;  %vm1126_vm14 = vmand %vm613_vm13, %vm870_vm4  ;;  %vm2367_vm6 = vcmp.eq.s32.totalorder %v12578_v53, %v12735_v47  ;;  %vm614_vm13 = vcmp.ge.s32.totalorder %v355_v33, %v12019_v5  ;;  %vm871_vm4 = vcmp.lt.s32.totalorder %v355_v33, %v12025_v7  ;;  %19069 = vst [vmem:[#allocation35_spill] sm:$0xff] %v13136_v21  ;;  %v13408_v33 = vadd.s32 328, %v12011_v2 }
  0xdf   : > { %vm10217_vm0 = vmpackc.low %vm1126_vm14, %vm1125_vm12  ;;  %vm615_vm12 = vcmp.ge.s32.totalorder %v356_v34, %v12019_v5  ;;  %vm872_vm14 = vcmp.lt.s32.totalorder %v356_v34, %v12025_v7  ;;  %v361_v34 = vadd.s32 1088, %v12011_v2  ;;  %19070 = vst [vmem:[#allocation36_spill] sm:$0xff] %v13139_v24 }
  0xe0   : > { %10218 = vmatpush1.bf16.msk.msra.mxu0 %vm10217_vm0, %v18812_v12  ;;  %vm10129_vm0 = vmpackc.low %vm2367_vm6, %vm2351_vm15  ;;  %vm2377_vm15 = vcmp.eq.s32.totalorder %v12598_v32, %v12732_v11  ;;  %vm2393_vm6 = vcmp.eq.s32.totalorder %v12604_v13, %v12732_v11  ;;  %19122 = vst [vmem:[#allocation44_spill] sm:$0xff] %v13408_v33 }
  0xe1   : > { %6766 = vmatprep.subr.bf16.mxu0 %v18814_v1 }
  0xe4   : > { %9644 = vmatmul.mubr.msk.bf16.gmra.mrb[32].mxu1 %vm9643_vm9, %v18812_v12  ;;  %vm2334_vm9 = vcmp.eq.s32.totalorder %v12530_v46, %v12747_v20 }
  0xe5   : > { %10124 = vmatmul.mubr.msk.bf16.gmra.mrb[32].mxu0 %vm10123_vm3, %v18812_v12  ;;  %9646 = vmatprep.mubr.msk.bf16.mxu1 %vm9645_vm11, %v18812_v12  ;;  %vm9647_vm3 = vmpackc.low %vm2328_vm7, %vm2312_vm10  ;;  %vm2344_vm7 = vcmp.eq.s32.totalorder %v12572_v52, %v12741_v16 }
  0xe6   : > { %10126 = vmatprep.mubr.msk.bf16.mxu0 %vm10125_vm5, %v18812_v12  ;;  %vm10127_vm11 = vmpackc.low %vm2334_vm9, %vm2318_vm2  ;;  %vm2360_vm2 = vcmp.eq.s32.totalorder %v12578_v53, %v12741_v16 }
  0xe7   : > { %vm9649_vm5 = vmpackc.low %vm2361_vm8, %vm2345_vm1  ;;  %vm2350_vm1 = vcmp.eq.s32.totalorder %v12572_v52, %v12747_v20  ;;  %vm2366_vm8 = vcmp.eq.s32.totalorder %v12578_v53, %v12747_v20 }
  0xe8   : > { %vm1127_vm10 = vmand %vm614_vm13, %vm871_vm4  ;;  %vm2383_vm13 = vcmp.eq.s32.totalorder %v12598_v32, %v12735_v47  ;;  %vm2399_vm4 = vcmp.eq.s32.totalorder %v12604_v13, %v12735_v47 }
  0xe9   : > { %vm1128_vm9 = vmand %vm615_vm12, %vm872_vm14  ;;  %vm2376_vm14 = vcmp.eq.s32.totalorder %v12598_v32, %v12741_v16 }
  0xea   : > { %vm9653_vm12 = vmpackc.low %vm2393_vm6, %vm2377_vm15  ;;  %vm874_vm15 = vcmp.lt.s32.totalorder %v358_v0, %v12025_v7 }
  0xec   : > { %9648 = vmatmul.mubr.msk.bf16.gmra.mrb[36].mxu1 %vm9647_vm3, %v18812_v12  ;;  %vm10219_vm3 = vmpackc.low %vm1128_vm9, %vm1127_vm10  ;;  %vm616_vm9 = vcmp.ge.s32.totalorder %v357_v41, %v12019_v5 }
  0xed   : > { %10128 = vmatmul.mubr.msk.bf16.gmra.mrb[36].mxu0 %vm10127_vm11, %v18812_v12  ;;  %9650 = vmatprep.mubr.msk.bf16.mxu1 %vm9649_vm5, %v18812_v12  ;;  %vm9651_vm11 = vmpackc.low %vm2360_vm2, %vm2344_vm7  ;;  %vm2382_vm7 = vcmp.eq.s32.totalorder %v12598_v32, %v12747_v20  ;;  %vm2398_vm2 = vcmp.eq.s32.totalorder %v12604_v13, %v12747_v20 }
  0xee   : > { %10130 = vmatprep.mubr.msk.bf16.mxu0 %vm10129_vm0, %v18812_v12  ;;  %10220 = vmatpush1.bf16.msk.msra.mxu0 %vm10219_vm3, %v18812_v12  ;;  %vm10131_vm5 = vmpackc.low %vm2366_vm8, %vm2350_vm1  ;;  %vm2392_vm0 = vcmp.eq.s32.totalorder %v12604_v13, %v12741_v16  ;;  %vm873_vm1 = vcmp.lt.s32.totalorder %v357_v41, %v12025_v7  ;;  %vm617_vm3 = vcmp.ge.s32.totalorder %v358_v0, %v12019_v5  ;;  %v362_v0 = vadd.s32 1096, %v12011_v2 }
  0xef   : > { %6768 = vmatprep.subr.bf16.mxu0 %v18814_v1  ;;  %vm10133_vm10 = vmpackc.low %vm2399_vm4, %vm2383_vm13  ;;  %vm2425_vm13 = vcmp.eq.s32.totalorder %v12632_v26, %v12732_v11  ;;  %v19098_v41 = vmov 0 }
  0xf0   : > { %vm13010_vm8 = vmpackc.low %vm2392_vm0, %vm2376_vm14 }
  0xf1   : > { %vm13017_vm6 = vmpackc.low %vm2398_vm2, %vm2382_vm7  ;;  %vm2408_vm2 = vcmp.eq.s32.totalorder %v12626_v25, %v12741_v16 }
  0xf2   : > { %v19051_v58 = vsel %vm13017_vm6, 4294967295, %v19050_v58  ;;  %vm1129_vm4 = vmand %vm616_vm9, %vm873_vm1  ;;  %vm2424_vm6 = vcmp.eq.s32.totalorder %v12632_v26, %v12741_v16  ;;  %vm2414_vm9 = vcmp.eq.s32.totalorder %v12626_v25, %v12747_v20  ;;  %vm2430_vm1 = vcmp.eq.s32.totalorder %v12632_v26, %v12747_v20 }
  0xf3   : > { %vm1130_vm14 = vmand %vm617_vm3, %vm874_vm15  ;;  %vm19052_vm3 = vnez %v19051_v58  ;;  %vm2441_vm15 = vcmp.eq.s32.totalorder %v12653_v40, %v12732_v11  ;;  %v13202_v58 = vadd.s32 272, %v12011_v2 }
  0xf4   : > { %9652 = vmatmul.mubr.msk.bf16.gmra.mrb[40].mxu1 %vm9651_vm11, %v18812_v12  ;;  %vm2409_vm11 = vcmp.eq.s32.totalorder %v12626_v25, %v12732_v11  ;;  %vm10221_vm0 = vmpackc.low %vm1130_vm14, %vm1129_vm4  ;;  %vm2463_vm4 = vcmp.eq.s32.totalorder %v12660_v54, %v12735_v47  ;;  %vm875_vm14 = vcmp.lt.s32.totalorder %v359_v62, %v12025_v7 }
  0xf5   : > { %10132 = vmatmul.mubr.msk.bf16.gmra.mrb[40].mxu0 %vm10131_vm5, %v18812_v12  ;;  %9654 = vmatprep.mubr.msk.bf16.mxu1 %vm9653_vm12, %v18812_v12  ;;  %vm2415_vm5 = vcmp.eq.s32.totalorder %v12626_v25, %v12735_v47  ;;  %vm2431_vm12 = vcmp.eq.s32.totalorder %v12632_v26, %v12735_v47  ;;  %19081 = vst [vmem:[#allocation37_spill] sm:$0xff] %v13202_v58 }
  0xf6   : > { %10134 = vmatprep.mubr.msk.bf16.mxu0 %vm10133_vm10, %v18812_v12  ;;  %vm9657_vm10 = vmpackc.low %vm2425_vm13, %vm2409_vm11  ;;  %10222 = vmatpush1.bf16.msk.msra.mxu0 %vm10221_vm0, %v18812_v12  ;;  %vm2447_vm13 = vcmp.eq.s32.totalorder %v12653_v40, %v12735_v47 }
  0xf7   : > { %vm10137_vm7 = vmpackc.low %vm2431_vm12, %vm2415_vm5  ;;  %6770 = vmatprep.subr.bf16.mxu0 %v18814_v1  ;;  %vm618_vm12 = vcmp.ge.s32.totalorder %v359_v62, %v12019_v5  ;;  %v19065_v62 = vmov 0 }
  0xf8   : > { %vm9659_vm11 = vmpackc.low %vm2424_vm6, %vm2408_vm2 }
  0xf9   : > { %vm13057_vm5 = vmpackc.low %vm2430_vm1, %vm2414_vm9  ;;  %vm2440_vm9 = vcmp.eq.s32.totalorder %v12653_v40, %v12741_v16  ;;  %vm2456_vm1 = vcmp.eq.s32.totalorder %v12660_v54, %v12741_v16 }
  0xfa   : > { %vm10141_vm6 = vmpackc.low %vm2463_vm4, %vm2447_vm13  ;;  %vm2473_vm4 = vcmp.eq.s32.totalorder %v12679_v17, %v12732_v11 }
  0xfb   : > { %vm13065_vm2 = vmand %vm618_vm12, %vm875_vm14  ;;  %vm2479_vm14 = vcmp.eq.s32.totalorder %v12679_v17, %v12735_v47 }
  0xfc   : > { %9656 = vmatmul.mubr.msk.bf16.gmra.mrb[44].mxu1 %vm13010_vm8, %v18812_v12  ;;  %vm2457_vm8 = vcmp.eq.s32.totalorder %v12660_v54, %v12732_v11  ;;  %vm13089_vm12 = vmpackc.low %vm2456_vm1, %vm2440_vm9  ;;  %vm2494_vm9 = vcmp.eq.s32.totalorder %v12686_v29, %v12747_v20 }
  0xfd   : > { %10136 = vmatmul.mubr.msk.bf16.gmra.mrb[44].mxu0 %vm19052_vm3, %v18812_v12  ;;  %9658 = vmatprep.mubr.msk.bf16.mxu1 %vm9657_vm10, %v18812_v12  ;;  %vm9661_vm0 = vmpackc.low %vm2457_vm8, %vm2441_vm15  ;;  %vm619_vm10 = vcmp.ge.s32.totalorder %v360_v6, %v12019_v5  ;;  %vm2446_vm15 = vcmp.eq.s32.totalorder %v12653_v40, %v12747_v20  ;;  %vm2462_vm8 = vcmp.eq.s32.totalorder %v12660_v54, %v12747_v20 }
  0xfe   : > { %10138 = vmatprep.mubr.msk.bf16.mxu0 %vm10137_vm7, %v18812_v12  ;;  %vm876_vm7 = vcmp.lt.s32.totalorder %v360_v6, %v12025_v7  ;;  %v19067_v6 = vmov 0 }
  0xff   : > { %vm1132_vm3 = vmand %vm619_vm10, %vm876_vm7  ;;  %vm2472_vm10 = vcmp.eq.s32.totalorder %v12679_v17, %v12741_v16  ;;  %vm2488_vm7 = vcmp.eq.s32.totalorder %v12686_v29, %v12741_v16 }
 0x100   : > { %vm10223_vm13 = vmpackc.low %vm1132_vm3, %vm13065_vm2  ;;  %vm2478_vm2 = vcmp.eq.s32.totalorder %v12679_v17, %v12747_v20  ;;  %vm2505_vm3 = vcmp.eq.s32.totalorder %v12704_v36, %v12732_v11 }
 0x101   : > { %10224 = vmatpush1.bf16.msk.msra.mxu0 %vm10223_vm13, %v18812_v12  ;;  %vm620_vm13 = vcmp.ge.s32.totalorder %v361_v34, %v12019_v5 }
 0x102   : > { %6772 = vmatprep.subr.bf16.mxu0 %v18814_v1 }
 0x104   : > { %9660 = vmatmul.mubr.msk.bf16.gmra.mrb[48].mxu1 %vm9659_vm11, %v18812_v12  ;;  %vm2489_vm11 = vcmp.eq.s32.totalorder %v12686_v29, %v12732_v11 }
 0x105   : > { %10140 = vmatmul.mubr.msk.bf16.gmra.mrb[48].mxu0 %vm13057_vm5, %v18812_v12  ;;  %9662 = vmatprep.mubr.msk.bf16.mxu1 %vm9661_vm0, %v18812_v12  ;;  %vm2495_vm5 = vcmp.eq.s32.totalorder %v12686_v29, %v12735_v47  ;;  %vm13099_vm0 = vmpackc.low %vm2462_vm8, %vm2446_vm15  ;;  %vm2521_vm15 = vcmp.eq.s32.totalorder %v12710_v37, %v12732_v11 }
 0x106   : > { %10142 = vmatprep.mubr.msk.bf16.mxu0 %vm10141_vm6, %v18812_v12  ;;  %vm13109_vm6 = vmpackc.low %vm2489_vm11, %vm2473_vm4  ;;  %vm877_vm4 = vcmp.lt.s32.totalorder %v361_v34, %v12025_v7  ;;  %v19071_v34 = vmov 0 }
 0x107   : > { %vm13117_vm1 = vmpackc.low %vm2495_vm5, %vm2479_vm14  ;;  %vm621_vm14 = vcmp.ge.s32.totalorder %v362_v0, %v12019_v5  ;;  %vm878_vm5 = vcmp.lt.s32.totalorder %v362_v0, %v12025_v7  ;;  %v13321_v0 = vadd.s32 312, %v12011_v2 }
 0x108   : > { %vm13125_vm8 = vmpackc.low %vm2488_vm7, %vm2472_vm10  ;;  %vm2511_vm7 = vcmp.eq.s32.totalorder %v12704_v36, %v12735_v47 }
 0x109   : > { %v19066_v62 = vsel %vm13125_vm8, 4294967295, %v19065_v62  ;;  %vm13131_vm11 = vmpackc.low %vm2494_vm9, %vm2478_vm2  ;;  %vm2527_vm2 = vcmp.eq.s32.totalorder %v12710_v37, %v12735_v47  ;;  %vm516_vm8 = vcmp.ge.s32.totalorder %v13136_v21, %v12019_v5  ;;  %19103 = vst [vmem:[#allocation42_spill] sm:$0xff] %v13321_v0 }
 0x10a   : > { %v19068_v6 = vsel %vm13131_vm11, 4294967295, %v19067_v6  ;;  %vm13146_vm10 = vmpackc.low %vm2521_vm15, %vm2505_vm3  ;;  %vm2526_vm15 = vcmp.eq.s32.totalorder %v12710_v37, %v12747_v20 }
 0x10b   : > { %v19072_v34 = vsel %vm13146_vm10, 4294967295, %v19071_v34  ;;  %vm1133_vm9 = vmand %vm620_vm13, %vm877_vm4  ;;  %vm2537_vm13 = vcmp.eq.s32.totalorder %v13136_v21, %v12732_v11  ;;  %vm2553_vm4 = vcmp.eq.s32.totalorder %v13139_v24, %v12732_v11 }
 0x10c   : > { %9664 = vmatmul.mubr.msk.bf16.gmra.mrb[52].mxu1 %vm13089_vm12, %v18812_v12  ;;  %vm2504_vm12 = vcmp.eq.s32.totalorder %v12704_v36, %v12741_v16  ;;  %vm1134_vm3 = vmand %vm621_vm14, %vm878_vm5  ;;  %vm2543_vm14 = vcmp.eq.s32.totalorder %v13136_v21, %v12735_v47  ;;  %vm2559_vm5 = vcmp.eq.s32.totalorder %v13139_v24, %v12735_v47 }
 0x10d   : > { %10144 = vmatmul.mubr.msk.bf16.gmra.mrb[52].mxu0 %vm13099_vm0, %v18812_v12  ;;  %9666 = vmatprep.mubr.msk.bf16.mxu1 %vm13109_vm6, %v18812_v12  ;;  %vm2520_vm0 = vcmp.eq.s32.totalorder %v12710_v37, %v12741_v16  ;;  %vm2510_vm6 = vcmp.eq.s32.totalorder %v12704_v36, %v12747_v20  ;;  %vm13175_vm10 = vmpackc.low %vm2527_vm2, %vm2511_vm7  ;;  %vm773_vm7 = vcmp.lt.s32.totalorder %v13136_v21, %v12025_v7 }
 0x10e   : > { %10146 = vmatprep.mubr.msk.bf16.mxu0 %vm13117_vm1, %v18812_v12  ;;  %vm10225_vm1 = vmpackc.low %vm1134_vm3, %vm1133_vm9 }
 0x10f   : > { %10226 = vmatpush1.bf16.msk.msra.mxu0 %vm10225_vm1, %v18812_v12  ;;  %vm13184_vm11 = vmpackc.low %vm2520_vm0, %vm2504_vm12  ;;  %vm517_vm12 = vcmp.ge.s32.totalorder %v13139_v24, %v12019_v5  ;;  %vm774_vm0 = vcmp.lt.s32.totalorder %v13139_v24, %v12025_v7  ;;  %v19082_v12 = vmov 0  ;;  %vm19087_vm1 = vnez %v19068_v6 }
 0x110   : > { %6774 = vmatprep.subr.bf16.mxu0 %v18814_v1  ;;  %vm13193_vm2 = vmpackc.low %vm2526_vm15, %vm2510_vm6  ;;  %v13213_v1 = vadd.s32 280, %v12011_v2  ;;  %vm19086_vm6 = vnez %v19066_v62  ;;  %v363_v62 = vadd.s32 1104, %v12011_v2  ;;  %v19089_v6 = vmov 0  }
 0x111   : > { %vm13197_vm9 = vmpackc.low %vm2553_vm4, %vm2537_vm13  ;;  %vm518_vm13 = vcmp.ge.s32.totalorder %v13202_v58, %v12019_v5  ;;  %vm775_vm4 = vcmp.lt.s32.totalorder %v13202_v58, %v12025_v7 }
 0x112   : > { %v19080_v56 = vsel %vm13197_vm9, 4294967295, %v19079_v56  ;;  %vm13208_vm3 = vmpackc.low %vm2559_vm5, %vm2543_vm14  ;;  %19084 = vst [vmem:[#allocation38_spill] sm:$0xff] %v13213_v1  ;;  %vm19088_vm14 = vnez %v19072_v34  ;;  %v364_v34 = vadd.s32 1112, %v12011_v2  ;;  %vm2591_vm9 = vcmp.eq.s32.totalorder %v13213_v1, %v12735_v47 }
 0x113   : > { %v19083_v12 = vsel %vm13208_vm3, 4294967295, %v19082_v12  ;;  %vm1029_vm15 = vmand %vm516_vm8, %vm773_vm7  ;;  %vm519_vm3 = vcmp.ge.s32.totalorder %v13213_v1, %v12019_v5  ;;  %vm776_vm8 = vcmp.lt.s32.totalorder %v13213_v1, %v12025_v7 }
 0x114   : > { %9668 = vmatmul.mubr.msk.bf16.gmra.mrb[56].mxu1 %vm19086_vm6, %v19085_v3  ;;  %vm1030_vm5 = vmand %vm517_vm12, %vm774_vm0  ;;  %vm2536_vm6 = vcmp.eq.s32.totalorder %v13136_v21, %v12741_v16  ;;  %vm2542_vm0 = vcmp.eq.s32.totalorder %v13136_v21, %v12747_v20 }
 0x115   : > { %10148 = vmatmul.mubr.msk.bf16.gmra.mrb[56].mxu0 %vm19087_vm1, %v19085_v3  ;;  %9670 = vmatprep.mubr.msk.bf16.mxu1 %vm19088_vm14, %v19085_v3  ;;  %vm9737_vm7 = vmpackc.low %vm1030_vm5, %vm1029_vm15  ;;  %vm2552_vm1 = vcmp.eq.s32.totalorder %v13139_v24, %v12741_v16  ;;  %vm2558_vm14 = vcmp.eq.s32.totalorder %v13139_v24, %v12747_v20  ;;  %vm2569_vm15 = vcmp.eq.s32.totalorder %v13202_v58, %v12732_v11 }
 0x116   : > { %10150 = vmatprep.mubr.msk.bf16.mxu0 %vm13175_vm10, %v19085_v3  ;;  %9738 = vmatpush1.bf16.msk.msra.mxu1 %vm9737_vm7, %v19085_v3  ;;  %vm1031_vm12 = vmand %vm518_vm13, %vm775_vm4  ;;  %vm2585_vm5 = vcmp.eq.s32.totalorder %v13213_v1, %v12732_v11  ;;  %vm2575_vm7 = vcmp.eq.s32.totalorder %v13202_v58, %v12735_v47 }
 0x117   : > { %5899 = vmatprep.subr.bf16.mxu1 %v19089_v6  ;;  %vm1032_vm10 = vmand %vm519_vm3, %vm776_vm8  ;;  %vm622_vm8 = vcmp.ge.s32.totalorder %v363_v62, %v12019_v5 }
 0x118   : > { %vm9739_vm13 = vmpackc.low %vm1032_vm10, %vm1031_vm12  ;;  %vm879_vm12 = vcmp.lt.s32.totalorder %v363_v62, %v12025_v7  ;;  %vm2568_vm10 = vcmp.eq.s32.totalorder %v13202_v58, %v12741_v16  ;;  %v13444_v62 = vadd.s32 336, %v12011_v2 }
 0x119   : > { %vm13251_vm4 = vmpackc.low %vm2552_vm1, %vm2536_vm6  ;;  %vm623_vm1 = vcmp.ge.s32.totalorder %v364_v34, %v12019_v5 }
 0x11a   : > { %vm13259_vm3 = vmpackc.low %vm2558_vm14, %vm2542_vm0  ;;  %9740 = vmatpush1.bf16.msk.msra.mxu1 %vm9739_vm13, %v19085_v3  ;;  %vm880_vm0 = vcmp.lt.s32.totalorder %v364_v34, %v12025_v7  ;;  %vm520_vm13 = vcmp.ge.s32.totalorder %v13274_v49, %v12019_v5  ;;  %19127 = vst [vmem:[#allocation45_spill] sm:$0xff] %v13444_v62  ;;  %v366_v34 = vadd.s32 1128, %v12011_v2 }
 0x11b   : > { %vm13269_vm6 = vmpackc.low %vm2585_vm5, %vm2569_vm15  ;;  %5901 = vmatprep.subr.bf16.mxu1 %v19089_v6  ;;  %vm19101_vm15 = vnez %v19083_v12  ;;  %v13312_v12 = vadd.s32 304, %v12011_v2  ;;  %vm521_vm5 = vcmp.ge.s32.totalorder %v13292_v51, %v12019_v5 }
 0x11c   : > { %9672 = vmatmul.mubr.msk.bf16.gmra.mrb[60].mxu1 %vm13184_vm11, %v19085_v3  ;;  %v19095_v48 = vsel %vm13269_vm6, 4294967295, %v19094_v48  ;;  %vm19097_vm11 = vnez %v19080_v56  ;;  %vm13285_vm14 = vmpackc.low %vm2591_vm9, %vm2575_vm7  ;;  %vm777_vm7 = vcmp.lt.s32.totalorder %v13274_v49, %v12025_v7  ;;  %v365_v56 = vadd.s32 1120, %v12011_v2 }
 0x11d   : > { %10152 = vmatmul.mubr.msk.bf16.gmra.mrb[60].mxu0 %vm13193_vm2, %v19085_v3  ;;  %9674 = vmatprep.mubr.msk.bf16.mxu1 %vm19097_vm11, %v19085_v3  ;;  %v19099_v41 = vsel %vm13285_vm14, 4294967295, %v19098_v41  ;;  %vm2584_vm2 = vcmp.eq.s32.totalorder %v13213_v1, %v12741_v16  ;;  %vm1135_vm9 = vmand %vm622_vm8, %vm879_vm12  ;;  %vm2590_vm11 = vcmp.eq.s32.totalorder %v13213_v1, %v12747_v20  ;;  %19102 = vst [vmem:[#allocation41_spill] sm:$0xff] %v13312_v12  ;;  %v13551_v1 = vadd.s32 360, %v12011_v2 }
 0x11e   : > { %10154 = vmatprep.mubr.msk.bf16.mxu0 %vm19101_vm15, %v19085_v3  ;;  %vm1136_vm15 = vmand %vm623_vm1, %vm880_vm0  ;;  %vm778_vm8 = vcmp.lt.s32.totalorder %v13292_v51, %v12025_v7  ;;  %vm522_vm0 = vcmp.ge.s32.totalorder %v13312_v12, %v12019_v5  ;;  %vm779_vm6 = vcmp.lt.s32.totalorder %v13312_v12, %v12025_v7 }
 0x11f   : > { %vm10227_vm12 = vmpackc.low %vm1136_vm15, %vm1135_vm9  ;;  %vm19108_vm9 = vcmp.eq.s32.totalorder %v13202_v58, %v12747_v20  ;;  %19149 = vst [vmem:[#allocation48_spill] sm:$0xff] %v13551_v1  ;;  %v13766_v58 = vadd.s32 400, %v12011_v2 }
 0x120   : > { %vm13326_vm14 = vmpackc.low %vm2584_vm2, %vm2568_vm10  ;;  %10228 = vmatpush1.bf16.msk.msra.mxu0 %vm10227_vm12, %v19085_v3  ;;  %vm523_vm2 = vcmp.ge.s32.totalorder %v13321_v0, %v12019_v5  ;;  %vm19115_vm12 = vnez %v19095_v48  ;;  %v13398_v48 = vadd.s32 320, %v12011_v2 }
 0x121   : > { %vm13331_vm1 = vmand %vm520_vm13, %vm777_vm7  ;;  %vm780_vm13 = vcmp.lt.s32.totalorder %v13321_v0, %v12025_v7  ;;  %6776 = vmatprep.subr.bf16.mxu0 %v19089_v6  ;;  %vm2601_vm7 = vcmp.eq.s32.totalorder %v13274_v49, %v12732_v11  ;;  %19189 = vst [vmem:[#allocation53_spill] sm:$0xff] %v13766_v58 }
 0x122   : > { %vm13342_vm15 = vmpackc.low %vm2590_vm11, %vm19108_vm9  ;;  %vm2617_vm11 = vcmp.eq.s32.totalorder %v13292_v51, %v12732_v11  ;;  %vm2607_vm9 = vcmp.eq.s32.totalorder %v13274_v49, %v12735_v47  ;;  %19121 = vst [vmem:[#allocation43_spill] sm:$0xff] %v13398_v48 }
 0x123   : > { %vm13346_vm10 = vmand %vm521_vm5, %vm778_vm8 }
 0x124   : > { %vm9741_vm5 = vmpackc.low %vm13346_vm10, %vm13331_vm1  ;;  %9676 = vmatmul.mubr.msk.bf16.gmra.mrb[64].mxu1 %vm13251_vm4, %v19085_v3  ;;  %vm2623_vm1 = vcmp.eq.s32.totalorder %v13292_v51, %v12735_v47  ;;  %vm19118_vm4 = vnez %v19099_v41  ;;  %v19123_v41 = vmov 0 }
 0x125   : > { %vm13366_vm8 = vmand %vm522_vm0, %vm779_vm6  ;;  %10156 = vmatmul.mubr.msk.bf16.gmra.mrb[64].mxu0 %vm13259_vm3, %v19085_v3  ;;  %9678 = vmatprep.mubr.msk.bf16.mxu1 %vm19115_vm12, %v19085_v3  ;;  %vm2600_vm3 = vcmp.eq.s32.totalorder %v13274_v49, %v12741_v16  ;;  %vm2616_vm0 = vcmp.eq.s32.totalorder %v13292_v51, %v12741_v16 }
 0x126   : > { %vm13380_vm10 = vmand %vm523_vm2, %vm780_vm13  ;;  %10158 = vmatprep.mubr.msk.bf16.mxu0 %vm19118_vm4, %v19085_v3  ;;  %vm2606_vm2 = vcmp.eq.s32.totalorder %v13274_v49, %v12747_v20  ;;  %9742 = vmatpush1.bf16.msk.msra.mxu1 %vm9741_vm5, %v19085_v3  ;;  %vm2639_vm4 = vcmp.eq.s32.totalorder %v13312_v12, %v12735_v47  ;;  %vm524_vm13 = vcmp.ge.s32.totalorder %v13398_v48, %v12019_v5  ;;  %v19135_v49 = vmov 0 }
 0x127   : > { %vm13387_vm6 = vmpackc.low %vm2617_vm11, %vm2601_vm7  ;;  %vm2649_vm11 = vcmp.eq.s32.totalorder %v13321_v0, %v12732_v11  ;;  %5903 = vmatprep.subr.bf16.mxu1 %v19089_v6  ;;  %vm2655_vm7 = vcmp.eq.s32.totalorder %v13321_v0, %v12735_v47 }
 0x128   : > { %v19120_v50 = vsel %vm13387_vm6, 4294967295, %v19119_v50  ;;  %vm9743_vm12 = vmpackc.low %vm13380_vm10, %vm13366_vm8  ;;  %vm781_vm8 = vcmp.lt.s32.totalorder %v13398_v48, %v12025_v7  ;;  %vm782_vm10 = vcmp.lt.s32.totalorder %v13408_v33, %v12025_v7 }
 0x129   : > { %vm13421_vm5 = vmpackc.low %vm2623_vm1, %vm2607_vm9  ;;  %vm525_vm1 = vcmp.ge.s32.totalorder %v13408_v33, %v12019_v5 }
 0x12a   : > { %v19124_v41 = vsel %vm13421_vm5, 4294967295, %v19123_v41  ;;  %vm13439_vm9 = vmpackc.low %vm2616_vm0, %vm2600_vm3  ;;  %vm19128_vm5 = vcmp.eq.s32.totalorder %v13292_v51, %v12747_v20  ;;  %vm19131_vm3 = vcmp.eq.s32.totalorder %v13312_v12, %v12732_v11  ;;  %9744 = vmatpush1.bf16.msk.msra.mxu1 %vm9743_vm12, %v19085_v3  ;;  %vm784_vm12 = vcmp.lt.s32.totalorder %v13468_v42, %v12025_v7 }
 0x12b   : > { %v19126_v61 = vsel %vm13439_vm9, 4294967295, %v19125_v61  ;;  %vm13456_vm6 = vmpackc.low %vm19128_vm5, %vm2606_vm2  ;;  %5905 = vmatprep.subr.bf16.mxu1 %v19089_v6  ;;  %vm526_vm5 = vcmp.ge.s32.totalorder %v13444_v62, %v12019_v5  ;;  %v19147_v51 = vmov 0 }
 0x12c   : > { %vm13463_vm0 = vmpackc.low %vm2649_vm11, %vm19131_vm3  ;;  %vm783_vm11 = vcmp.lt.s32.totalorder %v13444_v62, %v12025_v7  ;;  %9680 = vmatmul.mubr.msk.bf16.gmra.mrb[68].mxu1 %vm13326_vm14, %v19085_v3  ;;  %vm2632_vm14 = vcmp.eq.s32.totalorder %v13312_v12, %v12741_v16 }
 0x12d   : > { %vm13471_vm9 = vmpackc.low %vm2655_vm7, %vm2639_vm4  ;;  %vm527_vm7 = vcmp.ge.s32.totalorder %v13468_v42, %v12019_v5  ;;  %10160 = vmatmul.mubr.msk.bf16.gmra.mrb[68].mxu0 %vm13342_vm15, %v19085_v3  ;;  %vm2638_vm15 = vcmp.eq.s32.totalorder %v13312_v12, %v12747_v20  ;;  %v13532_v12 = vadd.s32 352, %v12011_v2 }
 0x12e   : > { %v19136_v49 = vsel %vm13471_vm9, 4294967295, %v19135_v49  ;;  %vm1037_vm2 = vmand %vm524_vm13, %vm781_vm8  ;;  %vm19137_vm13 = vnez %v19120_v50  ;;  %vm19138_vm8 = vnez %v19124_v41  ;;  %v19139_v50 = vmov 0 }
 0x12f   : > { %vm1038_vm3 = vmand %vm525_vm1, %vm782_vm10  ;;  %9682 = vmatprep.mubr.msk.bf16.mxu1 %vm19137_vm13, %v19085_v3  ;;  %10162 = vmatprep.mubr.msk.bf16.mxu0 %vm19138_vm8, %v19085_v3  ;;  %vm2648_vm1 = vcmp.eq.s32.totalorder %v13321_v0, %v12741_v16  ;;  %vm2665_vm13 = vcmp.eq.s32.totalorder %v13398_v48, %v12732_v11  ;;  %vm2671_vm8 = vcmp.eq.s32.totalorder %v13398_v48, %v12735_v47  ;;  %v19141_v41 = vmov 0 }
 0x130   : > { %vm9745_vm4 = vmpackc.low %vm1038_vm3, %vm1037_vm2  ;;  %vm2654_vm2 = vcmp.eq.s32.totalorder %v13321_v0, %v12747_v20  ;;  %vm2687_vm9 = vcmp.eq.s32.totalorder %v13408_v33, %v12735_v47  ;;  %v19143_v0 = vmov 0  ;;  %19145 = vst [vmem:[#allocation47_spill] sm:$0xff] %v13532_v12 }
 0x131   : > { %9746 = vmatpush1.bf16.msk.msra.mxu1 %vm9745_vm4, %v19085_v3  ;;  %vm1039_vm10 = vmand %vm526_vm5, %vm783_vm11  ;;  %vm2681_vm4 = vcmp.eq.s32.totalorder %v13408_v33, %v12732_v11 }
 0x132   : > { %5907 = vmatprep.subr.bf16.mxu1 %v19089_v6  ;;  %vm1040_vm3 = vmand %vm527_vm7, %vm784_vm12  ;;  %vm624_vm12 = vcmp.ge.s32.totalorder %v365_v56, %v12019_v5 }
 0x133   : > { %vm9747_vm5 = vmpackc.low %vm1040_vm3, %vm1039_vm10  ;;  %vm881_vm10 = vcmp.lt.s32.totalorder %v365_v56, %v12025_v7  ;;  %v368_v56 = vadd.s32 1144, %v12011_v2 }
 0x134   : > { %vm13512_vm11 = vmpackc.low %vm2648_vm1, %vm2632_vm14  ;;  %vm625_vm1 = vcmp.ge.s32.totalorder %v366_v34, %v12019_v5 }
 0x135   : > { %v19140_v50 = vsel %vm13512_vm11, 4294967295, %v19139_v50  ;;  %vm13520_vm7 = vmpackc.low %vm2654_vm2, %vm2638_vm15  ;;  %9748 = vmatpush1.bf16.msk.msra.mxu1 %vm9747_vm5, %v19085_v3  ;;  %vm882_vm15 = vcmp.lt.s32.totalorder %v366_v34, %v12025_v7  ;;  %vm19146_vm2 = vnez %v19126_v61  ;;  %10164 = vmatmul.mubr.msk.bf16.gmra.mrb[72].mxu0 %vm13456_vm6, %v19085_v3  ;;  %vm785_vm6 = vcmp.lt.s32.totalorder %v13532_v12, %v12025_v7 }
 0x136   : > { %v19142_v41 = vsel %vm13520_vm7, 4294967295, %v19141_v41  ;;  %vm13527_vm14 = vmpackc.low %vm2681_vm4, %vm2665_vm13  ;;  %5909 = vmatprep.subr.bf16.mxu1 %v19089_v6  ;;  %9684 = vmatmul.mubr.msk.bf16.gmra.mrb[72].mxu1 %vm19146_vm2, %v19085_v3  ;;  %vm2664_vm13 = vcmp.eq.s32.totalorder %v13398_v48, %v12741_v16  ;;  %vm528_vm2 = vcmp.ge.s32.totalorder %v13532_v12, %v12019_v5  ;;  %vm786_vm5 = vcmp.lt.s32.totalorder %v13551_v1, %v12025_v7 }
 0x137   : > { %v19144_v0 = vsel %vm13527_vm14, 4294967295, %v19143_v0  ;;  %vm13540_vm3 = vmpackc.low %vm2687_vm9, %vm2671_vm8  ;;  %9686 = vmatprep.mubr.msk.bf16.mxu1 %vm13463_vm0, %v19085_v3  ;;  %vm19152_vm0 = vnez %v19136_v49  ;;  %v13594_v49 = vadd.s32 376, %v12011_v2  ;;  %vm530_vm9 = vcmp.ge.s32.totalorder %v13579_v45, %v12019_v5 }
 0x138   : > { %v19148_v51 = vsel %vm13540_vm3, 4294967295, %v19147_v51  ;;  %vm13565_vm8 = vmand %vm624_vm12, %vm881_vm10  ;;  %10166 = vmatprep.mubr.msk.bf16.mxu0 %vm19152_vm0, %v19085_v3  ;;  %vm529_vm10 = vcmp.ge.s32.totalorder %v13551_v1, %v12019_v5  ;;  %vm787_vm0 = vcmp.lt.s32.totalorder %v13579_v45, %v12025_v7  ;;  %v19156_v34 = vmov 0 }
 0x139   : > { %vm1138_vm12 = vmand %vm625_vm1, %vm882_vm15  ;;  %19154 = vst [vmem:[#allocation50_spill] sm:$0xff] %v13594_v49  ;;  %vm2719_vm1 = vcmp.eq.s32.totalorder %v13468_v42, %v12735_v47  ;;  %vm19158_vm3 = vcmp.eq.s32.totalorder %v13398_v48, %v12747_v20  ;;  %vm19159_vm14 = vcmp.eq.s32.totalorder %v13408_v33, %v12747_v20  ;;  %v13702_v48 = vadd.s32 392, %v12011_v2 }
 0x13a   : > { %vm10229_vm4 = vmpackc.low %vm1138_vm12, %vm13565_vm8  ;;  %vm19155_vm8 = vcmp.eq.s32.totalorder %v13408_v33, %v12741_v16  ;;  %v19167_v33 = vmov 0  ;;  %v371_v61 = vadd.s32 1168, %v12011_v2 }
 0x13b   : > { %10230 = vmatpush1.bf16.msk.msra.mxu0 %vm10229_vm4, %v19085_v3  ;;  %vm1041_vm15 = vmand %vm528_vm2, %vm785_vm6  ;;  %vm531_vm2 = vcmp.ge.s32.totalorder %v13594_v49, %v12019_v5  ;;  %vm788_vm6 = vcmp.lt.s32.totalorder %v13594_v49, %v12025_v7  ;;  %19178 = vst [vmem:[#allocation52_spill] sm:$0xff] %v13702_v48 }
 0x13c   : > { %vm13616_vm12 = vmpackc.low %vm19155_vm8, %vm2664_vm13  ;;  %6778 = vmatprep.subr.bf16.mxu0 %v19089_v6  ;;  %vm19162_vm13 = vcmp.eq.s32.totalorder %v13444_v62, %v12732_v11 }
 0x13d   : > { %v19157_v34 = vsel %vm13616_vm12, 4294967295, %v19156_v34  ;;  %vm1042_vm4 = vmand %vm529_vm10, %vm786_vm5  ;;  %vm19163_vm5 = vcmp.eq.s32.totalorder %v13468_v42, %v12732_v11  ;;  %vm19166_vm12 = vcmp.eq.s32.totalorder %v13444_v62, %v12735_v47 }
 0x13e   : > { %vm13631_vm7 = vmpackc.low %vm19159_vm14, %vm19158_vm3  ;;  %vm626_vm3 = vcmp.ge.s32.totalorder %v367_v44, %v12019_v5 }
 0x13f   : > { %vm13641_vm10 = vmpackc.low %vm19163_vm5, %vm19162_vm13  ;;  %vm883_vm13 = vcmp.lt.s32.totalorder %v367_v44, %v12025_v7  ;;  %v370_v44 = vadd.s32 1160, %v12011_v2 }
 0x140   : > { %vm9749_vm8 = vmpackc.low %vm1042_vm4, %vm1041_vm15  ;;  %vm19171_vm15 = vnez %v19140_v50  ;;  %vm884_vm4 = vcmp.lt.s32.totalorder %v368_v56, %v12025_v7  ;;  %v369_v50 = vadd.s32 1152, %v12011_v2 }
 0x141   : > { %vm13648_vm11 = vmpackc.low %vm2719_vm1, %vm19166_vm12  ;;  %9750 = vmatpush1.bf16.msk.msra.mxu1 %vm9749_vm8, %v19085_v3  ;;  %vm627_vm12 = vcmp.ge.s32.totalorder %v368_v56, %v12019_v5  ;;  %vm19174_vm8 = vnez %v19148_v51  ;;  %v13690_v51 = vadd.s32 384, %v12011_v2  ;;  %v19181_v56 = vmov 0 }
 0x142   : > { %v19168_v33 = vsel %vm13648_vm11, 4294967295, %v19167_v33  ;;  %vm13653_vm14 = vmand %vm530_vm9, %vm787_vm0  ;;  %9688 = vmatmul.mubr.msk.bf16.gmra.mrb[76].mxu1 %vm19171_vm15, %v19085_v3  ;;  %5911 = vmatprep.subr.bf16.mxu1 %v19089_v6  ;;  %vm19172_vm9 = vnez %v19142_v41  ;;  %vm19173_vm0 = vnez %v19144_v0  ;;  %v19176_v0 = vmov 0 }
 0x143   : > { %vm1044_vm1 = vmand %vm531_vm2, %vm788_vm6  ;;  %10168 = vmatmul.mubr.msk.bf16.gmra.mrb[76].mxu0 %vm19172_vm9, %v19085_v3  ;;  %9690 = vmatprep.mubr.msk.bf16.mxu1 %vm19173_vm0, %v19085_v3  ;;  %vm2696_vm2 = vcmp.eq.s32.totalorder %v13444_v62, %v12741_v16  ;;  %vm2712_vm6 = vcmp.eq.s32.totalorder %v13468_v42, %v12741_v16  ;;  %vm2702_vm9 = vcmp.eq.s32.totalorder %v13444_v62, %v12747_v20  ;;  %v19179_v41 = vmov 0 }
 0x144   : > { %vm9751_vm5 = vmpackc.low %vm1044_vm1, %vm13653_vm14  ;;  %10170 = vmatprep.mubr.msk.bf16.mxu0 %vm19174_vm8, %v19085_v3  ;;  %vm2718_vm0 = vcmp.eq.s32.totalorder %v13468_v42, %v12747_v20  ;;  %vm2729_vm1 = vcmp.eq.s32.totalorder %v13532_v12, %v12732_v11  ;;  %vm2745_vm8 = vcmp.eq.s32.totalorder %v13551_v1, %v12732_v11  ;;  %19175 = vst [vmem:[#allocation51_spill] sm:$0xff] %v13690_v51  ;;  %v19184_v42 = vmov 0 }
 0x145   : > { %vm1139_vm15 = vmand %vm626_vm3, %vm883_vm13  ;;  %9752 = vmatpush1.bf16.msk.msra.mxu1 %vm9751_vm5, %v19085_v3  ;;  %vm2735_vm13 = vcmp.eq.s32.totalorder %v13532_v12, %v12735_v47  ;;  %vm532_vm5 = vcmp.ge.s32.totalorder %v13690_v51, %v12019_v5  ;;  %v13940_v62 = vadd.s32 432, %v12011_v2 }
 0x146   : > { %vm1140_vm14 = vmand %vm627_vm12, %vm884_vm4  ;;  %5913 = vmatprep.subr.bf16.mxu1 %v19089_v6  ;;  %vm2751_vm12 = vcmp.eq.s32.totalorder %v13551_v1, %v12735_v47 }
 0x147   : > { %vm10231_vm11 = vmpackc.low %vm1140_vm14, %vm1139_vm15  ;;  %vm790_vm15 = vcmp.lt.s32.totalorder %v13702_v48, %v12025_v7  ;;  %vm2728_vm14 = vcmp.eq.s32.totalorder %v13532_v12, %v12741_v16  ;;  %19222 = vst [vmem:[#allocation56_spill] sm:$0xff] %v13940_v62 }
 0x148   : > { %vm13693_vm3 = vmpackc.low %vm2712_vm6, %vm2696_vm2  ;;  %10232 = vmatpush1.bf16.msk.msra.mxu0 %vm10231_vm11, %v19085_v3  ;;  %vm789_vm2 = vcmp.lt.s32.totalorder %v13690_v51, %v12025_v7  ;;  %vm533_vm6 = vcmp.ge.s32.totalorder %v13702_v48, %v12019_v5 }
 0x149   : > { %v19177_v0 = vsel %vm13693_vm3, 4294967295, %v19176_v0  ;;  %vm13709_vm4 = vmpackc.low %vm2718_vm0, %vm2702_vm9  ;;  %6780 = vmatprep.subr.bf16.mxu0 %v19089_v6  ;;  %vm19183_vm9 = vnez %v19157_v34  ;;  %v19192_v34 = vmov 0 }
 0x14a   : > { %v19180_v41 = vsel %vm13709_vm4, 4294967295, %v19179_v41  ;;  %vm13725_vm11 = vmpackc.low %vm2745_vm8, %vm2729_vm1  ;;  %9692 = vmatmul.mubr.msk.bf16.gmra.mrb[80].mxu1 %vm19183_vm9, %v19085_v3  ;;  %vm628_vm9 = vcmp.ge.s32.totalorder %v369_v50, %v12019_v5  ;;  %vm885_vm1 = vcmp.lt.s32.totalorder %v369_v50, %v12025_v7  ;;  %vm19188_vm8 = vnez %v19168_v33 }
 0x14b   : > { %v19182_v56 = vsel %vm13725_vm11, 4294967295, %v19181_v56  ;;  %vm13736_vm0 = vmpackc.low %vm2751_vm12, %vm2735_vm13  ;;  %10172 = vmatmul.mubr.msk.bf16.gmra.mrb[80].mxu0 %vm13631_vm7, %v19085_v3  ;;  %9694 = vmatprep.mubr.msk.bf16.mxu1 %vm13641_vm10, %v19085_v3  ;;  %v13781_v33 = vadd.s32 408, %v12011_v2  ;;  %vm791_vm7 = vcmp.lt.s32.totalorder %v13766_v58, %v12025_v7  ;;  %vm19195_vm11 = vcmp.eq.s32.totalorder %v13551_v1, %v12747_v20 }
 0x14c   : > { %v19185_v42 = vsel %vm13736_vm0, 4294967295, %v19184_v42  ;;  %vm13754_vm12 = vmand %vm532_vm5, %vm789_vm2  ;;  %10174 = vmatprep.mubr.msk.bf16.mxu0 %vm19188_vm8, %v19085_v3  ;;  %vm629_vm5 = vcmp.ge.s32.totalorder %v370_v44, %v12019_v5  ;;  %vm886_vm2 = vcmp.lt.s32.totalorder %v370_v44, %v12025_v7  ;;  %vm534_vm8 = vcmp.ge.s32.totalorder %v13766_v58, %v12019_v5 }
 0x14d   : > { %vm1046_vm10 = vmand %vm533_vm6, %vm790_vm15  ;;  %19190 = vst [vmem:[#allocation54_spill] sm:$0xff] %v13781_v33  ;;  %vm2783_vm6 = vcmp.eq.s32.totalorder %v13594_v49, %v12735_v47  ;;  %v372_v44 = vadd.s32 1176, %v12011_v2  ;;  %vm19194_vm0 = vcmp.eq.s32.totalorder %v13532_v12, %v12747_v20  ;;  %v19196_v50 = vmov 0 }
 0x14e   : > { %vm9753_vm13 = vmpackc.low %vm1046_vm10, %vm13754_vm12  ;;  %vm19191_vm12 = vcmp.eq.s32.totalorder %v13551_v1, %v12741_v16  ;;  %v13955_v1 = vadd.s32 440, %v12011_v2  ;;  %v14114_v12 = vadd.s32 464, %v12011_v2 }
 0x14f   : > { %9754 = vmatpush1.bf16.msk.msra.mxu1 %vm9753_vm13, %v19085_v3  ;;  %vm1141_vm15 = vmand %vm628_vm9, %vm885_vm1  ;;  %vm535_vm1 = vcmp.ge.s32.totalorder %v13781_v33, %v12019_v5  ;;  %vm792_vm9 = vcmp.lt.s32.totalorder %v13781_v33, %v12025_v7 }
 0x150   : > { %vm13802_vm10 = vmpackc.low %vm19191_vm12, %vm2728_vm14  ;;  %5915 = vmatprep.subr.bf16.mxu1 %v19089_v6  ;;  %vm19198_vm14 = vcmp.eq.s32.totalorder %v13579_v45, %v12732_v11  ;;  %19224 = vst [vmem:[#allocation57_spill] sm:$0xff] %v13955_v1 }
 0x151   : > { %v19193_v34 = vsel %vm13802_vm10, 4294967295, %v19192_v34  ;;  %vm1142_vm13 = vmand %vm629_vm5, %vm886_vm2  ;;  %vm19199_vm5 = vcmp.eq.s32.totalorder %v13594_v49, %v12732_v11  ;;  %vm19202_vm10 = vcmp.eq.s32.totalorder %v13579_v45, %v12735_v47 }
 0x152   : > { %vm13817_vm4 = vmpackc.low %vm19195_vm11, %vm19194_vm0  ;;  %vm630_vm0 = vcmp.ge.s32.totalorder %v371_v61, %v12019_v5 }
 0x153   : > { %v19197_v50 = vsel %vm13817_vm4, 4294967295, %v19196_v50  ;;  %vm13827_vm2 = vmpackc.low %vm19199_vm5, %vm19198_vm14  ;;  %vm887_vm4 = vcmp.lt.s32.totalorder %v371_v61, %v12025_v7  ;;  %vm19205_vm14 = vnez %v19177_v0  ;;  %vm19208_vm5 = vnez %v19185_v42 }
 0x154   : > { %vm10233_vm12 = vmpackc.low %vm1142_vm13, %vm1141_vm15  ;;  %9696 = vmatmul.mubr.msk.bf16.gmra.mrb[84].mxu1 %vm19205_vm14, %v19085_v3  ;;  %vm631_vm13 = vcmp.ge.s32.totalorder %v372_v44, %v12019_v5  ;;  %vm2766_vm14 = vcmp.eq.s32.totalorder %v13579_v45, %v12747_v20  ;;  %v13871_v42 = vadd.s32 416, %v12011_v2  ;;  %v19209_v0 = vmov 0 }
 0x155   : > { %vm13834_vm3 = vmpackc.low %vm2783_vm6, %vm19202_vm10  ;;  %10234 = vmatpush1.bf16.msk.msra.mxu0 %vm10233_vm12, %v19085_v3  ;;  %vm888_vm6 = vcmp.lt.s32.totalorder %v372_v44, %v12025_v7  ;;  %vm19206_vm10 = vnez %v19180_v41  ;;  %v13882_v41 = vadd.s32 424, %v12011_v2  ;;  %v19212_v61 = vmov 0 }
 0x156   : > { %vm1047_vm11 = vmand %vm534_vm8, %vm791_vm7  ;;  %6782 = vmatprep.subr.bf16.mxu0 %v19089_v6  ;;  %10176 = vmatmul.mubr.msk.bf16.gmra.mrb[84].mxu0 %vm19206_vm10, %v19085_v3  ;;  %vm19207_vm7 = vnez %v19182_v56  ;;  %vm2782_vm10 = vcmp.eq.s32.totalorder %v13594_v49, %v12747_v20  ;;  %v373_v56 = vadd.s32 1184, %v12011_v2  ;;  %v374_v44 = vadd.s32 1192, %v12011_v2 }
 0x157   : > { %vm1048_vm15 = vmand %vm535_vm1, %vm792_vm9  ;;  %9698 = vmatprep.mubr.msk.bf16.mxu1 %vm19207_vm7, %v19085_v3  ;;  %10178 = vmatprep.mubr.msk.bf16.mxu0 %vm19208_vm5, %v19085_v3  ;;  %vm2760_vm1 = vcmp.eq.s32.totalorder %v13579_v45, %v12741_v16  ;;  %vm2776_vm9 = vcmp.eq.s32.totalorder %v13594_v49, %v12741_v16  ;;  %vm2809_vm7 = vcmp.eq.s32.totalorder %v13702_v48, %v12732_v11  ;;  %v19214_v49 = vmov 0 }
 0x158   : > { %vm9755_vm8 = vmpackc.low %vm1048_vm15, %vm1047_vm11  ;;  %vm2793_vm15 = vcmp.eq.s32.totalorder %v13690_v51, %v12732_v11  ;;  %19211 = vst [vmem:[#allocation55_spill] sm:$0xff] %v13882_v41  ;;  %vm536_vm5 = vcmp.ge.s32.totalorder %v13871_v42, %v12019_v5  ;;  %v19217_v45 = vmov 0 }
 0x159   : > { %9756 = vmatpush1.bf16.msk.msra.mxu1 %vm9755_vm8, %v19085_v3  ;;  %vm1143_vm12 = vmand %vm630_vm0, %vm887_vm4  ;;  %vm2799_vm0 = vcmp.eq.s32.totalorder %v13690_v51, %v12735_v47 }
 0x15a   : > { %vm1144_vm11 = vmand %vm631_vm13, %vm888_vm6  ;;  %5917 = vmatprep.subr.bf16.mxu1 %v19089_v6  ;;  %vm2815_vm13 = vcmp.eq.s32.totalorder %v13702_v48, %v12735_v47 }
 0x15b   : > { %vm10235_vm8 = vmpackc.low %vm1144_vm11, %vm1143_vm12  ;;  %vm19219_vm12 = vnez %v19197_v50  ;;  %v375_v50 = vadd.s32 1200, %v12011_v2 }
 0x15c   : > { %vm13873_vm4 = vmpackc.low %vm2776_vm9, %vm2760_vm1  ;;  %10236 = vmatpush1.bf16.msk.msra.mxu0 %vm10235_vm8, %v19085_v3  ;;  %vm793_vm1 = vcmp.lt.s32.totalorder %v13871_v42, %v12025_v7 }
 0x15d   : > { %v19210_v0 = vsel %vm13873_vm4, 4294967295, %v19209_v0  ;;  %vm13886_vm6 = vmpackc.low %vm2782_vm10, %vm2766_vm14  ;;  %6784 = vmatprep.subr.bf16.mxu0 %v19089_v6  ;;  %vm794_vm14 = vcmp.lt.s32.totalorder %v13882_v41, %v12025_v7  ;;  %vm19216_vm10 = vnez %v19193_v34  ;;  %v19226_v34 = vmov 0 }
 0x15e   : > { %v19213_v61 = vsel %vm13886_vm6, 4294967295, %v19212_v61  ;;  %vm13899_vm9 = vmpackc.low %vm2809_vm7, %vm2793_vm15  ;;  %9700 = vmatmul.mubr.msk.bf16.gmra.mrb[88].mxu1 %vm19216_vm10, %v19085_v3  ;;  %vm2792_vm15 = vcmp.eq.s32.totalorder %v13690_v51, %v12741_v16  ;;  %10180 = vmatmul.mubr.msk.bf16.gmra.mrb[88].mxu0 %vm19219_vm12, %v19085_v3  ;;  %vm632_vm10 = vcmp.ge.s32.totalorder %v373_v56, %v12019_v5  ;;  %vm889_vm7 = vcmp.lt.s32.totalorder %v373_v56, %v12025_v7 }
 0x15f   : > { %v19215_v49 = vsel %vm13899_vm9, 4294967295, %v19214_v49  ;;  %vm13910_vm11 = vmpackc.low %vm2815_vm13, %vm2799_vm0  ;;  %9702 = vmatprep.mubr.msk.bf16.mxu1 %vm13827_vm2, %v19085_v3  ;;  %10182 = vmatprep.mubr.msk.bf16.mxu0 %vm13834_vm3, %v19085_v3  ;;  %vm19223_vm2 = vcmp.ge.s32.totalorder %v13882_v41, %v12019_v5  ;;  %vm890_vm0 = vcmp.lt.s32.totalorder %v374_v44, %v12025_v7  ;;  %vm538_vm3 = vcmp.ge.s32.totalorder %v13940_v62, %v12019_v5 }
 0x160   : > { %v19218_v45 = vsel %vm13910_vm11, 4294967295, %v19217_v45  ;;  %vm13928_vm13 = vmand %vm536_vm5, %vm793_vm1  ;;  %vm633_vm1 = vcmp.ge.s32.totalorder %v374_v44, %v12019_v5  ;;  %vm795_vm12 = vcmp.lt.s32.totalorder %v13940_v62, %v12025_v7  ;;  %v376_v44 = vadd.s32 1208, %v12011_v2 }
 0x161   : > { %vm1050_vm5 = vmand %vm19223_vm2, %vm794_vm14  ;;  %vm2847_vm14 = vcmp.eq.s32.totalorder %v13781_v33, %v12735_v47  ;;  %vm19228_vm11 = vcmp.eq.s32.totalorder %v13690_v51, %v12747_v20  ;;  %vm19229_vm9 = vcmp.eq.s32.totalorder %v13702_v48, %v12747_v20  ;;  %v19230_v56 = vmov 0 }
 0x162   : > { %vm9757_vm8 = vmpackc.low %vm1050_vm5, %vm13928_vm13  ;;  %vm19225_vm13 = vcmp.eq.s32.totalorder %v13702_v48, %v12741_v16  ;;  %v14129_v48 = vadd.s32 472, %v12011_v2  ;;  %v14283_v51 = vadd.s32 504, %v12011_v2 }
 0x163   : > { %9758 = vmatpush1.bf16.msk.msra.mxu1 %vm9757_vm8, %v19085_v3  ;;  %vm1145_vm2 = vmand %vm632_vm10, %vm889_vm7  ;;  %vm539_vm7 = vcmp.ge.s32.totalorder %v13955_v1, %v12019_v5  ;;  %vm796_vm10 = vcmp.lt.s32.totalorder %v13955_v1, %v12025_v7 }
 0x164   : > { %vm13976_vm5 = vmpackc.low %vm19225_vm13, %vm2792_vm15  ;;  %5919 = vmatprep.subr.bf16.mxu1 %v19089_v6  ;;  %vm19232_vm15 = vcmp.eq.s32.totalorder %v13766_v58, %v12732_v11 }
 0x165   : > { %v19227_v34 = vsel %vm13976_vm5, 4294967295, %v19226_v34  ;;  %vm1146_vm8 = vmand %vm633_vm1, %vm890_vm0  ;;  %vm19233_vm0 = vcmp.eq.s32.totalorder %v13781_v33, %v12732_v11  ;;  %vm19236_vm5 = vcmp.eq.s32.totalorder %v13766_v58, %v12735_v47 }
 0x166   : > { %vm13991_vm6 = vmpackc.low %vm19229_vm9, %vm19228_vm11  ;;  %vm634_vm11 = vcmp.ge.s32.totalorder %v375_v50, %v12019_v5 }
 0x167   : > { %v19231_v56 = vsel %vm13991_vm6, 4294967295, %v19230_v56  ;;  %vm14001_vm1 = vmpackc.low %vm19233_vm0, %vm19232_vm15  ;;  %vm891_vm6 = vcmp.lt.s32.totalorder %v375_v50, %v12025_v7  ;;  %vm19239_vm15 = vnez %v19210_v0  ;;  %vm19242_vm0 = vnez %v19218_v45 }
 0x168   : > { %vm10237_vm13 = vmpackc.low %vm1146_vm8, %vm1145_vm2  ;;  %9704 = vmatmul.mubr.msk.bf16.gmra.mrb[92].mxu1 %vm19239_vm15, %v19085_v3  ;;  %vm635_vm8 = vcmp.ge.s32.totalorder %v376_v44, %v12019_v5  ;;  %vm2830_vm15 = vcmp.eq.s32.totalorder %v13766_v58, %v12747_v20  ;;  %v14045_v45 = vadd.s32 448, %v12011_v2  ;;  %v14056_v0 = vadd.s32 456, %v12011_v2 }
 0x169   : > { %vm14008_vm4 = vmpackc.low %vm2847_vm14, %vm19236_vm5  ;;  %10238 = vmatpush1.bf16.msk.msra.mxu0 %vm10237_vm13, %v19085_v3  ;;  %vm892_vm14 = vcmp.lt.s32.totalorder %v376_v44, %v12025_v7  ;;  %vm19240_vm5 = vnez %v19213_v61  ;;  %v377_v61 = vadd.s32 1216, %v12011_v2  ;;  %v19245_v50 = vmov 0 }
 0x16a   : > { %vm1051_vm9 = vmand %vm538_vm3, %vm795_vm12  ;;  %6786 = vmatprep.subr.bf16.mxu0 %v19089_v6  ;;  %10184 = vmatmul.mubr.msk.bf16.gmra.mrb[92].mxu0 %vm19240_vm5, %v19085_v3  ;;  %vm19241_vm12 = vnez %v19215_v49  ;;  %vm2846_vm5 = vcmp.eq.s32.totalorder %v13781_v33, %v12747_v20  ;;  %v19243_v49 = vmov 0  ;;  %v378_v44 = vadd.s32 1224, %v12011_v2 }
 0x16b   : > { %vm1052_vm2 = vmand %vm539_vm7, %vm796_vm10  ;;  %9706 = vmatprep.mubr.msk.bf16.mxu1 %vm19241_vm12, %v19085_v3  ;;  %10186 = vmatprep.mubr.msk.bf16.mxu0 %vm19242_vm0, %v19085_v3  ;;  %vm2824_vm7 = vcmp.eq.s32.totalorder %v13766_v58, %v12741_v16  ;;  %vm2840_vm10 = vcmp.eq.s32.totalorder %v13781_v33, %v12741_v16  ;;  %vm2873_vm12 = vcmp.eq.s32.totalorder %v13882_v41, %v12732_v11  ;;  %v19247_v33 = vmov 0 }
 0x16c   : > { %vm9759_vm3 = vmpackc.low %vm1052_vm2, %vm1051_vm9  ;;  %vm2857_vm2 = vcmp.eq.s32.totalorder %v13871_v42, %v12732_v11  ;;  %vm540_vm0 = vcmp.ge.s32.totalorder %v14045_v45, %v12019_v5  ;;  %v19250_v58 = vmov 0 }
 0x16d   : > { %9760 = vmatpush1.bf16.msk.msra.mxu1 %vm9759_vm3, %v19085_v3  ;;  %vm1147_vm13 = vmand %vm634_vm11, %vm891_vm6  ;;  %vm2863_vm11 = vcmp.eq.s32.totalorder %v13871_v42, %v12735_v47 }
 0x16e   : > { %vm1148_vm9 = vmand %vm635_vm8, %vm892_vm14  ;;  %5921 = vmatprep.subr.bf16.mxu1 %v19089_v6  ;;  %vm2879_vm8 = vcmp.eq.s32.totalorder %v13882_v41, %v12735_v47 }
 0x16f   : > { %vm10239_vm3 = vmpackc.low %vm1148_vm9, %vm1147_vm13  ;;  %vm19252_vm13 = vnez %v19231_v56  ;;  %v379_v56 = vadd.s32 1232, %v12011_v2 }
 0x170   : > { %vm14047_vm6 = vmpackc.low %vm2840_vm10, %vm2824_vm7  ;;  %10240 = vmatpush1.bf16.msk.msra.mxu0 %vm10239_vm3, %v19085_v3  ;;  %vm797_vm7 = vcmp.lt.s32.totalorder %v14045_v45, %v12025_v7 }
 0x171   : > { %v19244_v49 = vsel %vm14047_vm6, 4294967295, %v19243_v49  ;;  %vm14060_vm14 = vmpackc.low %vm2846_vm5, %vm2830_vm15  ;;  %6788 = vmatprep.subr.bf16.mxu0 %v19089_v6  ;;  %vm798_vm15 = vcmp.lt.s32.totalorder %v14056_v0, %v12025_v7  ;;  %vm19249_vm5 = vnez %v19227_v34  ;;  %v19257_v34 = vmov 0 }
 0x172   : > { %v19246_v50 = vsel %vm14060_vm14, 4294967295, %v19245_v50  ;;  %vm14073_vm10 = vmpackc.low %vm2873_vm12, %vm2857_vm2  ;;  %9708 = vmatmul.mubr.msk.bf16.gmra.mrb[96].mxu1 %vm19249_vm5, %v19085_v3  ;;  %vm2856_vm2 = vcmp.eq.s32.totalorder %v13871_v42, %v12741_v16  ;;  %10188 = vmatmul.mubr.msk.bf16.gmra.mrb[96].mxu0 %vm19252_vm13, %v19085_v3  ;;  %vm636_vm5 = vcmp.ge.s32.totalorder %v377_v61, %v12019_v5  ;;  %vm893_vm12 = vcmp.lt.s32.totalorder %v377_v61, %v12025_v7 }
 0x173   : > { %v19248_v33 = vsel %vm14073_vm10, 4294967295, %v19247_v33  ;;  %vm14084_vm9 = vmpackc.low %vm2879_vm8, %vm2863_vm11  ;;  %9710 = vmatprep.mubr.msk.bf16.mxu1 %vm14001_vm1, %v19085_v3  ;;  %10190 = vmatprep.mubr.msk.bf16.mxu0 %vm14008_vm4, %v19085_v3  ;;  %vm19255_vm1 = vcmp.ge.s32.totalorder %v14056_v0, %v12019_v5  ;;  %vm894_vm11 = vcmp.lt.s32.totalorder %v378_v44, %v12025_v7  ;;  %vm542_vm4 = vcmp.ge.s32.totalorder %v14114_v12, %v12019_v5 }
 0x174   : > { %v19251_v58 = vsel %vm14084_vm9, 4294967295, %v19250_v58  ;;  %vm14102_vm8 = vmand %vm540_vm0, %vm797_vm7  ;;  %vm637_vm7 = vcmp.ge.s32.totalorder %v378_v44, %v12019_v5  ;;  %vm799_vm13 = vcmp.lt.s32.totalorder %v14114_v12, %v12025_v7  ;;  %v380_v44 = vadd.s32 1240, %v12011_v2 }
 0x175   : > { %vm1054_vm0 = vmand %vm19255_vm1, %vm798_vm15  ;;  %vm2911_vm15 = vcmp.eq.s32.totalorder %v13955_v1, %v12735_v47  ;;  %vm19259_vm9 = vcmp.eq.s32.totalorder %v13871_v42, %v12747_v20  ;;  %vm19260_vm10 = vcmp.eq.s32.totalorder %v13882_v41, %v12747_v20  ;;  %v19261_v61 = vmov 0 }
 0x176   : > { %vm9761_vm3 = vmpackc.low %vm1054_vm0, %vm14102_vm8  ;;  %vm19256_vm8 = vcmp.eq.s32.totalorder %v13882_v41, %v12741_v16  ;;  %v384_v41 = vadd.s32 1272, %v12011_v2 }
 0x177   : > { %9762 = vmatpush1.bf16.msk.msra.mxu1 %vm9761_vm3, %v19085_v3  ;;  %vm1149_vm1 = vmand %vm636_vm5, %vm893_vm12  ;;  %vm543_vm12 = vcmp.ge.s32.totalorder %v14129_v48, %v12019_v5  ;;  %vm800_vm5 = vcmp.lt.s32.totalorder %v14129_v48, %v12025_v7 }
 0x178   : > { %vm14150_vm0 = vmpackc.low %vm19256_vm8, %vm2856_vm2  ;;  %5923 = vmatprep.subr.bf16.mxu1 %v19089_v6  ;;  %vm19263_vm2 = vcmp.eq.s32.totalorder %v13940_v62, %v12732_v11 }
 0x179   : > { %v19258_v34 = vsel %vm14150_vm0, 4294967295, %v19257_v34  ;;  %vm1150_vm3 = vmand %vm637_vm7, %vm894_vm11  ;;  %vm19264_vm11 = vcmp.eq.s32.totalorder %v13955_v1, %v12732_v11  ;;  %vm19267_vm0 = vcmp.eq.s32.totalorder %v13940_v62, %v12735_v47 }
 0x17a   : > { %vm14165_vm14 = vmpackc.low %vm19260_vm10, %vm19259_vm9  ;;  %vm638_vm9 = vcmp.ge.s32.totalorder %v379_v56, %v12019_v5 }
 0x17b   : > { %v19262_v61 = vsel %vm14165_vm14, 4294967295, %v19261_v61  ;;  %vm14175_vm7 = vmpackc.low %vm19264_vm11, %vm19263_vm2  ;;  %vm895_vm14 = vcmp.lt.s32.totalorder %v379_v56, %v12025_v7  ;;  %vm19270_vm2 = vnez %v19244_v49  ;;  %vm19273_vm11 = vnez %v19251_v58 }
 0x17c   : > { %vm10241_vm8 = vmpackc.low %vm1150_vm3, %vm1149_vm1  ;;  %9712 = vmatmul.mubr.msk.bf16.gmra.mrb[100].mxu1 %vm19270_vm2, %v19085_v3  ;;  %vm639_vm3 = vcmp.ge.s32.totalorder %v380_v44, %v12019_v5  ;;  %vm2894_vm2 = vcmp.eq.s32.totalorder %v13940_v62, %v12747_v20  ;;  %v14219_v58 = vadd.s32 480, %v12011_v2  ;;  %v14230_v49 = vadd.s32 488, %v12011_v2 }
 0x17d   : > { %vm14182_vm6 = vmpackc.low %vm2911_vm15, %vm19267_vm0  ;;  %10242 = vmatpush1.bf16.msk.msra.mxu0 %vm10241_vm8, %v19085_v3  ;;  %vm896_vm15 = vcmp.lt.s32.totalorder %v380_v44, %v12025_v7  ;;  %vm19271_vm0 = vnez %v19246_v50  ;;  %v381_v50 = vadd.s32 1248, %v12011_v2  ;;  %v382_v44 = vadd.s32 1256, %v12011_v2 }
 0x17e   : > { %vm1055_vm10 = vmand %vm542_vm4, %vm799_vm13  ;;  %6790 = vmatprep.subr.bf16.mxu0 %v19089_v6  ;;  %10192 = vmatmul.mubr.msk.bf16.gmra.mrb[100].mxu0 %vm19271_vm0, %v19085_v3  ;;  %vm19272_vm13 = vnez %v19248_v33  ;;  %vm2910_vm0 = vcmp.eq.s32.totalorder %v13955_v1, %v12747_v20  ;;  %v19291_v56 = vmov 0  ;;  %v19308_v33 = vmov 0 }
 0x17f   : > { %vm1056_vm1 = vmand %vm543_vm12, %vm800_vm5  ;;  %9714 = vmatprep.mubr.msk.bf16.mxu1 %vm19272_vm13, %v19085_v3  ;;  %10194 = vmatprep.mubr.msk.bf16.mxu0 %vm19273_vm11, %v19085_v3  ;;  %vm2888_vm12 = vcmp.eq.s32.totalorder %v13940_v62, %v12741_v16  ;;  %vm2904_vm5 = vcmp.eq.s32.totalorder %v13955_v1, %v12741_v16  ;;  %vm2937_vm13 = vcmp.eq.s32.totalorder %v14056_v0, %v12732_v11  ;;  %v19278_v1 = vmov 0 }
 0x180   : > { %vm9763_vm4 = vmpackc.low %vm1056_vm1, %vm1055_vm10  ;;  %vm2921_vm1 = vcmp.eq.s32.totalorder %v14045_v45, %v12732_v11  ;;  %vm544_vm11 = vcmp.ge.s32.totalorder %v14219_v58, %v12019_v5  ;;  %v19281_v62 = vmov 0 }
 0x181   : > { %9764 = vmatpush1.bf16.msk.msra.mxu1 %vm9763_vm4, %v19085_v3  ;;  %vm1151_vm8 = vmand %vm638_vm9, %vm895_vm14  ;;  %vm2927_vm9 = vcmp.eq.s32.totalorder %v14045_v45, %v12735_v47 }
 0x182   : > { %vm1152_vm10 = vmand %vm639_vm3, %vm896_vm15  ;;  %5925 = vmatprep.subr.bf16.mxu1 %v19089_v6  ;;  %vm2943_vm3 = vcmp.eq.s32.totalorder %v14056_v0, %v12735_v47 }
 0x183   : > { %vm10243_vm4 = vmpackc.low %vm1152_vm10, %vm1151_vm8  ;;  %vm545_vm8 = vcmp.ge.s32.totalorder %v14230_v49, %v12019_v5 }
 0x184   : > { %vm14221_vm14 = vmpackc.low %vm2904_vm5, %vm2888_vm12  ;;  %10244 = vmatpush1.bf16.msk.msra.mxu0 %vm10243_vm4, %v19085_v3  ;;  %vm801_vm12 = vcmp.lt.s32.totalorder %v14219_v58, %v12025_v7 }
 0x185   : > { %vm14234_vm15 = vmpackc.low %vm2910_vm0, %vm2894_vm2  ;;  %6792 = vmatprep.subr.bf16.mxu0 %v19089_v6  ;;  %vm802_vm2 = vcmp.lt.s32.totalorder %v14230_v49, %v12025_v7  ;;  %vm19280_vm0 = vnez %v19258_v34  ;;  %v14278_v34 = vadd.s32 496, %v12011_v2 }
 0x186   : > { %vm14247_vm5 = vmpackc.low %vm2937_vm13, %vm2921_vm1  ;;  %9716 = vmatmul.mubr.msk.bf16.gmra.mrb[104].mxu1 %vm19280_vm0, %v19085_v3  ;;  %vm19283_vm1 = vnez %v19262_v61  ;;  %vm897_vm0 = vcmp.lt.s32.totalorder %v381_v50, %v12025_v7  ;;  %v383_v61 = vadd.s32 1264, %v12011_v2 }
 0x187   : > { %v19279_v1 = vsel %vm14247_vm5, 4294967295, %v19278_v1  ;;  %vm14258_vm10 = vmpackc.low %vm2943_vm3, %vm2927_vm9  ;;  %10196 = vmatmul.mubr.msk.bf16.gmra.mrb[104].mxu0 %vm19283_vm1, %v19085_v3  ;;  %9718 = vmatprep.mubr.msk.bf16.mxu1 %vm14175_vm7, %v19085_v3  ;;  %vm640_vm5 = vcmp.ge.s32.totalorder %v381_v50, %v12019_v5  ;;  %vm2936_vm9 = vcmp.eq.s32.totalorder %v14056_v0, %v12741_v16  ;;  %vm641_vm7 = vcmp.ge.s32.totalorder %v382_v44, %v12019_v5 }
 0x188   : > { %v19282_v62 = vsel %vm14258_vm10, 4294967295, %v19281_v62  ;;  %vm1057_vm4 = vmand %vm544_vm11, %vm801_vm12  ;;  %10198 = vmatprep.mubr.msk.bf16.mxu0 %vm14182_vm6, %v19085_v3  ;;  %vm898_vm1 = vcmp.lt.s32.totalorder %v382_v44, %v12025_v7  ;;  %vm546_vm12 = vcmp.ge.s32.totalorder %v14278_v34, %v12019_v5  ;;  %vm803_vm13 = vcmp.lt.s32.totalorder %v14278_v34, %v12025_v7 }
 0x189   : > { %vm1058_vm3 = vmand %vm545_vm8, %vm802_vm2  ;;  %vm19284_vm8 = vcmp.eq.s32.totalorder %v14045_v45, %v12741_v16  ;;  %vm642_vm10 = vcmp.ge.s32.totalorder %v383_v61, %v12019_v5  ;;  %v391_v44 = vadd.s32 1328, %v12011_v2  ;;  %v291_v50 = vadd.s32 528, %v12011_v2 }
 0x18a   : > { %vm9765_vm11 = vmpackc.low %vm1058_vm3, %vm1057_vm4 }
 0x18b   : > { %9766 = vmatpush1.bf16.msk.msra.mxu1 %vm9765_vm11, %v19085_v3  ;;  %vm1153_vm6 = vmand %vm640_vm5, %vm897_vm0  ;;  %vm547_vm5 = vcmp.ge.s32.totalorder %v14283_v51, %v12019_v5  ;;  %vm804_vm0 = vcmp.lt.s32.totalorder %v14283_v51, %v12025_v7 }
 0x18c   : > { %vm14295_vm2 = vmpackc.low %vm2936_vm9, %vm19284_vm8  ;;  %5927 = vmatprep.subr.bf16.mxu1 %v19089_v6  ;;  %vm899_vm9 = vcmp.lt.s32.totalorder %v383_v61, %v12025_v7  ;;  %vm900_vm8 = vcmp.lt.s32.totalorder %v384_v41, %v12025_v7  ;;  %v392_v61 = vadd.s32 1336, %v12011_v2 }
 0x18d   : > { %vm1154_vm4 = vmand %vm641_vm7, %vm898_vm1  ;;  %vm643_vm1 = vcmp.ge.s32.totalorder %v384_v41, %v12019_v5  ;;  %v294_v41 = vadd.s32 552, %v12011_v2 }
 0x18e   : > { %vm10245_vm3 = vmpackc.low %vm1154_vm4, %vm1153_vm6  ;;  %9720 = vmatmul.mubr.msk.bf16.gmra.mrb[108].mxu1 %vm14221_vm14, %v19085_v3  ;;  %vm2926_vm14 = vcmp.eq.s32.totalorder %v14045_v45, %v12747_v20  ;;  %vm2942_vm4 = vcmp.eq.s32.totalorder %v14056_v0, %v12747_v20 }
 0x18f   : > { %10246 = vmatpush1.bf16.msk.msra.mxu0 %vm10245_vm3, %v19085_v3  ;;  %vm1059_vm11 = vmand %vm546_vm12, %vm803_vm13  ;;  %vm19287_vm13 = vnez %v19279_v1  ;;  %vm19288_vm12 = vnez %v19282_v62  ;;  %v389_v62 = vadd.s32 1312, %v12011_v2  ;;  %v390_v1 = vadd.s32 1320, %v12011_v2 }
 0x190   : > { %6794 = vmatprep.subr.bf16.mxu0 %v19089_v6  ;;  %vm1060_vm7 = vmand %vm547_vm5, %vm804_vm0  ;;  %10200 = vmatmul.mubr.msk.bf16.gmra.mrb[108].mxu0 %vm14234_vm15, %v19085_v3  ;;  %vm2953_vm15 = vcmp.eq.s32.totalorder %v14114_v12, %v12732_v11  ;;  %vm2969_vm0 = vcmp.eq.s32.totalorder %v14129_v48, %v12732_v11 }
 0x191   : > { %9722 = vmatprep.mubr.msk.bf16.mxu1 %vm19287_vm13, %v19085_v3  ;;  %vm9767_vm6 = vmpackc.low %vm1060_vm7, %vm1059_vm11  ;;  %10202 = vmatprep.mubr.msk.bf16.mxu0 %vm19288_vm12, %v19085_v3  ;;  %vm2959_vm11 = vcmp.eq.s32.totalorder %v14114_v12, %v12735_v47  ;;  %vm2975_vm7 = vcmp.eq.s32.totalorder %v14129_v48, %v12735_v47 }
 0x192   : > { %9768 = vmatpush1.bf16.msk.msra.mxu1 %vm9767_vm6, %v19085_v3  ;;  %vm1155_vm5 = vmand %vm642_vm10, %vm899_vm9  ;;  %vm2958_vm6 = vcmp.eq.s32.totalorder %v14114_v12, %v12747_v20 }
 0x193   : > { %vm1156_vm3 = vmand %vm643_vm1, %vm900_vm8  ;;  %6186 = vmatprep.subr.bf16.mxu1 %v19089_v6  ;;  %vm2952_vm1 = vcmp.eq.s32.totalorder %v14114_v12, %v12741_v16  ;;  %vm2968_vm8 = vcmp.eq.s32.totalorder %v14129_v48, %v12741_v16 }
 0x194   : > { %vm10247_vm13 = vmpackc.low %vm1156_vm3, %vm1155_vm5 }
 0x195   : > { %vm10203_vm12 = vmpackc.low %vm2942_vm4, %vm2926_vm14  ;;  %10248 = vmatpush1.bf16.msk.msra.mxu0 %vm10247_vm13, %v19085_v3  ;;  %vm2974_vm14 = vcmp.eq.s32.totalorder %v14129_v48, %v12747_v20  ;;  %vm3001_vm4 = vcmp.eq.s32.totalorder %v14230_v49, %v12732_v11  ;;  %vm2984_vm13 = vcmp.eq.s32.totalorder %v14219_v58, %v12741_v16 }
 0x196   : > { %vm9725_vm10 = vmpackc.low %vm2969_vm0, %vm2953_vm15  ;;  %7053 = vmatprep.subr.bf16.mxu0 %v19089_v6  ;;  %9724 = vmatmul.mubr.msk.bf16.gmra.mrb[112].mxu1 %vm14295_vm2, %v19085_v3  ;;  %vm2985_vm2 = vcmp.eq.s32.totalorder %v14219_v58, %v12732_v11  ;;  %vm2991_vm15 = vcmp.eq.s32.totalorder %v14219_v58, %v12735_v47  ;;  %vm3007_vm0 = vcmp.eq.s32.totalorder %v14230_v49, %v12735_v47 }
 0x197   : > { %vm10205_vm9 = vmpackc.low %vm2975_vm7, %vm2959_vm11  ;;  %9726 = vmatprep.mubr.msk.bf16.mxu1 %vm9725_vm10, %v19085_v3  ;;  %vm2990_vm10 = vcmp.eq.s32.totalorder %v14219_v58, %v12747_v20 }
 0x198   : > { %10204 = vmatmul.mubr.msk.bf16.gmra.mrb[112].mxu0 %vm10203_vm12, %v19085_v3  ;;  %vm9727_vm5 = vmpackc.low %vm2968_vm8, %vm2952_vm1  ;;  %vm3000_vm12 = vcmp.eq.s32.totalorder %v14230_v49, %v12741_v16  ;;  %vm3017_vm1 = vcmp.eq.s32.totalorder %v14278_v34, %v12732_v11  ;;  %vm3033_vm8 = vcmp.eq.s32.totalorder %v14283_v51, %v12732_v11  ;;  %v1931_v11 = vrot.slane %v12421_v39, %v12424_v8 }
 0x199   : > { %10206 = vmatprep.mubr.msk.bf16.mxu0 %vm10205_vm9, %v19085_v3  ;;  %vm10207_vm3 = vmpackc.low %vm2974_vm14, %vm2958_vm6  ;;  %vm3006_vm9 = vcmp.eq.s32.totalorder %v14230_v49, %v12747_v20  ;;  %vm3023_vm14 = vcmp.eq.s32.totalorder %v14278_v34, %v12735_v47 }
 0x19a   : > { %vm9729_vm11 = vmpackc.low %vm3001_vm4, %vm2985_vm2  ;;  %vm3039_vm2 = vcmp.eq.s32.totalorder %v14283_v51, %v12735_v47  ;;  %v14403_v39 = vrot.slane %v1931_v11, %v12424_v8  ;;  %v385_v8 = vadd.s32 1280, %v12011_v2  ;;  %v386_v47 = vadd.s32 1288, %v12011_v2 }
 0x19b   : > { %vm10209_vm7 = vmpackc.low %vm3007_vm0, %vm2991_vm15  ;;  %vm3016_vm0 = vcmp.eq.s32.totalorder %v14278_v34, %v12741_v16  ;;  %v19314_v11 = vmov 0 }
 0x19c   : > { %vm9731_vm6 = vmpackc.low %vm3000_vm12, %vm2984_vm13  ;;  %vm2027_vm13 = vcmp.eq.s32.totalorder %v12011_v2, %v12499_v30  ;;  %vm2043_vm12 = vcmp.eq.s32.totalorder %v12016_v4, %v12499_v30 }
 0x19d   : > { %vm10211_vm4 = vmpackc.low %vm3006_vm9, %vm2990_vm10  ;;  %vm2033_vm9 = vcmp.eq.s32.totalorder %v12011_v2, %v12521_v43 }
 0x19e   : > { %9728 = vmatmul.mubr.msk.bf16.gmra.mrb[116].mxu1 %vm9727_vm5, %v19085_v3  ;;  %vm9733_vm5 = vmpackc.low %vm3033_vm8, %vm3017_vm1  ;;  %vm2049_vm1 = vcmp.eq.s32.totalorder %v12016_v4, %v12521_v43 }
 0x19f   : > { %9730 = vmatprep.mubr.msk.bf16.mxu1 %vm9729_vm11, %v19085_v3  ;;  %vm10213_vm15 = vmpackc.low %vm3039_vm2, %vm3023_vm14  ;;  %vm3022_vm11 = vcmp.eq.s32.totalorder %v14278_v34, %v12747_v20  ;;  %vm2026_vm2 = vcmp.eq.s32.totalorder %v12011_v2, %v12496_v60 }
 0x1a0   : > { %10208 = vmatmul.mubr.msk.bf16.gmra.mrb[116].mxu0 %vm10207_vm3, %v19085_v3  ;;  %vm3032_vm3 = vcmp.eq.s32.totalorder %v14283_v51, %v12741_v16  ;;  %vm10249_vm14 = vmpackc.low %vm2049_vm1, %vm2033_vm9  ;;  %vm2058_vm1 = vcmp.eq.s32.totalorder %v12035_v9, %v12496_v60  ;;  %v387_v16 = vadd.s32 1296, %v12011_v2 }
 0x1a1   : > { %10210 = vmatprep.mubr.msk.bf16.mxu0 %vm10209_vm7, %v19085_v3  ;;  %vm3038_vm7 = vcmp.eq.s32.totalorder %v14283_v51, %v12747_v20  ;;  %vm9735_vm10 = vmpackc.low %vm3032_vm3, %vm3016_vm0  ;;  %vm2059_vm0 = vcmp.eq.s32.totalorder %v12035_v9, %v12499_v30  ;;  %vm2075_vm3 = vcmp.eq.s32.totalorder %v12040_v10, %v12499_v30  ;;  %v388_v20 = vadd.s32 1304, %v12011_v2 }
 0x1a2   : > { %vm10215_vm8 = vmpackc.low %vm3038_vm7, %vm3022_vm11  ;;  %vm2065_vm7 = vcmp.eq.s32.totalorder %v12035_v9, %v12521_v43 }
 0x1a6   : > { %9732 = vmatmul.mubr.msk.bf16.gmra.mrb[120].mxu1 %vm9731_vm6, %v19085_v3  ;;  %vm9769_vm6 = vmpackc.low %vm2043_vm12, %vm2027_vm13  ;;  %vm2081_vm13 = vcmp.eq.s32.totalorder %v12040_v10, %v12521_v43 }
 0x1a7   : > { %9734 = vmatprep.mubr.msk.bf16.mxu1 %vm9733_vm5, %v19085_v3  ;;  %vm2032_vm5 = vcmp.eq.s32.totalorder %v12011_v2, %v14403_v39  ;;  %vm10253_vm9 = vmpackc.low %vm2081_vm13, %vm2065_vm7  ;;  %vm2090_vm13 = vcmp.eq.s32.totalorder %v12057_v14, %v12496_v60 }
 0x1a8   : > { %10212 = vmatmul.mubr.msk.bf16.gmra.mrb[120].mxu0 %vm10211_vm4, %v19085_v3  ;;  %vm2042_vm4 = vcmp.eq.s32.totalorder %v12016_v4, %v12496_v60 }
 0x1a9   : > { %10214 = vmatprep.mubr.msk.bf16.mxu0 %vm10213_vm15, %v19085_v3  ;;  %vm2048_vm15 = vcmp.eq.s32.totalorder %v12016_v4, %v14403_v39  ;;  %vm9771_vm11 = vmpackc.low %vm2042_vm4, %vm2026_vm2  ;;  %vm2091_vm2 = vcmp.eq.s32.totalorder %v12057_v14, %v12499_v30  ;;  %vm2107_vm4 = vcmp.eq.s32.totalorder %v12063_v15, %v12499_v30 }
 0x1aa   : > { %vm10251_vm12 = vmpackc.low %vm2048_vm15, %vm2032_vm5  ;;  %vm2097_vm15 = vcmp.eq.s32.totalorder %v12057_v14, %v12521_v43 }
 0x1ae   : > { %9736 = vmatmul.mubr.msk.bf16.gmra.mrb[124].mxu1 %vm9735_vm10, %v19085_v3  ;;  %vm9773_vm10 = vmpackc.low %vm2075_vm3, %vm2059_vm0  ;;  %vm2113_vm0 = vcmp.eq.s32.totalorder %v12063_v15, %v12521_v43 }
 0x1af   : > { %9770 = vmatprep.mubr.msk.bf16.mxu1 %vm9769_vm6, %v19085_v3  ;;  %vm2064_vm6 = vcmp.eq.s32.totalorder %v12035_v9, %v14403_v39  ;;  %vm10257_vm7 = vmpackc.low %vm2113_vm0, %vm2097_vm15  ;;  %vm2122_vm0 = vcmp.eq.s32.totalorder %v12081_v18, %v12496_v60 }
 0x1b0   : > { %10216 = vmatmul.mubr.msk.bf16.gmra.mrb[124].mxu0 %vm10215_vm8, %v19085_v3  ;;  %vm2074_vm8 = vcmp.eq.s32.totalorder %v12040_v10, %v12496_v60 }
 0x1b1   : > { %10250 = vmatprep.mubr.msk.bf16.mxu0 %vm10249_vm14, %v19085_v3  ;;  %vm2080_vm14 = vcmp.eq.s32.totalorder %v12040_v10, %v14403_v39  ;;  %vm9775_vm5 = vmpackc.low %vm2074_vm8, %vm2058_vm1  ;;  %vm2123_vm1 = vcmp.eq.s32.totalorder %v12081_v18, %v12499_v30  ;;  %vm2139_vm8 = vcmp.eq.s32.totalorder %v12087_v19, %v12499_v30 }
 0x1b2   : > { %vm10255_vm3 = vmpackc.low %vm2080_vm14, %vm2064_vm6  ;;  %vm2129_vm14 = vcmp.eq.s32.totalorder %v12081_v18, %v12521_v43 }
 0x1b6   : > { %9772 = vmatmul.mubr.msk.bf16.vlgmr.msra.gmra.mrb[0].mxu1 %vm9771_vm11, %v19085_v3  ;;  %vm9777_vm11 = vmpackc.low %vm2107_vm4, %vm2091_vm2  ;;  %vm2145_vm2 = vcmp.eq.s32.totalorder %v12087_v19, %v12521_v43 }
 0x1b7   : > { %9774 = vmatprep.mubr.msk.bf16.mxu1 %vm9773_vm10, %v19085_v3  ;;  %vm2096_vm10 = vcmp.eq.s32.totalorder %v12057_v14, %v14403_v39  ;;  %vm10261_vm15 = vmpackc.low %vm2145_vm2, %vm2129_vm14  ;;  %vm2154_vm14 = vcmp.eq.s32.totalorder %v12095_v22, %v12496_v60  ;;  %vm2170_vm2 = vcmp.eq.s32.totalorder %v12098_v23, %v12496_v60 }
 0x1b8   : > { %10252 = vmatmul.mubr.msk.bf16.vlgmr.msra.gmra.mrb[0].mxu0 %vm10251_vm12, %v19085_v3  ;;  %vm2106_vm12 = vcmp.eq.s32.totalorder %v12063_v15, %v12496_v60 }
 0x1b9   : > { %10254 = vmatprep.mubr.msk.bf16.mxu0 %vm10253_vm9, %v19085_v3  ;;  %vm2112_vm9 = vcmp.eq.s32.totalorder %v12063_v15, %v14403_v39  ;;  %vm9779_vm6 = vmpackc.low %vm2106_vm12, %vm2090_vm13  ;;  %vm2155_vm13 = vcmp.eq.s32.totalorder %v12095_v22, %v12499_v30  ;;  %vm2171_vm12 = vcmp.eq.s32.totalorder %v12098_v23, %v12499_v30 }
 0x1ba   : > { %vm10259_vm4 = vmpackc.low %vm2112_vm9, %vm2096_vm10  ;;  %vm2161_vm9 = vcmp.eq.s32.totalorder %v12095_v22, %v12521_v43 }
 0x1be   : > { %9776 = vmatmul.mubr.msk.bf16.gmra.mrb[4].mxu1 %vm9775_vm5, %v19085_v3  ;;  %vm9781_vm5 = vmpackc.low %vm2139_vm8, %vm2123_vm1  ;;  %vm2177_vm1 = vcmp.eq.s32.totalorder %v12098_v23, %v12521_v43 }
 0x1bf   : > { %9778 = vmatprep.mubr.msk.bf16.mxu1 %vm9777_vm11, %v19085_v3  ;;  %vm2128_vm11 = vcmp.eq.s32.totalorder %v12081_v18, %v14403_v39 }
 0x1c0   : > { %10256 = vmatmul.mubr.msk.bf16.gmra.mrb[4].mxu0 %vm10255_vm3, %v19085_v3  ;;  %vm2138_vm3 = vcmp.eq.s32.totalorder %v12087_v19, %v12496_v60 }
 0x1c1   : > { %10258 = vmatprep.mubr.msk.bf16.mxu0 %vm10257_vm7, %v19085_v3  ;;  %vm2144_vm7 = vcmp.eq.s32.totalorder %v12087_v19, %v14403_v39  ;;  %vm9783_vm10 = vmpackc.low %vm2138_vm3, %vm2122_vm0  ;;  %vm2187_vm0 = vcmp.eq.s32.totalorder %v12122_v27, %v12499_v30  ;;  %vm2203_vm3 = vcmp.eq.s32.totalorder %v12130_v28, %v12499_v30 }
 0x1c2   : > { %vm10263_vm8 = vmpackc.low %vm2144_vm7, %vm2128_vm11  ;;  %vm2193_vm7 = vcmp.eq.s32.totalorder %v12122_v27, %v12521_v43 }
 0x1c3   : > { %vm9787_vm11 = vmpackc.low %vm2170_vm2, %vm2154_vm14 }
 0x1c6   : > { %9780 = vmatmul.mubr.msk.bf16.gmra.mrb[8].mxu1 %vm9779_vm6, %v19085_v3  ;;  %vm9785_vm6 = vmpackc.low %vm2171_vm12, %vm2155_vm13  ;;  %vm2209_vm13 = vcmp.eq.s32.totalorder %v12130_v28, %v12521_v43 }
 0x1c7   : > { %9782 = vmatprep.mubr.msk.bf16.mxu1 %vm9781_vm5, %v19085_v3  ;;  %vm2160_vm5 = vcmp.eq.s32.totalorder %v12095_v22, %v14403_v39  ;;  %vm10269_vm2 = vmpackc.low %vm2209_vm13, %vm2193_vm7  ;;  %vm2219_vm7 = vcmp.eq.s32.totalorder %v12194_v35, %v12499_v30  ;;  %vm2235_vm13 = vcmp.eq.s32.totalorder %v12208_v38, %v12499_v30 }
 0x1c8   : > { %10260 = vmatmul.mubr.msk.bf16.gmra.mrb[8].mxu0 %vm10259_vm4, %v19085_v3  ;;  %vm10265_vm4 = vmpackc.low %vm2177_vm1, %vm2161_vm9  ;;  %vm901_vm9 = vcmp.lt.s32.totalorder %v385_v8, %v12025_v7 }
 0x1c9   : > { %10262 = vmatprep.mubr.msk.bf16.mxu0 %vm10261_vm15, %v19085_v3  ;;  %vm2176_vm15 = vcmp.eq.s32.totalorder %v12098_v23, %v14403_v39  ;;  %vm9789_vm1 = vmpackc.low %vm2203_vm3, %vm2187_vm0  ;;  %vm2202_vm0 = vcmp.eq.s32.totalorder %v12130_v28, %v12496_v60  ;;  %vm2192_vm3 = vcmp.eq.s32.totalorder %v12122_v27, %v14403_v39 }
 0x1ca   : > { %vm10267_vm12 = vmpackc.low %vm2176_vm15, %vm2160_vm5  ;;  %vm2186_vm15 = vcmp.eq.s32.totalorder %v12122_v27, %v12496_v60 }
 0x1ce   : > { %9784 = vmatmul.mubr.msk.bf16.gmra.mrb[12].mxu1 %vm9783_vm10, %v19085_v3  ;;  %vm644_vm10 = vcmp.ge.s32.totalorder %v385_v8, %v12019_v5  ;;  %v393_v8 = vadd.s32 1344, %v12011_v2 }
 0x1cf   : > { %9786 = vmatprep.mubr.msk.bf16.mxu1 %vm9785_vm6, %v19085_v3  ;;  %vm902_vm6 = vcmp.lt.s32.totalorder %v386_v47, %v12025_v7  ;;  %vm1157_vm14 = vmand %vm644_vm10, %vm901_vm9  ;;  %vm2225_vm10 = vcmp.eq.s32.totalorder %v12194_v35, %v12521_v43  ;;  %vm2241_vm9 = vcmp.eq.s32.totalorder %v12208_v38, %v12521_v43 }
 0x1d0   : > { %10264 = vmatmul.mubr.msk.bf16.gmra.mrb[12].mxu0 %vm10263_vm8, %v19085_v3  ;;  %vm645_vm8 = vcmp.ge.s32.totalorder %v386_v47, %v12019_v5  ;;  %v296_v47 = vadd.s32 568, %v12011_v2 }
 0x1d1   : > { %10266 = vmatprep.mubr.msk.bf16.mxu0 %vm10265_vm4, %v19085_v3  ;;  %vm1158_vm4 = vmand %vm645_vm8, %vm902_vm6  ;;  %vm646_vm8 = vcmp.ge.s32.totalorder %v387_v16, %v12019_v5  ;;  %vm903_vm6 = vcmp.lt.s32.totalorder %v387_v16, %v12025_v7  ;;  %v394_v16 = vadd.s32 1352, %v12011_v2 }
 0x1d2   : > { %vm10377_vm5 = vmpackc.low %vm1158_vm4, %vm1157_vm14  ;;  %vm647_vm14 = vcmp.ge.s32.totalorder %v388_v20, %v12019_v5  ;;  %vm904_vm4 = vcmp.lt.s32.totalorder %v388_v20, %v12025_v7  ;;  %v19321_v20 = vmov 0 }
 0x1d3   : > { %10378 = vmatpush1.bf16.msk.msra.mxu0 %vm10377_vm5, %v19085_v3  ;;  %vm10273_vm5 = vmpackc.low %vm2241_vm9, %vm2225_vm10  ;;  %vm2251_vm10 = vcmp.eq.s32.totalorder %v12268_v55, %v12499_v30  ;;  %vm2267_vm9 = vcmp.eq.s32.totalorder %v12288_v59, %v12499_v30 }
 0x1d4   : > { %7055 = vmatprep.subr.bf16.mxu0 %v19089_v6 }
 0x1d6   : > { %9788 = vmatmul.mubr.msk.bf16.gmra.mrb[16].mxu1 %vm9787_vm11, %v19085_v3  ;;  %vm2208_vm11 = vcmp.eq.s32.totalorder %v12130_v28, %v14403_v39 }
 0x1d7   : > { %9790 = vmatprep.mubr.msk.bf16.mxu1 %vm9789_vm1, %v19085_v3  ;;  %vm10271_vm1 = vmpackc.low %vm2208_vm11, %vm2192_vm3  ;;  %vm2234_vm3 = vcmp.eq.s32.totalorder %v12208_v38, %v12496_v60 }
 0x1d8   : > { %10268 = vmatmul.mubr.msk.bf16.gmra.mrb[16].mxu0 %vm10267_vm12, %v19085_v3  ;;  %vm9791_vm12 = vmpackc.low %vm2202_vm0, %vm2186_vm15  ;;  %vm2218_vm0 = vcmp.eq.s32.totalorder %v12194_v35, %v12496_v60 }
 0x1d9   : > { %10270 = vmatprep.mubr.msk.bf16.mxu0 %vm10269_vm2, %v19085_v3  ;;  %vm9793_vm2 = vmpackc.low %vm2235_vm13, %vm2219_vm7  ;;  %vm2224_vm7 = vcmp.eq.s32.totalorder %v12194_v35, %v14403_v39  ;;  %vm2240_vm13 = vcmp.eq.s32.totalorder %v12208_v38, %v14403_v39 }
 0x1da   : > { %vm1159_vm15 = vmand %vm646_vm8, %vm903_vm6  ;;  %vm2257_vm8 = vcmp.eq.s32.totalorder %v12268_v55, %v12521_v43  ;;  %vm2273_vm6 = vcmp.eq.s32.totalorder %v12288_v59, %v12521_v43 }
 0x1db   : > { %vm1160_vm11 = vmand %vm647_vm14, %vm904_vm4  ;;  %vm2250_vm4 = vcmp.eq.s32.totalorder %v12268_v55, %v12496_v60 }
 0x1dc   : > { %vm9797_vm14 = vmpackc.low %vm2267_vm9, %vm2251_vm10  ;;  %vm906_vm10 = vcmp.lt.s32.totalorder %v390_v1, %v12025_v7 }
 0x1de   : > { %9792 = vmatmul.mubr.msk.bf16.gmra.mrb[20].mxu1 %vm9791_vm12, %v19085_v3  ;;  %vm10379_vm12 = vmpackc.low %vm1160_vm11, %vm1159_vm15  ;;  %vm648_vm11 = vcmp.ge.s32.totalorder %v389_v62, %v12019_v5 }
 0x1df   : > { %9794 = vmatprep.mubr.msk.bf16.mxu1 %vm9793_vm2, %v19085_v3  ;;  %10380 = vmatpush1.bf16.msk.msra.mxu0 %vm10379_vm12, %v19085_v3  ;;  %vm10275_vm2 = vmpackc.low %vm2240_vm13, %vm2224_vm7  ;;  %vm905_vm7 = vcmp.lt.s32.totalorder %v389_v62, %v12025_v7  ;;  %vm649_vm12 = vcmp.ge.s32.totalorder %v390_v1, %v12019_v5  ;;  %v395_v1 = vadd.s32 1360, %v12011_v2  ;;  %v397_v62 = vadd.s32 1376, %v12011_v2 }
 0x1e0   : > { %10272 = vmatmul.mubr.msk.bf16.gmra.mrb[20].mxu0 %vm10271_vm1, %v19085_v3  ;;  %vm9795_vm1 = vmpackc.low %vm2234_vm3, %vm2218_vm0  ;;  %7057 = vmatprep.subr.bf16.mxu0 %v19089_v6  ;;  %vm2256_vm0 = vcmp.eq.s32.totalorder %v12268_v55, %v14403_v39  ;;  %vm2272_vm3 = vcmp.eq.s32.totalorder %v12288_v59, %v14403_v39 }
 0x1e1   : > { %10274 = vmatprep.mubr.msk.bf16.mxu0 %vm10273_vm5, %v19085_v3  ;;  %vm2266_vm5 = vcmp.eq.s32.totalorder %v12288_v59, %v12496_v60  ;;  %vm10277_vm15 = vmpackc.low %vm2273_vm6, %vm2257_vm8  ;;  %vm2299_vm8 = vcmp.eq.s32.totalorder %v12411_v57, %v12499_v30 }
 0x1e2   : > { %vm14576_vm13 = vmpackc.low %vm2266_vm5, %vm2250_vm4 }
 0x1e3   : > { %vm14583_vm9 = vmpackc.low %vm2272_vm3, %vm2256_vm0  ;;  %vm2282_vm3 = vcmp.eq.s32.totalorder %v12305_v63, %v12496_v60 }
 0x1e4   : > { %v19292_v56 = vsel %vm14583_vm9, 4294967295, %v19291_v56  ;;  %vm1161_vm6 = vmand %vm648_vm11, %vm905_vm7  ;;  %vm2298_vm9 = vcmp.eq.s32.totalorder %v12411_v57, %v12496_v60  ;;  %vm2288_vm11 = vcmp.eq.s32.totalorder %v12305_v63, %v14403_v39  ;;  %vm2304_vm7 = vcmp.eq.s32.totalorder %v12411_v57, %v14403_v39 }
 0x1e5   : > { %vm1162_vm4 = vmand %vm649_vm12, %vm906_vm10  ;;  %vm19293_vm12 = vnez %v19292_v56  ;;  %vm2315_vm10 = vcmp.eq.s32.totalorder %v12511_v31, %v12499_v30  ;;  %v19326_v56 = vmov 0 }
 0x1e6   : > { %9796 = vmatmul.mubr.msk.bf16.gmra.mrb[24].mxu1 %vm9795_vm1, %v19085_v3  ;;  %vm2283_vm1 = vcmp.eq.s32.totalorder %v12305_v63, %v12499_v30  ;;  %vm10381_vm5 = vmpackc.low %vm1162_vm4, %vm1161_vm6  ;;  %vm2337_vm6 = vcmp.eq.s32.totalorder %v12530_v46, %v12521_v43  ;;  %vm907_vm4 = vcmp.lt.s32.totalorder %v391_v44, %v12025_v7 }
 0x1e7   : > { %9798 = vmatprep.mubr.msk.bf16.mxu1 %vm9797_vm14, %v19085_v3  ;;  %vm2305_vm14 = vcmp.eq.s32.totalorder %v12411_v57, %v12521_v43  ;;  %10382 = vmatpush1.bf16.msk.msra.mxu0 %vm10381_vm5, %v19085_v3 }
 0x1e8   : > { %10276 = vmatmul.mubr.msk.bf16.gmra.mrb[24].mxu0 %vm10275_vm2, %v19085_v3  ;;  %vm2289_vm2 = vcmp.eq.s32.totalorder %v12305_v63, %v12521_v43  ;;  %7059 = vmatprep.subr.bf16.mxu0 %v19089_v6 }
 0x1e9   : > { %10278 = vmatprep.mubr.msk.bf16.mxu0 %vm10277_vm15, %v19085_v3  ;;  %vm9801_vm15 = vmpackc.low %vm2299_vm8, %vm2283_vm1  ;;  %vm2321_vm8 = vcmp.eq.s32.totalorder %v12511_v31, %v12521_v43 }
 0x1ea   : > { %vm10281_vm0 = vmpackc.low %vm2305_vm14, %vm2289_vm2  ;;  %vm650_vm14 = vcmp.ge.s32.totalorder %v391_v44, %v12019_v5  ;;  %v289_v44 = vadd.s32 512, %v12011_v2 }
 0x1eb   : > { %vm9803_vm1 = vmpackc.low %vm2298_vm9, %vm2282_vm3 }
 0x1ec   : > { %vm14623_vm2 = vmpackc.low %vm2304_vm7, %vm2288_vm11  ;;  %vm2314_vm11 = vcmp.eq.s32.totalorder %v12511_v31, %v12496_v60  ;;  %vm2330_vm7 = vcmp.eq.s32.totalorder %v12530_v46, %v12496_v60 }
 0x1ed   : > { %vm10285_vm9 = vmpackc.low %vm2337_vm6, %vm2321_vm8  ;;  %vm2347_vm6 = vcmp.eq.s32.totalorder %v12572_v52, %v12499_v30 }
 0x1ee   : > { %9800 = vmatmul.mubr.msk.bf16.gmra.mrb[28].mxu1 %vm14576_vm13, %v19085_v3  ;;  %vm2331_vm13 = vcmp.eq.s32.totalorder %v12530_v46, %v12499_v30  ;;  %vm14631_vm3 = vmand %vm650_vm14, %vm907_vm4  ;;  %vm2353_vm4 = vcmp.eq.s32.totalorder %v12572_v52, %v12521_v43 }
 0x1ef   : > { %9802 = vmatprep.mubr.msk.bf16.mxu1 %vm9801_vm15, %v19085_v3  ;;  %vm9805_vm5 = vmpackc.low %vm2331_vm13, %vm2315_vm10  ;;  %vm651_vm15 = vcmp.ge.s32.totalorder %v392_v61, %v12019_v5  ;;  %vm2320_vm10 = vcmp.eq.s32.totalorder %v12511_v31, %v14403_v39  ;;  %vm2336_vm13 = vcmp.eq.s32.totalorder %v12530_v46, %v14403_v39 }
 0x1f0   : > { %10280 = vmatmul.mubr.msk.bf16.gmra.mrb[28].mxu0 %vm19293_vm12, %v19085_v3  ;;  %vm14655_vm14 = vmpackc.low %vm2330_vm7, %vm2314_vm11  ;;  %vm2368_vm11 = vcmp.eq.s32.totalorder %v12578_v53, %v14403_v39 }
 0x1f1   : > { %10282 = vmatprep.mubr.msk.bf16.mxu0 %vm10281_vm0, %v19085_v3  ;;  %vm908_vm0 = vcmp.lt.s32.totalorder %v392_v61, %v12025_v7  ;;  %v290_v61 = vadd.s32 520, %v12011_v2 }
 0x1f2   : > { %vm1164_vm12 = vmand %vm651_vm15, %vm908_vm0  ;;  %vm2346_vm15 = vcmp.eq.s32.totalorder %v12572_v52, %v12496_v60  ;;  %vm2362_vm0 = vcmp.eq.s32.totalorder %v12578_v53, %v12496_v60 }
 0x1f3   : > { %vm10383_vm8 = vmpackc.low %vm1164_vm12, %vm14631_vm3  ;;  %vm2352_vm3 = vcmp.eq.s32.totalorder %v12572_v52, %v14403_v39  ;;  %vm2379_vm12 = vcmp.eq.s32.totalorder %v12598_v32, %v12499_v30 }
 0x1f4   : > { %10384 = vmatpush1.bf16.msk.msra.mxu0 %vm10383_vm8, %v19085_v3  ;;  %vm652_vm8 = vcmp.ge.s32.totalorder %v393_v8, %v12019_v5 }
 0x1f5   : > { %7061 = vmatprep.subr.bf16.mxu0 %v19089_v6 }
 0x1f6   : > { %9804 = vmatmul.mubr.msk.bf16.gmra.mrb[32].mxu1 %vm9803_vm1, %v19085_v3  ;;  %vm2363_vm1 = vcmp.eq.s32.totalorder %v12578_v53, %v12499_v30 }
 0x1f7   : > { %9806 = vmatprep.mubr.msk.bf16.mxu1 %vm9805_vm5, %v19085_v3  ;;  %vm14665_vm5 = vmpackc.low %vm2336_vm13, %vm2320_vm10  ;;  %vm2395_vm10 = vcmp.eq.s32.totalorder %v12604_v13, %v12499_v30 }
 0x1f8   : > { %10284 = vmatmul.mubr.msk.bf16.gmra.mrb[32].mxu0 %vm14623_vm2, %v19085_v3  ;;  %vm2369_vm2 = vcmp.eq.s32.totalorder %v12578_v53, %v12521_v43  ;;  %vm14687_vm13 = vmpackc.low %vm2362_vm0, %vm2346_vm15  ;;  %vm2385_vm0 = vcmp.eq.s32.totalorder %v12598_v32, %v12521_v43 }
 0x1f9   : > { %10286 = vmatprep.mubr.msk.bf16.mxu0 %vm10285_vm9, %v19085_v3  ;;  %vm9809_vm9 = vmpackc.low %vm2363_vm1, %vm2347_vm6  ;;  %vm909_vm6 = vcmp.lt.s32.totalorder %v393_v8, %v12025_v7  ;;  %v292_v8 = vadd.s32 536, %v12011_v2 }
 0x1fa   : > { %vm14679_vm7 = vmpackc.low %vm2369_vm2, %vm2353_vm4  ;;  %vm653_vm4 = vcmp.ge.s32.totalorder %v394_v16, %v12019_v5  ;;  %vm910_vm2 = vcmp.lt.s32.totalorder %v394_v16, %v12025_v7  ;;  %v303_v16 = vadd.s32 624, %v12011_v2 }
 0x1fb   : > { %vm14693_vm1 = vmpackc.low %vm2368_vm11, %vm2352_vm3  ;;  %vm2401_vm3 = vcmp.eq.s32.totalorder %v12604_v13, %v12521_v43 }
 0x1fc   : > { %vm14702_vm15 = vmpackc.low %vm2395_vm10, %vm2379_vm12  ;;  %vm2400_vm10 = vcmp.eq.s32.totalorder %v12604_v13, %v14403_v39 }
 0x1fd   : > { %v19309_v33 = vsel %vm14702_vm15, 4294967295, %v19308_v33  ;;  %vm14714_vm11 = vmand %vm652_vm8, %vm909_vm6  ;;  %vm2411_vm8 = vcmp.eq.s32.totalorder %v12626_v25, %v12499_v30 }
 0x1fe   : > { %9808 = vmatmul.mubr.msk.bf16.gmra.mrb[36].mxu1 %vm14655_vm14, %v19085_v3  ;;  %vm2378_vm14 = vcmp.eq.s32.totalorder %v12598_v32, %v12496_v60  ;;  %vm14737_vm15 = vmpackc.low %vm2401_vm3, %vm2385_vm0  ;;  %vm805_vm0 = vcmp.lt.s32.totalorder %v289_v44, %v12025_v7  ;;  %vm19316_vm3 = vcmp.eq.s32.totalorder %v12598_v32, %v14403_v39 }
 0x1ff   : > { %9810 = vmatprep.mubr.msk.bf16.mxu1 %vm9809_vm9, %v19085_v3  ;;  %vm1166_vm9 = vmand %vm653_vm4, %vm910_vm2  ;;  %vm2417_vm4 = vcmp.eq.s32.totalorder %v12626_v25, %v12521_v43  ;;  %vm2433_vm2 = vcmp.eq.s32.totalorder %v12632_v26, %v12521_v43 }
 0x200   : > { %10288 = vmatmul.mubr.msk.bf16.gmra.mrb[36].mxu0 %vm14665_vm5, %v19085_v3  ;;  %vm2394_vm5 = vcmp.eq.s32.totalorder %v12604_v13, %v12496_v60  ;;  %vm10385_vm6 = vmpackc.low %vm1166_vm9, %vm14714_vm11  ;;  %vm548_vm11 = vcmp.ge.s32.totalorder %v289_v44, %v12019_v5  ;;  %v293_v44 = vadd.s32 544, %v12011_v2 }
 0x201   : > { %10290 = vmatprep.mubr.msk.bf16.mxu0 %vm14679_vm7, %v19085_v3  ;;  %vm2427_vm7 = vcmp.eq.s32.totalorder %v12632_v26, %v12499_v30  ;;  %10386 = vmatpush1.bf16.msk.msra.mxu0 %vm10385_vm6, %v19085_v3  ;;  %vm14747_vm12 = vmpackc.low %vm2394_vm5, %vm2378_vm14  ;;  %vm549_vm14 = vcmp.ge.s32.totalorder %v290_v61, %v12019_v5  ;;  %vm806_vm5 = vcmp.lt.s32.totalorder %v290_v61, %v12025_v7  ;;  %v19328_v61 = vmov 0 }
 0x202   : > { %v19315_v11 = vsel %vm14747_vm12, 4294967295, %v19314_v11  ;;  %7063 = vmatprep.subr.bf16.mxu0 %v19089_v6  ;;  %vm14758_vm9 = vmpackc.low %vm2400_vm10, %vm19316_vm3  ;;  %vm550_vm3 = vcmp.ge.s32.totalorder %v291_v50, %v12019_v5 }
 0x203   : > { %vm14762_vm6 = vmpackc.low %vm2427_vm7, %vm2411_vm8  ;;  %vm807_vm8 = vcmp.lt.s32.totalorder %v291_v50, %v12025_v7  ;;  %vm19323_vm7 = vnez %v19309_v33  ;;  %v396_v33 = vadd.s32 1368, %v12011_v2  ;;  %v19331_v50 = vmov 0 }
 0x204   : > { %vm14768_vm12 = vmpackc.low %vm2433_vm2, %vm2417_vm4  ;;  %vm551_vm2 = vcmp.ge.s32.totalorder %v292_v8, %v12019_v5 }
 0x205   : > { %v19322_v20 = vsel %vm14768_vm12, 4294967295, %v19321_v20  ;;  %vm1061_vm10 = vmand %vm548_vm11, %vm805_vm0  ;;  %vm808_vm12 = vcmp.lt.s32.totalorder %v292_v8, %v12025_v7  ;;  %vm2410_vm11 = vcmp.eq.s32.totalorder %v12626_v25, %v12496_v60  ;;  %v295_v8 = vadd.s32 560, %v12011_v2 }
 0x206   : > { %9812 = vmatmul.mubr.msk.bf16.gmra.mrb[40].mxu1 %vm14687_vm13, %v19085_v3  ;;  %vm1062_vm4 = vmand %vm549_vm14, %vm806_vm5  ;;  %vm2416_vm14 = vcmp.eq.s32.totalorder %v12626_v25, %v14403_v39 }
 0x207   : > { %9814 = vmatprep.mubr.msk.bf16.mxu1 %vm19323_vm7, %v19085_v3  ;;  %vm9897_vm13 = vmpackc.low %vm1062_vm4, %vm1061_vm10  ;;  %vm2443_vm10 = vcmp.eq.s32.totalorder %v12653_v40, %v12499_v30  ;;  %vm2449_vm4 = vcmp.eq.s32.totalorder %v12653_v40, %v12521_v43 }
 0x208   : > { %10292 = vmatmul.mubr.msk.bf16.gmra.mrb[40].mxu0 %vm14693_vm1, %v19085_v3  ;;  %vm2426_vm1 = vcmp.eq.s32.totalorder %v12632_v26, %v12496_v60  ;;  %9898 = vmatpush1.bf16.msk.msra.mxu1 %vm9897_vm13, %v19085_v3  ;;  %vm14793_vm0 = vmand %vm550_vm3, %vm807_vm8  ;;  %vm2459_vm3 = vcmp.eq.s32.totalorder %v12660_v54, %v12499_v30  ;;  %vm654_vm13 = vcmp.ge.s32.totalorder %v395_v1, %v12019_v5 }
 0x209   : > { %10294 = vmatprep.mubr.msk.bf16.mxu0 %vm14737_vm15, %v19085_v3  ;;  %vm2432_vm15 = vcmp.eq.s32.totalorder %v12632_v26, %v14403_v39  ;;  %6188 = vmatprep.subr.bf16.mxu1 %v19089_v6  ;;  %vm1064_vm5 = vmand %vm551_vm2, %vm808_vm12  ;;  %vm2465_vm12 = vcmp.eq.s32.totalorder %v12660_v54, %v12521_v43 }
 0x20a   : > { %vm9899_vm8 = vmpackc.low %vm1064_vm5, %vm14793_vm0 }
 0x20b   : > { %vm14810_vm7 = vmpackc.low %vm2426_vm1, %vm2410_vm11  ;;  %vm911_vm11 = vcmp.lt.s32.totalorder %v395_v1, %v12025_v7  ;;  %vm19330_vm1 = vnez %v19315_v11  ;;  %v19333_v11 = vmov 0  ;;  %v19385_v1 = vld [vmem:[#allocation38_spill] sm:$0xff] }
 0x20c   : > { %v19327_v56 = vsel %vm14810_vm7, 4294967295, %v19326_v56  ;;  %vm14819_vm2 = vmpackc.low %vm2432_vm15, %vm2416_vm14  ;;  %9900 = vmatpush1.bf16.msk.msra.mxu1 %vm9899_vm8, %v19085_v3  ;;  %vm655_vm14 = vcmp.ge.s32.totalorder %v396_v33, %v12019_v5  ;;  %vm912_vm15 = vcmp.lt.s32.totalorder %v396_v33, %v12025_v7  ;;  %vm552_vm8 = vcmp.ge.s32.totalorder %v293_v44, %v12019_v5 }
 0x20d   : > { %v19329_v61 = vsel %vm14819_vm2, 4294967295, %v19328_v61  ;;  %vm14830_vm0 = vmpackc.low %vm2459_vm3, %vm2443_vm10  ;;  %6190 = vmatprep.subr.bf16.mxu1 %v19089_v6  ;;  %vm2442_vm10 = vcmp.eq.s32.totalorder %v12653_v40, %v12496_v60  ;;  %vm19335_vm3 = vnez %v19322_v20  ;;  %vm554_vm7 = vcmp.ge.s32.totalorder %v295_v8, %v12019_v5 }
 0x20e   : > { %9816 = vmatmul.mubr.msk.bf16.gmra.mrb[44].mxu1 %vm19330_vm1, %v19085_v3  ;;  %v19332_v50 = vsel %vm14830_vm0, 4294967295, %v19331_v50  ;;  %vm14846_vm5 = vmpackc.low %vm2465_vm12, %vm2449_vm4  ;;  %vm809_vm4 = vcmp.lt.s32.totalorder %v293_v44, %v12025_v7  ;;  %vm2448_vm12 = vcmp.eq.s32.totalorder %v12653_v40, %v14403_v39  ;;  %vm2464_vm1 = vcmp.eq.s32.totalorder %v12660_v54, %v14403_v39 }
 0x20f   : > { %9818 = vmatprep.mubr.msk.bf16.mxu1 %vm14762_vm6, %v19085_v3  ;;  %v19334_v11 = vsel %vm14846_vm5, 4294967295, %v19333_v11  ;;  %vm1167_vm6 = vmand %vm654_vm13, %vm911_vm11  ;;  %vm553_vm5 = vcmp.ge.s32.totalorder %v294_v41, %v12019_v5  ;;  %vm810_vm0 = vcmp.lt.s32.totalorder %v294_v41, %v12025_v7  ;;  %v297_v44 = vadd.s32 576, %v12011_v2 }
 0x210   : > { %10296 = vmatmul.mubr.msk.bf16.gmra.mrb[44].mxu0 %vm14758_vm9, %v19085_v3  ;;  %vm2458_vm9 = vcmp.eq.s32.totalorder %v12660_v54, %v12496_v60  ;;  %vm14876_vm2 = vmand %vm552_vm8, %vm809_vm4  ;;  %vm2491_vm8 = vcmp.eq.s32.totalorder %v12686_v29, %v12499_v30  ;;  %v19352_v41 = vmov 0  ;;  %v19360_v20 = vmov 0 }
 0x211   : > { %10298 = vmatprep.mubr.msk.bf16.mxu0 %vm19335_vm3, %v19085_v3  ;;  %vm1168_vm3 = vmand %vm655_vm14, %vm912_vm15  ;;  %vm811_vm14 = vcmp.lt.s32.totalorder %v295_v8, %v12025_v7  ;;  %v300_v8 = vadd.s32 600, %v12011_v2  ;;  %v399_v33 = vadd.s32 1392, %v12011_v2 }
 0x212   : > { %vm10387_vm13 = vmpackc.low %vm1168_vm3, %vm1167_vm6  ;;  %vm2475_vm6 = vcmp.eq.s32.totalorder %v12679_v17, %v12499_v30 }
 0x213   : > { %vm14871_vm11 = vmpackc.low %vm2458_vm9, %vm2442_vm10  ;;  %10388 = vmatpush1.bf16.msk.msra.mxu0 %vm10387_vm13, %v19085_v3  ;;  %vm555_vm10 = vcmp.ge.s32.totalorder %v296_v47, %v12019_v5  ;;  %vm812_vm9 = vcmp.lt.s32.totalorder %v296_v47, %v12025_v7  ;;  %vm2481_vm13 = vcmp.eq.s32.totalorder %v12679_v17, %v12521_v43  ;;  %v19358_v47 = vmov 0 }
 0x214   : > { %vm14882_vm15 = vmpackc.low %vm2464_vm1, %vm2448_vm12  ;;  %7065 = vmatprep.subr.bf16.mxu0 %v19089_v6  ;;  %vm19347_vm12 = vnez %v19329_v61  ;;  %vm19348_vm1 = vnez %v19332_v50  ;;  %v298_v61 = vadd.s32 584, %v12011_v2  ;;  %v299_v50 = vadd.s32 592, %v12011_v2 }
 0x215   : > { %vm14886_vm3 = vmand %vm553_vm5, %vm810_vm0  ;;  %vm19344_vm5 = vnez %v19327_v56  ;;  %v19372_v56 = vmov 0 }
 0x216   : > { %vm9901_vm0 = vmpackc.low %vm14886_vm3, %vm14876_vm2  ;;  %9820 = vmatmul.mubr.msk.bf16.gmra.mrb[48].mxu1 %vm19344_vm5, %v19085_v3  ;;  %vm2490_vm5 = vcmp.eq.s32.totalorder %v12686_v29, %v12496_v60  ;;  %vm19354_vm2 = vcmp.eq.s32.totalorder %v12686_v29, %v12521_v43 }
 0x217   : > { %vm14904_vm4 = vmand %vm554_vm7, %vm811_vm14  ;;  %9822 = vmatprep.mubr.msk.bf16.mxu1 %vm19348_vm1, %v19085_v3  ;;  %vm2480_vm7 = vcmp.eq.s32.totalorder %v12679_v17, %v14403_v39  ;;  %9902 = vmatpush1.bf16.msk.msra.mxu1 %vm9901_vm0, %v19085_v3  ;;  %vm2529_vm0 = vcmp.eq.s32.totalorder %v12710_v37, %v12521_v43 }
 0x218   : > { %10300 = vmatmul.mubr.msk.bf16.gmra.mrb[48].mxu0 %vm19347_vm12, %v19085_v3  ;;  %vm14921_vm14 = vmand %vm555_vm10, %vm812_vm9  ;;  %vm19351_vm12 = vnez %v19334_v11  ;;  %vm2496_vm10 = vcmp.eq.s32.totalorder %v12686_v29, %v14403_v39  ;;  %6192 = vmatprep.subr.bf16.mxu1 %v19089_v6  ;;  %v19355_v11 = vmov 0  ;;  %vm813_vm9 = vcmp.lt.s32.totalorder %v297_v44, %v12025_v7 }
 0x219   : > { %10302 = vmatprep.mubr.msk.bf16.mxu0 %vm19351_vm12, %v19085_v3  ;;  %vm14929_vm1 = vmpackc.low %vm2491_vm8, %vm2475_vm6  ;;  %vm2523_vm6 = vcmp.eq.s32.totalorder %v12710_v37, %v12499_v30  ;;  %vm556_vm8 = vcmp.ge.s32.totalorder %v297_v44, %v12019_v5  ;;  %v398_v44 = vadd.s32 1384, %v12011_v2 }
 0x21a   : > { %v19353_v41 = vsel %vm14929_vm1, 4294967295, %v19352_v41  ;;  %vm9903_vm12 = vmpackc.low %vm14921_vm14, %vm14904_vm4  ;;  %vm19357_vm4 = vcmp.eq.s32.totalorder %v12679_v17, %v12496_v60 }
 0x21b   : > { %vm14963_vm3 = vmpackc.low %vm19354_vm2, %vm2481_vm13  ;;  %vm557_vm13 = vcmp.ge.s32.totalorder %v298_v61, %v12019_v5  ;;  %vm814_vm2 = vcmp.lt.s32.totalorder %v298_v61, %v12025_v7  ;;  %9904 = vmatpush1.bf16.msk.msra.mxu1 %vm9903_vm12, %v19085_v3  ;;  %vm559_vm12 = vcmp.ge.s32.totalorder %v300_v8, %v12019_v5  ;;  %v301_v61 = vadd.s32 608, %v12011_v2 }
 0x21c   : > { %v19356_v11 = vsel %vm14963_vm3, 4294967295, %v19355_v11  ;;  %vm14978_vm14 = vmpackc.low %vm2490_vm5, %vm19357_vm4  ;;  %vm19362_vm5 = vcmp.eq.s32.totalorder %v12704_v36, %v12499_v30  ;;  %6194 = vmatprep.subr.bf16.mxu1 %v19089_v6 }
 0x21d   : > { %v19359_v47 = vsel %vm14978_vm14, 4294967295, %v19358_v47  ;;  %vm14990_vm3 = vmpackc.low %vm2496_vm10, %vm2480_vm7  ;;  %vm19365_vm14 = vcmp.eq.s32.totalorder %v12704_v36, %v12521_v43  ;;  %vm558_vm10 = vcmp.ge.s32.totalorder %v299_v50, %v12019_v5 }
 0x21e   : > { %v19361_v20 = vsel %vm14990_vm3, 4294967295, %v19360_v20  ;;  %vm14997_vm4 = vmpackc.low %vm2523_vm6, %vm19362_vm5  ;;  %vm815_vm3 = vcmp.lt.s32.totalorder %v299_v50, %v12025_v7  ;;  %9824 = vmatmul.mubr.msk.bf16.gmra.mrb[52].mxu1 %vm14871_vm11, %v19085_v3  ;;  %vm816_vm5 = vcmp.lt.s32.totalorder %v300_v8, %v12025_v7  ;;  %vm2506_vm11 = vcmp.eq.s32.totalorder %v12704_v36, %v12496_v60 }
 0x21f   : > { %vm15005_vm1 = vmpackc.low %vm2529_vm0, %vm19365_vm14  ;;  %vm19369_vm0 = vnez %v19356_v11  ;;  %vm2522_vm14 = vcmp.eq.s32.totalorder %v12710_v37, %v12496_v60  ;;  %v302_v50 = vadd.s32 616, %v12011_v2  ;;  %v19376_v11 = vmov 0 }
 0x220   : > { %vm1069_vm7 = vmand %vm556_vm8, %vm813_vm9  ;;  %10304 = vmatmul.mubr.msk.bf16.gmra.mrb[52].mxu0 %vm14882_vm15, %v19085_v3  ;;  %vm19368_vm9 = vnez %v19353_v41  ;;  %vm2512_vm15 = vcmp.eq.s32.totalorder %v12704_v36, %v14403_v39  ;;  %v19374_v41 = vmov 0  ;;  %v19379_v8 = vmov 0 }
 0x221   : > { %vm1070_vm6 = vmand %vm557_vm13, %vm814_vm2  ;;  %9826 = vmatprep.mubr.msk.bf16.mxu1 %vm19368_vm9, %v19085_v3  ;;  %10306 = vmatprep.mubr.msk.bf16.mxu0 %vm19369_vm0, %v19085_v3  ;;  %vm2528_vm2 = vcmp.eq.s32.totalorder %v12710_v37, %v14403_v39  ;;  %vm656_vm0 = vcmp.ge.s32.totalorder %v397_v62, %v12019_v5 }
 0x222   : > { %vm9905_vm8 = vmpackc.low %vm1070_vm6, %vm1069_vm7  ;;  %vm2539_vm6 = vcmp.eq.s32.totalorder %v13136_v21, %v12499_v30 }
 0x223   : > { %9906 = vmatpush1.bf16.msk.msra.mxu1 %vm9905_vm8, %v19085_v3  ;;  %vm15031_vm13 = vmand %vm558_vm10, %vm815_vm3  ;;  %vm2555_vm3 = vcmp.eq.s32.totalorder %v13139_v24, %v12499_v30  ;;  %vm2545_vm8 = vcmp.eq.s32.totalorder %v13136_v21, %v12521_v43 }
 0x224   : > { %6196 = vmatprep.subr.bf16.mxu1 %v19089_v6  ;;  %vm1072_vm7 = vmand %vm559_vm12, %vm816_vm5  ;;  %vm2561_vm12 = vcmp.eq.s32.totalorder %v13139_v24, %v12521_v43 }
 0x225   : > { %vm9907_vm10 = vmpackc.low %vm1072_vm7, %vm15031_vm13  ;;  %vm657_vm13 = vcmp.ge.s32.totalorder %v398_v44, %v12019_v5 }
 0x226   : > { %vm15048_vm9 = vmpackc.low %vm2522_vm14, %vm2506_vm11  ;;  %vm913_vm11 = vcmp.lt.s32.totalorder %v397_v62, %v12025_v7  ;;  %v304_v62 = vadd.s32 632, %v12011_v2 }
 0x227   : > { %v19373_v56 = vsel %vm15048_vm9, 4294967295, %v19372_v56  ;;  %vm15057_vm5 = vmpackc.low %vm2528_vm2, %vm2512_vm15  ;;  %9908 = vmatpush1.bf16.msk.msra.mxu1 %vm9907_vm10, %v19085_v3  ;;  %vm914_vm15 = vcmp.lt.s32.totalorder %v398_v44, %v12025_v7  ;;  %vm19378_vm2 = vnez %v19359_v47  ;;  %vm818_vm10 = vcmp.lt.s32.totalorder %v302_v50, %v12025_v7 }
 0x228   : > { %v19375_v41 = vsel %vm15057_vm5, 4294967295, %v19374_v41  ;;  %vm15065_vm14 = vmpackc.low %vm2555_vm3, %vm2539_vm6  ;;  %6198 = vmatprep.subr.bf16.mxu1 %v19089_v6  ;;  %9828 = vmatmul.mubr.msk.bf16.gmra.mrb[56].mxu1 %vm19378_vm2, %v19085_v3  ;;  %vm19381_vm3 = vnez %v19361_v20  ;;  %vm817_vm2 = vcmp.lt.s32.totalorder %v301_v61, %v12025_v7  ;;  %v19384_v20 = vld [vmem:[#allocation37_spill] sm:$0xff]  ;;  %vm819_vm6 = vcmp.lt.s32.totalorder %v303_v16, %v12025_v7 }
 0x229   : > { %v19377_v11 = vsel %vm15065_vm14, 4294967295, %v19376_v11  ;;  %vm15075_vm7 = vmpackc.low %vm2561_vm12, %vm2545_vm8  ;;  %10308 = vmatmul.mubr.msk.bf16.gmra.mrb[56].mxu0 %vm19381_vm3, %v19085_v3  ;;  %9830 = vmatprep.mubr.msk.bf16.mxu1 %vm14997_vm4, %v19085_v3  ;;  %vm560_vm12 = vcmp.ge.s32.totalorder %v301_v61, %v12019_v5  ;;  %v400_v44 = vadd.s32 1400, %v12011_v2  ;;  %vm19391_vm14 = vcmp.eq.s32.totalorder %v13139_v24, %v14403_v39  ;;  %v19421_v61 = vld [vmem:[#allocation41_spill] sm:$0xff] }
 0x22a   : > { %v19380_v8 = vsel %vm15075_vm7, 4294967295, %v19379_v8  ;;  %vm15090_vm8 = vmand %vm656_vm0, %vm913_vm11  ;;  %10310 = vmatprep.mubr.msk.bf16.mxu0 %vm15005_vm1, %v19085_v3  ;;  %vm561_vm11 = vcmp.ge.s32.totalorder %v302_v50, %v12019_v5  ;;  %vm562_vm1 = vcmp.ge.s32.totalorder %v303_v16, %v12019_v5  ;;  %v19388_v50 = vmov 0  ;;  %v19422_v16 = vld [vmem:[#allocation42_spill] sm:$0xff] }
 0x22b   : > { %vm1170_vm0 = vmand %vm657_vm13, %vm914_vm15  ;;  %vm2593_vm13 = vcmp.eq.s32.totalorder %v19385_v1, %v12521_v43  ;;  %vm19390_vm7 = vcmp.eq.s32.totalorder %v13136_v21, %v14403_v39  ;;  %v19399_v47 = vmov 0 }
 0x22c   : > { %vm10389_vm3 = vmpackc.low %vm1170_vm0, %vm15090_vm8  ;;  %vm19386_vm8 = vcmp.eq.s32.totalorder %v13136_v21, %v12496_v60  ;;  %vm19387_vm0 = vcmp.eq.s32.totalorder %v13139_v24, %v12496_v60  ;;  %v19416_v24 = vmov 0  ;;  %v308_v21 = vadd.s32 664, %v12011_v2 }
 0x22d   : > { %10390 = vmatpush1.bf16.msk.msra.mxu0 %vm10389_vm3, %v19085_v3  ;;  %vm1073_vm15 = vmand %vm560_vm12, %vm817_vm2  ;;  %vm563_vm12 = vcmp.ge.s32.totalorder %v304_v62, %v12019_v5  ;;  %vm820_vm2 = vcmp.lt.s32.totalorder %v304_v62, %v12025_v7  ;;  %v19411_v62 = vmov 0 }
 0x22e   : > { %vm15135_vm4 = vmpackc.low %vm19387_vm0, %vm19386_vm8  ;;  %7067 = vmatprep.subr.bf16.mxu0 %v19089_v6  ;;  %vm19394_vm8 = vcmp.eq.s32.totalorder %v19384_v20, %v12499_v30 }
 0x22f   : > { %v19389_v50 = vsel %vm15135_vm4, 4294967295, %v19388_v50  ;;  %vm1074_vm3 = vmand %vm561_vm11, %vm818_vm10  ;;  %vm19395_vm10 = vcmp.eq.s32.totalorder %v19385_v1, %v12499_v30  ;;  %vm19398_vm4 = vcmp.eq.s32.totalorder %v19384_v20, %v12521_v43 }
 0x230   : > { %vm15148_vm5 = vmpackc.low %vm19391_vm14, %vm19390_vm7  ;;  %vm658_vm7 = vcmp.ge.s32.totalorder %v399_v33, %v12019_v5 }
 0x231   : > { %vm15158_vm11 = vmpackc.low %vm19395_vm10, %vm19394_vm8  ;;  %vm915_vm8 = vcmp.lt.s32.totalorder %v399_v33, %v12025_v7  ;;  %v19409_v33 = vmov 0 }
 0x232   : > { %vm9909_vm0 = vmpackc.low %vm1074_vm3, %vm1073_vm15  ;;  %vm19403_vm15 = vnez %v19373_v56  ;;  %vm916_vm3 = vcmp.lt.s32.totalorder %v400_v44, %v12025_v7  ;;  %v305_v56 = vadd.s32 640, %v12011_v2 }
 0x233   : > { %vm15165_vm9 = vmpackc.low %vm2593_vm13, %vm19398_vm4  ;;  %9910 = vmatpush1.bf16.msk.msra.mxu1 %vm9909_vm0, %v19085_v3  ;;  %vm659_vm13 = vcmp.ge.s32.totalorder %v400_v44, %v12019_v5  ;;  %vm19406_vm0 = vnez %v19380_v8  ;;  %v19408_v8 = vld [vmem:[#allocation40_spill] sm:$0xff]  ;;  %v401_v44 = vadd.s32 1408, %v12011_v2 }
 0x234   : > { %v19400_v47 = vsel %vm15165_vm9, 4294967295, %v19399_v47  ;;  %vm15170_vm14 = vmand %vm562_vm1, %vm819_vm6  ;;  %9832 = vmatmul.mubr.msk.bf16.gmra.mrb[60].mxu1 %vm19403_vm15, %v19085_v3  ;;  %6200 = vmatprep.subr.bf16.mxu1 %v19089_v6  ;;  %vm19404_vm6 = vnez %v19375_v41  ;;  %vm19405_vm1 = vnez %v19377_v11  ;;  %v306_v41 = vadd.s32 648, %v12011_v2  ;;  %v19407_v11 = vld [vmem:[#allocation39_spill] sm:$0xff] }
 0x235   : > { %vm1076_vm4 = vmand %vm563_vm12, %vm820_vm2  ;;  %10312 = vmatmul.mubr.msk.bf16.gmra.mrb[60].mxu0 %vm19404_vm6, %v19085_v3  ;;  %9834 = vmatprep.mubr.msk.bf16.mxu1 %vm19405_vm1, %v19085_v3  ;;  %vm2570_vm12 = vcmp.eq.s32.totalorder %v19384_v20, %v12496_v60  ;;  %vm2586_vm2 = vcmp.eq.s32.totalorder %v19385_v1, %v12496_v60  ;;  %vm2576_vm6 = vcmp.eq.s32.totalorder %v19384_v20, %v14403_v39  ;;  %v19413_v20 = vmov 0 }
 0x236   : > { %vm9911_vm10 = vmpackc.low %vm1076_vm4, %vm15170_vm14  ;;  %10314 = vmatprep.mubr.msk.bf16.mxu0 %vm19406_vm0, %v19085_v3  ;;  %vm2592_vm1 = vcmp.eq.s32.totalorder %v19385_v1, %v14403_v39  ;;  %vm2603_vm4 = vcmp.eq.s32.totalorder %v19407_v11, %v12499_v30  ;;  %vm2619_vm0 = vcmp.eq.s32.totalorder %v19408_v8, %v12499_v30  ;;  %vm2609_vm9 = vcmp.eq.s32.totalorder %v19407_v11, %v12521_v43 }
 0x237   : > { %vm1171_vm15 = vmand %vm658_vm7, %vm915_vm8  ;;  %9912 = vmatpush1.bf16.msk.msra.mxu1 %vm9911_vm10, %v19085_v3  ;;  %vm564_vm10 = vcmp.ge.s32.totalorder %v305_v56, %v12019_v5  ;;  %v402_v1 = vadd.s32 1416, %v12011_v2 }
 0x238   : > { %vm1172_vm14 = vmand %vm659_vm13, %vm916_vm3  ;;  %6202 = vmatprep.subr.bf16.mxu1 %v19089_v6  ;;  %vm2625_vm13 = vcmp.eq.s32.totalorder %v19408_v8, %v12521_v43 }
 0x239   : > { %vm10391_vm7 = vmpackc.low %vm1172_vm14, %vm1171_vm15  ;;  %vm565_vm15 = vcmp.ge.s32.totalorder %v306_v41, %v12019_v5  ;;  %vm822_vm14 = vcmp.lt.s32.totalorder %v306_v41, %v12025_v7  ;;  %v19425_v41 = vmov 0 }
 0x23a   : > { %vm15209_vm8 = vmpackc.low %vm2586_vm2, %vm2570_vm12  ;;  %10392 = vmatpush1.bf16.msk.msra.mxu0 %vm10391_vm7, %v19085_v3  ;;  %vm821_vm12 = vcmp.lt.s32.totalorder %v305_v56, %v12025_v7  ;;  %v307_v56 = vadd.s32 656, %v12011_v2 }
 0x23b   : > { %v19410_v33 = vsel %vm15209_vm8, 4294967295, %v19409_v33  ;;  %vm15219_vm3 = vmpackc.low %vm2592_vm1, %vm2576_vm6  ;;  %7069 = vmatprep.subr.bf16.mxu0 %v19089_v6  ;;  %vm19415_vm6 = vnez %v19389_v50  ;;  %v19444_v50 = vmov 0 }
 0x23c   : > { %v19412_v62 = vsel %vm15219_vm3, 4294967295, %v19411_v62  ;;  %vm15227_vm2 = vmpackc.low %vm2619_vm0, %vm2603_vm4  ;;  %9836 = vmatmul.mubr.msk.bf16.gmra.mrb[64].mxu1 %vm19415_vm6, %v19085_v3  ;;  %vm660_vm0 = vcmp.ge.s32.totalorder %v401_v44, %v12019_v5  ;;  %vm918_vm4 = vcmp.lt.s32.totalorder %v402_v1, %v12025_v7  ;;  %vm823_vm7 = vcmp.lt.s32.totalorder %v307_v56, %v12025_v7 }
 0x23d   : > { %v19414_v20 = vsel %vm15227_vm2, 4294967295, %v19413_v20  ;;  %vm15236_vm1 = vmpackc.low %vm2625_vm13, %vm2609_vm9  ;;  %10316 = vmatmul.mubr.msk.bf16.gmra.mrb[64].mxu0 %vm15148_vm5, %v19085_v3  ;;  %9838 = vmatprep.mubr.msk.bf16.mxu1 %vm15158_vm11, %v19085_v3  ;;  %vm917_vm13 = vcmp.lt.s32.totalorder %v401_v44, %v12025_v7  ;;  %vm19420_vm5 = vnez %v19400_v47  ;;  %v403_v47 = vadd.s32 1424, %v12011_v2 }
 0x23e   : > { %v19417_v24 = vsel %vm15236_vm1, 4294967295, %v19416_v24  ;;  %vm15251_vm9 = vmand %vm564_vm10, %vm821_vm12  ;;  %10318 = vmatprep.mubr.msk.bf16.mxu0 %vm19420_vm5, %v19085_v3  ;;  %vm661_vm12 = vcmp.ge.s32.totalorder %v402_v1, %v12019_v5  ;;  %vm566_vm5 = vcmp.ge.s32.totalorder %v307_v56, %v12019_v5  ;;  %v404_v1 = vadd.s32 1432, %v12011_v2  ;;  %v19457_v56 = vld [vmem:[#allocation46_spill] sm:$0xff] }
 0x23f   : > { %vm1078_vm10 = vmand %vm565_vm15, %vm822_vm14  ;;  %vm2657_vm15 = vcmp.eq.s32.totalorder %v19422_v16, %v12521_v43  ;;  %vm19427_vm1 = vcmp.eq.s32.totalorder %v19407_v11, %v14403_v39  ;;  %vm19428_vm2 = vcmp.eq.s32.totalorder %v19408_v8, %v14403_v39  ;;  %v19429_v44 = vmov 0 }
 0x240   : > { %vm9913_vm6 = vmpackc.low %vm1078_vm10, %vm15251_vm9  ;;  %vm19423_vm9 = vcmp.eq.s32.totalorder %v19407_v11, %v12496_v60  ;;  %vm19424_vm10 = vcmp.eq.s32.totalorder %v19408_v8, %v12496_v60  ;;  %v19451_v8 = vmov 0  ;;  %v312_v11 = vadd.s32 696, %v12011_v2 }
 0x241   : > { %9914 = vmatpush1.bf16.msk.msra.mxu1 %vm9913_vm6, %v19085_v3  ;;  %vm1173_vm14 = vmand %vm660_vm0, %vm917_vm13  ;;  %vm567_vm0 = vcmp.ge.s32.totalorder %v308_v21, %v12019_v5  ;;  %vm824_vm13 = vcmp.lt.s32.totalorder %v308_v21, %v12025_v7  ;;  %v407_v21 = vadd.s32 1456, %v12011_v2 }
 0x242   : > { %vm15296_vm11 = vmpackc.low %vm19424_vm10, %vm19423_vm9  ;;  %6204 = vmatprep.subr.bf16.mxu1 %v19089_v6  ;;  %vm19431_vm9 = vcmp.eq.s32.totalorder %v19421_v61, %v12499_v30 }
 0x243   : > { %v19426_v41 = vsel %vm15296_vm11, 4294967295, %v19425_v41  ;;  %vm1174_vm6 = vmand %vm661_vm12, %vm918_vm4  ;;  %vm19432_vm4 = vcmp.eq.s32.totalorder %v19422_v16, %v12499_v30  ;;  %vm19435_vm11 = vcmp.eq.s32.totalorder %v19421_v61, %v12521_v43 }
 0x244   : > { %vm15309_vm3 = vmpackc.low %vm19428_vm2, %vm19427_vm1  ;;  %vm662_vm1 = vcmp.ge.s32.totalorder %v403_v47, %v12019_v5 }
 0x245   : > { %v19430_v44 = vsel %vm15309_vm3, 4294967295, %v19429_v44  ;;  %vm15319_vm12 = vmpackc.low %vm19432_vm4, %vm19431_vm9  ;;  %vm919_vm3 = vcmp.lt.s32.totalorder %v403_v47, %v12025_v7  ;;  %vm19438_vm9 = vnez %v19410_v33  ;;  %vm19441_vm4 = vnez %v19417_v24 }
 0x246   : > { %vm10393_vm10 = vmpackc.low %vm1174_vm6, %vm1173_vm14  ;;  %9840 = vmatmul.mubr.msk.bf16.gmra.mrb[68].mxu1 %vm19438_vm9, %v19085_v3  ;;  %vm663_vm6 = vcmp.ge.s32.totalorder %v404_v1, %v12019_v5  ;;  %v309_v33 = vadd.s32 672, %v12011_v2  ;;  %vm2640_vm9 = vcmp.eq.s32.totalorder %v19421_v61, %v14403_v39  ;;  %v310_v24 = vadd.s32 680, %v12011_v2 }
 0x247   : > { %vm15326_vm8 = vmpackc.low %vm2657_vm15, %vm19435_vm11  ;;  %10394 = vmatpush1.bf16.msk.msra.mxu0 %vm10393_vm10, %v19085_v3  ;;  %vm920_vm11 = vcmp.lt.s32.totalorder %v404_v1, %v12025_v7  ;;  %vm19439_vm15 = vnez %v19412_v62  ;;  %v19443_v62 = vld [vmem:[#allocation44_spill] sm:$0xff]  ;;  %v405_v47 = vadd.s32 1440, %v12011_v2  ;;  %v19446_v1 = vmov 0 }
 0x248   : > { %vm1079_vm2 = vmand %vm566_vm5, %vm823_vm7  ;;  %7071 = vmatprep.subr.bf16.mxu0 %v19089_v6  ;;  %10320 = vmatmul.mubr.msk.bf16.gmra.mrb[68].mxu0 %vm19439_vm15, %v19085_v3  ;;  %vm19440_vm7 = vnez %v19414_v20  ;;  %v19442_v20 = vld [vmem:[#allocation43_spill] sm:$0xff] }
 0x249   : > { %vm1080_vm14 = vmand %vm567_vm0, %vm824_vm13  ;;  %9842 = vmatprep.mubr.msk.bf16.mxu1 %vm19440_vm7, %v19085_v3  ;;  %10322 = vmatprep.mubr.msk.bf16.mxu0 %vm19441_vm4, %v19085_v3  ;;  %vm2634_vm0 = vcmp.eq.s32.totalorder %v19421_v61, %v12496_v60  ;;  %vm2650_vm13 = vcmp.eq.s32.totalorder %v19422_v16, %v12496_v60  ;;  %vm2667_vm15 = vcmp.eq.s32.totalorder %v19442_v20, %v12499_v30  ;;  %v19448_v61 = vmov 0 }
 0x24a   : > { %vm9915_vm5 = vmpackc.low %vm1080_vm14, %vm1079_vm2  ;;  %vm2656_vm2 = vcmp.eq.s32.totalorder %v19422_v16, %v14403_v39  ;;  %vm2683_vm7 = vcmp.eq.s32.totalorder %v19443_v62, %v12499_v30  ;;  %vm568_vm4 = vcmp.ge.s32.totalorder %v309_v33, %v12019_v5  ;;  %v406_v16 = vadd.s32 1448, %v12011_v2 }
 0x24b   : > { %9916 = vmatpush1.bf16.msk.msra.mxu1 %vm9915_vm5, %v19085_v3  ;;  %vm1175_vm10 = vmand %vm662_vm1, %vm919_vm3  ;;  %vm2673_vm5 = vcmp.eq.s32.totalorder %v19442_v20, %v12521_v43 }
 0x24c   : > { %vm1176_vm14 = vmand %vm663_vm6, %vm920_vm11  ;;  %6206 = vmatprep.subr.bf16.mxu1 %v19089_v6  ;;  %vm2689_vm6 = vcmp.eq.s32.totalorder %v19443_v62, %v12521_v43 }
 0x24d   : > { %vm10395_vm3 = vmpackc.low %vm1176_vm14, %vm1175_vm10  ;;  %vm569_vm10 = vcmp.ge.s32.totalorder %v310_v24, %v12019_v5  ;;  %vm826_vm14 = vcmp.lt.s32.totalorder %v310_v24, %v12025_v7  ;;  %v19460_v24 = vmov 0 }
 0x24e   : > { %vm15364_vm1 = vmpackc.low %vm2650_vm13, %vm2634_vm0  ;;  %10396 = vmatpush1.bf16.msk.msra.mxu0 %vm10395_vm3, %v19085_v3  ;;  %vm825_vm0 = vcmp.lt.s32.totalorder %v309_v33, %v12025_v7  ;;  %v311_v33 = vadd.s32 688, %v12011_v2 }
 0x24f   : > { %v19445_v50 = vsel %vm15364_vm1, 4294967295, %v19444_v50  ;;  %vm15374_vm11 = vmpackc.low %vm2656_vm2, %vm2640_vm9  ;;  %7073 = vmatprep.subr.bf16.mxu0 %v19089_v6  ;;  %vm19450_vm9 = vnez %v19426_v41  ;;  %v19479_v41 = vmov 0 }
 0x250   : > { %v19447_v1 = vsel %vm15374_vm11, 4294967295, %v19446_v1  ;;  %vm15382_vm13 = vmpackc.low %vm2683_vm7, %vm2667_vm15  ;;  %9844 = vmatmul.mubr.msk.bf16.gmra.mrb[72].mxu1 %vm19450_vm9, %v19085_v3  ;;  %vm19453_vm15 = vnez %v19430_v44  ;;  %vm921_vm9 = vcmp.lt.s32.totalorder %v405_v47, %v12025_v7  ;;  %vm922_vm7 = vcmp.lt.s32.totalorder %v406_v16, %v12025_v7  ;;  %v19456_v44 = vld [vmem:[#allocation45_spill] sm:$0xff] }
 0x251   : > { %v19449_v61 = vsel %vm15382_vm13, 4294967295, %v19448_v61  ;;  %vm15391_vm2 = vmpackc.low %vm2689_vm6, %vm2673_vm5  ;;  %10324 = vmatmul.mubr.msk.bf16.gmra.mrb[72].mxu0 %vm19453_vm15, %v19085_v3  ;;  %9846 = vmatprep.mubr.msk.bf16.mxu1 %vm15319_vm12, %v19085_v3  ;;  %vm664_vm6 = vcmp.ge.s32.totalorder %v405_v47, %v12019_v5  ;;  %vm827_vm3 = vcmp.lt.s32.totalorder %v311_v33, %v12025_v7  ;;  %vm19463_vm13 = vcmp.eq.s32.totalorder %v19443_v62, %v14403_v39 }
 0x252   : > { %v19452_v8 = vsel %vm15391_vm2, 4294967295, %v19451_v8  ;;  %vm15406_vm5 = vmand %vm568_vm4, %vm825_vm0  ;;  %10326 = vmatprep.mubr.msk.bf16.mxu0 %vm15326_vm8, %v19085_v3  ;;  %vm665_vm0 = vcmp.ge.s32.totalorder %v406_v16, %v12019_v5  ;;  %vm570_vm8 = vcmp.ge.s32.totalorder %v311_v33, %v12019_v5  ;;  %v408_v16 = vadd.s32 1464, %v12011_v2  ;;  %v19492_v33 = vld [vmem:[#allocation50_spill] sm:$0xff] }
 0x253   : > { %vm1082_vm4 = vmand %vm569_vm10, %vm826_vm14  ;;  %vm2721_vm10 = vcmp.eq.s32.totalorder %v19457_v56, %v12521_v43  ;;  %vm19462_vm2 = vcmp.eq.s32.totalorder %v19442_v20, %v14403_v39  ;;  %v19464_v47 = vmov 0 }
 0x254   : > { %vm9917_vm15 = vmpackc.low %vm1082_vm4, %vm15406_vm5  ;;  %vm19458_vm5 = vcmp.eq.s32.totalorder %v19442_v20, %v12496_v60  ;;  %vm19459_vm4 = vcmp.eq.s32.totalorder %v19443_v62, %v12496_v60  ;;  %v19486_v62 = vmov 0  ;;  %v316_v20 = vadd.s32 728, %v12011_v2 }
 0x255   : > { %9918 = vmatpush1.bf16.msk.msra.mxu1 %vm9917_vm15, %v19085_v3  ;;  %vm1177_vm14 = vmand %vm664_vm6, %vm921_vm9  ;;  %vm571_vm6 = vcmp.ge.s32.totalorder %v312_v11, %v12019_v5  ;;  %vm828_vm9 = vcmp.lt.s32.totalorder %v312_v11, %v12025_v7  ;;  %v411_v11 = vadd.s32 1488, %v12011_v2 }
 0x256   : > { %vm15451_vm12 = vmpackc.low %vm19459_vm4, %vm19458_vm5  ;;  %6208 = vmatprep.subr.bf16.mxu1 %v19089_v6  ;;  %vm19466_vm5 = vcmp.eq.s32.totalorder %v19456_v44, %v12499_v30 }
 0x257   : > { %v19461_v24 = vsel %vm15451_vm12, 4294967295, %v19460_v24  ;;  %vm1178_vm15 = vmand %vm665_vm0, %vm922_vm7  ;;  %vm19467_vm7 = vcmp.eq.s32.totalorder %v19457_v56, %v12499_v30  ;;  %vm19470_vm12 = vcmp.eq.s32.totalorder %v19456_v44, %v12521_v43 }
 0x258   : > { %vm15464_vm11 = vmpackc.low %vm19463_vm13, %vm19462_vm2  ;;  %vm666_vm2 = vcmp.ge.s32.totalorder %v407_v21, %v12019_v5 }
 0x259   : > { %v19465_v47 = vsel %vm15464_vm11, 4294967295, %v19464_v47  ;;  %vm15474_vm0 = vmpackc.low %vm19467_vm7, %vm19466_vm5  ;;  %vm923_vm11 = vcmp.lt.s32.totalorder %v407_v21, %v12025_v7  ;;  %vm19473_vm5 = vnez %v19445_v50  ;;  %vm19476_vm7 = vnez %v19452_v8 }
 0x25a   : > { %vm10397_vm4 = vmpackc.low %vm1178_vm15, %vm1177_vm14  ;;  %9848 = vmatmul.mubr.msk.bf16.gmra.mrb[76].mxu1 %vm19473_vm5, %v19085_v3  ;;  %vm667_vm15 = vcmp.ge.s32.totalorder %v408_v16, %v12019_v5  ;;  %v313_v50 = vadd.s32 704, %v12011_v2  ;;  %vm2704_vm5 = vcmp.eq.s32.totalorder %v19456_v44, %v14403_v39  ;;  %v314_v8 = vadd.s32 712, %v12011_v2 }
 0x25b   : > { %vm15481_vm1 = vmpackc.low %vm2721_vm10, %vm19470_vm12  ;;  %10398 = vmatpush1.bf16.msk.msra.mxu0 %vm10397_vm4, %v19085_v3  ;;  %vm924_vm12 = vcmp.lt.s32.totalorder %v408_v16, %v12025_v7  ;;  %vm19474_vm10 = vnez %v19447_v1  ;;  %v19478_v1 = vld [vmem:[#allocation48_spill] sm:$0xff]  ;;  %v409_v21 = vadd.s32 1472, %v12011_v2  ;;  %v19481_v16 = vmov 0 }
 0x25c   : > { %vm1083_vm13 = vmand %vm570_vm8, %vm827_vm3  ;;  %7075 = vmatprep.subr.bf16.mxu0 %v19089_v6  ;;  %10328 = vmatmul.mubr.msk.bf16.gmra.mrb[76].mxu0 %vm19474_vm10, %v19085_v3  ;;  %vm19475_vm3 = vnez %v19449_v61  ;;  %v19477_v61 = vld [vmem:[#allocation47_spill] sm:$0xff] }
 0x25d   : > { %vm1084_vm14 = vmand %vm571_vm6, %vm828_vm9  ;;  %9850 = vmatprep.mubr.msk.bf16.mxu1 %vm19475_vm3, %v19085_v3  ;;  %10330 = vmatprep.mubr.msk.bf16.mxu0 %vm19476_vm7, %v19085_v3  ;;  %vm2698_vm6 = vcmp.eq.s32.totalorder %v19456_v44, %v12496_v60  ;;  %vm2714_vm9 = vcmp.eq.s32.totalorder %v19457_v56, %v12496_v60  ;;  %vm2731_vm10 = vcmp.eq.s32.totalorder %v19477_v61, %v12499_v30  ;;  %v19483_v44 = vmov 0 }
 0x25e   : > { %vm9919_vm8 = vmpackc.low %vm1084_vm14, %vm1083_vm13  ;;  %vm2720_vm13 = vcmp.eq.s32.totalorder %v19457_v56, %v14403_v39  ;;  %vm2747_vm3 = vcmp.eq.s32.totalorder %v19478_v1, %v12499_v30  ;;  %vm572_vm7 = vcmp.ge.s32.totalorder %v313_v50, %v12019_v5  ;;  %v410_v56 = vadd.s32 1480, %v12011_v2 }
 0x25f   : > { %9920 = vmatpush1.bf16.msk.msra.mxu1 %vm9919_vm8, %v19085_v3  ;;  %vm1179_vm4 = vmand %vm666_vm2, %vm923_vm11  ;;  %vm2737_vm8 = vcmp.eq.s32.totalorder %v19477_v61, %v12521_v43 }
 0x260   : > { %vm1180_vm14 = vmand %vm667_vm15, %vm924_vm12  ;;  %6210 = vmatprep.subr.bf16.mxu1 %v19089_v6  ;;  %vm2753_vm15 = vcmp.eq.s32.totalorder %v19478_v1, %v12521_v43 }
 0x261   : > { %vm10399_vm11 = vmpackc.low %vm1180_vm14, %vm1179_vm4  ;;  %vm573_vm4 = vcmp.ge.s32.totalorder %v314_v8, %v12019_v5  ;;  %vm830_vm14 = vcmp.lt.s32.totalorder %v314_v8, %v12025_v7  ;;  %v19495_v8 = vmov 0 }
 0x262   : > { %vm15519_vm2 = vmpackc.low %vm2714_vm9, %vm2698_vm6  ;;  %10400 = vmatpush1.bf16.msk.msra.mxu0 %vm10399_vm11, %v19085_v3  ;;  %vm829_vm6 = vcmp.lt.s32.totalorder %v313_v50, %v12025_v7  ;;  %v315_v50 = vadd.s32 720, %v12011_v2 }
 0x263   : > { %v19480_v41 = vsel %vm15519_vm2, 4294967295, %v19479_v41  ;;  %vm15529_vm12 = vmpackc.low %vm2720_vm13, %vm2704_vm5  ;;  %7077 = vmatprep.subr.bf16.mxu0 %v19089_v6  ;;  %vm19485_vm5 = vnez %v19461_v24  ;;  %v19533_v24 = vld [vmem:[#allocation57_spill] sm:$0xff] }
 0x264   : > { %v19482_v16 = vsel %vm15529_vm12, 4294967295, %v19481_v16  ;;  %vm15537_vm9 = vmpackc.low %vm2747_vm3, %vm2731_vm10  ;;  %9852 = vmatmul.mubr.msk.bf16.gmra.mrb[80].mxu1 %vm19485_vm5, %v19085_v3  ;;  %vm19488_vm10 = vnez %v19465_v47  ;;  %vm925_vm5 = vcmp.lt.s32.totalorder %v409_v21, %v12025_v7  ;;  %vm926_vm3 = vcmp.lt.s32.totalorder %v410_v56, %v12025_v7  ;;  %v19491_v47 = vld [vmem:[#allocation49_spill] sm:$0xff] }
 0x265   : > { %v19484_v44 = vsel %vm15537_vm9, 4294967295, %v19483_v44  ;;  %vm15546_vm13 = vmpackc.low %vm2753_vm15, %vm2737_vm8  ;;  %10332 = vmatmul.mubr.msk.bf16.gmra.mrb[80].mxu0 %vm19488_vm10, %v19085_v3  ;;  %9854 = vmatprep.mubr.msk.bf16.mxu1 %vm15474_vm0, %v19085_v3  ;;  %vm668_vm15 = vcmp.ge.s32.totalorder %v409_v21, %v12019_v5  ;;  %vm831_vm11 = vcmp.lt.s32.totalorder %v315_v50, %v12025_v7  ;;  %vm19498_vm9 = vcmp.eq.s32.totalorder %v19478_v1, %v14403_v39 }
 0x266   : > { %v19487_v62 = vsel %vm15546_vm13, 4294967295, %v19486_v62  ;;  %vm15561_vm8 = vmand %vm572_vm7, %vm829_vm6  ;;  %10334 = vmatprep.mubr.msk.bf16.mxu0 %vm15481_vm1, %v19085_v3  ;;  %vm669_vm6 = vcmp.ge.s32.totalorder %v410_v56, %v12019_v5  ;;  %vm574_vm1 = vcmp.ge.s32.totalorder %v315_v50, %v12019_v5  ;;  %v412_v56 = vadd.s32 1496, %v12011_v2 }
 0x267   : > { %vm1086_vm7 = vmand %vm573_vm4, %vm830_vm14  ;;  %vm2785_vm4 = vcmp.eq.s32.totalorder %v19492_v33, %v12521_v43  ;;  %vm19497_vm13 = vcmp.eq.s32.totalorder %v19477_v61, %v14403_v39  ;;  %v19499_v21 = vmov 0  ;;  %v416_v50 = vadd.s32 1528, %v12011_v2 }
 0x268   : > { %vm9921_vm10 = vmpackc.low %vm1086_vm7, %vm15561_vm8  ;;  %vm19493_vm8 = vcmp.eq.s32.totalorder %v19477_v61, %v12496_v60  ;;  %vm19494_vm7 = vcmp.eq.s32.totalorder %v19478_v1, %v12496_v60  ;;  %v19521_v1 = vmov 0 }
 0x269   : > { %9922 = vmatpush1.bf16.msk.msra.mxu1 %vm9921_vm10, %v19085_v3  ;;  %vm1181_vm14 = vmand %vm668_vm15, %vm925_vm5  ;;  %vm575_vm15 = vcmp.ge.s32.totalorder %v316_v20, %v12019_v5  ;;  %vm832_vm5 = vcmp.lt.s32.totalorder %v316_v20, %v12025_v7  ;;  %v19544_v20 = vmov 0 }
 0x26a   : > { %vm15606_vm0 = vmpackc.low %vm19494_vm7, %vm19493_vm8  ;;  %6212 = vmatprep.subr.bf16.mxu1 %v19089_v6  ;;  %vm19501_vm8 = vcmp.eq.s32.totalorder %v19491_v47, %v12499_v30 }
 0x26b   : > { %v19496_v8 = vsel %vm15606_vm0, 4294967295, %v19495_v8  ;;  %vm1182_vm10 = vmand %vm669_vm6, %vm926_vm3  ;;  %vm19502_vm3 = vcmp.eq.s32.totalorder %v19492_v33, %v12499_v30  ;;  %vm19505_vm0 = vcmp.eq.s32.totalorder %v19491_v47, %v12521_v43 }
 0x26c   : > { %vm15619_vm12 = vmpackc.low %vm19498_vm9, %vm19497_vm13  ;;  %vm670_vm13 = vcmp.ge.s32.totalorder %v411_v11, %v12019_v5 }
 0x26d   : > { %v19500_v21 = vsel %vm15619_vm12, 4294967295, %v19499_v21  ;;  %vm15629_vm6 = vmpackc.low %vm19502_vm3, %vm19501_vm8  ;;  %vm927_vm12 = vcmp.lt.s32.totalorder %v411_v11, %v12025_v7  ;;  %vm19508_vm8 = vnez %v19480_v41  ;;  %vm19511_vm3 = vnez %v19487_v62 }
 0x26e   : > { %vm10401_vm7 = vmpackc.low %vm1182_vm10, %vm1181_vm14  ;;  %9856 = vmatmul.mubr.msk.bf16.gmra.mrb[84].mxu1 %vm19508_vm8, %v19085_v3  ;;  %vm671_vm10 = vcmp.ge.s32.totalorder %v412_v56, %v12019_v5  ;;  %v317_v41 = vadd.s32 736, %v12011_v2  ;;  %vm2768_vm8 = vcmp.eq.s32.totalorder %v19491_v47, %v14403_v39  ;;  %v318_v62 = vadd.s32 744, %v12011_v2 }
 0x26f   : > { %vm15636_vm2 = vmpackc.low %vm2785_vm4, %vm19505_vm0  ;;  %10402 = vmatpush1.bf16.msk.msra.mxu0 %vm10401_vm7, %v19085_v3  ;;  %vm928_vm0 = vcmp.lt.s32.totalorder %v412_v56, %v12025_v7  ;;  %vm19509_vm4 = vnez %v19482_v16  ;;  %v19513_v16 = vld [vmem:[#allocation52_spill] sm:$0xff]  ;;  %v413_v11 = vadd.s32 1504, %v12011_v2  ;;  %v19516_v56 = vmov 0 }
 0x270   : > { %vm1087_vm9 = vmand %vm574_vm1, %vm831_vm11  ;;  %7079 = vmatprep.subr.bf16.mxu0 %v19089_v6  ;;  %10336 = vmatmul.mubr.msk.bf16.gmra.mrb[84].mxu0 %vm19509_vm4, %v19085_v3  ;;  %vm19510_vm11 = vnez %v19484_v44  ;;  %v19512_v44 = vld [vmem:[#allocation51_spill] sm:$0xff] }
 0x271   : > { %vm1088_vm14 = vmand %vm575_vm15, %vm832_vm5  ;;  %9858 = vmatprep.mubr.msk.bf16.mxu1 %vm19510_vm11, %v19085_v3  ;;  %10338 = vmatprep.mubr.msk.bf16.mxu0 %vm19511_vm3, %v19085_v3  ;;  %vm2762_vm15 = vcmp.eq.s32.totalorder %v19491_v47, %v12496_v60  ;;  %vm2778_vm5 = vcmp.eq.s32.totalorder %v19492_v33, %v12496_v60  ;;  %vm2795_vm4 = vcmp.eq.s32.totalorder %v19512_v44, %v12499_v30  ;;  %v19518_v47 = vmov 0 }
 0x272   : > { %vm9923_vm1 = vmpackc.low %vm1088_vm14, %vm1087_vm9  ;;  %vm2784_vm9 = vcmp.eq.s32.totalorder %v19492_v33, %v14403_v39  ;;  %vm2811_vm11 = vcmp.eq.s32.totalorder %v19513_v16, %v12499_v30  ;;  %vm576_vm3 = vcmp.ge.s32.totalorder %v317_v41, %v12019_v5  ;;  %v414_v33 = vadd.s32 1512, %v12011_v2 }
 0x273   : > { %9924 = vmatpush1.bf16.msk.msra.mxu1 %vm9923_vm1, %v19085_v3  ;;  %vm1183_vm7 = vmand %vm670_vm13, %vm927_vm12  ;;  %vm2801_vm1 = vcmp.eq.s32.totalorder %v19512_v44, %v12521_v43 }
 0x274   : > { %vm1184_vm14 = vmand %vm671_vm10, %vm928_vm0  ;;  %6214 = vmatprep.subr.bf16.mxu1 %v19089_v6  ;;  %vm2817_vm10 = vcmp.eq.s32.totalorder %v19513_v16, %v12521_v43 }
 0x275   : > { %vm10403_vm12 = vmpackc.low %vm1184_vm14, %vm1183_vm7  ;;  %vm577_vm7 = vcmp.ge.s32.totalorder %v318_v62, %v12019_v5  ;;  %vm834_vm14 = vcmp.lt.s32.totalorder %v318_v62, %v12025_v7  ;;  %v19532_v62 = vld [vmem:[#allocation56_spill] sm:$0xff] }
 0x276   : > { %vm15674_vm13 = vmpackc.low %vm2778_vm5, %vm2762_vm15  ;;  %10404 = vmatpush1.bf16.msk.msra.mxu0 %vm10403_vm12, %v19085_v3  ;;  %vm833_vm15 = vcmp.lt.s32.totalorder %v317_v41, %v12025_v7  ;;  %v319_v41 = vadd.s32 752, %v12011_v2  ;;  %vm672_vm12 = vcmp.ge.s32.totalorder %v413_v11, %v12019_v5 }
 0x277   : > { %vm15684_vm0 = vmpackc.low %vm2784_vm9, %vm2768_vm8  ;;  %7081 = vmatprep.subr.bf16.mxu0 %v19089_v6  ;;  %vm19520_vm8 = vnez %v19496_v8  ;;  %v320_v8 = vadd.s32 760, %v12011_v2 }
 0x278   : > { %v19517_v56 = vsel %vm15684_vm0, 4294967295, %v19516_v56  ;;  %vm15692_vm5 = vmpackc.low %vm2811_vm11, %vm2795_vm4  ;;  %9860 = vmatmul.mubr.msk.bf16.gmra.mrb[88].mxu1 %vm19520_vm8, %v19085_v3  ;;  %vm19523_vm4 = vnez %v19500_v21  ;;  %v415_v21 = vadd.s32 1520, %v12011_v2 }
 0x279   : > { %v19519_v47 = vsel %vm15692_vm5, 4294967295, %v19518_v47  ;;  %vm15701_vm9 = vmpackc.low %vm2817_vm10, %vm2801_vm1  ;;  %10340 = vmatmul.mubr.msk.bf16.gmra.mrb[88].mxu0 %vm19523_vm4, %v19085_v3  ;;  %9862 = vmatprep.mubr.msk.bf16.mxu1 %vm15629_vm6, %v19085_v3  ;;  %vm929_vm5 = vcmp.lt.s32.totalorder %v413_v11, %v12025_v7  ;;  %vm2794_vm1 = vcmp.eq.s32.totalorder %v19512_v44, %v12496_v60  ;;  %vm2810_vm10 = vcmp.eq.s32.totalorder %v19513_v16, %v12496_v60 }
 0x27a   : > { %v19522_v1 = vsel %vm15701_vm9, 4294967295, %v19521_v1  ;;  %vm1089_vm11 = vmand %vm576_vm3, %vm833_vm15  ;;  %10342 = vmatprep.mubr.msk.bf16.mxu0 %vm15636_vm2, %v19085_v3  ;;  %vm673_vm6 = vcmp.ge.s32.totalorder %v414_v33, %v12019_v5  ;;  %vm930_vm3 = vcmp.lt.s32.totalorder %v414_v33, %v12025_v7  ;;  %vm578_vm9 = vcmp.ge.s32.totalorder %v319_v41, %v12019_v5  ;;  %v19529_v33 = vld [vmem:[#allocation53_spill] sm:$0xff] }
 0x27b   : > { %vm1090_vm8 = vmand %vm577_vm7, %vm834_vm14  ;;  %vm835_vm2 = vcmp.lt.s32.totalorder %v319_v41, %v12025_v7  ;;  %vm579_vm14 = vcmp.ge.s32.totalorder %v320_v8, %v12019_v5  ;;  %v19538_v11 = vmov 0  ;;  %v418_v41 = vadd.s32 1544, %v12011_v2 }
 0x27c   : > { %vm9925_vm15 = vmpackc.low %vm1090_vm8, %vm1089_vm11  ;;  %vm836_vm11 = vcmp.lt.s32.totalorder %v320_v8, %v12025_v7  ;;  %v19541_v8 = vmov 0 }
 0x27d   : > { %9926 = vmatpush1.bf16.msk.msra.mxu1 %vm9925_vm15, %v19085_v3  ;;  %vm1185_vm4 = vmand %vm672_vm12, %vm929_vm5  ;;  %vm674_vm12 = vcmp.ge.s32.totalorder %v415_v21, %v12019_v5  ;;  %vm931_vm15 = vcmp.lt.s32.totalorder %v415_v21, %v12025_v7  ;;  %v419_v21 = vadd.s32 1552, %v12011_v2 }
 0x27e   : > { %vm15729_vm0 = vmpackc.low %vm2810_vm10, %vm2794_vm1  ;;  %6216 = vmatprep.subr.bf16.mxu1 %v19089_v6  ;;  %vm675_vm10 = vcmp.ge.s32.totalorder %v416_v50, %v12019_v5 }
 0x27f   : > { %vm1186_vm7 = vmand %vm673_vm6, %vm930_vm3  ;;  %vm932_vm6 = vcmp.lt.s32.totalorder %v416_v50, %v12025_v7  ;;  %vm19526_vm3 = vnez %v19517_v56  ;;  %v417_v56 = vadd.s32 1536, %v12011_v2  ;;  %v420_v50 = vadd.s32 1560, %v12011_v2 }
 0x280   : > { %vm10405_vm8 = vmpackc.low %vm1186_vm7, %vm1185_vm4  ;;  %9864 = vmatmul.mubr.msk.bf16.gmra.mrb[92].mxu1 %vm15674_vm13, %v19085_v3  ;;  %vm2800_vm13 = vcmp.eq.s32.totalorder %v19512_v44, %v14403_v39  ;;  %vm2816_vm7 = vcmp.eq.s32.totalorder %v19513_v16, %v14403_v39 }
 0x281   : > { %10406 = vmatpush1.bf16.msk.msra.mxu0 %vm10405_vm8, %v19085_v3  ;;  %vm1091_vm5 = vmand %vm578_vm9, %vm835_vm2  ;;  %vm19527_vm9 = vnez %v19519_v47  ;;  %vm19528_vm2 = vnez %v19522_v1  ;;  %v19530_v47 = vld [vmem:[#allocation54_spill] sm:$0xff]  ;;  %v19531_v1 = vld [vmem:[#allocation55_spill] sm:$0xff] }
 0x282   : > { %7083 = vmatprep.subr.bf16.mxu0 %v19089_v6  ;;  %vm1092_vm1 = vmand %vm579_vm14, %vm836_vm11  ;;  %10344 = vmatmul.mubr.msk.bf16.gmra.mrb[92].mxu0 %vm19526_vm3, %v19085_v3  ;;  %vm2827_vm11 = vcmp.eq.s32.totalorder %v19529_v33, %v12499_v30  ;;  %vm2843_vm8 = vcmp.eq.s32.totalorder %v19530_v47, %v12499_v30  ;;  %vm2849_vm3 = vcmp.eq.s32.totalorder %v19530_v47, %v12521_v43 }
 0x283   : > { %9866 = vmatprep.mubr.msk.bf16.mxu1 %vm19527_vm9, %v19085_v3  ;;  %vm9927_vm4 = vmpackc.low %vm1092_vm1, %vm1091_vm5  ;;  %10346 = vmatprep.mubr.msk.bf16.mxu0 %vm19528_vm2, %v19085_v3  ;;  %vm2833_vm1 = vcmp.eq.s32.totalorder %v19529_v33, %v12521_v43 }
 0x284   : > { %9928 = vmatpush1.bf16.msk.msra.mxu1 %vm9927_vm4, %v19085_v3  ;;  %vm1187_vm14 = vmand %vm674_vm12, %vm931_vm15  ;;  %vm2832_vm4 = vcmp.eq.s32.totalorder %v19529_v33, %v14403_v39 }
 0x285   : > { %vm1188_vm5 = vmand %vm675_vm10, %vm932_vm6  ;;  %10906 = vmatprep.subr.bf16.mxu1 %v19089_v6  ;;  %vm2826_vm10 = vcmp.eq.s32.totalorder %v19529_v33, %v12496_v60  ;;  %vm2842_vm6 = vcmp.eq.s32.totalorder %v19530_v47, %v12496_v60 }
 0x286   : > { %vm10407_vm9 = vmpackc.low %vm1188_vm5, %vm1187_vm14 }
 0x287   : > { %vm10347_vm2 = vmpackc.low %vm2816_vm7, %vm2800_vm13  ;;  %10408 = vmatpush1.bf16.msk.msra.mxu0 %vm10407_vm9, %v19085_v3  ;;  %vm2848_vm13 = vcmp.eq.s32.totalorder %v19530_v47, %v14403_v39  ;;  %vm2875_vm7 = vcmp.eq.s32.totalorder %v19531_v1, %v12499_v30  ;;  %vm2858_vm9 = vcmp.eq.s32.totalorder %v13871_v42, %v12496_v60 }
 0x288   : > { %vm9869_vm12 = vmpackc.low %vm2843_vm8, %vm2827_vm11  ;;  %7342 = vmatprep.subr.bf16.mxu0 %v19089_v6  ;;  %9868 = vmatmul.mubr.msk.bf16.gmra.mrb[96].mxu1 %vm15729_vm0, %v19085_v3  ;;  %vm2859_vm0 = vcmp.eq.s32.totalorder %v13871_v42, %v12499_v30  ;;  %vm2865_vm11 = vcmp.eq.s32.totalorder %v13871_v42, %v12521_v43  ;;  %vm2881_vm8 = vcmp.eq.s32.totalorder %v19531_v1, %v12521_v43 }
 0x289   : > { %vm10349_vm15 = vmpackc.low %vm2849_vm3, %vm2833_vm1  ;;  %9870 = vmatprep.mubr.msk.bf16.mxu1 %vm9869_vm12, %v19085_v3  ;;  %vm2864_vm12 = vcmp.eq.s32.totalorder %v13871_v42, %v14403_v39 }
 0x28a   : > { %10348 = vmatmul.mubr.msk.bf16.gmra.mrb[96].mxu0 %vm10347_vm2, %v19085_v3  ;;  %vm9871_vm14 = vmpackc.low %vm2842_vm6, %vm2826_vm10  ;;  %vm2874_vm2 = vcmp.eq.s32.totalorder %v19531_v1, %v12496_v60  ;;  %vm2891_vm10 = vcmp.eq.s32.totalorder %v19532_v62, %v12499_v30  ;;  %vm2907_vm6 = vcmp.eq.s32.totalorder %v19533_v24, %v12499_v30 }
 0x28b   : > { %10350 = vmatprep.mubr.msk.bf16.mxu0 %vm10349_vm15, %v19085_v3  ;;  %vm10351_vm5 = vmpackc.low %vm2848_vm13, %vm2832_vm4  ;;  %vm2880_vm15 = vcmp.eq.s32.totalorder %v19531_v1, %v14403_v39  ;;  %vm2897_vm13 = vcmp.eq.s32.totalorder %v19532_v62, %v12521_v43 }
 0x28c   : > { %vm9873_vm1 = vmpackc.low %vm2875_vm7, %vm2859_vm0  ;;  %vm2913_vm0 = vcmp.eq.s32.totalorder %v19533_v24, %v12521_v43 }
 0x28d   : > { %vm10353_vm3 = vmpackc.low %vm2881_vm8, %vm2865_vm11  ;;  %vm2890_vm8 = vcmp.eq.s32.totalorder %v19532_v62, %v12496_v60 }
 0x28e   : > { %vm9875_vm4 = vmpackc.low %vm2874_vm2, %vm2858_vm9  ;;  %vm2923_vm9 = vcmp.eq.s32.totalorder %v14045_v45, %v12499_v30  ;;  %vm2939_vm2 = vcmp.eq.s32.totalorder %v14056_v0, %v12499_v30 }
 0x28f   : > { %vm10355_vm7 = vmpackc.low %vm2880_vm15, %vm2864_vm12  ;;  %vm2929_vm15 = vcmp.eq.s32.totalorder %v14045_v45, %v12521_v43 }
 0x290   : > { %9872 = vmatmul.mubr.msk.bf16.gmra.mrb[100].mxu1 %vm9871_vm14, %v19085_v3  ;;  %vm9877_vm14 = vmpackc.low %vm2907_vm6, %vm2891_vm10  ;;  %vm2945_vm10 = vcmp.eq.s32.totalorder %v14056_v0, %v12521_v43 }
 0x291   : > { %9874 = vmatprep.mubr.msk.bf16.mxu1 %vm9873_vm1, %v19085_v3  ;;  %vm10357_vm11 = vmpackc.low %vm2913_vm0, %vm2897_vm13  ;;  %vm2896_vm1 = vcmp.eq.s32.totalorder %v19532_v62, %v14403_v39  ;;  %vm2922_vm0 = vcmp.eq.s32.totalorder %v14045_v45, %v12496_v60 }
 0x292   : > { %10352 = vmatmul.mubr.msk.bf16.gmra.mrb[100].mxu0 %vm10351_vm5, %v19085_v3  ;;  %vm2906_vm5 = vcmp.eq.s32.totalorder %v19533_v24, %v12496_v60  ;;  %vm10361_vm13 = vmpackc.low %vm2945_vm10, %vm2929_vm15  ;;  %vm2954_vm10 = vcmp.eq.s32.totalorder %v14114_v12, %v12496_v60 }
 0x293   : > { %10354 = vmatprep.mubr.msk.bf16.mxu0 %vm10353_vm3, %v19085_v3  ;;  %vm2912_vm3 = vcmp.eq.s32.totalorder %v19533_v24, %v14403_v39  ;;  %vm9879_vm12 = vmpackc.low %vm2906_vm5, %vm2890_vm8  ;;  %vm2955_vm8 = vcmp.eq.s32.totalorder %v14114_v12, %v12499_v30  ;;  %vm2971_vm5 = vcmp.eq.s32.totalorder %v14129_v48, %v12499_v30 }
 0x294   : > { %vm10359_vm6 = vmpackc.low %vm2912_vm3, %vm2896_vm1  ;;  %vm2961_vm3 = vcmp.eq.s32.totalorder %v14114_v12, %v12521_v43 }
 0x298   : > { %9876 = vmatmul.mubr.msk.bf16.gmra.mrb[104].mxu1 %vm9875_vm4, %v19085_v3  ;;  %vm9881_vm4 = vmpackc.low %vm2939_vm2, %vm2923_vm9  ;;  %vm2977_vm9 = vcmp.eq.s32.totalorder %v14129_v48, %v12521_v43 }
 0x299   : > { %9878 = vmatprep.mubr.msk.bf16.mxu1 %vm9877_vm14, %v19085_v3  ;;  %vm2928_vm14 = vcmp.eq.s32.totalorder %v14045_v45, %v14403_v39  ;;  %vm10365_vm15 = vmpackc.low %vm2977_vm9, %vm2961_vm3  ;;  %vm2986_vm9 = vcmp.eq.s32.totalorder %v14219_v58, %v12496_v60 }
 0x29a   : > { %10356 = vmatmul.mubr.msk.bf16.gmra.mrb[104].mxu0 %vm10355_vm7, %v19085_v3  ;;  %vm2938_vm7 = vcmp.eq.s32.totalorder %v14056_v0, %v12496_v60 }
 0x29b   : > { %10358 = vmatprep.mubr.msk.bf16.mxu0 %vm10357_vm11, %v19085_v3  ;;  %vm2944_vm11 = vcmp.eq.s32.totalorder %v14056_v0, %v14403_v39  ;;  %vm9883_vm1 = vmpackc.low %vm2938_vm7, %vm2922_vm0  ;;  %vm2987_vm0 = vcmp.eq.s32.totalorder %v14219_v58, %v12499_v30  ;;  %vm3003_vm7 = vcmp.eq.s32.totalorder %v14230_v49, %v12499_v30 }
 0x29c   : > { %vm10363_vm2 = vmpackc.low %vm2944_vm11, %vm2928_vm14  ;;  %vm2993_vm11 = vcmp.eq.s32.totalorder %v14219_v58, %v12521_v43 }
 0x2a0   : > { %9880 = vmatmul.mubr.msk.bf16.gmra.mrb[108].mxu1 %vm9879_vm12, %v19085_v3  ;;  %vm9885_vm12 = vmpackc.low %vm2971_vm5, %vm2955_vm8  ;;  %vm3009_vm8 = vcmp.eq.s32.totalorder %v14230_v49, %v12521_v43 }
 0x2a1   : > { %9882 = vmatprep.mubr.msk.bf16.mxu1 %vm9881_vm4, %v19085_v3  ;;  %vm2960_vm4 = vcmp.eq.s32.totalorder %v14114_v12, %v14403_v39  ;;  %vm10369_vm3 = vmpackc.low %vm3009_vm8, %vm2993_vm11  ;;  %vm3018_vm8 = vcmp.eq.s32.totalorder %v14278_v34, %v12496_v60 }
 0x2a2   : > { %10360 = vmatmul.mubr.msk.bf16.gmra.mrb[108].mxu0 %vm10359_vm6, %v19085_v3  ;;  %vm2970_vm6 = vcmp.eq.s32.totalorder %v14129_v48, %v12496_v60 }
 0x2a3   : > { %10362 = vmatprep.mubr.msk.bf16.mxu0 %vm10361_vm13, %v19085_v3  ;;  %vm2976_vm13 = vcmp.eq.s32.totalorder %v14129_v48, %v14403_v39  ;;  %vm9887_vm14 = vmpackc.low %vm2970_vm6, %vm2954_vm10  ;;  %vm3019_vm10 = vcmp.eq.s32.totalorder %v14278_v34, %v12499_v30  ;;  %vm3035_vm6 = vcmp.eq.s32.totalorder %v14283_v51, %v12499_v30  ;;  %v19534_v30 = vld [vmem:[#allocation14_spill] sm:$0xff] }
 0x2a4   : > { %vm10367_vm5 = vmpackc.low %vm2976_vm13, %vm2960_vm4  ;;  %vm3025_vm13 = vcmp.eq.s32.totalorder %v14278_v34, %v12521_v43 }
 0x2a8   : > { %9884 = vmatmul.mubr.msk.bf16.gmra.mrb[112].mxu1 %vm9883_vm1, %v19085_v3  ;;  %vm9889_vm1 = vmpackc.low %vm3003_vm7, %vm2987_vm0  ;;  %vm3041_vm0 = vcmp.eq.s32.totalorder %v14283_v51, %v12521_v43  ;;  %v19535_v43 = vld [vmem:[#allocation17_spill] sm:$0xff] }
 0x2a9   : > { %9886 = vmatprep.mubr.msk.bf16.mxu1 %vm9885_vm12, %v19085_v3  ;;  %vm2992_vm12 = vcmp.eq.s32.totalorder %v14219_v58, %v14403_v39  ;;  %vm10373_vm11 = vmpackc.low %vm3041_vm0, %vm3025_vm13 }
 0x2aa   : > { %10364 = vmatmul.mubr.msk.bf16.gmra.mrb[112].mxu0 %vm10363_vm2, %v19085_v3  ;;  %vm3002_vm2 = vcmp.eq.s32.totalorder %v14230_v49, %v12496_v60 }
 0x2ab   : > { %10366 = vmatprep.mubr.msk.bf16.mxu0 %vm10365_vm15, %v19085_v3  ;;  %vm3008_vm15 = vcmp.eq.s32.totalorder %v14230_v49, %v14403_v39  ;;  %vm9891_vm4 = vmpackc.low %vm3002_vm2, %vm2986_vm9  ;;  %vm2029_vm9 = vcmp.eq.s32.totalorder %v12011_v2, %v19534_v30  ;;  %vm2045_vm2 = vcmp.eq.s32.totalorder %v12016_v4, %v19534_v30 }
 0x2ac   : > { %vm10371_vm7 = vmpackc.low %vm3008_vm15, %vm2992_vm12  ;;  %vm2035_vm15 = vcmp.eq.s32.totalorder %v12011_v2, %v19535_v43 }
 0x2b0   : > { %9888 = vmatmul.mubr.msk.bf16.gmra.mrb[116].mxu1 %vm9887_vm14, %v19085_v3  ;;  %vm9893_vm14 = vmpackc.low %vm3035_vm6, %vm3019_vm10  ;;  %vm2051_vm10 = vcmp.eq.s32.totalorder %v12016_v4, %v19535_v43 }
 0x2b1   : > { %9890 = vmatprep.mubr.msk.bf16.mxu1 %vm9889_vm1, %v19085_v3  ;;  %vm3024_vm1 = vcmp.eq.s32.totalorder %v14278_v34, %v14403_v39 }
 0x2b2   : > { %10368 = vmatmul.mubr.msk.bf16.gmra.mrb[116].mxu0 %vm10367_vm5, %v19085_v3  ;;  %vm3034_vm5 = vcmp.eq.s32.totalorder %v14283_v51, %v12496_v60  ;;  %v19536_v60 = vld [vmem:[#allocation13_spill] sm:$0xff] }
 0x2b3   : > { %10370 = vmatprep.mubr.msk.bf16.mxu0 %vm10369_vm3, %v19085_v3  ;;  %vm3040_vm3 = vcmp.eq.s32.totalorder %v14283_v51, %v14403_v39  ;;  %vm9895_vm12 = vmpackc.low %vm3034_vm5, %vm3018_vm8  ;;  %vm2028_vm13 = vcmp.eq.s32.totalorder %v12011_v2, %v19536_v60  ;;  %vm2044_vm0 = vcmp.eq.s32.totalorder %v12016_v4, %v19536_v60  ;;  %v19537_v39 = vld [vmem:[#allocation16_spill] sm:$0xff]  ;;  %vm2061_vm8 = vcmp.eq.s32.totalorder %v12035_v9, %v19534_v30 }
 0x2b4   : > { %vm10375_vm6 = vmpackc.low %vm3040_vm3, %vm3024_vm1  ;;  %vm2077_vm5 = vcmp.eq.s32.totalorder %v12040_v10, %v19534_v30  ;;  %vm2067_vm3 = vcmp.eq.s32.totalorder %v12035_v9, %v19535_v43 }
 0x2b5   : > { %vm15927_vm1 = vmpackc.low %vm2044_vm0, %vm2028_vm13 }
 0x2b6   : > { %v19539_v11 = vsel %vm15927_vm1, 4294967295, %v19538_v11 }
 0x2b8   : > { %9892 = vmatmul.mubr.msk.bf16.gmra.mrb[120].mxu1 %vm9891_vm4, %v19085_v3  ;;  %vm9929_vm4 = vmpackc.low %vm2045_vm2, %vm2029_vm9  ;;  %vm2083_vm9 = vcmp.eq.s32.totalorder %v12040_v10, %v19535_v43 }
 0x2b9   : > { %9894 = vmatprep.mubr.msk.bf16.mxu1 %vm9893_vm14, %v19085_v3  ;;  %vm2034_vm14 = vcmp.eq.s32.totalorder %v12011_v2, %v19537_v39  ;;  %vm10413_vm13 = vmpackc.low %vm2083_vm9, %vm2067_vm3  ;;  %vm2093_vm3 = vcmp.eq.s32.totalorder %v12057_v14, %v19534_v30  ;;  %vm2109_vm9 = vcmp.eq.s32.totalorder %v12063_v15, %v19534_v30 }
 0x2ba   : > { %10372 = vmatmul.mubr.msk.bf16.gmra.mrb[120].mxu0 %vm10371_vm7, %v19085_v3  ;;  %vm10409_vm7 = vmpackc.low %vm2051_vm10, %vm2035_vm15  ;;  %vm676_vm15 = vcmp.ge.s32.totalorder %v417_v56, %v12019_v5  ;;  %vm677_vm10 = vcmp.ge.s32.totalorder %v418_v41, %v12019_v5 }
 0x2bb   : > { %10374 = vmatprep.mubr.msk.bf16.mxu0 %vm10373_vm11, %v19085_v3  ;;  %vm2050_vm11 = vcmp.eq.s32.totalorder %v12016_v4, %v19537_v39 }
 0x2bc   : > { %vm10411_vm2 = vmpackc.low %vm2050_vm11, %vm2034_vm14  ;;  %vm19540_vm11 = vnez %v19539_v11  ;;  %vm2060_vm14 = vcmp.eq.s32.totalorder %v12035_v9, %v19536_v60  ;;  %v421_v11 = vadd.s32 1568, %v12011_v2 }
 0x2c0   : > { %9896 = vmatmul.mubr.msk.bf16.gmra.mrb[124].mxu1 %vm9895_vm12, %v19085_v3  ;;  %vm9933_vm12 = vmpackc.low %vm2077_vm5, %vm2061_vm8  ;;  %vm2076_vm8 = vcmp.eq.s32.totalorder %v12040_v10, %v19536_v60  ;;  %vm2066_vm5 = vcmp.eq.s32.totalorder %v12035_v9, %v19537_v39 }
 0x2c1   : > { %9930 = vmatprep.mubr.msk.bf16.mxu1 %vm9929_vm4, %v19085_v3  ;;  %vm934_vm4 = vcmp.lt.s32.totalorder %v418_v41, %v12025_v7  ;;  %v19547_v41 = vmov 0 }
 0x2c2   : > { %10376 = vmatmul.mubr.msk.bf16.gmra.mrb[124].mxu0 %vm10375_vm6, %v19085_v3  ;;  %vm933_vm6 = vcmp.lt.s32.totalorder %v417_v56, %v12025_v7  ;;  %vm1190_vm1 = vmand %vm677_vm10, %vm934_vm4  ;;  %vm2092_vm4 = vcmp.eq.s32.totalorder %v12057_v14, %v19536_v60  ;;  %v422_v56 = vadd.s32 1576, %v12011_v2 }
 0x2c3   : > { %10410 = vmatprep.mubr.msk.bf16.mxu0 %vm10409_vm7, %v19085_v3  ;;  %vm1189_vm0 = vmand %vm676_vm15, %vm933_vm6  ;;  %vm2115_vm15 = vcmp.eq.s32.totalorder %v12063_v15, %v19535_v43 }
 0x2c4   : > { %vm10537_vm7 = vmpackc.low %vm1190_vm1, %vm1189_vm0  ;;  %vm2082_vm1 = vcmp.eq.s32.totalorder %v12040_v10, %v19537_v39 }
 0x2c5   : > { %vm10415_vm10 = vmpackc.low %vm2082_vm1, %vm2066_vm5 }
 0x2c6   : > { %vm9937_vm6 = vmpackc.low %vm2109_vm9, %vm2093_vm3  ;;  %vm678_vm9 = vcmp.ge.s32.totalorder %v419_v21, %v12019_v5 }
 0x2c8   : > { %9932 = vmatmul.mubr.msk.bf16.vlgmr.msra.gmra.mrb[0].mxu1 %vm19540_vm11, %v19085_v3  ;;  %vm2114_vm11 = vcmp.eq.s32.totalorder %v12063_v15, %v19537_v39 }
 0x2c9   : > { %9934 = vmatprep.mubr.msk.bf16.mxu1 %vm9933_vm12, %v19085_v3  ;;  %vm2099_vm12 = vcmp.eq.s32.totalorder %v12057_v14, %v19535_v43 }
 0x2ca   : > { %10412 = vmatmul.mubr.msk.bf16.vlgmr.msra.gmra.mrb[0].mxu0 %vm10411_vm2, %v19085_v3  ;;  %vm9935_vm2 = vmpackc.low %vm2076_vm8, %vm2060_vm14  ;;  %vm2125_vm14 = vcmp.eq.s32.totalorder %v12081_v18, %v19534_v30  ;;  %vm2141_vm8 = vcmp.eq.s32.totalorder %v12087_v19, %v19534_v30 }
 0x2cb   : > { %10414 = vmatprep.mubr.msk.bf16.mxu0 %vm10413_vm13, %v19085_v3  ;;  %10538 = vmatpush1.bf16.msk.msra.mxu0 %vm10537_vm7, %v19085_v3  ;;  %vm2108_vm13 = vcmp.eq.s32.totalorder %v12063_v15, %v19536_v60  ;;  %vm10417_vm0 = vmpackc.low %vm2115_vm15, %vm2099_vm12  ;;  %vm2098_vm7 = vcmp.eq.s32.totalorder %v12057_v14, %v19537_v39  ;;  %vm935_vm12 = vcmp.lt.s32.totalorder %v419_v21, %v12025_v7  ;;  %v424_v21 = vadd.s32 1592, %v12011_v2 }
 0x2cc   : > { %7344 = vmatprep.subr.bf16.mxu0 %v19089_v6  ;;  %vm15981_vm5 = vmpackc.low %vm2108_vm13, %vm2092_vm4  ;;  %vm936_vm15 = vcmp.lt.s32.totalorder %v420_v50, %v12025_v7 }
 0x2cd   : > { %v19542_v8 = vsel %vm15981_vm5, 4294967295, %v19541_v8  ;;  %vm10419_vm1 = vmpackc.low %vm2114_vm11, %vm2098_vm7  ;;  %vm2124_vm11 = vcmp.eq.s32.totalorder %v12081_v18, %v19536_v60 }
 0x2ce   : > { %vm9941_vm3 = vmpackc.low %vm2141_vm8, %vm2125_vm14  ;;  %vm19543_vm7 = vnez %v19542_v8  ;;  %vm2140_vm14 = vcmp.eq.s32.totalorder %v12087_v19, %v19536_v60  ;;  %vm2130_vm8 = vcmp.eq.s32.totalorder %v12081_v18, %v19537_v39  ;;  %v423_v8 = vadd.s32 1584, %v12011_v2 }
 0x2cf   : > { %vm1191_vm4 = vmand %vm678_vm9, %vm935_vm12  ;;  %vm2157_vm9 = vcmp.eq.s32.totalorder %v12095_v22, %v19534_v30  ;;  %vm2179_vm12 = vcmp.eq.s32.totalorder %v12098_v23, %v19535_v43 }
 0x2d0   : > { %9936 = vmatmul.mubr.msk.bf16.gmra.mrb[4].mxu1 %vm9935_vm2, %v19085_v3  ;;  %vm679_vm2 = vcmp.ge.s32.totalorder %v420_v50, %v12019_v5  ;;  %v19550_v50 = vmov 0 }
 0x2d1   : > { %9938 = vmatprep.mubr.msk.bf16.mxu1 %vm9937_vm6, %v19085_v3  ;;  %vm2147_vm6 = vcmp.eq.s32.totalorder %v12087_v19, %v19535_v43  ;;  %vm1192_vm13 = vmand %vm679_vm2, %vm936_vm15  ;;  %vm2163_vm2 = vcmp.eq.s32.totalorder %v12095_v22, %v19535_v43 }
 0x2d2   : > { %10416 = vmatmul.mubr.msk.bf16.gmra.mrb[4].mxu0 %vm10415_vm10, %v19085_v3  ;;  %vm2131_vm10 = vcmp.eq.s32.totalorder %v12081_v18, %v19535_v43  ;;  %vm10539_vm5 = vmpackc.low %vm1192_vm13, %vm1191_vm4  ;;  %vm2172_vm4 = vcmp.eq.s32.totalorder %v12098_v23, %v19536_v60 }
 0x2d3   : > { %10418 = vmatprep.mubr.msk.bf16.mxu0 %vm10417_vm0, %v19085_v3  ;;  %vm10421_vm0 = vmpackc.low %vm2147_vm6, %vm2131_vm10  ;;  %10540 = vmatpush1.bf16.msk.msra.mxu0 %vm10539_vm5, %v19085_v3  ;;  %vm2146_vm5 = vcmp.eq.s32.totalorder %v12087_v19, %v19537_v39  ;;  %vm2156_vm6 = vcmp.eq.s32.totalorder %v12095_v22, %v19536_v60 }
 0x2d4   : > { %7346 = vmatprep.subr.bf16.mxu0 %v19089_v6  ;;  %vm10423_vm15 = vmpackc.low %vm2146_vm5, %vm2130_vm8 }
 0x2d5   : > { %vm10425_vm13 = vmpackc.low %vm2179_vm12, %vm2163_vm2  ;;  %vm937_vm2 = vcmp.lt.s32.totalorder %v421_v11, %v12025_v7  ;;  %vm938_vm12 = vcmp.lt.s32.totalorder %v422_v56, %v12025_v7 }
 0x2d6   : > { %vm16035_vm8 = vmpackc.low %vm2172_vm4, %vm2156_vm6 }
 0x2d7   : > { %v19545_v20 = vsel %vm16035_vm8, 4294967295, %v19544_v20 }
 0x2d8   : > { %9940 = vmatmul.mubr.msk.bf16.gmra.mrb[8].mxu1 %vm19543_vm7, %v19085_v3  ;;  %vm2178_vm7 = vcmp.eq.s32.totalorder %v12098_v23, %v19537_v39 }
 0x2d9   : > { %9942 = vmatprep.mubr.msk.bf16.mxu1 %vm9941_vm3, %v19085_v3  ;;  %vm9943_vm3 = vmpackc.low %vm2140_vm14, %vm2124_vm11  ;;  %vm2189_vm11 = vcmp.eq.s32.totalorder %v12122_v27, %v19534_v30  ;;  %vm2205_vm14 = vcmp.eq.s32.totalorder %v12130_v28, %v19534_v30 }
 0x2da   : > { %10420 = vmatmul.mubr.msk.bf16.gmra.mrb[8].mxu0 %vm10419_vm1, %v19085_v3  ;;  %vm2173_vm1 = vcmp.eq.s32.totalorder %v12098_v23, %v19534_v30 }
 0x2db   : > { %10422 = vmatprep.mubr.msk.bf16.mxu0 %vm10421_vm0, %v19085_v3  ;;  %vm9945_vm10 = vmpackc.low %vm2173_vm1, %vm2157_vm9  ;;  %vm2162_vm0 = vcmp.eq.s32.totalorder %v12095_v22, %v19537_v39  ;;  %vm680_vm1 = vcmp.ge.s32.totalorder %v421_v11, %v12019_v5  ;;  %v426_v11 = vadd.s32 1608, %v12011_v2 }
 0x2dc   : > { %vm10427_vm5 = vmpackc.low %vm2178_vm7, %vm2162_vm0  ;;  %vm19546_vm0 = vnez %v19545_v20  ;;  %vm2188_vm7 = vcmp.eq.s32.totalorder %v12122_v27, %v19536_v60  ;;  %v425_v20 = vadd.s32 1600, %v12011_v2 }
 0x2dd   : > { %vm9949_vm9 = vmpackc.low %vm2205_vm14, %vm2189_vm11  ;;  %vm2204_vm11 = vcmp.eq.s32.totalorder %v12130_v28, %v19536_v60  ;;  %vm2194_vm14 = vcmp.eq.s32.totalorder %v12122_v27, %v19537_v39 }
 0x2de   : > { %vm1193_vm6 = vmand %vm680_vm1, %vm937_vm2  ;;  %vm2221_vm1 = vcmp.eq.s32.totalorder %v12194_v35, %v19534_v30  ;;  %vm2243_vm2 = vcmp.eq.s32.totalorder %v12208_v38, %v19535_v43 }
 0x2e0   : > { %9944 = vmatmul.mubr.msk.bf16.gmra.mrb[12].mxu1 %vm9943_vm3, %v19085_v3  ;;  %vm681_vm3 = vcmp.ge.s32.totalorder %v422_v56, %v12019_v5  ;;  %v431_v56 = vadd.s32 1648, %v12011_v2 }
 0x2e1   : > { %9946 = vmatprep.mubr.msk.bf16.mxu1 %vm9945_vm10, %v19085_v3  ;;  %vm2211_vm10 = vcmp.eq.s32.totalorder %v12130_v28, %v19535_v43  ;;  %vm1194_vm4 = vmand %vm681_vm3, %vm938_vm12  ;;  %vm2227_vm3 = vcmp.eq.s32.totalorder %v12194_v35, %v19535_v43 }
 0x2e2   : > { %10424 = vmatmul.mubr.msk.bf16.gmra.mrb[12].mxu0 %vm10423_vm15, %v19085_v3  ;;  %vm2195_vm15 = vcmp.eq.s32.totalorder %v12122_v27, %v19535_v43  ;;  %vm10541_vm8 = vmpackc.low %vm1194_vm4, %vm1193_vm6  ;;  %vm2236_vm6 = vcmp.eq.s32.totalorder %v12208_v38, %v19536_v60 }
 0x2e3   : > { %10426 = vmatprep.mubr.msk.bf16.mxu0 %vm10425_vm13, %v19085_v3  ;;  %vm10429_vm13 = vmpackc.low %vm2211_vm10, %vm2195_vm15  ;;  %10542 = vmatpush1.bf16.msk.msra.mxu0 %vm10541_vm8, %v19085_v3  ;;  %vm2210_vm8 = vcmp.eq.s32.totalorder %v12130_v28, %v19537_v39  ;;  %vm2220_vm10 = vcmp.eq.s32.totalorder %v12194_v35, %v19536_v60 }
 0x2e4   : > { %7348 = vmatprep.subr.bf16.mxu0 %v19089_v6  ;;  %vm10431_vm12 = vmpackc.low %vm2210_vm8, %vm2194_vm14 }
 0x2e5   : > { %vm10433_vm4 = vmpackc.low %vm2243_vm2, %vm2227_vm3  ;;  %vm939_vm3 = vcmp.lt.s32.totalorder %v423_v8, %v12025_v7  ;;  %vm940_vm2 = vcmp.lt.s32.totalorder %v424_v21, %v12025_v7 }
 0x2e6   : > { %vm16089_vm14 = vmpackc.low %vm2236_vm6, %vm2220_vm10 }
 0x2e7   : > { %v19548_v41 = vsel %vm16089_vm14, 4294967295, %v19547_v41 }
 0x2e8   : > { %9948 = vmatmul.mubr.msk.bf16.gmra.mrb[16].mxu1 %vm19546_vm0, %v19085_v3  ;;  %vm2242_vm0 = vcmp.eq.s32.totalorder %v12208_v38, %v19537_v39 }
 0x2e9   : > { %9950 = vmatprep.mubr.msk.bf16.mxu1 %vm9949_vm9, %v19085_v3  ;;  %vm9951_vm9 = vmpackc.low %vm2204_vm11, %vm2188_vm7  ;;  %vm2253_vm7 = vcmp.eq.s32.totalorder %v12268_v55, %v19534_v30  ;;  %vm2269_vm11 = vcmp.eq.s32.totalorder %v12288_v59, %v19534_v30 }
 0x2ea   : > { %10428 = vmatmul.mubr.msk.bf16.gmra.mrb[16].mxu0 %vm10427_vm5, %v19085_v3  ;;  %vm2237_vm5 = vcmp.eq.s32.totalorder %v12208_v38, %v19534_v30 }
 0x2eb   : > { %10430 = vmatprep.mubr.msk.bf16.mxu0 %vm10429_vm13, %v19085_v3  ;;  %vm9953_vm15 = vmpackc.low %vm2237_vm5, %vm2221_vm1  ;;  %vm2226_vm13 = vcmp.eq.s32.totalorder %v12194_v35, %v19537_v39  ;;  %vm682_vm5 = vcmp.ge.s32.totalorder %v423_v8, %v12019_v5  ;;  %v428_v8 = vadd.s32 1624, %v12011_v2 }
 0x2ec   : > { %vm10435_vm8 = vmpackc.low %vm2242_vm0, %vm2226_vm13  ;;  %vm19549_vm13 = vnez %v19548_v41  ;;  %vm2252_vm0 = vcmp.eq.s32.totalorder %v12268_v55, %v19536_v60  ;;  %v427_v41 = vadd.s32 1616, %v12011_v2 }
 0x2ed   : > { %vm9957_vm1 = vmpackc.low %vm2269_vm11, %vm2253_vm7  ;;  %vm2268_vm7 = vcmp.eq.s32.totalorder %v12288_v59, %v19536_v60  ;;  %vm2258_vm11 = vcmp.eq.s32.totalorder %v12268_v55, %v19537_v39 }
 0x2ee   : > { %vm1195_vm10 = vmand %vm682_vm5, %vm939_vm3  ;;  %vm2285_vm5 = vcmp.eq.s32.totalorder %v12305_v63, %v19534_v30  ;;  %vm2307_vm3 = vcmp.eq.s32.totalorder %v12411_v57, %v19535_v43 }
 0x2f0   : > { %9952 = vmatmul.mubr.msk.bf16.gmra.mrb[20].mxu1 %vm9951_vm9, %v19085_v3  ;;  %vm683_vm9 = vcmp.ge.s32.totalorder %v424_v21, %v12019_v5  ;;  %v432_v21 = vadd.s32 1656, %v12011_v2 }
 0x2f1   : > { %9954 = vmatprep.mubr.msk.bf16.mxu1 %vm9953_vm15, %v19085_v3  ;;  %vm2275_vm15 = vcmp.eq.s32.totalorder %v12288_v59, %v19535_v43  ;;  %vm1196_vm6 = vmand %vm683_vm9, %vm940_vm2  ;;  %vm2291_vm9 = vcmp.eq.s32.totalorder %v12305_v63, %v19535_v43 }
 0x2f2   : > { %10432 = vmatmul.mubr.msk.bf16.gmra.mrb[20].mxu0 %vm10431_vm12, %v19085_v3  ;;  %vm2259_vm12 = vcmp.eq.s32.totalorder %v12268_v55, %v19535_v43  ;;  %vm10543_vm14 = vmpackc.low %vm1196_vm6, %vm1195_vm10  ;;  %vm2300_vm10 = vcmp.eq.s32.totalorder %v12411_v57, %v19536_v60  ;;  %v19707_v55 = vld [vmem:[#allocation44_spill] sm:$0xff] }
 0x2f3   : > { %10434 = vmatprep.mubr.msk.bf16.mxu0 %vm10433_vm4, %v19085_v3  ;;  %vm10437_vm4 = vmpackc.low %vm2275_vm15, %vm2259_vm12  ;;  %10544 = vmatpush1.bf16.msk.msra.mxu0 %vm10543_vm14, %v19085_v3  ;;  %vm2274_vm14 = vcmp.eq.s32.totalorder %v12288_v59, %v19537_v39  ;;  %vm2284_vm15 = vcmp.eq.s32.totalorder %v12305_v63, %v19536_v60  ;;  %v462_v59 = vadd.s32 1896, %v12011_v2 }
 0x2f4   : > { %7350 = vmatprep.subr.bf16.mxu0 %v19089_v6  ;;  %vm10439_vm2 = vmpackc.low %vm2274_vm14, %vm2258_vm11 }
 0x2f5   : > { %vm10441_vm6 = vmpackc.low %vm2307_vm3, %vm2291_vm9  ;;  %vm941_vm9 = vcmp.lt.s32.totalorder %v425_v20, %v12025_v7  ;;  %vm942_vm3 = vcmp.lt.s32.totalorder %v426_v11, %v12025_v7 }
 0x2f6   : > { %vm16143_vm11 = vmpackc.low %vm2300_vm10, %vm2284_vm15 }
 0x2f7   : > { %v19551_v50 = vsel %vm16143_vm11, 4294967295, %v19550_v50 }
 0x2f8   : > { %9956 = vmatmul.mubr.msk.bf16.gmra.mrb[24].mxu1 %vm19549_vm13, %v19085_v3  ;;  %vm2306_vm13 = vcmp.eq.s32.totalorder %v12411_v57, %v19537_v39 }
 0x2f9   : > { %9958 = vmatprep.mubr.msk.bf16.mxu1 %vm9957_vm1, %v19085_v3  ;;  %vm9959_vm1 = vmpackc.low %vm2268_vm7, %vm2252_vm0  ;;  %vm2317_vm0 = vcmp.eq.s32.totalorder %v12511_v31, %v19534_v30  ;;  %vm2333_vm7 = vcmp.eq.s32.totalorder %v12530_v46, %v19534_v30 }
 0x2fa   : > { %10436 = vmatmul.mubr.msk.bf16.gmra.mrb[24].mxu0 %vm10435_vm8, %v19085_v3  ;;  %vm2301_vm8 = vcmp.eq.s32.totalorder %v12411_v57, %v19534_v30  ;;  %v440_v57 = vadd.s32 1720, %v12011_v2 }
 0x2fb   : > { %10438 = vmatprep.mubr.msk.bf16.mxu0 %vm10437_vm4, %v19085_v3  ;;  %vm9961_vm12 = vmpackc.low %vm2301_vm8, %vm2285_vm5  ;;  %vm2290_vm4 = vcmp.eq.s32.totalorder %v12305_v63, %v19537_v39  ;;  %vm684_vm8 = vcmp.ge.s32.totalorder %v425_v20, %v12019_v5  ;;  %v19571_v20 = vmov 0  ;;  %v461_v63 = vadd.s32 1888, %v12011_v2 }
 0x2fc   : > { %vm10443_vm14 = vmpackc.low %vm2306_vm13, %vm2290_vm4  ;;  %vm19552_vm4 = vnez %v19551_v50  ;;  %vm2316_vm13 = vcmp.eq.s32.totalorder %v12511_v31, %v19536_v60  ;;  %v19567_v50 = vmov 0 }
 0x2fd   : > { %vm9965_vm5 = vmpackc.low %vm2333_vm7, %vm2317_vm0  ;;  %vm2332_vm0 = vcmp.eq.s32.totalorder %v12530_v46, %v19536_v60  ;;  %vm2322_vm7 = vcmp.eq.s32.totalorder %v12511_v31, %v19537_v39 }
 0x2fe   : > { %vm1197_vm15 = vmand %vm684_vm8, %vm941_vm9  ;;  %vm2349_vm8 = vcmp.eq.s32.totalorder %v12572_v52, %v19534_v30  ;;  %vm2371_vm9 = vcmp.eq.s32.totalorder %v12578_v53, %v19535_v43 }
 0x300   : > { %9960 = vmatmul.mubr.msk.bf16.gmra.mrb[28].mxu1 %vm9959_vm1, %v19085_v3  ;;  %vm685_vm1 = vcmp.ge.s32.totalorder %v426_v11, %v12019_v5  ;;  %v19573_v11 = vmov 0 }
 0x301   : > { %9962 = vmatprep.mubr.msk.bf16.mxu1 %vm9961_vm12, %v19085_v3  ;;  %vm2339_vm12 = vcmp.eq.s32.totalorder %v12530_v46, %v19535_v43  ;;  %vm1198_vm10 = vmand %vm685_vm1, %vm942_vm3  ;;  %vm2355_vm1 = vcmp.eq.s32.totalorder %v12572_v52, %v19535_v43 }
 0x302   : > { %10440 = vmatmul.mubr.msk.bf16.gmra.mrb[28].mxu0 %vm10439_vm2, %v19085_v3  ;;  %vm2323_vm2 = vcmp.eq.s32.totalorder %v12511_v31, %v19535_v43  ;;  %vm10545_vm11 = vmpackc.low %vm1198_vm10, %vm1197_vm15  ;;  %vm2364_vm15 = vcmp.eq.s32.totalorder %v12578_v53, %v19536_v60  ;;  %v19659_v31 = vld [vmem:[#allocation40_spill] sm:$0xff] }
 0x303   : > { %10442 = vmatprep.mubr.msk.bf16.mxu0 %vm10441_vm6, %v19085_v3  ;;  %vm10445_vm6 = vmpackc.low %vm2339_vm12, %vm2323_vm2  ;;  %10546 = vmatpush1.bf16.msk.msra.mxu0 %vm10545_vm11, %v19085_v3  ;;  %vm2338_vm11 = vcmp.eq.s32.totalorder %v12530_v46, %v19537_v39  ;;  %vm2348_vm12 = vcmp.eq.s32.totalorder %v12572_v52, %v19536_v60  ;;  %v458_v46 = vadd.s32 1864, %v12011_v2 }
 0x304   : > { %7352 = vmatprep.subr.bf16.mxu0 %v19089_v6  ;;  %vm10447_vm3 = vmpackc.low %vm2338_vm11, %vm2322_vm7 }
 0x305   : > { %vm10449_vm10 = vmpackc.low %vm2371_vm9, %vm2355_vm1  ;;  %vm943_vm1 = vcmp.lt.s32.totalorder %v427_v41, %v12025_v7  ;;  %vm944_vm9 = vcmp.lt.s32.totalorder %v428_v8, %v12025_v7 }
 0x306   : > { %vm16197_vm7 = vmpackc.low %vm2364_vm15, %vm2348_vm12 }
 0x308   : > { %9964 = vmatmul.mubr.msk.bf16.gmra.mrb[32].mxu1 %vm19552_vm4, %v19085_v3  ;;  %vm2370_vm4 = vcmp.eq.s32.totalorder %v12578_v53, %v19537_v39 }
 0x309   : > { %9966 = vmatprep.mubr.msk.bf16.mxu1 %vm9965_vm5, %v19085_v3  ;;  %vm9967_vm5 = vmpackc.low %vm2332_vm0, %vm2316_vm13  ;;  %vm2381_vm13 = vcmp.eq.s32.totalorder %v12598_v32, %v19534_v30  ;;  %vm2397_vm0 = vcmp.eq.s32.totalorder %v12604_v13, %v19534_v30 }
 0x30a   : > { %10444 = vmatmul.mubr.msk.bf16.gmra.mrb[32].mxu0 %vm10443_vm14, %v19085_v3  ;;  %vm2365_vm14 = vcmp.eq.s32.totalorder %v12578_v53, %v19534_v30  ;;  %v436_v53 = vadd.s32 1688, %v12011_v2 }
 0x30b   : > { %10446 = vmatprep.mubr.msk.bf16.mxu0 %vm10445_vm6, %v19085_v3  ;;  %vm9969_vm2 = vmpackc.low %vm2365_vm14, %vm2349_vm8  ;;  %vm2354_vm6 = vcmp.eq.s32.totalorder %v12572_v52, %v19537_v39  ;;  %vm686_vm14 = vcmp.ge.s32.totalorder %v427_v41, %v12019_v5  ;;  %v429_v41 = vadd.s32 1632, %v12011_v2  ;;  %v457_v52 = vadd.s32 1856, %v12011_v2 }
 0x30c   : > { %vm16204_vm11 = vmpackc.low %vm2370_vm4, %vm2354_vm6  ;;  %vm2380_vm4 = vcmp.eq.s32.totalorder %v12598_v32, %v19536_v60 }
 0x30d   : > { %vm16208_vm8 = vmpackc.low %vm2397_vm0, %vm2381_vm13  ;;  %vm2396_vm13 = vcmp.eq.s32.totalorder %v12604_v13, %v19536_v60  ;;  %vm2386_vm0 = vcmp.eq.s32.totalorder %v12598_v32, %v19537_v39 }
 0x30e   : > { %vm1199_vm12 = vmand %vm686_vm14, %vm943_vm1  ;;  %vm2413_vm14 = vcmp.eq.s32.totalorder %v12626_v25, %v19534_v30 }
 0x30f   : > { %vm16244_vm1 = vmpackc.low %vm2396_vm13, %vm2380_vm4  ;;  %vm2445_vm4 = vcmp.eq.s32.totalorder %v12653_v40, %v19534_v30  ;;  %vm2461_vm13 = vcmp.eq.s32.totalorder %v12660_v54, %v19534_v30 }
 0x310   : > { %9968 = vmatmul.mubr.msk.bf16.gmra.mrb[36].mxu1 %vm9967_vm5, %v19085_v3  ;;  %vm687_vm5 = vcmp.ge.s32.totalorder %v428_v8, %v12019_v5  ;;  %v430_v8 = vadd.s32 1640, %v12011_v2 }
 0x311   : > { %9970 = vmatprep.mubr.msk.bf16.mxu1 %vm9969_vm2, %v19085_v3  ;;  %vm2403_vm2 = vcmp.eq.s32.totalorder %v12604_v13, %v19535_v43  ;;  %vm1200_vm15 = vmand %vm687_vm5, %vm944_vm9  ;;  %vm2429_vm5 = vcmp.eq.s32.totalorder %v12632_v26, %v19534_v30 }
 0x312   : > { %10448 = vmatmul.mubr.msk.bf16.gmra.mrb[36].mxu0 %vm10447_vm3, %v19085_v3  ;;  %vm2387_vm3 = vcmp.eq.s32.totalorder %v12598_v32, %v19535_v43  ;;  %v19612_v32 = vld [vmem:[#allocation36_spill] sm:$0xff] }
 0x313   : > { %10450 = vmatprep.mubr.msk.bf16.mxu0 %vm10449_vm10, %v19085_v3  ;;  %vm10547_vm10 = vmpackc.low %vm1200_vm15, %vm1199_vm12  ;;  %vm2418_vm15 = vcmp.eq.s32.totalorder %v12626_v25, %v19537_v39 }
 0x314   : > { %vm10453_vm6 = vmpackc.low %vm2403_vm2, %vm2387_vm3  ;;  %10548 = vmatpush1.bf16.msk.msra.mxu0 %vm10547_vm10, %v19085_v3  ;;  %vm2412_vm3 = vcmp.eq.s32.totalorder %v12626_v25, %v19536_v60  ;;  %vm2428_vm2 = vcmp.eq.s32.totalorder %v12632_v26, %v19536_v60  ;;  %vm2434_vm10 = vcmp.eq.s32.totalorder %v12632_v26, %v19537_v39 }
 0x315   : > { %7354 = vmatprep.subr.bf16.mxu0 %v19089_v6  ;;  %vm16260_vm12 = vmpackc.low %vm2429_vm5, %vm2413_vm14  ;;  %vm2467_vm14 = vcmp.eq.s32.totalorder %v12660_v54, %v19535_v43 }
 0x316   : > { %vm16289_vm5 = vmpackc.low %vm2434_vm10, %vm2418_vm15  ;;  %vm689_vm15 = vcmp.ge.s32.totalorder %v430_v8, %v12019_v5  ;;  %vm946_vm10 = vcmp.lt.s32.totalorder %v430_v8, %v12025_v7  ;;  %v19581_v8 = vmov 0 }
 0x318   : > { %9972 = vmatmul.mubr.msk.bf16.gmra.mrb[40].mxu1 %vm16197_vm7, %v19085_v3  ;;  %vm2402_vm7 = vcmp.eq.s32.totalorder %v12604_v13, %v19537_v39  ;;  %v450_v13 = vadd.s32 1800, %v12011_v2 }
 0x319   : > { %9974 = vmatprep.mubr.msk.bf16.mxu1 %vm16208_vm8, %v19085_v3  ;;  %vm2435_vm8 = vcmp.eq.s32.totalorder %v12632_v26, %v19535_v43  ;;  %vm16252_vm9 = vmpackc.low %vm2402_vm7, %vm2386_vm0  ;;  %vm2451_vm7 = vcmp.eq.s32.totalorder %v12653_v40, %v19535_v43  ;;  %v19569_v26 = vmov 0 }
 0x31a   : > { %10452 = vmatmul.mubr.msk.bf16.gmra.mrb[40].mxu0 %vm16204_vm11, %v19085_v3  ;;  %vm2419_vm11 = vcmp.eq.s32.totalorder %v12626_v25, %v19535_v43  ;;  %vm16278_vm0 = vmpackc.low %vm2428_vm2, %vm2412_vm3  ;;  %v19570_v26 = vsel %vm16289_vm5, 4294967295, %v19569_v26  ;;  %vm688_vm3 = vcmp.ge.s32.totalorder %v429_v41, %v12019_v5  ;;  %vm945_vm2 = vcmp.lt.s32.totalorder %v429_v41, %v12025_v7 }
 0x31b   : > { %10454 = vmatprep.mubr.msk.bf16.mxu0 %vm10453_vm6, %v19085_v3  ;;  %vm16270_vm6 = vmpackc.low %vm2435_vm8, %vm2419_vm11  ;;  %v19568_v50 = vsel %vm16278_vm0, 4294967295, %v19567_v50  ;;  %v449_v25 = vadd.s32 1792, %v12011_v2  ;;  %vm19575_vm5 = vcmp.eq.s32.totalorder %v12653_v40, %v19536_v60  ;;  %vm19576_vm0 = vcmp.eq.s32.totalorder %v12660_v54, %v19536_v60 }
 0x31c   : > { %vm1202_vm11 = vmand %vm689_vm15, %vm946_vm10  ;;  %v19577_v41 = vmov 0 }
 0x31d   : > { %vm965_vm8 = vcmp.lt.s32.totalorder %v449_v25, %v12025_v7 }
 0x320   : > { %9976 = vmatmul.mubr.msk.bf16.gmra.mrb[44].mxu1 %vm16244_vm1, %v19085_v3  ;;  %vm16305_vm1 = vmpackc.low %vm2461_vm13, %vm2445_vm4  ;;  %vm2466_vm4 = vcmp.eq.s32.totalorder %v12660_v54, %v19537_v39  ;;  %vm2477_vm13 = vcmp.eq.s32.totalorder %v12679_v17, %v19534_v30  ;;  %v19585_v54 = vmov 0 }
 0x321   : > { %9978 = vmatprep.mubr.msk.bf16.mxu1 %vm16260_vm12, %v19085_v3  ;;  %v19572_v20 = vsel %vm16305_vm1, 4294967295, %v19571_v20  ;;  %vm2450_vm12 = vcmp.eq.s32.totalorder %v12653_v40, %v19537_v39  ;;  %vm966_vm1 = vcmp.lt.s32.totalorder %v450_v13, %v12025_v7  ;;  %v451_v40 = vadd.s32 1808, %v12011_v2 }
 0x322   : > { %10456 = vmatmul.mubr.msk.bf16.gmra.mrb[44].mxu0 %vm16252_vm9, %v19085_v3  ;;  %vm16322_vm9 = vmpackc.low %vm2467_vm14, %vm2451_vm7  ;;  %vm708_vm14 = vcmp.ge.s32.totalorder %v449_v25, %v12019_v5  ;;  %v19579_v25 = vmov 0 }
 0x323   : > { %10458 = vmatprep.mubr.msk.bf16.mxu0 %vm16270_vm6, %v19085_v3  ;;  %v19574_v11 = vsel %vm16322_vm9, 4294967295, %v19573_v11  ;;  %vm2493_vm6 = vcmp.eq.s32.totalorder %v12686_v29, %v19534_v30  ;;  %vm1201_vm7 = vmand %vm688_vm3, %vm945_vm2  ;;  %vm709_vm9 = vcmp.ge.s32.totalorder %v450_v13, %v12019_v5  ;;  %v19583_v13 = vmov 0 }
 0x324   : > { %vm16352_vm3 = vmpackc.low %vm19576_vm0, %vm19575_vm5  ;;  %vm690_vm5 = vcmp.ge.s32.totalorder %v431_v56, %v12019_v5 }
 0x325   : > { %v19578_v41 = vsel %vm16352_vm3, 4294967295, %v19577_v41  ;;  %vm10549_vm2 = vmpackc.low %vm1202_vm11, %vm1201_vm7  ;;  %vm947_vm3 = vcmp.lt.s32.totalorder %v431_v56, %v12025_v7  ;;  %vm691_vm11 = vcmp.ge.s32.totalorder %v432_v21, %v12019_v5  ;;  %v452_v56 = vadd.s32 1816, %v12011_v2 }
 0x326   : > { %vm16356_vm10 = vmpackc.low %vm2466_vm4, %vm2450_vm12  ;;  %10550 = vmatpush1.bf16.msk.msra.mxu0 %vm10549_vm2, %v19085_v3  ;;  %vm948_vm12 = vcmp.lt.s32.totalorder %v432_v21, %v12025_v7  ;;  %vm19589_vm4 = vnez %v19572_v20  ;;  %vm19590_vm2 = vnez %v19574_v11  ;;  %v19594_v20 = vmov 0 }
 0x327   : > { %v19580_v25 = vsel %vm16356_vm10, 4294967295, %v19579_v25  ;;  %vm16360_vm15 = vmpackc.low %vm2493_vm6, %vm2477_vm13  ;;  %7356 = vmatprep.subr.bf16.mxu0 %v19089_v6  ;;  %vm2483_vm13 = vcmp.eq.s32.totalorder %v12679_v17, %v19535_v43  ;;  %vm2499_vm6 = vcmp.eq.s32.totalorder %v12686_v29, %v19535_v43  ;;  %v19596_v11 = vmov 0 }
 0x328   : > { %v19582_v8 = vsel %vm16360_vm15, 4294967295, %v19581_v8  ;;  %vm16365_vm0 = vmand %vm708_vm14, %vm965_vm8  ;;  %vm19587_vm8 = vnez %v19568_v50  ;;  %vm967_vm15 = vcmp.lt.s32.totalorder %v451_v40, %v12025_v7  ;;  %v433_v50 = vadd.s32 1664, %v12011_v2 }
 0x329   : > { %v19584_v13 = vsel %vm16365_vm0, 4294967295, %v19583_v13  ;;  %vm16371_vm7 = vmand %vm709_vm9, %vm966_vm1  ;;  %9980 = vmatmul.mubr.msk.bf16.gmra.mrb[48].mxu1 %vm19587_vm8, %v19085_v3  ;;  %vm19588_vm9 = vnez %v19570_v26  ;;  %vm710_vm8 = vcmp.ge.s32.totalorder %v451_v40, %v12019_v5  ;;  %v434_v40 = vadd.s32 1672, %v12011_v2 }
 0x32a   : > { %v19586_v54 = vsel %vm16371_vm7, 4294967295, %v19585_v54  ;;  %vm18894_vm1 = vmpackc.low %vm16371_vm7, %vm16365_vm0  ;;  %10460 = vmatmul.mubr.msk.bf16.gmra.mrb[48].mxu0 %vm19588_vm9, %v19085_v3  ;;  %9982 = vmatprep.mubr.msk.bf16.mxu1 %vm19589_vm4, %v19085_v3  ;;  %vm2492_vm9 = vcmp.eq.s32.totalorder %v12686_v29, %v19536_v60  ;;  %vm2498_vm4 = vcmp.eq.s32.totalorder %v12686_v29, %v19537_v39  ;;  %v19598_v21 = vmov 0 }
 0x32b   : > { %vm1203_vm14 = vmand %vm690_vm5, %vm947_vm3  ;;  %10462 = vmatprep.mubr.msk.bf16.mxu0 %vm19590_vm2, %v19085_v3  ;;  %10922 = vmatpush1.bf16.msk.msra.mxu1 %vm18894_vm1, %v19085_v3  ;;  %vm2482_vm5 = vcmp.eq.s32.totalorder %v12679_v17, %v19537_v39  ;;  %v453_v29 = vadd.s32 1824, %v12011_v2  ;;  %v435_v26 = vadd.s32 1680, %v12011_v2  ;;  %vm19616_vm7 = vcmp.eq.s32.totalorder %v12704_v36, %v19536_v60 }
 0x32c   : > { %vm1204_vm3 = vmand %vm691_vm11, %vm948_vm12  ;;  %10907 = vmatprep.subr.bf16.mxu1 %v19089_v6  ;;  %vm711_vm11 = vcmp.ge.s32.totalorder %v452_v56, %v12019_v5  ;;  %vm968_vm12 = vcmp.lt.s32.totalorder %v452_v56, %v12025_v7  ;;  %v19600_v56 = vmov 0 }
 0x32d   : > { %vm10551_vm2 = vmpackc.low %vm1204_vm3, %vm1203_vm14  ;;  %vm19593_vm14 = vcmp.eq.s32.totalorder %v12679_v17, %v19536_v60  ;;  %v454_v17 = vadd.s32 1832, %v12011_v2 }
 0x32e   : > { %vm16419_vm10 = vmpackc.low %vm2499_vm6, %vm2483_vm13  ;;  %10552 = vmatpush1.bf16.msk.msra.mxu0 %vm10551_vm2, %v19085_v3  ;;  %vm2509_vm6 = vcmp.eq.s32.totalorder %v12704_v36, %v19534_v30  ;;  %vm2525_vm2 = vcmp.eq.s32.totalorder %v12710_v37, %v19534_v30 }
 0x32f   : > { %vm16430_vm3 = vmpackc.low %vm2492_vm9, %vm19593_vm14  ;;  %7358 = vmatprep.subr.bf16.mxu0 %v19089_v6  ;;  %vm2515_vm9 = vcmp.eq.s32.totalorder %v12704_v36, %v19535_v43  ;;  %vm712_vm14 = vcmp.ge.s32.totalorder %v453_v29, %v12019_v5  ;;  %vm970_vm0 = vcmp.lt.s32.totalorder %v454_v17, %v12025_v7 }
 0x330   : > { %v19595_v20 = vsel %vm16430_vm3, 4294967295, %v19594_v20  ;;  %vm16436_vm13 = vmpackc.low %vm2498_vm4, %vm2482_vm5  ;;  %vm19602_vm4 = vnez %v19578_v41  ;;  %v19605_v41 = vmov 0 }
 0x331   : > { %v19597_v11 = vsel %vm16436_vm13, 4294967295, %v19596_v11  ;;  %vm16444_vm1 = vmand %vm710_vm8, %vm967_vm15  ;;  %9984 = vmatmul.mubr.msk.bf16.gmra.mrb[52].mxu1 %vm19602_vm4, %v19085_v3  ;;  %vm19604_vm4 = vnez %v19582_v8  ;;  %vm950_vm8 = vcmp.lt.s32.totalorder %v434_v40, %v12025_v7  ;;  %v19610_v8 = vld [vmem:[#allocation35_spill] sm:$0xff] }
 0x332   : > { %v19599_v21 = vsel %vm16444_vm1, 4294967295, %v19598_v21  ;;  %vm16452_vm5 = vmand %vm711_vm11, %vm968_vm12  ;;  %vm19603_vm12 = vnez %v19580_v25  ;;  %9986 = vmatprep.mubr.msk.bf16.mxu1 %vm19604_vm4, %v19085_v3  ;;  %v19608_v25 = vmov 0  ;;  %vm969_vm11 = vcmp.lt.s32.totalorder %v453_v29, %v12025_v7 }
 0x333   : > { %v19601_v56 = vsel %vm16452_vm5, 4294967295, %v19600_v56  ;;  %10464 = vmatmul.mubr.msk.bf16.gmra.mrb[52].mxu0 %vm19603_vm12, %v19085_v3  ;;  %vm16478_vm15 = vmpackc.low %vm2525_vm2, %vm2509_vm6  ;;  %vm19607_vm6 = vcmp.eq.s32.totalorder %v12710_v37, %v19535_v43  ;;  %vm19614_vm12 = vcmp.ge.s32.totalorder %v433_v50, %v12019_v5  ;;  %v19622_v29 = vmov 0 }
 0x334   : > { %v19606_v41 = vsel %vm16478_vm15, 4294967295, %v19605_v41  ;;  %10466 = vmatprep.mubr.msk.bf16.mxu0 %vm16419_vm10, %v19085_v3  ;;  %vm16495_vm2 = vmpackc.low %vm19607_vm6, %vm2515_vm9  ;;  %vm2557_vm9 = vcmp.eq.s32.totalorder %v19612_v32, %v19534_v30  ;;  %vm19613_vm6 = vcmp.lt.s32.totalorder %v433_v50, %v12025_v7  ;;  %v19618_v50 = vmov 0 }
 0x335   : > { %v19609_v25 = vsel %vm16495_vm2, 4294967295, %v19608_v25  ;;  %vm19611_vm10 = vmpackc.low %vm16452_vm5, %vm16444_vm1  ;;  %vm713_vm5 = vcmp.ge.s32.totalorder %v454_v17, %v12019_v5  ;;  %vm19620_vm15 = vcmp.eq.s32.totalorder %v12704_v36, %v19537_v39  ;;  %vm19624_vm13 = vcmp.eq.s32.totalorder %v19610_v8, %v19534_v30 }
 0x336   : > { %10923 = vmatpush1.bf16.msk.msra.mxu1 %vm19611_vm10, %v19085_v3  ;;  %vm1205_vm4 = vmand %vm19614_vm12, %vm19613_vm6  ;;  %vm19615_vm10 = vcmp.ge.s32.totalorder %v434_v40, %v12019_v5  ;;  %vm19617_vm12 = vcmp.eq.s32.totalorder %v12710_v37, %v19536_v60  ;;  %v19625_v17 = vmov 0  ;;  %v19627_v40 = vmov 0 }
 0x337   : > { %10908 = vmatprep.subr.bf16.mxu1 %v19089_v6  ;;  %vm1206_vm1 = vmand %vm19615_vm10, %vm950_vm8  ;;  %vm19621_vm8 = vcmp.eq.s32.totalorder %v12710_v37, %v19537_v39  ;;  %v19629_v37 = vmov 0  ;;  %v455_v36 = vadd.s32 1840, %v12011_v2 }
 0x338   : > { %vm16532_vm6 = vmpackc.low %vm19617_vm12, %vm19616_vm7  ;;  %vm2563_vm12 = vcmp.eq.s32.totalorder %v19612_v32, %v19535_v43 }
 0x339   : > { %v19619_v50 = vsel %vm16532_vm6, 4294967295, %v19618_v50  ;;  %vm10553_vm2 = vmpackc.low %vm1206_vm1, %vm1205_vm4  ;;  %vm694_vm1 = vcmp.ge.s32.totalorder %v435_v26, %v12019_v5 }
 0x33a   : > { %vm16542_vm10 = vmpackc.low %vm19621_vm8, %vm19620_vm15  ;;  %10554 = vmatpush1.bf16.msk.msra.mxu0 %vm10553_vm2, %v19085_v3  ;;  %vm951_vm15 = vcmp.lt.s32.totalorder %v435_v26, %v12025_v7  ;;  %v456_v26 = vadd.s32 1848, %v12011_v2  ;;  %vm2547_vm2 = vcmp.eq.s32.totalorder %v19610_v8, %v19535_v43 }
 0x33b   : > { %v19623_v29 = vsel %vm16542_vm10, 4294967295, %v19622_v29  ;;  %vm16549_vm3 = vmpackc.low %vm2557_vm9, %vm19624_vm13  ;;  %7360 = vmatprep.subr.bf16.mxu0 %v19089_v6  ;;  %vm952_vm9 = vcmp.lt.s32.totalorder %v436_v53, %v12025_v7  ;;  %vm971_vm10 = vcmp.lt.s32.totalorder %v455_v36, %v12025_v7 }
 0x33c   : > { %v19626_v17 = vsel %vm16549_vm3, 4294967295, %v19625_v17  ;;  %vm16554_vm7 = vmand %vm712_vm14, %vm969_vm11  ;;  %vm19631_vm14 = vnez %v19595_v20  ;;  %vm19633_vm11 = vnez %v19606_v41  ;;  %vm714_vm3 = vcmp.ge.s32.totalorder %v455_v36, %v12019_v5 }
 0x33d   : > { %v19628_v40 = vsel %vm16554_vm7, 4294967295, %v19627_v40  ;;  %vm16560_vm4 = vmand %vm713_vm5, %vm970_vm0  ;;  %9988 = vmatmul.mubr.msk.bf16.gmra.mrb[56].mxu1 %vm19631_vm14, %v19085_v3  ;;  %vm19632_vm5 = vnez %v19597_v11  ;;  %vm19634_vm14 = vnez %v19609_v25  ;;  %v19639_v11 = vmov 0  ;;  %v19643_v25 = vld [vmem:[#allocation37_spill] sm:$0xff] }
 0x33e   : > { %v19630_v37 = vsel %vm16560_vm4, 4294967295, %v19629_v37  ;;  %vm18911_vm0 = vmpackc.low %vm16560_vm4, %vm16554_vm7  ;;  %10468 = vmatmul.mubr.msk.bf16.gmra.mrb[56].mxu0 %vm19632_vm5, %v19085_v3  ;;  %9990 = vmatprep.mubr.msk.bf16.mxu1 %vm19633_vm11, %v19085_v3  ;;  %vm2556_vm5 = vcmp.eq.s32.totalorder %v19612_v32, %v19536_v60  ;;  %vm19635_vm11 = vcmp.ge.s32.totalorder %v436_v53, %v12019_v5  ;;  %v437_v53 = vadd.s32 1696, %v12011_v2 }
 0x33f   : > { %vm1207_vm8 = vmand %vm694_vm1, %vm951_vm15  ;;  %10470 = vmatprep.mubr.msk.bf16.mxu0 %vm19634_vm14, %v19085_v3  ;;  %10924 = vmatpush1.bf16.msk.msra.mxu1 %vm18911_vm0, %v19085_v3  ;;  %vm2546_vm15 = vcmp.eq.s32.totalorder %v19610_v8, %v19537_v39  ;;  %vm2562_vm14 = vcmp.eq.s32.totalorder %v19612_v32, %v19537_v39  ;;  %v438_v36 = vadd.s32 1704, %v12011_v2  ;;  %v19641_v41 = vmov 0 }
 0x340   : > { %vm1208_vm1 = vmand %vm19635_vm11, %vm952_vm9  ;;  %10909 = vmatprep.subr.bf16.mxu1 %v19089_v6  ;;  %vm715_vm9 = vcmp.ge.s32.totalorder %v456_v26, %v12019_v5  ;;  %vm972_vm11 = vcmp.lt.s32.totalorder %v456_v26, %v12025_v7  ;;  %v19644_v26 = vld [vmem:[#allocation38_spill] sm:$0xff]  ;;  %v19645_v32 = vmov 0  ;;  %v439_v20 = vadd.s32 1712, %v12011_v2 }
 0x341   : > { %vm10555_vm13 = vmpackc.low %vm1208_vm1, %vm1207_vm8  ;;  %vm19638_vm8 = vcmp.eq.s32.totalorder %v19610_v8, %v19536_v60  ;;  %v19647_v8 = vmov 0  ;;  %vm974_vm7 = vcmp.lt.s32.totalorder %v458_v46, %v12025_v7  ;;  %vm19663_vm4 = vcmp.eq.s32.totalorder %v19643_v25, %v19536_v60 }
 0x342   : > { %vm16608_vm6 = vmpackc.low %vm2563_vm12, %vm2547_vm2  ;;  %10556 = vmatpush1.bf16.msk.msra.mxu0 %vm10555_vm13, %v19085_v3  ;;  %vm2573_vm13 = vcmp.eq.s32.totalorder %v19643_v25, %v19534_v30  ;;  %vm2589_vm12 = vcmp.eq.s32.totalorder %v19644_v26, %v19534_v30 }
 0x343   : > { %vm16619_vm1 = vmpackc.low %vm2556_vm5, %vm19638_vm8  ;;  %7362 = vmatprep.subr.bf16.mxu0 %v19089_v6  ;;  %vm2579_vm5 = vcmp.eq.s32.totalorder %v19643_v25, %v19535_v43  ;;  %vm716_vm8 = vcmp.ge.s32.totalorder %v457_v52, %v12019_v5 }
 0x344   : > { %v19640_v11 = vsel %vm16619_vm1, 4294967295, %v19639_v11  ;;  %vm16625_vm2 = vmpackc.low %vm2562_vm14, %vm2546_vm15  ;;  %vm19649_vm14 = vnez %v19619_v50  ;;  %v19652_v50 = vmov 0 }
 0x345   : > { %v19642_v41 = vsel %vm16625_vm2, 4294967295, %v19641_v41  ;;  %vm16633_vm0 = vmand %vm714_vm3, %vm971_vm10  ;;  %9992 = vmatmul.mubr.msk.bf16.gmra.mrb[60].mxu1 %vm19649_vm14, %v19085_v3  ;;  %vm19651_vm14 = vnez %v19626_v17  ;;  %vm954_vm10 = vcmp.lt.s32.totalorder %v438_v36, %v12025_v7  ;;  %v19657_v17 = vld [vmem:[#allocation39_spill] sm:$0xff] }
 0x346   : > { %v19646_v32 = vsel %vm16633_vm0, 4294967295, %v19645_v32  ;;  %vm16641_vm15 = vmand %vm715_vm9, %vm972_vm11  ;;  %vm19650_vm11 = vnez %v19623_v29  ;;  %9994 = vmatprep.mubr.msk.bf16.mxu1 %vm19651_vm14, %v19085_v3  ;;  %v19655_v29 = vmov 0  ;;  %vm973_vm9 = vcmp.lt.s32.totalorder %v457_v52, %v12025_v7 }
 0x347   : > { %v19648_v8 = vsel %vm16641_vm15, 4294967295, %v19647_v8  ;;  %10472 = vmatmul.mubr.msk.bf16.gmra.mrb[60].mxu0 %vm19650_vm11, %v19085_v3  ;;  %vm16667_vm3 = vmpackc.low %vm2589_vm12, %vm2573_vm13  ;;  %vm19654_vm13 = vcmp.eq.s32.totalorder %v19644_v26, %v19535_v43  ;;  %vm19661_vm11 = vcmp.ge.s32.totalorder %v437_v53, %v12019_v5  ;;  %v19669_v52 = vmov 0 }
 0x348   : > { %v19653_v50 = vsel %vm16667_vm3, 4294967295, %v19652_v50  ;;  %10474 = vmatprep.mubr.msk.bf16.mxu0 %vm16608_vm6, %v19085_v3  ;;  %vm16684_vm12 = vmpackc.low %vm19654_vm13, %vm2579_vm5  ;;  %vm2621_vm5 = vcmp.eq.s32.totalorder %v19659_v31, %v19534_v30  ;;  %vm19660_vm13 = vcmp.lt.s32.totalorder %v437_v53, %v12025_v7  ;;  %v19665_v53 = vmov 0 }
 0x349   : > { %v19656_v29 = vsel %vm16684_vm12, 4294967295, %v19655_v29  ;;  %vm19658_vm6 = vmpackc.low %vm16641_vm15, %vm16633_vm0  ;;  %vm717_vm15 = vcmp.ge.s32.totalorder %v458_v46, %v12019_v5  ;;  %vm19667_vm3 = vcmp.eq.s32.totalorder %v19643_v25, %v19537_v39  ;;  %vm19671_vm2 = vcmp.eq.s32.totalorder %v19657_v17, %v19534_v30 }
 0x34a   : > { %10925 = vmatpush1.bf16.msk.msra.mxu1 %vm19658_vm6, %v19085_v3  ;;  %vm1209_vm14 = vmand %vm19661_vm11, %vm19660_vm13  ;;  %vm19662_vm6 = vcmp.ge.s32.totalorder %v438_v36, %v12019_v5  ;;  %vm19664_vm11 = vcmp.eq.s32.totalorder %v19644_v26, %v19536_v60  ;;  %v19672_v46 = vmov 0  ;;  %v19674_v36 = vmov 0 }
 0x34b   : > { %10910 = vmatprep.subr.bf16.mxu1 %v19089_v6  ;;  %vm1210_vm0 = vmand %vm19662_vm6, %vm954_vm10  ;;  %vm19668_vm10 = vcmp.eq.s32.totalorder %v19644_v26, %v19537_v39  ;;  %v19676_v26 = vmov 0  ;;  %v459_v25 = vadd.s32 1872, %v12011_v2 }
 0x34c   : > { %vm16721_vm13 = vmpackc.low %vm19664_vm11, %vm19663_vm4  ;;  %vm2627_vm11 = vcmp.eq.s32.totalorder %v19659_v31, %v19535_v43 }
 0x34d   : > { %v19666_v53 = vsel %vm16721_vm13, 4294967295, %v19665_v53  ;;  %vm10557_vm12 = vmpackc.low %vm1210_vm0, %vm1209_vm14  ;;  %vm698_vm0 = vcmp.ge.s32.totalorder %v439_v20, %v12019_v5 }
 0x34e   : > { %vm16731_vm6 = vmpackc.low %vm19668_vm10, %vm19667_vm3  ;;  %10558 = vmatpush1.bf16.msk.msra.mxu0 %vm10557_vm12, %v19085_v3  ;;  %vm955_vm3 = vcmp.lt.s32.totalorder %v439_v20, %v12025_v7  ;;  %v460_v20 = vadd.s32 1880, %v12011_v2  ;;  %vm2611_vm12 = vcmp.eq.s32.totalorder %v19657_v17, %v19535_v43 }
 0x34f   : > { %v19670_v52 = vsel %vm16731_vm6, 4294967295, %v19669_v52  ;;  %vm16738_vm1 = vmpackc.low %vm2621_vm5, %vm19671_vm2  ;;  %7364 = vmatprep.subr.bf16.mxu0 %v19089_v6  ;;  %vm956_vm5 = vcmp.lt.s32.totalorder %v440_v57, %v12025_v7  ;;  %vm975_vm6 = vcmp.lt.s32.totalorder %v459_v25, %v12025_v7 }
 0x350   : > { %v19673_v46 = vsel %vm16738_vm1, 4294967295, %v19672_v46  ;;  %vm16743_vm4 = vmand %vm716_vm8, %vm973_vm9  ;;  %vm19678_vm8 = vnez %v19640_v11  ;;  %vm19680_vm9 = vnez %v19653_v50  ;;  %vm718_vm1 = vcmp.ge.s32.totalorder %v459_v25, %v12019_v5 }
 0x351   : > { %v19675_v36 = vsel %vm16743_vm4, 4294967295, %v19674_v36  ;;  %vm16749_vm14 = vmand %vm717_vm15, %vm974_vm7  ;;  %9996 = vmatmul.mubr.msk.bf16.gmra.mrb[64].mxu1 %vm19678_vm8, %v19085_v3  ;;  %vm19679_vm15 = vnez %v19642_v41  ;;  %vm19681_vm8 = vnez %v19656_v29  ;;  %v19686_v41 = vmov 0  ;;  %v19690_v29 = vld [vmem:[#allocation41_spill] sm:$0xff] }
 0x352   : > { %v19677_v26 = vsel %vm16749_vm14, 4294967295, %v19676_v26  ;;  %vm18928_vm7 = vmpackc.low %vm16749_vm14, %vm16743_vm4  ;;  %10476 = vmatmul.mubr.msk.bf16.gmra.mrb[64].mxu0 %vm19679_vm15, %v19085_v3  ;;  %9998 = vmatprep.mubr.msk.bf16.mxu1 %vm19680_vm9, %v19085_v3  ;;  %vm2620_vm15 = vcmp.eq.s32.totalorder %v19659_v31, %v19536_v60  ;;  %vm19682_vm9 = vcmp.ge.s32.totalorder %v440_v57, %v12019_v5  ;;  %v441_v57 = vadd.s32 1728, %v12011_v2 }
 0x353   : > { %vm1211_vm10 = vmand %vm698_vm0, %vm955_vm3  ;;  %10478 = vmatprep.mubr.msk.bf16.mxu0 %vm19681_vm8, %v19085_v3  ;;  %10926 = vmatpush1.bf16.msk.msra.mxu1 %vm18928_vm7, %v19085_v3  ;;  %vm2610_vm3 = vcmp.eq.s32.totalorder %v19657_v17, %v19537_v39  ;;  %vm2626_vm8 = vcmp.eq.s32.totalorder %v19659_v31, %v19537_v39  ;;  %v442_v25 = vadd.s32 1736, %v12011_v2  ;;  %v19688_v50 = vmov 0 }
 0x354   : > { %vm1212_vm0 = vmand %vm19682_vm9, %vm956_vm5  ;;  %10911 = vmatprep.subr.bf16.mxu1 %v19089_v6  ;;  %vm719_vm5 = vcmp.ge.s32.totalorder %v460_v20, %v12019_v5  ;;  %vm976_vm9 = vcmp.lt.s32.totalorder %v460_v20, %v12025_v7  ;;  %v19691_v20 = vld [vmem:[#allocation42_spill] sm:$0xff]  ;;  %v19692_v31 = vmov 0  ;;  %v443_v11 = vadd.s32 1744, %v12011_v2 }
 0x355   : > { %vm10559_vm2 = vmpackc.low %vm1212_vm0, %vm1211_vm10  ;;  %vm19685_vm10 = vcmp.eq.s32.totalorder %v19657_v17, %v19536_v60  ;;  %v19695_v17 = vmov 0  ;;  %vm978_vm4 = vcmp.lt.s32.totalorder %v462_v59, %v12025_v7  ;;  %vm19711_vm14 = vcmp.eq.s32.totalorder %v19690_v29, %v19536_v60 }
 0x356   : > { %vm16797_vm13 = vmpackc.low %vm2627_vm11, %vm2611_vm12  ;;  %10560 = vmatpush1.bf16.msk.msra.mxu0 %vm10559_vm2, %v19085_v3  ;;  %vm2637_vm2 = vcmp.eq.s32.totalorder %v19690_v29, %v19534_v30  ;;  %vm2653_vm11 = vcmp.eq.s32.totalorder %v19691_v20, %v19534_v30 }
 0x357   : > { %vm16808_vm0 = vmpackc.low %vm2620_vm15, %vm19685_vm10  ;;  %7366 = vmatprep.subr.bf16.mxu0 %v19089_v6  ;;  %vm2643_vm15 = vcmp.eq.s32.totalorder %v19690_v29, %v19535_v43  ;;  %vm720_vm10 = vcmp.ge.s32.totalorder %v461_v63, %v12019_v5 }
 0x358   : > { %v19687_v41 = vsel %vm16808_vm0, 4294967295, %v19686_v41  ;;  %vm16814_vm12 = vmpackc.low %vm2626_vm8, %vm2610_vm3  ;;  %vm19697_vm8 = vnez %v19666_v53  ;;  %v19700_v53 = vmov 0 }
 0x359   : > { %v19689_v50 = vsel %vm16814_vm12, 4294967295, %v19688_v50  ;;  %vm16822_vm7 = vmand %vm718_vm1, %vm975_vm6  ;;  %10000 = vmatmul.mubr.msk.bf16.gmra.mrb[68].mxu1 %vm19697_vm8, %v19085_v3  ;;  %vm19699_vm8 = vnez %v19673_v46  ;;  %vm958_vm6 = vcmp.lt.s32.totalorder %v442_v25, %v12025_v7  ;;  %v19705_v46 = vld [vmem:[#allocation43_spill] sm:$0xff] }
 0x35a   : > { %v19693_v31 = vsel %vm16822_vm7, 4294967295, %v19692_v31  ;;  %vm16830_vm3 = vmand %vm719_vm5, %vm976_vm9  ;;  %vm19698_vm9 = vnez %v19670_v52  ;;  %10002 = vmatprep.mubr.msk.bf16.mxu1 %vm19699_vm8, %v19085_v3  ;;  %v19703_v52 = vmov 0  ;;  %vm977_vm5 = vcmp.lt.s32.totalorder %v461_v63, %v12025_v7 }
 0x35b   : > { %19694 = vst [vmem:[#allocation53_spill] sm:$0xff] %v19693_v31  ;;  %v19696_v17 = vsel %vm16830_vm3, 4294967295, %v19695_v17  ;;  %10480 = vmatmul.mubr.msk.bf16.gmra.mrb[68].mxu0 %vm19698_vm9, %v19085_v3  ;;  %vm16856_vm1 = vmpackc.low %vm2653_vm11, %vm2637_vm2  ;;  %vm19702_vm2 = vcmp.eq.s32.totalorder %v19691_v20, %v19535_v43  ;;  %vm19709_vm9 = vcmp.ge.s32.totalorder %v441_v57, %v12019_v5  ;;  %v444_v31 = vadd.s32 1752, %v12011_v2 }
 0x35c   : > { %v19701_v53 = vsel %vm16856_vm1, 4294967295, %v19700_v53  ;;  %10482 = vmatprep.mubr.msk.bf16.mxu0 %vm16797_vm13, %v19085_v3  ;;  %vm16873_vm11 = vmpackc.low %vm19702_vm2, %vm2643_vm15  ;;  %vm2685_vm15 = vcmp.eq.s32.totalorder %v19707_v55, %v19534_v30  ;;  %vm19708_vm2 = vcmp.lt.s32.totalorder %v441_v57, %v12025_v7  ;;  %v19713_v57 = vmov 0 }
 0x35d   : > { %v19704_v52 = vsel %vm16873_vm11, 4294967295, %v19703_v52  ;;  %vm19706_vm13 = vmpackc.low %vm16830_vm3, %vm16822_vm7  ;;  %vm721_vm3 = vcmp.ge.s32.totalorder %v462_v59, %v12019_v5  ;;  %vm19715_vm1 = vcmp.eq.s32.totalorder %v19690_v29, %v19537_v39  ;;  %v19717_v63 = vmov 0 }
 0x35e   : > { %10927 = vmatpush1.bf16.msk.msra.mxu1 %vm19706_vm13, %v19085_v3  ;;  %vm1213_vm8 = vmand %vm19709_vm9, %vm19708_vm2  ;;  %vm19710_vm13 = vcmp.ge.s32.totalorder %v442_v25, %v12019_v5  ;;  %vm19712_vm9 = vcmp.eq.s32.totalorder %v19691_v20, %v19536_v60  ;;  %vm19719_vm12 = vcmp.eq.s32.totalorder %v19705_v46, %v19534_v30  ;;  %v19720_v59 = vmov 0 }
 0x35f   : > { %10912 = vmatprep.subr.bf16.mxu1 %v19089_v6  ;;  %vm1214_vm7 = vmand %vm19710_vm13, %vm958_vm6  ;;  %vm19716_vm6 = vcmp.eq.s32.totalorder %v19691_v20, %v19537_v39  ;;  %v19722_v25 = vmov 0  ;;  %v19725_v20 = vmov 0  ;;  %v463_v29 = vadd.s32 1904, %v12011_v2 }
 0x360   : > { %vm16910_vm2 = vmpackc.low %vm19712_vm9, %vm19711_vm14  ;;  %vm2691_vm9 = vcmp.eq.s32.totalorder %v19707_v55, %v19535_v43 }
 0x361   : > { %v19714_v57 = vsel %vm16910_vm2, 4294967295, %v19713_v57  ;;  %vm10561_vm11 = vmpackc.low %vm1214_vm7, %vm1213_vm8  ;;  %vm702_vm7 = vcmp.ge.s32.totalorder %v443_v11, %v12019_v5 }
 0x362   : > { %vm16920_vm13 = vmpackc.low %vm19716_vm6, %vm19715_vm1  ;;  %10562 = vmatpush1.bf16.msk.msra.mxu0 %vm10561_vm11, %v19085_v3  ;;  %vm959_vm1 = vcmp.lt.s32.totalorder %v443_v11, %v12025_v7  ;;  %v464_v11 = vadd.s32 1912, %v12011_v2  ;;  %vm2675_vm11 = vcmp.eq.s32.totalorder %v19705_v46, %v19535_v43 }
 0x363   : > { %v19718_v63 = vsel %vm16920_vm13, 4294967295, %v19717_v63  ;;  %vm16927_vm0 = vmpackc.low %vm2685_vm15, %vm19719_vm12  ;;  %7368 = vmatprep.subr.bf16.mxu0 %v19089_v6  ;;  %vm960_vm15 = vcmp.lt.s32.totalorder %v444_v31, %v12025_v7  ;;  %vm979_vm13 = vcmp.lt.s32.totalorder %v463_v29, %v12025_v7 }
 0x364   : > { %v19721_v59 = vsel %vm16927_vm0, 4294967295, %v19720_v59  ;;  %vm16932_vm14 = vmand %vm720_vm10, %vm977_vm5  ;;  %vm19728_vm10 = vnez %v19687_v41  ;;  %vm19730_vm5 = vnez %v19701_v53  ;;  %vm722_vm0 = vcmp.ge.s32.totalorder %v463_v29, %v12019_v5  ;;  %v19757_v41 = vld [vmem:[#allocation48_spill] sm:$0xff] }
 0x365   : > { %v19723_v25 = vsel %vm16932_vm14, 4294967295, %v19722_v25  ;;  %vm16938_vm8 = vmand %vm721_vm3, %vm978_vm4  ;;  %10004 = vmatmul.mubr.msk.bf16.gmra.mrb[72].mxu1 %vm19728_vm10, %v19085_v3  ;;  %vm19729_vm3 = vnez %v19689_v50  ;;  %vm19731_vm10 = vnez %v19704_v52  ;;  %v19736_v50 = vmov 0  ;;  %v19740_v52 = vld [vmem:[#allocation45_spill] sm:$0xff] }
 0x366   : > { %19724 = vst [vmem:[#allocation54_spill] sm:$0xff] %v19723_v25  ;;  %v19726_v20 = vsel %vm16938_vm8, 4294967295, %v19725_v20  ;;  %vm18944_vm4 = vmpackc.low %vm16938_vm8, %vm16932_vm14  ;;  %10484 = vmatmul.mubr.msk.bf16.gmra.mrb[72].mxu0 %vm19729_vm3, %v19085_v3  ;;  %10006 = vmatprep.mubr.msk.bf16.mxu1 %vm19730_vm5, %v19085_v3  ;;  %vm2684_vm3 = vcmp.eq.s32.totalorder %v19707_v55, %v19536_v60  ;;  %vm19732_vm5 = vcmp.ge.s32.totalorder %v444_v31, %v12019_v5  ;;  %v445_v31 = vadd.s32 1760, %v12011_v2 }
 0x367   : > { %19727 = vst [vmem:[#allocation55_spill] sm:$0xff] %v19726_v20  ;;  %vm1215_vm6 = vmand %vm702_vm7, %vm959_vm1  ;;  %10486 = vmatprep.mubr.msk.bf16.mxu0 %vm19731_vm10, %v19085_v3  ;;  %10928 = vmatpush1.bf16.msk.msra.mxu1 %vm18944_vm4, %v19085_v3  ;;  %vm2674_vm1 = vcmp.eq.s32.totalorder %v19705_v46, %v19537_v39  ;;  %vm2690_vm10 = vcmp.eq.s32.totalorder %v19707_v55, %v19537_v39  ;;  %v446_v29 = vadd.s32 1768, %v12011_v2  ;;  %v19738_v53 = vmov 0 }
 0x368   : > { %vm1216_vm7 = vmand %vm19732_vm5, %vm960_vm15  ;;  %10913 = vmatprep.subr.bf16.mxu1 %v19089_v6  ;;  %vm723_vm15 = vcmp.ge.s32.totalorder %v464_v11, %v12019_v5  ;;  %vm980_vm5 = vcmp.lt.s32.totalorder %v464_v11, %v12025_v7  ;;  %v19741_v11 = vld [vmem:[#allocation46_spill] sm:$0xff]  ;;  %v19742_v55 = vmov 0  ;;  %v465_v25 = vadd.s32 1920, %v12011_v2 }
 0x369   : > { %vm10563_vm12 = vmpackc.low %vm1216_vm7, %vm1215_vm6  ;;  %vm19735_vm6 = vcmp.eq.s32.totalorder %v19705_v46, %v19536_v60  ;;  %v19745_v46 = vmov 0  ;;  %v466_v20 = vadd.s32 1928, %v12011_v2  ;;  %vm19761_vm8 = vcmp.eq.s32.totalorder %v19740_v52, %v19536_v60 }
 0x36a   : > { %vm16986_vm2 = vmpackc.low %vm2691_vm9, %vm2675_vm11  ;;  %10564 = vmatpush1.bf16.msk.msra.mxu0 %vm10563_vm12, %v19085_v3  ;;  %vm2701_vm12 = vcmp.eq.s32.totalorder %v19740_v52, %v19534_v30  ;;  %vm2717_vm9 = vcmp.eq.s32.totalorder %v19741_v11, %v19534_v30 }
 0x36b   : > { %vm16997_vm7 = vmpackc.low %vm2684_vm3, %vm19735_vm6  ;;  %7370 = vmatprep.subr.bf16.mxu0 %v19089_v6  ;;  %vm2707_vm3 = vcmp.eq.s32.totalorder %v19740_v52, %v19535_v43  ;;  %vm724_vm6 = vcmp.ge.s32.totalorder %v465_v25, %v12019_v5  ;;  %vm982_vm14 = vcmp.lt.s32.totalorder %v466_v20, %v12025_v7 }
 0x36c   : > { %v19737_v50 = vsel %vm16997_vm7, 4294967295, %v19736_v50  ;;  %vm17003_vm11 = vmpackc.low %vm2690_vm10, %vm2674_vm1  ;;  %vm19748_vm10 = vnez %v19714_v57  ;;  %v19751_v57 = vmov 0 }
 0x36d   : > { %v19739_v53 = vsel %vm17003_vm11, 4294967295, %v19738_v53  ;;  %vm17011_vm4 = vmand %vm722_vm0, %vm979_vm13  ;;  %10008 = vmatmul.mubr.msk.bf16.gmra.mrb[76].mxu1 %vm19748_vm10, %v19085_v3  ;;  %vm19750_vm10 = vnez %v19721_v59  ;;  %vm962_vm13 = vcmp.lt.s32.totalorder %v446_v29, %v12025_v7  ;;  %v447_v59 = vadd.s32 1776, %v12011_v2 }
 0x36e   : > { %v19743_v55 = vsel %vm17011_vm4, 4294967295, %v19742_v55  ;;  %vm17019_vm1 = vmand %vm723_vm15, %vm980_vm5  ;;  %vm19749_vm5 = vnez %v19718_v63  ;;  %10010 = vmatprep.mubr.msk.bf16.mxu1 %vm19750_vm10, %v19085_v3  ;;  %v19754_v63 = vmov 0  ;;  %vm981_vm15 = vcmp.lt.s32.totalorder %v465_v25, %v12025_v7 }
 0x36f   : > { %19744 = vst [vmem:[#allocation56_spill] sm:$0xff] %v19743_v55  ;;  %v19746_v46 = vsel %vm17019_vm1, 4294967295, %v19745_v46  ;;  %10488 = vmatmul.mubr.msk.bf16.gmra.mrb[76].mxu0 %vm19749_vm5, %v19085_v3  ;;  %vm17045_vm0 = vmpackc.low %vm2717_vm9, %vm2701_vm12  ;;  %vm19753_vm12 = vcmp.eq.s32.totalorder %v19741_v11, %v19535_v43  ;;  %vm19759_vm5 = vcmp.ge.s32.totalorder %v445_v31, %v12019_v5  ;;  %v448_v55 = vadd.s32 1784, %v12011_v2 }
 0x370   : > { %19747 = vst [vmem:[#allocation57_spill] sm:$0xff] %v19746_v46  ;;  %v19752_v57 = vsel %vm17045_vm0, 4294967295, %v19751_v57  ;;  %10490 = vmatprep.mubr.msk.bf16.mxu0 %vm16986_vm2, %v19085_v3  ;;  %vm17062_vm9 = vmpackc.low %vm19753_vm12, %vm2707_vm3  ;;  %vm2749_vm3 = vcmp.eq.s32.totalorder %v19757_v41, %v19534_v30  ;;  %vm19758_vm12 = vcmp.lt.s32.totalorder %v445_v31, %v12025_v7  ;;  %vm19765_vm0 = vcmp.eq.s32.totalorder %v19740_v52, %v19537_v39 }
 0x371   : > { %v19755_v63 = vsel %vm17062_vm9, 4294967295, %v19754_v63  ;;  %vm19756_vm2 = vmpackc.low %vm17019_vm1, %vm17011_vm4  ;;  %vm725_vm1 = vcmp.ge.s32.totalorder %v466_v20, %v12019_v5  ;;  %vm19769_vm11 = vcmp.eq.s32.totalorder %v19477_v61, %v19534_v30  ;;  %v19775_v52 = vmov 0 }
 0x372   : > { %10929 = vmatpush1.bf16.msk.msra.mxu1 %vm19756_vm2, %v19085_v3  ;;  %vm1217_vm10 = vmand %vm19759_vm5, %vm19758_vm12  ;;  %vm19760_vm2 = vcmp.ge.s32.totalorder %v446_v29, %v12019_v5  ;;  %vm19762_vm5 = vcmp.eq.s32.totalorder %v19741_v11, %v19536_v60  ;;  %v19772_v29 = vmov 0  ;;  %v468_v46 = vadd.s32 1944, %v12011_v2 }
 0x373   : > { %10914 = vmatprep.subr.bf16.mxu1 %v19089_v6  ;;  %vm1218_vm4 = vmand %vm19760_vm2, %vm962_vm13  ;;  %vm19766_vm13 = vcmp.eq.s32.totalorder %v19741_v11, %v19537_v39  ;;  %v467_v11 = vadd.s32 1936, %v12011_v2  ;;  %v19802_v31 = vmov 0  ;;  %v19807_v25 = vmov 0 }
 0x374   : > { %vm17099_vm12 = vmpackc.low %vm19762_vm5, %vm19761_vm8  ;;  %vm2755_vm5 = vcmp.eq.s32.totalorder %v19757_v41, %v19535_v43  ;;  %v473_v20 = vadd.s32 1984, %v12011_v2 }
 0x375   : > { %vm10565_vm9 = vmpackc.low %vm1218_vm4, %vm1217_vm10  ;;  %vm706_vm4 = vcmp.ge.s32.totalorder %v447_v59, %v12019_v5 }
 0x376   : > { %vm17109_vm2 = vmpackc.low %vm19766_vm13, %vm19765_vm0  ;;  %10566 = vmatpush1.bf16.msk.msra.mxu0 %vm10565_vm9, %v19085_v3  ;;  %vm963_vm0 = vcmp.lt.s32.totalorder %v447_v59, %v12025_v7  ;;  %vm964_vm9 = vcmp.lt.s32.totalorder %v448_v55, %v12025_v7  ;;  %vm727_vm13 = vcmp.ge.s32.totalorder %v468_v46, %v12019_v5  ;;  %v19793_v59 = vmov 0 }
 0x377   : > { %vm17116_vm7 = vmpackc.low %vm2749_vm3, %vm19769_vm11  ;;  %7372 = vmatprep.subr.bf16.mxu0 %v19089_v6  ;;  %vm707_vm11 = vcmp.ge.s32.totalorder %v448_v55, %v12019_v5  ;;  %vm19780_vm3 = vnez %v19752_v57  ;;  %v470_v55 = vadd.s32 1960, %v12011_v2  ;;  %v19791_v57 = vld [vmem:[#allocation49_spill] sm:$0xff] }
 0x378   : > { %vm17121_vm8 = vmand %vm724_vm6, %vm981_vm15  ;;  %vm19778_vm6 = vnez %v19737_v50  ;;  %v19796_v50 = vmov 0 }
 0x379   : > { %v19773_v29 = vsel %vm17121_vm8, 4294967295, %v19772_v29  ;;  %vm17128_vm10 = vmand %vm725_vm1, %vm982_vm14  ;;  %10012 = vmatmul.mubr.msk.bf16.gmra.mrb[80].mxu1 %vm19778_vm6, %v19085_v3  ;;  %vm19779_vm1 = vnez %v19739_v53  ;;  %vm983_vm6 = vcmp.lt.s32.totalorder %v467_v11, %v12025_v7  ;;  %v469_v53 = vadd.s32 1952, %v12011_v2 }
 0x37a   : > { %19774 = vst [vmem:[#allocation14_spill] sm:$0xff] %v19773_v29  ;;  %v19776_v52 = vsel %vm17128_vm10, 4294967295, %v19775_v52  ;;  %vm18957_vm14 = vmpackc.low %vm17128_vm10, %vm17121_vm8  ;;  %10492 = vmatmul.mubr.msk.bf16.gmra.mrb[80].mxu0 %vm19779_vm1, %v19085_v3  ;;  %10014 = vmatprep.mubr.msk.bf16.mxu1 %vm19780_vm3, %v19085_v3  ;;  %vm19783_vm1 = vnez %v19755_v63  ;;  %vm2765_vm10 = vcmp.eq.s32.totalorder %v19791_v57, %v19534_v30  ;;  %v19792_v63 = vld [vmem:[#allocation50_spill] sm:$0xff]  ;;  %v471_v29 = vadd.s32 1968, %v12011_v2 }
 0x37b   : > { %19777 = vst [vmem:[#allocation17_spill] sm:$0xff] %v19776_v52  ;;  %vm17161_vm15 = vmand %vm706_vm4, %vm963_vm0  ;;  %10494 = vmatprep.mubr.msk.bf16.mxu0 %vm19783_vm1, %v19085_v3  ;;  %10930 = vmatpush1.bf16.msk.msra.mxu1 %vm18957_vm14, %v19085_v3  ;;  %vm726_vm0 = vcmp.ge.s32.totalorder %v467_v11, %v12019_v5  ;;  %vm2754_vm1 = vcmp.eq.s32.totalorder %v19757_v41, %v19537_v39  ;;  %v19785_v11 = vmov 0  ;;  %v19800_v52 = vmov 0 }
 0x37c   : > { %vm1220_vm4 = vmand %vm707_vm11, %vm964_vm9  ;;  %10915 = vmatprep.subr.bf16.mxu1 %v19089_v6  ;;  %vm984_vm14 = vcmp.lt.s32.totalorder %v468_v46, %v12025_v7  ;;  %vm19784_vm11 = vcmp.eq.s32.totalorder %v19477_v61, %v19535_v43  ;;  %v19828_v46 = vmov 0 }
 0x37d   : > { %vm10567_vm3 = vmpackc.low %vm1220_vm4, %vm17161_vm15  ;;  %vm19787_vm15 = vcmp.eq.s32.totalorder %v19477_v61, %v19536_v60  ;;  %vm19788_vm4 = vcmp.eq.s32.totalorder %v19757_v41, %v19536_v60  ;;  %v19798_v41 = vmov 0 }
 0x37e   : > { %vm17195_vm9 = vmpackc.low %vm2755_vm5, %vm19784_vm11  ;;  %10568 = vmatpush1.bf16.msk.msra.mxu0 %vm10567_vm3, %v19085_v3  ;;  %vm2781_vm5 = vcmp.eq.s32.totalorder %v19792_v63, %v19534_v30  ;;  %vm19795_vm3 = vcmp.eq.s32.totalorder %v19477_v61, %v19537_v39  ;;  %v472_v61 = vadd.s32 1976, %v12011_v2 }
 0x37f   : > { %v19786_v11 = vsel %vm17195_vm9, 4294967295, %v19785_v11  ;;  %vm17206_vm8 = vmpackc.low %vm19788_vm4, %vm19787_vm15  ;;  %7631 = vmatprep.subr.bf16.mxu0 %v19089_v6  ;;  %vm728_vm4 = vcmp.ge.s32.totalorder %v469_v53, %v12019_v5 }
 0x380   : > { %vm17214_vm11 = vmand %vm726_vm0, %vm983_vm6  ;;  %vm985_vm6 = vcmp.lt.s32.totalorder %v469_v53, %v12025_v7  ;;  %v474_v53 = vadd.s32 1992, %v12011_v2 }
 0x381   : > { %v19794_v59 = vsel %vm17214_vm11, 4294967295, %v19793_v59  ;;  %vm17222_vm9 = vmpackc.low %vm2754_vm1, %vm19795_vm3  ;;  %vm986_vm3 = vcmp.lt.s32.totalorder %v470_v55, %v12025_v7  ;;  %10016 = vmatmul.mubr.msk.bf16.gmra.mrb[84].mxu1 %vm17099_vm12, %v19085_v3  ;;  %vm2787_vm1 = vcmp.eq.s32.totalorder %v19792_v63, %v19535_v43 }
 0x382   : > { %v19797_v50 = vsel %vm17222_vm9, 4294967295, %v19796_v50  ;;  %vm17226_vm15 = vmand %vm727_vm13, %vm984_vm14  ;;  %vm2771_vm13 = vcmp.eq.s32.totalorder %v19791_v57, %v19535_v43  ;;  %10496 = vmatmul.mubr.msk.bf16.gmra.mrb[84].mxu0 %vm17109_vm2, %v19085_v3  ;;  %10018 = vmatprep.mubr.msk.bf16.mxu1 %vm17116_vm7, %v19085_v3  ;;  %vm19805_vm2 = vnez %v19786_v11  ;;  %vm2786_vm7 = vcmp.eq.s32.totalorder %v19792_v63, %v19537_v39 }
 0x383   : > { %v19799_v41 = vsel %vm17226_vm15, 4294967295, %v19798_v41  ;;  %vm18964_vm0 = vmpackc.low %vm17226_vm15, %vm17214_vm11  ;;  %10498 = vmatprep.mubr.msk.bf16.mxu0 %vm19805_vm2, %v19085_v3  ;;  %vm987_vm2 = vcmp.lt.s32.totalorder %v471_v29, %v12025_v7  ;;  %vm19812_vm11 = vcmp.eq.s32.totalorder %v19791_v57, %v19536_v60  ;;  %vm2813_vm9 = vcmp.eq.s32.totalorder %v19513_v16, %v19534_v30 }
 0x384   : > { %vm17243_vm14 = vmpackc.low %vm2781_vm5, %vm2765_vm10  ;;  %10931 = vmatpush1.bf16.msk.msra.mxu1 %vm18964_vm0, %v19085_v3  ;;  %vm19806_vm10 = vcmp.ge.s32.totalorder %v470_v55, %v12019_v5  ;;  %vm19813_vm0 = vcmp.eq.s32.totalorder %v19792_v63, %v19536_v60  ;;  %v19816_v55 = vmov 0  ;;  %v19819_v11 = vmov 0 }
 0x385   : > { %v19801_v52 = vsel %vm17243_vm14, 4294967295, %v19800_v52  ;;  %vm17263_vm5 = vmand %vm728_vm4, %vm985_vm6  ;;  %vm730_vm6 = vcmp.ge.s32.totalorder %v471_v29, %v12019_v5  ;;  %10916 = vmatprep.subr.bf16.mxu1 %v19089_v6  ;;  %v19810_v29 = vmov 0  ;;  %vm2797_vm14 = vcmp.eq.s32.totalorder %v19512_v44, %v19534_v30 }
 0x386   : > { %v19803_v31 = vsel %vm17263_vm5, 4294967295, %v19802_v31  ;;  %vm17280_vm4 = vmand %vm19806_vm10, %vm986_vm3  ;;  %vm731_vm3 = vcmp.ge.s32.totalorder %v472_v61, %v12019_v5  ;;  %vm988_vm10 = vcmp.lt.s32.totalorder %v472_v61, %v12025_v7  ;;  %v19822_v63 = vmov 0 }
 0x387   : > { %19804 = vst [vmem:[#allocation13_spill] sm:$0xff] %v19803_v31  ;;  %v19808_v25 = vsel %vm17280_vm4, 4294967295, %v19807_v25  ;;  %vm17303_vm12 = vmpackc.low %vm2787_vm1, %vm2771_vm13  ;;  %vm19818_vm13 = vcmp.eq.s32.totalorder %v19791_v57, %v19537_v39  ;;  %v475_v57 = vadd.s32 2000, %v12011_v2  ;;  %v476_v31 = vadd.s32 2008, %v12011_v2 }
 0x388   : > { %19809 = vst [vmem:[#allocation16_spill] sm:$0xff] %v19808_v25  ;;  %v19811_v29 = vsel %vm17303_vm12, 4294967295, %v19810_v29  ;;  %vm17313_vm15 = vmpackc.low %vm19813_vm0, %vm19812_vm11  ;;  %v19824_v25 = vmov 0  ;;  %v19856_v61 = vmov 0 }
 0x389   : > { %vm17321_vm1 = vmand %vm730_vm6, %vm987_vm2  ;;  %vm732_vm6 = vcmp.ge.s32.totalorder %v473_v20, %v12019_v5  ;;  %vm989_vm2 = vcmp.lt.s32.totalorder %v473_v20, %v12025_v7  ;;  %10020 = vmatmul.mubr.msk.bf16.gmra.mrb[88].mxu1 %vm17206_vm8, %v19085_v3  ;;  %v478_v20 = vadd.s32 2024, %v12011_v2  ;;  %vm19836_vm8 = vcmp.eq.s32.totalorder %v19512_v44, %v19535_v43 }
 0x38a   : > { %v19817_v55 = vsel %vm17321_vm1, 4294967295, %v19816_v55  ;;  %vm17328_vm12 = vmpackc.low %vm2786_vm7, %vm19818_vm13  ;;  %vm19826_vm13 = vnez %v19797_v50  ;;  %vm19827_vm7 = vnez %v19801_v52  ;;  %v19834_v52 = vmov 0 }
 0x38b   : > { %v19820_v11 = vsel %vm17328_vm12, 4294967295, %v19819_v11  ;;  %vm19821_vm11 = vmpackc.low %vm17280_vm4, %vm17263_vm5  ;;  %10500 = vmatmul.mubr.msk.bf16.gmra.mrb[88].mxu0 %vm19826_vm13, %v19085_v3  ;;  %10022 = vmatprep.mubr.msk.bf16.mxu1 %vm19827_vm7, %v19085_v3  ;;  %vm19831_vm7 = vnez %v19811_v29  ;;  %v477_v50 = vadd.s32 2016, %v12011_v2  ;;  %vm2818_vm13 = vcmp.eq.s32.totalorder %v19513_v16, %v19537_v39 }
 0x38c   : > { %10932 = vmatpush1.bf16.msk.msra.mxu1 %vm19821_vm11, %v19085_v3  ;;  %vm17338_vm0 = vmand %vm731_vm3, %vm988_vm10  ;;  %vm990_vm3 = vcmp.lt.s32.totalorder %v474_v53, %v12025_v7  ;;  %10502 = vmatprep.mubr.msk.bf16.mxu0 %vm19831_vm7, %v19085_v3  ;;  %vm991_vm7 = vcmp.lt.s32.totalorder %v475_v57, %v12025_v7  ;;  %vm19840_vm5 = vcmp.eq.s32.totalorder %v19512_v44, %v19536_v60 }
 0x38d   : > { %v19823_v63 = vsel %vm17338_vm0, 4294967295, %v19822_v63  ;;  %10917 = vmatprep.subr.bf16.mxu1 %v19089_v6  ;;  %vm17359_vm10 = vmpackc.low %vm2813_vm9, %vm2797_vm14  ;;  %vm19833_vm9 = vcmp.ge.s32.totalorder %v474_v53, %v12019_v5  ;;  %vm2845_vm12 = vcmp.eq.s32.totalorder %v19530_v47, %v19534_v30  ;;  %v19844_v53 = vmov 0 }
 0x38e   : > { %v19825_v25 = vsel %vm17359_vm10, 4294967295, %v19824_v25  ;;  %vm17381_vm11 = vmand %vm732_vm6, %vm989_vm2  ;;  %vm734_vm2 = vcmp.ge.s32.totalorder %v475_v57, %v12019_v5  ;;  %v19838_v57 = vmov 0  ;;  %vm2829_vm10 = vcmp.eq.s32.totalorder %v19529_v33, %v19534_v30 }
 0x38f   : > { %v19829_v46 = vsel %vm17381_vm11, 4294967295, %v19828_v46  ;;  %vm19832_vm14 = vmpackc.low %vm17338_vm0, %vm17321_vm1  ;;  %vm19837_vm1 = vcmp.eq.s32.totalorder %v19513_v16, %v19535_v43 }
 0x390   : > { %19830 = vst [vmem:[#allocation58_spill] sm:$0xff] %v19829_v46  ;;  %10933 = vmatpush1.bf16.msk.msra.mxu1 %vm19832_vm14, %v19085_v3  ;;  %vm17398_vm6 = vmand %vm19833_vm9, %vm990_vm3  ;;  %vm735_vm3 = vcmp.ge.s32.totalorder %v476_v31, %v12019_v5  ;;  %vm992_vm9 = vcmp.lt.s32.totalorder %v476_v31, %v12025_v7  ;;  %vm19841_vm14 = vcmp.eq.s32.totalorder %v19513_v16, %v19536_v60  ;;  %v480_v46 = vadd.s32 2040, %v12011_v2 }
 0x391   : > { %v19835_v52 = vsel %vm17398_vm6, 4294967295, %v19834_v52  ;;  %10918 = vmatprep.subr.bf16.mxu1 %v19089_v6  ;;  %vm17421_vm0 = vmpackc.low %vm19837_vm1, %vm19836_vm8  ;;  %vm19846_vm8 = vcmp.eq.s32.totalorder %v19512_v44, %v19537_v39  ;;  %v479_v44 = vadd.s32 2032, %v12011_v2  ;;  %10024 = vmatmul.mubr.msk.bf16.gmra.mrb[92].mxu1 %vm17313_vm15, %v19085_v3  ;;  %vm2851_vm15 = vcmp.eq.s32.totalorder %v19530_v47, %v19535_v43 }
 0x392   : > { %v19839_v57 = vsel %vm17421_vm0, 4294967295, %v19838_v57  ;;  %vm17431_vm4 = vmpackc.low %vm19841_vm14, %vm19840_vm5 }
 0x393   : > { %vm17439_vm1 = vmand %vm734_vm2, %vm991_vm7  ;;  %vm736_vm2 = vcmp.ge.s32.totalorder %v477_v50, %v12019_v5  ;;  %vm993_vm7 = vcmp.lt.s32.totalorder %v477_v50, %v12025_v7 }
 0x394   : > { %v19845_v53 = vsel %vm17439_vm1, 4294967295, %v19844_v53  ;;  %vm17446_vm0 = vmpackc.low %vm2818_vm13, %vm19846_vm8  ;;  %vm737_vm8 = vcmp.ge.s32.totalorder %v478_v20, %v12019_v5  ;;  %vm19855_vm13 = vnez %v19825_v25  ;;  %v19860_v25 = vmov 0 }
 0x395   : > { %vm19849_vm5 = vmpackc.low %vm17398_vm6, %vm17381_vm11  ;;  %10026 = vmatprep.mubr.msk.bf16.mxu1 %vm19855_vm13, %v19085_v3  ;;  %vm2835_vm11 = vcmp.eq.s32.totalorder %v19529_v33, %v19535_v43 }
 0x396   : > { %10934 = vmatpush1.bf16.msk.msra.mxu1 %vm19849_vm5, %v19085_v3  ;;  %vm17456_vm14 = vmand %vm735_vm3, %vm992_vm9  ;;  %vm994_vm3 = vcmp.lt.s32.totalorder %v478_v20, %v12025_v7  ;;  %vm19854_vm5 = vnez %v19820_v11  ;;  %v19862_v11 = vmov 0 }
 0x397   : > { %10919 = vmatprep.subr.bf16.mxu1 %v19089_v6  ;;  %vm17477_vm9 = vmpackc.low %vm2845_vm12, %vm2829_vm10  ;;  %10504 = vmatmul.mubr.msk.bf16.gmra.mrb[92].mxu0 %vm19854_vm5, %v19085_v3  ;;  %vm19858_vm12 = vnez %v19839_v57 }
 0x398   : > { %vm17491_vm6 = vmand %vm736_vm2, %vm993_vm7  ;;  %10506 = vmatprep.mubr.msk.bf16.mxu0 %vm19858_vm12, %v19085_v3  ;;  %vm738_vm2 = vcmp.ge.s32.totalorder %v479_v44, %v12019_v5  ;;  %vm995_vm7 = vcmp.lt.s32.totalorder %v479_v44, %v12025_v7  ;;  %vm739_vm12 = vcmp.ge.s32.totalorder %v480_v46, %v12019_v5  ;;  %v19864_v44 = vmov 0 }
 0x399   : > { %v19857_v61 = vsel %vm17491_vm6, 4294967295, %v19856_v61  ;;  %vm19859_vm10 = vmpackc.low %vm17456_vm14, %vm17439_vm1  ;;  %vm996_vm1 = vcmp.lt.s32.totalorder %v480_v46, %v12025_v7  ;;  %10028 = vmatmul.mubr.msk.bf16.gmra.mrb[96].mxu1 %vm17431_vm4, %v19085_v3  ;;  %vm2850_vm4 = vcmp.eq.s32.totalorder %v19530_v47, %v19537_v39 }
 0x39a   : > { %10935 = vmatpush1.bf16.msk.msra.mxu1 %vm19859_vm10, %v19085_v3  ;;  %vm17504_vm13 = vmand %vm737_vm8, %vm994_vm3  ;;  %10030 = vmatprep.mubr.msk.bf16.mxu1 %vm17477_vm9, %v19085_v3  ;;  %vm2877_vm9 = vcmp.eq.s32.totalorder %v19531_v1, %v19534_v30 }
 0x39b   : > { %v19861_v25 = vsel %vm17504_vm13, 4294967295, %v19860_v25  ;;  %10920 = vmatprep.subr.bf16.mxu1 %v19089_v6  ;;  %vm18981_vm5 = vmpackc.low %vm17504_vm13, %vm17491_vm6  ;;  %v17600_v5 = vpop.f32.mrb[0].mxu1 }
 0x39c   : > { %vm10509_vm10 = vmpackc.low %vm2851_vm15, %vm2835_vm11  ;;  %vm2844_vm15 = vcmp.eq.s32.totalorder %v19530_v47, %v19536_v60  ;;  %19866 = vst [vmem:[#allocation59_spill] sm:$0xff] %v17600_v5  ;;  %v6222_v7 = vpop.f32.mrb[1].mxu1 }
 0x39d   : > { %vm17517_vm8 = vmand %vm738_vm2, %vm995_vm7  ;;  %vm2834_vm2 = vcmp.eq.s32.totalorder %v19529_v33, %v19537_v39  ;;  %v17610_v46 = vpop.f32.mrb[2].mxu1 }
 0x39e   : > { %v19863_v11 = vsel %vm17517_vm8, 4294967295, %v19862_v11  ;;  %10936 = vmatpush1.bf16.msk.msra.mxu1 %vm18981_vm5, %v19085_v3  ;;  %vm17527_vm3 = vmand %vm739_vm12, %vm996_vm1  ;;  %vm2828_vm1 = vcmp.eq.s32.totalorder %v19529_v33, %v19536_v60  ;;  %vm2867_vm12 = vcmp.eq.s32.totalorder %v13871_v42, %v19535_v43  ;;  %19867 = vst [vmem:[#allocation60_spill] sm:$0xff] %v17610_v46  ;;  %v6225_v20 = vpop.f32.mrb[3].mxu1 }
 0x39f   : > { %v19865_v44 = vsel %vm17527_vm3, 4294967295, %v19864_v44  ;;  %10921 = vmatprep.subr.bf16.mxu1 %v19089_v6  ;;  %vm18984_vm11 = vmpackc.low %vm17527_vm3, %vm17517_vm8  ;;  %10508 = vmatmul.mubr.msk.bf16.gmra.mrb[96].mxu0 %vm17446_vm0, %v19085_v3  ;;  %vm2861_vm0 = vcmp.eq.s32.totalorder %v13871_v42, %v19534_v30 }
 0x3a0   : > { %10510 = vmatprep.mubr.msk.bf16.mxu0 %vm10509_vm10, %v19085_v3  ;;  %vm10031_vm7 = vmpackc.low %vm2844_vm15, %vm2828_vm1  ;;  %vm2883_vm10 = vcmp.eq.s32.totalorder %v19531_v1, %v19535_v43  ;;  %vm2876_vm1 = vcmp.eq.s32.totalorder %v19531_v1, %v19536_v60  ;;  %vm2866_vm15 = vcmp.eq.s32.totalorder %v13871_v42, %v19537_v39 }
 0x3a1   : > { %vm10511_vm5 = vmpackc.low %vm2850_vm4, %vm2834_vm2  ;;  %10032 = vmatmul.mubr.msk.bf16.gmra.mrb[100].mxu1 %vm10031_vm7, %v19085_v3  ;;  %vm2882_vm2 = vcmp.eq.s32.totalorder %v19531_v1, %v19537_v39  ;;  %vm2893_vm4 = vcmp.eq.s32.totalorder %v19532_v62, %v19534_v30 }
 0x3a2   : > { %10937 = vmatpush1.bf16.msk.msra.mxu1 %vm18984_vm11, %v19085_v3  ;;  %vm10033_vm6 = vmpackc.low %vm2877_vm9, %vm2861_vm0  ;;  %vm2860_vm11 = vcmp.eq.s32.totalorder %v13871_v42, %v19536_v60  ;;  %vm2899_vm0 = vcmp.eq.s32.totalorder %v19532_v62, %v19535_v43  ;;  %vm2915_vm9 = vcmp.eq.s32.totalorder %v19533_v24, %v19535_v43 }
 0x3a3   : > { %vm10513_vm13 = vmpackc.low %vm2883_vm10, %vm2867_vm12  ;;  %10034 = vmatprep.mubr.msk.bf16.mxu1 %vm10033_vm6, %v19085_v3  ;;  %vm2909_vm6 = vcmp.eq.s32.totalorder %v19533_v24, %v19534_v30  ;;  %vm2892_vm10 = vcmp.eq.s32.totalorder %v19532_v62, %v19536_v60  ;;  %v17624_v57 = vpop.f32.mrb[4].mxu1 }
 0x3a4   : > { %vm10037_vm7 = vmpackc.low %vm2909_vm6, %vm2893_vm4  ;;  %vm2941_vm4 = vcmp.eq.s32.totalorder %v14056_v0, %v19534_v30  ;;  %19868 = vst [vmem:[#allocation61_spill] sm:$0xff] %v17624_v57  ;;  %v6230_v31 = vpop.f32.mrb[5].mxu1 }
 0x3a5   : > { %vm10517_vm12 = vmpackc.low %vm2915_vm9, %vm2899_vm0  ;;  %vm2947_vm0 = vcmp.eq.s32.totalorder %v14056_v0, %v19535_v43  ;;  %v17634_v29 = vpop.f32.mrb[6].mxu1 }
 0x3a6   : > { %19869 = vst [vmem:[#allocation62_spill] sm:$0xff] %v17634_v29  ;;  %v6233_v50 = vpop.f32.mrb[7].mxu1  ;;  %v19874_v29 = vld [vmem:[#allocation19_spill] sm:$0xff] }
 0x3a7   : > { %10512 = vmatmul.mubr.msk.bf16.gmra.mrb[100].mxu0 %vm10511_vm5, %v19085_v3  ;;  %vm10035_vm5 = vmpackc.low %vm2876_vm1, %vm2860_vm11  ;;  %vm2908_vm11 = vcmp.eq.s32.totalorder %v19533_v24, %v19536_v60  ;;  %vm2898_vm1 = vcmp.eq.s32.totalorder %v19532_v62, %v19537_v39 }
 0x3a8   : > { %10514 = vmatprep.mubr.msk.bf16.mxu0 %vm10513_vm13, %v19085_v3  ;;  %vm10515_vm13 = vmpackc.low %vm2882_vm2, %vm2866_vm15  ;;  %vm2914_vm15 = vcmp.eq.s32.totalorder %v19533_v24, %v19537_v39  ;;  %vm2925_vm2 = vcmp.eq.s32.totalorder %v14045_v45, %v19534_v30 }
 0x3a9   : > { %10036 = vmatmul.mubr.msk.bf16.gmra.mrb[104].mxu1 %vm10035_vm5, %v19085_v3  ;;  %vm10039_vm6 = vmpackc.low %vm2908_vm11, %vm2892_vm10  ;;  %vm2931_vm5 = vcmp.eq.s32.totalorder %v14045_v45, %v19535_v43  ;;  %vm2940_vm10 = vcmp.eq.s32.totalorder %v14056_v0, %v19536_v60  ;;  %vm2930_vm11 = vcmp.eq.s32.totalorder %v14045_v45, %v19537_v39 }
 0x3aa   : > { %10038 = vmatprep.mubr.msk.bf16.mxu1 %vm10037_vm7, %v19085_v3  ;;  %vm10519_vm9 = vmpackc.low %vm2914_vm15, %vm2898_vm1  ;;  %vm2946_vm1 = vcmp.eq.s32.totalorder %v14056_v0, %v19537_v39  ;;  %vm2957_vm15 = vcmp.eq.s32.totalorder %v14114_v12, %v19534_v30 }
 0x3ab   : > { %vm10521_vm7 = vmpackc.low %vm2947_vm0, %vm2931_vm5  ;;  %vm2979_vm5 = vcmp.eq.s32.totalorder %v14129_v48, %v19535_v43  ;;  %v17648_v7 = vpop.f32.mrb[8].mxu1 }
 0x3ac   : > { %vm10523_vm0 = vmpackc.low %vm2946_vm1, %vm2930_vm11  ;;  %vm2978_vm11 = vcmp.eq.s32.totalorder %v14129_v48, %v19537_v39  ;;  %19870 = vst [vmem:[#allocation63_spill] sm:$0xff] %v17648_v7  ;;  %vm2989_vm1 = vcmp.eq.s32.totalorder %v14219_v58, %v19534_v30  ;;  %v6238_v20 = vpop.f32.mrb[9].mxu1 }
 0x3ad   : > { %v17658_v31 = vpop.f32.mrb[10].mxu1 }
 0x3ae   : > { %19871 = vst [vmem:[#allocation64_spill] sm:$0xff] %v17658_v31  ;;  %v6241_v50 = vpop.f32.mrb[11].mxu1 }
 0x3af   : > { %10516 = vmatmul.mubr.msk.bf16.gmra.mrb[104].mxu0 %vm10515_vm13, %v19085_v3  ;;  %vm10041_vm13 = vmpackc.low %vm2941_vm4, %vm2925_vm2  ;;  %vm2973_vm2 = vcmp.eq.s32.totalorder %v14129_v48, %v19534_v30 }
 0x3b0   : > { %10518 = vmatprep.mubr.msk.bf16.mxu0 %vm10517_vm12, %v19085_v3  ;;  %vm2924_vm12 = vcmp.eq.s32.totalorder %v14045_v45, %v19536_v60 }
 0x3b1   : > { %10040 = vmatmul.mubr.msk.bf16.gmra.mrb[108].mxu1 %vm10039_vm6, %v19085_v3  ;;  %vm10043_vm4 = vmpackc.low %vm2940_vm10, %vm2924_vm12  ;;  %vm2963_vm6 = vcmp.eq.s32.totalorder %v14114_v12, %v19535_v43  ;;  %vm2972_vm12 = vcmp.eq.s32.totalorder %v14129_v48, %v19536_v60  ;;  %vm2962_vm10 = vcmp.eq.s32.totalorder %v14114_v12, %v19537_v39 }
 0x3b2   : > { %10042 = vmatprep.mubr.msk.bf16.mxu1 %vm10041_vm13, %v19085_v3  ;;  %vm10525_vm13 = vmpackc.low %vm2979_vm5, %vm2963_vm6  ;;  %vm3011_vm6 = vcmp.eq.s32.totalorder %v14230_v49, %v19535_v43 }
 0x3b3   : > { %vm10527_vm5 = vmpackc.low %vm2978_vm11, %vm2962_vm10  ;;  %vm3010_vm10 = vcmp.eq.s32.totalorder %v14230_v49, %v19537_v39  ;;  %v17672_v20 = vpop.f32.mrb[12].mxu1  ;;  %vm3021_vm11 = vcmp.eq.s32.totalorder %v14278_v34, %v19534_v30 }
 0x3b4   : > { %v6246_v50 = vpop.f32.mrb[13].mxu1 }
 0x3b5   : > { %v17682_v31 = vpop.f32.mrb[14].mxu1  ;;  %v19873_v50 = vld [vmem:[#allocation20_spill] sm:$0xff] }
 0x3b6   : > { %v6249_v7 = vpop.f32.mrb[15].mxu1 }
 0x3b7   : > { %10520 = vmatmul.mubr.msk.bf16.gmra.mrb[108].mxu0 %vm10519_vm9, %v19085_v3  ;;  %vm10045_vm9 = vmpackc.low %vm2973_vm2, %vm2957_vm15  ;;  %vm3005_vm15 = vcmp.eq.s32.totalorder %v14230_v49, %v19534_v30 }
 0x3b8   : > { %10522 = vmatprep.mubr.msk.bf16.mxu0 %vm10521_vm7, %v19085_v3  ;;  %vm2956_vm7 = vcmp.eq.s32.totalorder %v14114_v12, %v19536_v60 }
 0x3b9   : > { %10044 = vmatmul.mubr.msk.bf16.gmra.mrb[112].mxu1 %vm10043_vm4, %v19085_v3  ;;  %vm10047_vm2 = vmpackc.low %vm2972_vm12, %vm2956_vm7  ;;  %vm2995_vm4 = vcmp.eq.s32.totalorder %v14219_v58, %v19535_v43  ;;  %vm3004_vm7 = vcmp.eq.s32.totalorder %v14230_v49, %v19536_v60  ;;  %vm2994_vm12 = vcmp.eq.s32.totalorder %v14219_v58, %v19537_v39 }
 0x3ba   : > { %10046 = vmatprep.mubr.msk.bf16.mxu1 %vm10045_vm9, %v19085_v3  ;;  %vm10529_vm9 = vmpackc.low %vm3011_vm6, %vm2995_vm4  ;;  %vm3043_vm4 = vcmp.eq.s32.totalorder %v14283_v51, %v19535_v43 }
 0x3bb   : > { %vm10531_vm6 = vmpackc.low %vm3010_vm10, %vm2994_vm12  ;;  %vm3042_vm12 = vcmp.eq.s32.totalorder %v14283_v51, %v19537_v39 }
 0x3bf   : > { %10524 = vmatmul.mubr.msk.bf16.gmra.mrb[112].mxu0 %vm10523_vm0, %v19085_v3  ;;  %vm10049_vm0 = vmpackc.low %vm3005_vm15, %vm2989_vm1  ;;  %vm3037_vm1 = vcmp.eq.s32.totalorder %v14283_v51, %v19534_v30  ;;  %v17696_v30 = vpop.f32.mrb[16].mxu1 }
 0x3c0   : > { %10526 = vmatprep.mubr.msk.bf16.mxu0 %vm10525_vm13, %v19085_v3  ;;  %vm2988_vm13 = vcmp.eq.s32.totalorder %v14219_v58, %v19536_v60  ;;  %v6254_v7 = vpop.f32.mrb[17].mxu1 }
 0x3c1   : > { %10048 = vmatmul.mubr.msk.bf16.gmra.mrb[116].mxu1 %vm10047_vm2, %v19085_v3  ;;  %vm10051_vm15 = vmpackc.low %vm3004_vm7, %vm2988_vm13  ;;  %vm3027_vm2 = vcmp.eq.s32.totalorder %v14278_v34, %v19535_v43  ;;  %vm3036_vm13 = vcmp.eq.s32.totalorder %v14283_v51, %v19536_v60  ;;  %vm3026_vm7 = vcmp.eq.s32.totalorder %v14278_v34, %v19537_v39  ;;  %v19872_v43 = vld [vmem:[#allocation22_spill] sm:$0xff]  ;;  %v19875_v7 = vld [vmem:[#allocation21_spill] sm:$0xff] }
 0x3c2   : > { %10050 = vmatprep.mubr.msk.bf16.mxu1 %vm10049_vm0, %v19085_v3  ;;  %vm10533_vm0 = vmpackc.low %vm3043_vm4, %vm3027_vm2  ;;  %vm2135_vm10 = vcmp.eq.s32.totalorder %v12081_v18, %v19872_v43  ;;  %vm2053_vm2 = vcmp.eq.s32.totalorder %v12016_v4, %v19873_v50 }
 0x3c3   : > { %vm10535_vm4 = vmpackc.low %vm3042_vm12, %vm3026_vm7  ;;  %vm2150_vm7 = vcmp.eq.s32.totalorder %v12087_v19, %v19875_v7  ;;  %vm2167_vm12 = vcmp.eq.s32.totalorder %v12095_v22, %v19872_v43 }
 0x3c7   : > { %10528 = vmatmul.mubr.msk.bf16.gmra.mrb[116].mxu0 %vm10527_vm5, %v19085_v3  ;;  %vm10053_vm5 = vmpackc.low %vm3037_vm1, %vm3021_vm11  ;;  %vm2151_vm11 = vcmp.eq.s32.totalorder %v12087_v19, %v19872_v43 }
 0x3c8   : > { %10530 = vmatprep.mubr.msk.bf16.mxu0 %vm10529_vm9, %v19085_v3  ;;  %vm3020_vm9 = vcmp.eq.s32.totalorder %v14278_v34, %v19536_v60  ;;  %v17706_v60 = vpop.f32.mrb[18].mxu1 }
 0x3c9   : > { %10052 = vmatmul.mubr.msk.bf16.gmra.mrb[120].mxu1 %vm10051_vm15, %v19085_v3  ;;  %vm10055_vm1 = vmpackc.low %vm3036_vm13, %vm3020_vm9  ;;  %vm2037_vm15 = vcmp.eq.s32.totalorder %v12011_v2, %v19873_v50  ;;  %v6257_v39 = vpop.f32.mrb[19].mxu1  ;;  %vm2052_vm9 = vcmp.eq.s32.totalorder %v12016_v4, %v19874_v29  ;;  %vm2134_vm13 = vcmp.eq.s32.totalorder %v12081_v18, %v19875_v7 }
 0x3ca   : > { %10054 = vmatprep.mubr.msk.bf16.mxu1 %vm10053_vm5, %v19085_v3  ;;  %vm10569_vm5 = vmpackc.low %vm2053_vm2, %vm2037_vm15  ;;  %v17720_v39 = vpop.f32.mrb[20].mxu1  ;;  %vm2085_vm15 = vcmp.eq.s32.totalorder %v12040_v10, %v19873_v50 }
 0x3cb   : > { %v6262_v57 = vpop.f32.mrb[21].mxu1  ;;  %vm10743_vm2 = vmpackc.low %vm2150_vm7, %vm2134_vm13  ;;  %vm2182_vm13 = vcmp.eq.s32.totalorder %v12098_v23, %v19875_v7  ;;  %vm19876_vm7 = vnez %v19586_v54 }
 0x3cc   : > { %v17730_v46 = vpop.f32.mrb[22].mxu1 }
 0x3cd   : > { %v6265_v5 = vpop.f32.mrb[23].mxu1 }
 0x3ce   : > { %v17750_v5 = vpop.f32.mrb[24].mxu1 }
 0x3cf   : > { %10532 = vmatmul.mubr.msk.bf16.gmra.mrb[120].mxu0 %vm10531_vm6, %v19085_v3  ;;  %vm10741_vm6 = vmpackc.low %vm2151_vm11, %vm2135_vm10  ;;  %vm2183_vm10 = vcmp.eq.s32.totalorder %v12098_v23, %v19872_v43  ;;  %v6270_v57 = vpop.f32.mrb[25].mxu1 }
 0x3d0   : > { %10534 = vmatprep.mubr.msk.bf16.mxu0 %vm10533_vm0, %v19085_v3  ;;  %vm2036_vm0 = vcmp.eq.s32.totalorder %v12011_v2, %v19874_v29  ;;  %v17761_v54 = vpop.f32.mrb[26].mxu1  ;;  %v19894_v57 = vld [vmem:[#allocation53_spill] sm:$0xff] }
 0x3d1   : > { %10056 = vmatmul.mubr.msk.bf16.gmra.mrb[124].mxu1 %vm10055_vm1, %v19085_v3  ;;  %vm10571_vm11 = vmpackc.low %vm2052_vm9, %vm2036_vm0  ;;  %vm2069_vm1 = vcmp.eq.s32.totalorder %v12035_v9, %v19873_v50  ;;  %vm2084_vm0 = vcmp.eq.s32.totalorder %v12040_v10, %v19874_v29  ;;  %vm2166_vm9 = vcmp.eq.s32.totalorder %v12095_v22, %v19875_v7 }
 0x3d2   : > { %10742 = vmatprep.mubr.msk.bf16.mxu1 %vm10741_vm6, %v19085_v3  ;;  %vm10573_vm6 = vmpackc.low %vm2085_vm15, %vm2069_vm1  ;;  %vm2215_vm1 = vcmp.eq.s32.totalorder %v12130_v28, %v19872_v43 }
 0x3d7   : > { %10536 = vmatmul.mubr.msk.bf16.gmra.mrb[124].mxu0 %vm10535_vm4, %v19085_v3  ;;  %vm10745_vm4 = vmpackc.low %vm2183_vm10, %vm2167_vm12  ;;  %vm19877_vm12 = vnez %v19584_v13  ;;  %v6273_v13 = vpop.f32.mrb[27].mxu1 }
 0x3d8   : > { %10570 = vmatprep.mubr.msk.bf16.mxu0 %vm10569_vm5, %v19085_v3  ;;  %vm2068_vm5 = vcmp.eq.s32.totalorder %v12035_v9, %v19874_v29  ;;  %vm19878_vm10 = vmpackc.low %vm19876_vm7, %vm19877_vm12  ;;  %vm19879_vm12 = vnez %v19601_v56  ;;  %v19899_v13 = vld [vmem:[#allocation54_spill] sm:$0xff] }
 0x3d9   : > { %10744 = vmatmul.mubr.msk.bf16.vlgmr.msra.gmra.mrb[128].mxu1 %vm10743_vm2, %v19085_v3  ;;  %vm10575_vm15 = vmpackc.low %vm2084_vm0, %vm2068_vm5  ;;  %vm2101_vm2 = vcmp.eq.s32.totalorder %v12057_v14, %v19873_v50  ;;  %vm2100_vm5 = vcmp.eq.s32.totalorder %v12057_v14, %v19874_v29  ;;  %vm2116_vm0 = vcmp.eq.s32.totalorder %v12063_v15, %v19874_v29 }
 0x3da   : > { %10746 = vmatprep.mubr.msk.bf16.mxu1 %vm10745_vm4, %v19085_v3  ;;  %vm2117_vm4 = vcmp.eq.s32.totalorder %v12063_v15, %v19873_v50 }
 0x3db   : > { %vm10577_vm3 = vmpackc.low %vm2117_vm4, %vm2101_vm2  ;;  %vm2133_vm4 = vcmp.eq.s32.totalorder %v12081_v18, %v19873_v50 }
 0x3dc   : > { %vm10579_vm2 = vmpackc.low %vm2116_vm0, %vm2100_vm5  ;;  %vm2132_vm5 = vcmp.eq.s32.totalorder %v12081_v18, %v19874_v29  ;;  %vm2148_vm0 = vcmp.eq.s32.totalorder %v12087_v19, %v19874_v29 }
 0x3df   : > { %10572 = vmatmul.mubr.msk.bf16.vlgmr.msra.gmra.mrb[0].mxu0 %vm10571_vm11, %v19085_v3  ;;  %vm2199_vm11 = vcmp.eq.s32.totalorder %v12122_v27, %v19872_v43 }
 0x3e0   : > { %10574 = vmatprep.mubr.msk.bf16.mxu0 %vm10573_vm6, %v19085_v3  ;;  %10698 = vmatpush1.bf16.msk.msra.mxu0 %vm19878_vm10, %v19085_v3  ;;  %vm10747_vm6 = vmpackc.low %vm2182_vm13, %vm2166_vm9  ;;  %vm19880_vm10 = vnez %v19599_v21  ;;  %vm2214_vm9 = vcmp.eq.s32.totalorder %v12130_v28, %v19875_v7  ;;  %vm19882_vm13 = vnez %v19630_v37  ;;  %v17788_v21 = vpop.f32.mrb[28].mxu1 }
 0x3e1   : > { %7633 = vmatprep.subr.bf16.mxu0 %v19089_v6  ;;  %vm10749_vm7 = vmpackc.low %vm2215_vm1, %vm2199_vm11  ;;  %10748 = vmatmul.mubr.msk.bf16.gmra.mrb[132].mxu1 %vm10747_vm6, %v19085_v3  ;;  %vm19883_vm11 = vnez %v19628_v40  ;;  %v6278_v56 = vpop.f32.mrb[29].mxu1  ;;  %vm2149_vm6 = vcmp.eq.s32.totalorder %v12087_v19, %v19873_v50  ;;  %v19891_v19 = vld [vmem:[#allocation9_spill] sm:$0xff] }
 0x3e2   : > { %vm19881_vm8 = vmpackc.low %vm19879_vm12, %vm19880_vm10  ;;  %10750 = vmatprep.mubr.msk.bf16.mxu1 %vm10749_vm7, %v19085_v3  ;;  %v17799_v37 = vpop.f32.mrb[30].mxu1  ;;  %vm19885_vm10 = vnez %v19648_v8  ;;  %v19903_v56 = vld [vmem:[#allocation12_spill] sm:$0xff] }
 0x3e3   : > { %vm19884_vm1 = vmpackc.low %vm19882_vm13, %vm19883_vm11  ;;  %v6281_v40 = vpop.f32.mrb[31].mxu1  ;;  %vm19886_vm13 = vnez %v19646_v32  ;;  %v19892_v32 = vld [vmem:[#allocation10_spill] sm:$0xff] }
 0x3e4   : > { %10700 = vmatpush1.bf16.msk.msra.mxu0 %vm19881_vm8, %v19085_v3  ;;  %vm2198_vm8 = vcmp.eq.s32.totalorder %v12122_v27, %v19875_v7  ;;  %vm19887_vm11 = vmpackc.low %vm19885_vm10, %vm19886_vm13  ;;  %v17826_v18 = vpop.f32.mrb[32].mxu1  ;;  %vm2181_vm10 = vcmp.eq.s32.totalorder %v12098_v23, %v19873_v50 }
 0x3e5   : > { %7635 = vmatprep.subr.bf16.mxu0 %v19089_v6  ;;  %vm10751_vm7 = vmpackc.low %vm2214_vm9, %vm2198_vm8  ;;  %vm2230_vm8 = vcmp.eq.s32.totalorder %v12194_v35, %v19875_v7  ;;  %vm2246_vm9 = vcmp.eq.s32.totalorder %v12208_v38, %v19875_v7  ;;  %v6286_v8 = vpop.f32.mrb[33].mxu1 }
 0x3e6   : > { %vm10755_vm13 = vmpackc.low %vm2246_vm9, %vm2230_vm8  ;;  %vm2262_vm8 = vcmp.eq.s32.totalorder %v19891_v19, %v19875_v7  ;;  %vm2278_vm9 = vcmp.eq.s32.totalorder %v19892_v32, %v19875_v7 }
 0x3e7   : > { %10576 = vmatmul.mubr.msk.bf16.gmra.mrb[4].mxu0 %vm10575_vm15, %v19085_v3  ;;  %vm2231_vm15 = vcmp.eq.s32.totalorder %v12194_v35, %v19872_v43 }
 0x3e8   : > { %10578 = vmatprep.mubr.msk.bf16.mxu0 %vm10577_vm3, %v19085_v3  ;;  %10702 = vmatpush1.bf16.msk.msra.mxu0 %vm19884_vm1, %v19085_v3  ;;  %vm2247_vm3 = vcmp.eq.s32.totalorder %v12208_v38, %v19872_v43  ;;  %vm10581_vm1 = vmpackc.low %vm2149_vm6, %vm2133_vm4  ;;  %vm2263_vm4 = vcmp.eq.s32.totalorder %v19891_v19, %v19872_v43  ;;  %vm2279_vm6 = vcmp.eq.s32.totalorder %v19892_v32, %v19872_v43 }
 0x3e9   : > { %7637 = vmatprep.subr.bf16.mxu0 %v19089_v6  ;;  %vm10753_vm12 = vmpackc.low %vm2247_vm3, %vm2231_vm15  ;;  %10752 = vmatmul.mubr.msk.bf16.gmra.mrb[136].mxu1 %vm10751_vm7, %v19085_v3  ;;  %vm19888_vm15 = vnez %v19677_v26  ;;  %vm19889_vm3 = vnez %v19675_v36  ;;  %v17837_v26 = vpop.f32.mrb[34].mxu1 }
 0x3ea   : > { %10754 = vmatprep.mubr.msk.bf16.mxu1 %vm10753_vm12, %v19085_v3  ;;  %vm10583_vm7 = vmpackc.low %vm2148_vm0, %vm2132_vm5  ;;  %vm2165_vm12 = vcmp.eq.s32.totalorder %v12095_v22, %v19873_v50  ;;  %v6289_v36 = vpop.f32.mrb[35].mxu1  ;;  %vm2164_vm5 = vcmp.eq.s32.totalorder %v12095_v22, %v19874_v29  ;;  %vm2180_vm0 = vcmp.eq.s32.totalorder %v12098_v23, %v19874_v29  ;;  %v19902_v23 = vld [vmem:[#allocation11_spill] sm:$0xff] }
 0x3eb   : > { %v17864_v22 = vpop.f32.mrb[36].mxu1 }
 0x3ec   : > { %10704 = vmatpush1.bf16.msk.msra.mxu0 %vm19887_vm11, %v19085_v3  ;;  %vm10757_vm11 = vmpackc.low %vm2279_vm6, %vm2263_vm4  ;;  %vm19900_vm6 = vnez %v19899_v13  ;;  %v6294_v40 = vpop.f32.mrb[37].mxu1  ;;  %v19909_v13 = vld [vmem:[#allocation17_spill] sm:$0xff] }
 0x3ed   : > { %7639 = vmatprep.subr.bf16.mxu0 %v19089_v6  ;;  %v17875_v8 = vpop.f32.mrb[38].mxu1  ;;  %v19911_v40 = vld [vmem:[#allocation14_spill] sm:$0xff] }
 0x3ee   : > { %v6297_v36 = vpop.f32.mrb[39].mxu1 }
 0x3ef   : > { %10580 = vmatmul.mubr.msk.bf16.gmra.mrb[8].mxu0 %vm10579_vm2, %v19085_v3  ;;  %vm19890_vm2 = vmpackc.low %vm19888_vm15, %vm19889_vm3  ;;  %vm19895_vm15 = vnez %v19894_v57  ;;  %v19904_v57 = vld [vmem:[#allocation57_spill] sm:$0xff]  ;;  %v19915_v36 = vld [vmem:[#allocation18_spill] sm:$0xff] }
 0x3f0   : > { %10582 = vmatprep.mubr.msk.bf16.mxu0 %vm10581_vm1, %v19085_v3  ;;  %10706 = vmatpush1.bf16.msk.msra.mxu0 %vm19890_vm2, %v19085_v3  ;;  %vm19893_vm1 = vnez %v19696_v17  ;;  %vm10585_vm2 = vmpackc.low %vm2181_vm10, %vm2165_vm12  ;;  %v19897_v17 = vld [vmem:[#allocation55_spill] sm:$0xff]  ;;  %vm2295_vm12 = vcmp.eq.s32.totalorder %v19902_v23, %v19872_v43  ;;  %vm2311_vm10 = vcmp.eq.s32.totalorder %v19903_v56, %v19872_v43 }
 0x3f1   : > { %7641 = vmatprep.subr.bf16.mxu0 %v19089_v6  ;;  %vm19896_vm3 = vmpackc.low %vm19893_vm1, %vm19895_vm15  ;;  %10756 = vmatmul.mubr.msk.bf16.gmra.mrb[140].mxu1 %vm10755_vm13, %v19085_v3  ;;  %vm19898_vm4 = vnez %v19897_v17  ;;  %vm2213_vm1 = vcmp.eq.s32.totalorder %v12130_v28, %v19873_v50  ;;  %v19906_v17 = vld [vmem:[#allocation56_spill] sm:$0xff] }
 0x3f2   : > { %10758 = vmatprep.mubr.msk.bf16.mxu1 %vm10757_vm11, %v19085_v3  ;;  %vm10587_vm13 = vmpackc.low %vm2180_vm0, %vm2164_vm5  ;;  %vm2197_vm11 = vcmp.eq.s32.totalorder %v12122_v27, %v19873_v50  ;;  %vm2196_vm5 = vcmp.eq.s32.totalorder %v12122_v27, %v19874_v29  ;;  %vm2212_vm0 = vcmp.eq.s32.totalorder %v12130_v28, %v19874_v29  ;;  %v17902_v27 = vpop.f32.mrb[40].mxu1  ;;  %v19914_v28 = vld [vmem:[#allocation15_spill] sm:$0xff] }
 0x3f3   : > { %vm10759_vm15 = vmpackc.low %vm2278_vm9, %vm2262_vm8  ;;  %vm2294_vm8 = vcmp.eq.s32.totalorder %v19902_v23, %v19875_v7  ;;  %vm2310_vm9 = vcmp.eq.s32.totalorder %v19903_v56, %v19875_v7 }
 0x3f4   : > { %10708 = vmatpush1.bf16.msk.msra.mxu0 %vm19896_vm3, %v19085_v3  ;;  %vm10761_vm3 = vmpackc.low %vm2311_vm10, %vm2295_vm12  ;;  %vm19910_vm12 = vnez %v19909_v13  ;;  %vm19912_vm10 = vnez %v19911_v40  ;;  %v19925_v40 = vld [vmem:[#allocation24_spill] sm:$0xff] }
 0x3f5   : > { %7643 = vmatprep.subr.bf16.mxu0 %v19089_v6 }
 0x3f7   : > { %10584 = vmatmul.mubr.msk.bf16.gmra.mrb[12].mxu0 %vm10583_vm7, %v19085_v3  ;;  %vm19901_vm7 = vmpackc.low %vm19898_vm4, %vm19900_vm6  ;;  %vm19907_vm4 = vnez %v19906_v17 }
 0x3f8   : > { %10586 = vmatprep.mubr.msk.bf16.mxu0 %vm10585_vm2, %v19085_v3  ;;  %10710 = vmatpush1.bf16.msk.msra.mxu0 %vm19901_vm7, %v19085_v3  ;;  %vm19905_vm2 = vnez %v19904_v57  ;;  %vm10589_vm7 = vmpackc.low %vm2213_vm1, %vm2197_vm11  ;;  %vm2327_vm11 = vcmp.eq.s32.totalorder %v19914_v28, %v19872_v43  ;;  %vm2343_vm1 = vcmp.eq.s32.totalorder %v19915_v36, %v19872_v43  ;;  %v6302_v57 = vpop.f32.mrb[41].mxu1 }
 0x3f9   : > { %7645 = vmatprep.subr.bf16.mxu0 %v19089_v6  ;;  %vm19908_vm6 = vmpackc.low %vm19905_vm2, %vm19907_vm4  ;;  %10760 = vmatmul.mubr.msk.bf16.gmra.mrb[144].mxu1 %vm10759_vm15, %v19085_v3  ;;  %vm2245_vm2 = vcmp.eq.s32.totalorder %v12208_v38, %v19873_v50  ;;  %v17913_v17 = vpop.f32.mrb[42].mxu1 }
 0x3fa   : > { %10762 = vmatprep.mubr.msk.bf16.mxu1 %vm10761_vm3, %v19085_v3  ;;  %vm10591_vm15 = vmpackc.low %vm2212_vm0, %vm2196_vm5  ;;  %vm2229_vm3 = vcmp.eq.s32.totalorder %v12194_v35, %v19873_v50  ;;  %v6305_v13 = vpop.f32.mrb[43].mxu1  ;;  %vm2228_vm5 = vcmp.eq.s32.totalorder %v12194_v35, %v19874_v29  ;;  %vm2244_vm0 = vcmp.eq.s32.totalorder %v12208_v38, %v19874_v29  ;;  %v19924_v38 = vld [vmem:[#allocation23_spill] sm:$0xff] }
 0x3fb   : > { %vm10763_vm4 = vmpackc.low %vm2310_vm9, %vm2294_vm8  ;;  %vm2326_vm8 = vcmp.eq.s32.totalorder %v19914_v28, %v19875_v7  ;;  %vm2342_vm9 = vcmp.eq.s32.totalorder %v19915_v36, %v19875_v7  ;;  %v17940_v35 = vpop.f32.mrb[44].mxu1 }
 0x3fc   : > { %10712 = vmatpush1.bf16.msk.msra.mxu0 %vm19908_vm6, %v19085_v3  ;;  %vm10765_vm6 = vmpackc.low %vm2343_vm1, %vm2327_vm11  ;;  %v6310_v57 = vpop.f32.mrb[45].mxu1 }
 0x3fd   : > { %7647 = vmatprep.subr.bf16.mxu0 %v19089_v6  ;;  %v17951_v13 = vpop.f32.mrb[46].mxu1 }
 0x3ff   : > { %10588 = vmatmul.mubr.msk.bf16.gmra.mrb[16].mxu0 %vm10587_vm13, %v19085_v3  ;;  %vm19913_vm13 = vmpackc.low %vm19910_vm12, %vm19912_vm10  ;;  %vm19917_vm12 = vnez %v19794_v59  ;;  %v19921_v59 = vld [vmem:[#allocation13_spill] sm:$0xff] }
 0x400   : > { %10590 = vmatprep.mubr.msk.bf16.mxu0 %vm10589_vm7, %v19085_v3  ;;  %10714 = vmatpush1.bf16.msk.msra.mxu0 %vm19913_vm13, %v19085_v3  ;;  %vm19916_vm7 = vnez %v19799_v41  ;;  %vm10593_vm13 = vmpackc.low %vm2245_vm2, %vm2229_vm3  ;;  %v19919_v41 = vld [vmem:[#allocation16_spill] sm:$0xff]  ;;  %vm19922_vm1 = vnez %v19921_v59  ;;  %vm2359_vm3 = vcmp.eq.s32.totalorder %v19924_v38, %v19872_v43  ;;  %vm2375_vm2 = vcmp.eq.s32.totalorder %v19925_v40, %v19872_v43 }
 0x401   : > { %7649 = vmatprep.subr.bf16.mxu0 %v19089_v6  ;;  %vm19918_vm10 = vmpackc.low %vm19916_vm7, %vm19917_vm12  ;;  %10764 = vmatmul.mubr.msk.bf16.gmra.mrb[148].mxu1 %vm10763_vm4, %v19085_v3  ;;  %vm19920_vm11 = vnez %v19919_v41  ;;  %vm2277_vm7 = vcmp.eq.s32.totalorder %v19892_v32, %v19873_v50  ;;  %v6313_v41 = vpop.f32.mrb[47].mxu1 }
 0x402   : > { %10766 = vmatprep.mubr.msk.bf16.mxu1 %vm10765_vm6, %v19085_v3  ;;  %vm10595_vm4 = vmpackc.low %vm2244_vm0, %vm2228_vm5  ;;  %vm2261_vm6 = vcmp.eq.s32.totalorder %v19891_v19, %v19873_v50  ;;  %vm2260_vm5 = vcmp.eq.s32.totalorder %v19891_v19, %v19874_v29  ;;  %vm2276_vm0 = vcmp.eq.s32.totalorder %v19892_v32, %v19874_v29  ;;  %v19933_v19 = vld [vmem:[#allocation25_spill] sm:$0xff]  ;;  %v19934_v32 = vld [vmem:[#allocation26_spill] sm:$0xff] }
 0x403   : > { %vm10767_vm12 = vmpackc.low %vm2342_vm9, %vm2326_vm8  ;;  %vm2358_vm8 = vcmp.eq.s32.totalorder %v19924_v38, %v19875_v7  ;;  %vm2374_vm9 = vcmp.eq.s32.totalorder %v19925_v40, %v19875_v7 }
 0x404   : > { %10716 = vmatpush1.bf16.msk.msra.mxu0 %vm19918_vm10, %v19085_v3  ;;  %vm10769_vm10 = vmpackc.low %vm2375_vm2, %vm2359_vm3  ;;  %vm19929_vm3 = vnez %v19835_v52 }
 0x405   : > { %7651 = vmatprep.subr.bf16.mxu0 %v19089_v6 }
 0x407   : > { %10592 = vmatmul.mubr.msk.bf16.gmra.mrb[20].mxu0 %vm10591_vm15, %v19085_v3  ;;  %vm19923_vm15 = vmpackc.low %vm19920_vm11, %vm19922_vm1  ;;  %vm19927_vm11 = vnez %v19817_v55  ;;  %v17978_v55 = vpop.f32.mrb[48].mxu1 }
 0x408   : > { %10594 = vmatprep.mubr.msk.bf16.mxu0 %vm10593_vm13, %v19085_v3  ;;  %10718 = vmatpush1.bf16.msk.msra.mxu0 %vm19923_vm15, %v19085_v3  ;;  %vm19926_vm13 = vnez %v19823_v63  ;;  %vm10597_vm15 = vmpackc.low %vm2277_vm7, %vm2261_vm6  ;;  %v19930_v63 = vld [vmem:[#allocation58_spill] sm:$0xff]  ;;  %vm2391_vm6 = vcmp.eq.s32.totalorder %v19933_v19, %v19872_v43  ;;  %vm2407_vm7 = vcmp.eq.s32.totalorder %v19934_v32, %v19872_v43  ;;  %v6318_v59 = vpop.f32.mrb[49].mxu1 }
 0x409   : > { %7653 = vmatprep.subr.bf16.mxu0 %v19089_v6  ;;  %vm19928_vm1 = vmpackc.low %vm19926_vm13, %vm19927_vm11  ;;  %10768 = vmatmul.mubr.msk.bf16.gmra.mrb[152].mxu1 %vm10767_vm12, %v19085_v3  ;;  %vm19931_vm2 = vnez %v19930_v63  ;;  %vm2309_vm13 = vcmp.eq.s32.totalorder %v19903_v56, %v19873_v50  ;;  %v17989_v52 = vpop.f32.mrb[50].mxu1  ;;  %v19947_v59 = vld [vmem:[#allocation31_spill] sm:$0xff] }
 0x40a   : > { %10770 = vmatprep.mubr.msk.bf16.mxu1 %vm10769_vm10, %v19085_v3  ;;  %vm10599_vm12 = vmpackc.low %vm2276_vm0, %vm2260_vm5  ;;  %vm2293_vm10 = vcmp.eq.s32.totalorder %v19902_v23, %v19873_v50  ;;  %v6321_v57 = vpop.f32.mrb[51].mxu1  ;;  %vm2292_vm5 = vcmp.eq.s32.totalorder %v19902_v23, %v19874_v29  ;;  %vm2308_vm0 = vcmp.eq.s32.totalorder %v19903_v56, %v19874_v29  ;;  %v19941_v23 = vld [vmem:[#allocation28_spill] sm:$0xff] }
 0x40b   : > { %vm10771_vm11 = vmpackc.low %vm2374_vm9, %vm2358_vm8  ;;  %vm2406_vm8 = vcmp.eq.s32.totalorder %v19934_v32, %v19875_v7  ;;  %vm19937_vm9 = vnez %v19861_v25  ;;  %v18016_v16 = vpop.f32.mrb[52].mxu1 }
 0x40c   : > { %10720 = vmatpush1.bf16.msk.msra.mxu0 %vm19928_vm1, %v19085_v3  ;;  %vm10773_vm1 = vmpackc.low %vm2407_vm7, %vm2391_vm6  ;;  %v6326_v56 = vpop.f32.mrb[53].mxu1 }
 0x40d   : > { %7655 = vmatprep.subr.bf16.mxu0 %v19089_v6 }
 0x40f   : > { %10596 = vmatmul.mubr.msk.bf16.gmra.mrb[24].mxu0 %vm10595_vm4, %v19085_v3  ;;  %vm19932_vm4 = vmpackc.low %vm19929_vm3, %vm19931_vm2 }
 0x410   : > { %10598 = vmatprep.mubr.msk.bf16.mxu0 %vm10597_vm15, %v19085_v3  ;;  %10722 = vmatpush1.bf16.msk.msra.mxu0 %vm19932_vm4, %v19085_v3  ;;  %vm19935_vm15 = vnez %v19845_v53  ;;  %vm10601_vm2 = vmpackc.low %vm2309_vm13, %vm2293_vm10  ;;  %vm19938_vm4 = vnez %v19857_v61  ;;  %v19940_v53 = vld [vmem:[#allocation27_spill] sm:$0xff]  ;;  %vm2325_vm13 = vcmp.eq.s32.totalorder %v19914_v28, %v19873_v50  ;;  %v18027_v61 = vpop.f32.mrb[54].mxu1 }
 0x411   : > { %7657 = vmatprep.subr.bf16.mxu0 %v19089_v6  ;;  %vm19936_vm3 = vmpackc.low %vm17456_vm14, %vm19935_vm15  ;;  %10772 = vmatmul.mubr.msk.bf16.gmra.mrb[156].mxu1 %vm10771_vm11, %v19085_v3  ;;  %vm2390_vm14 = vcmp.eq.s32.totalorder %v19933_v19, %v19875_v7  ;;  %vm2423_vm7 = vcmp.eq.s32.totalorder %v19940_v53, %v19872_v43  ;;  %vm2341_vm11 = vcmp.eq.s32.totalorder %v19915_v36, %v19873_v50  ;;  %v6329_v25 = vpop.f32.mrb[55].mxu1 }
 0x412   : > { %10774 = vmatprep.mubr.msk.bf16.mxu1 %vm10773_vm1, %v19085_v3  ;;  %vm19939_vm6 = vmpackc.low %vm19937_vm9, %vm19938_vm4 }
 0x413   : > { %vm10603_vm10 = vmpackc.low %vm2308_vm0, %vm2292_vm5  ;;  %vm2324_vm5 = vcmp.eq.s32.totalorder %v19914_v28, %v19874_v29  ;;  %vm2340_vm0 = vcmp.eq.s32.totalorder %v19915_v36, %v19874_v29 }
 0x414   : > { %10724 = vmatpush1.bf16.msk.msra.mxu0 %vm19936_vm3, %v19085_v3  ;;  %vm10775_vm1 = vmpackc.low %vm2406_vm8, %vm2390_vm14  ;;  %vm19942_vm3 = vnez %v19865_v44  ;;  %vm2422_vm14 = vcmp.eq.s32.totalorder %v19940_v53, %v19875_v7  ;;  %vm2438_vm8 = vcmp.eq.s32.totalorder %v19941_v23, %v19875_v7  ;;  %v19946_v44 = vld [vmem:[#allocation30_spill] sm:$0xff] }
 0x415   : > { %7659 = vmatprep.subr.bf16.mxu0 %v19089_v6  ;;  %vm10605_vm4 = vmpackc.low %vm2341_vm11, %vm2325_vm13  ;;  %vm2373_vm13 = vcmp.eq.s32.totalorder %v19925_v40, %v19873_v50 }
 0x416   : > { %vm10779_vm11 = vmpackc.low %vm2438_vm8, %vm2422_vm14  ;;  %vm2389_vm8 = vcmp.eq.s32.totalorder %v19933_v19, %v19873_v50 }
 0x417   : > { %10600 = vmatmul.mubr.msk.bf16.gmra.mrb[28].mxu0 %vm10599_vm12, %v19085_v3  ;;  %vm2439_vm12 = vcmp.eq.s32.totalorder %v19941_v23, %v19872_v43 }
 0x418   : > { %10602 = vmatprep.mubr.msk.bf16.mxu0 %vm10601_vm2, %v19085_v3  ;;  %10726 = vmatpush1.bf16.msk.msra.mxu0 %vm19939_vm6, %v19085_v3  ;;  %vm10777_vm15 = vmpackc.low %vm2439_vm12, %vm2423_vm7  ;;  %vm19943_vm2 = vnez %v19863_v11  ;;  %v19945_v11 = vld [vmem:[#allocation29_spill] sm:$0xff]  ;;  %vm2471_vm7 = vcmp.eq.s32.totalorder %v19946_v44, %v19872_v43 }
 0x419   : > { %7661 = vmatprep.subr.bf16.mxu0 %v19089_v6  ;;  %vm19944_vm9 = vmpackc.low %vm19942_vm3, %vm19943_vm2  ;;  %10776 = vmatmul.mubr.msk.bf16.gmra.mrb[160].mxu1 %vm10775_vm1, %v19085_v3  ;;  %v18047_v6 = vpop.f32.mrb[56].mxu1  ;;  %vm2455_vm6 = vcmp.eq.s32.totalorder %v19945_v11, %v19872_v43  ;;  %vm2356_vm3 = vcmp.eq.s32.totalorder %v19924_v38, %v19874_v29  ;;  %vm2372_vm2 = vcmp.eq.s32.totalorder %v19925_v40, %v19874_v29 }
 0x41a   : > { %10778 = vmatprep.mubr.msk.bf16.mxu1 %vm10777_vm15, %v19085_v3  ;;  %v6334_v28 = vpop.f32.mrb[57].mxu1  ;;  %vm10607_vm12 = vmpackc.low %vm2340_vm0, %vm2324_vm5  ;;  %vm2487_vm5 = vcmp.eq.s32.totalorder %v19947_v59, %v19872_v43 }
 0x41b   : > { %v18057_v36 = vpop.f32.mrb[58].mxu1  ;;  %vm10781_vm1 = vmpackc.low %vm2471_vm7, %vm2455_vm6  ;;  %vm2405_vm6 = vcmp.eq.s32.totalorder %v19934_v32, %v19873_v50  ;;  %v19949_v28 = vld [vmem:[#allocation33_spill] sm:$0xff] }
 0x41c   : > { %10728 = vmatpush1.bf16.msk.msra.mxu0 %vm19944_vm9, %v19085_v3  ;;  %v6337_v41 = vpop.f32.mrb[59].mxu1  ;;  %vm2454_vm9 = vcmp.eq.s32.totalorder %v19945_v11, %v19875_v7  ;;  %vm10611_vm14 = vmpackc.low %vm2372_vm2, %vm2356_vm3  ;;  %vm2519_vm3 = vcmp.eq.s32.totalorder %v19949_v28, %v19872_v43 }
 0x41d   : > { %v18071_v63 = vpop.f32.mrb[60].mxu1 }
 0x41e   : > { %v6342_v57 = vpop.f32.mrb[61].mxu1 }
 0x41f   : > { %10604 = vmatmul.mubr.msk.bf16.gmra.mrb[32].mxu0 %vm10603_vm10, %v19085_v3  ;;  %vm2357_vm10 = vcmp.eq.s32.totalorder %v19924_v38, %v19873_v50  ;;  %v19948_v38 = vld [vmem:[#allocation32_spill] sm:$0xff]  ;;  %v18081_v40 = vpop.f32.mrb[62].mxu1 }
 0x420   : > { %10606 = vmatprep.mubr.msk.bf16.mxu0 %vm10605_vm4, %v19085_v3  ;;  %vm10609_vm15 = vmpackc.low %vm2373_vm13, %vm2357_vm10  ;;  %vm2470_vm4 = vcmp.eq.s32.totalorder %v19946_v44, %v19875_v7  ;;  %vm2503_vm0 = vcmp.eq.s32.totalorder %v19948_v38, %v19872_v43  ;;  %v6345_v56 = vpop.f32.mrb[63].mxu1  ;;  %vm2388_vm13 = vcmp.eq.s32.totalorder %v19933_v19, %v19874_v29  ;;  %v19950_v19 = vld [vmem:[#allocation34_spill] sm:$0xff] }
 0x421   : > { %10780 = vmatmul.mubr.msk.bf16.gmra.mrb[164].mxu1 %vm10779_vm11, %v19085_v3  ;;  %vm10783_vm7 = vmpackc.low %vm2470_vm4, %vm2454_vm9  ;;  %vm2404_vm11 = vcmp.eq.s32.totalorder %v19934_v32, %v19874_v29  ;;  %vm2535_vm2 = vcmp.eq.s32.totalorder %v19950_v19, %v19872_v43  ;;  %vm2421_vm4 = vcmp.eq.s32.totalorder %v19940_v53, %v19873_v50 }
 0x422   : > { %10782 = vmatprep.mubr.msk.bf16.mxu1 %vm10781_vm1, %v19085_v3  ;;  %vm10613_vm10 = vmpackc.low %vm2405_vm6, %vm2389_vm8  ;;  %vm2486_vm1 = vcmp.eq.s32.totalorder %v19947_v59, %v19875_v7  ;;  %vm2420_vm6 = vcmp.eq.s32.totalorder %v19940_v53, %v19874_v29  ;;  %v19954_v53 = vld [vmem:[#allocation36_spill] sm:$0xff] }
 0x423   : > { %vm10615_vm9 = vmpackc.low %vm2404_vm11, %vm2388_vm13  ;;  %vm2567_vm11 = vcmp.eq.s32.totalorder %v19954_v53, %v19872_v43 }
 0x424   : > { %v18095_v25 = vpop.f32.mrb[64].mxu1 }
 0x425   : > { %v6350_v41 = vpop.f32.mrb[65].mxu1 }
 0x426   : > { %v18105_v32 = vpop.f32.mrb[66].mxu1  ;;  %v19953_v41 = vld [vmem:[#allocation35_spill] sm:$0xff] }
 0x427   : > { %10608 = vmatmul.mubr.msk.bf16.gmra.mrb[36].mxu0 %vm10607_vm12, %v19085_v3  ;;  %vm10785_vm12 = vmpackc.low %vm2503_vm0, %vm2487_vm5  ;;  %vm2437_vm5 = vcmp.eq.s32.totalorder %v19941_v23, %v19873_v50  ;;  %19951 = vst [vmem:[#allocation22_spill] sm:$0xff] %v18105_v32  ;;  %v6353_v57 = vpop.f32.mrb[67].mxu1  ;;  %vm2551_vm13 = vcmp.eq.s32.totalorder %v19953_v41, %v19872_v43 }
 0x428   : > { %10610 = vmatprep.mubr.msk.bf16.mxu0 %vm10609_vm15, %v19085_v3  ;;  %vm2502_vm15 = vcmp.eq.s32.totalorder %v19948_v38, %v19875_v7  ;;  %vm10617_vm8 = vmpackc.low %vm2437_vm5, %vm2421_vm4  ;;  %vm2452_vm5 = vcmp.eq.s32.totalorder %v19945_v11, %v19874_v29 }
 0x429   : > { %10784 = vmatmul.mubr.msk.bf16.gmra.mrb[168].mxu1 %vm10783_vm7, %v19085_v3  ;;  %vm10787_vm0 = vmpackc.low %vm2502_vm15, %vm2486_vm1  ;;  %vm2436_vm7 = vcmp.eq.s32.totalorder %v19941_v23, %v19874_v29  ;;  %vm2453_vm15 = vcmp.eq.s32.totalorder %v19945_v11, %v19873_v50  ;;  %v19958_v11 = vld [vmem:[#allocation38_spill] sm:$0xff] }
 0x42a   : > { %10786 = vmatprep.mubr.msk.bf16.mxu1 %vm10785_vm12, %v19085_v3  ;;  %vm2518_vm12 = vcmp.eq.s32.totalorder %v19949_v28, %v19875_v7  ;;  %vm10619_vm1 = vmpackc.low %vm2436_vm7, %vm2420_vm6  ;;  %vm2599_vm7 = vcmp.eq.s32.totalorder %v19958_v11, %v19872_v43 }
 0x42c   : > { %v18119_v56 = vpop.f32.mrb[68].mxu1 }
 0x42d   : > { %19952 = vst [vmem:[#allocation20_spill] sm:$0xff] %v18119_v56  ;;  %v6358_v57 = vpop.f32.mrb[69].mxu1 }
 0x42e   : > { %v18129_v23 = vpop.f32.mrb[70].mxu1  ;;  %v19957_v57 = vld [vmem:[#allocation37_spill] sm:$0xff] }
 0x42f   : > { %10612 = vmatmul.mubr.msk.bf16.gmra.mrb[40].mxu0 %vm10611_vm14, %v19085_v3  ;;  %vm10789_vm14 = vmpackc.low %vm2535_vm2, %vm2519_vm3  ;;  %vm2469_vm3 = vcmp.eq.s32.totalorder %v19946_v44, %v19873_v50  ;;  %19955 = vst [vmem:[#allocation19_spill] sm:$0xff] %v18129_v23  ;;  %v6361_v32 = vpop.f32.mrb[71].mxu1  ;;  %vm2583_vm6 = vcmp.eq.s32.totalorder %v19957_v57, %v19872_v43 }
 0x430   : > { %10614 = vmatprep.mubr.msk.bf16.mxu0 %vm10613_vm10, %v19085_v3  ;;  %vm2534_vm10 = vcmp.eq.s32.totalorder %v19950_v19, %v19875_v7  ;;  %vm10621_vm4 = vmpackc.low %vm2469_vm3, %vm2453_vm15  ;;  %vm2484_vm3 = vcmp.eq.s32.totalorder %v19947_v59, %v19874_v29 }
 0x431   : > { %10788 = vmatmul.mubr.msk.bf16.gmra.mrb[172].mxu1 %vm10787_vm0, %v19085_v3  ;;  %vm10791_vm2 = vmpackc.low %vm2534_vm10, %vm2518_vm12  ;;  %vm2468_vm0 = vcmp.eq.s32.totalorder %v19946_v44, %v19874_v29  ;;  %vm2485_vm10 = vcmp.eq.s32.totalorder %v19947_v59, %v19873_v50  ;;  %v19962_v59 = vld [vmem:[#allocation40_spill] sm:$0xff] }
 0x432   : > { %10790 = vmatprep.mubr.msk.bf16.mxu1 %vm10789_vm14, %v19085_v3  ;;  %vm2550_vm14 = vcmp.eq.s32.totalorder %v19953_v41, %v19875_v7  ;;  %vm10623_vm12 = vmpackc.low %vm2468_vm0, %vm2452_vm5  ;;  %vm2631_vm0 = vcmp.eq.s32.totalorder %v19962_v59, %v19872_v43 }
 0x437   : > { %10616 = vmatmul.mubr.msk.bf16.gmra.mrb[44].mxu0 %vm10615_vm9, %v19085_v3  ;;  %vm10793_vm9 = vmpackc.low %vm2567_vm11, %vm2551_vm13  ;;  %vm2501_vm13 = vcmp.eq.s32.totalorder %v19948_v38, %v19873_v50 }
 0x438   : > { %10618 = vmatprep.mubr.msk.bf16.mxu0 %vm10617_vm8, %v19085_v3  ;;  %vm2566_vm8 = vcmp.eq.s32.totalorder %v19954_v53, %v19875_v7  ;;  %v18143_v32 = vpop.f32.mrb[72].mxu1  ;;  %vm10625_vm15 = vmpackc.low %vm2501_vm13, %vm2485_vm10  ;;  %vm2516_vm13 = vcmp.eq.s32.totalorder %v19949_v28, %v19874_v29 }
 0x439   : > { %10792 = vmatmul.mubr.msk.bf16.gmra.mrb[176].mxu1 %vm10791_vm2, %v19085_v3  ;;  %19956 = vst [vmem:[#allocation21_spill] sm:$0xff] %v18143_v32  ;;  %v6366_v23 = vpop.f32.mrb[73].mxu1  ;;  %vm10795_vm11 = vmpackc.low %vm2566_vm8, %vm2550_vm14  ;;  %vm2500_vm2 = vcmp.eq.s32.totalorder %v19948_v38, %v19874_v29  ;;  %vm2517_vm8 = vcmp.eq.s32.totalorder %v19949_v28, %v19873_v50  ;;  %v19966_v28 = vld [vmem:[#allocation42_spill] sm:$0xff] }
 0x43a   : > { %10794 = vmatprep.mubr.msk.bf16.mxu1 %vm10793_vm9, %v19085_v3  ;;  %v18153_v44 = vpop.f32.mrb[74].mxu1  ;;  %vm2582_vm9 = vcmp.eq.s32.totalorder %v19957_v57, %v19875_v7  ;;  %v19961_v23 = vld [vmem:[#allocation39_spill] sm:$0xff]  ;;  %vm10627_vm14 = vmpackc.low %vm2500_vm2, %vm2484_vm3  ;;  %vm2663_vm2 = vcmp.eq.s32.totalorder %v19966_v28, %v19872_v43 }
 0x43b   : > { %19959 = vst [vmem:[#allocation9_spill] sm:$0xff] %v18153_v44  ;;  %v6369_v56 = vpop.f32.mrb[75].mxu1  ;;  %vm2615_vm5 = vcmp.eq.s32.totalorder %v19961_v23, %v19872_v43 }
 0x43f   : > { %10620 = vmatmul.mubr.msk.bf16.gmra.mrb[48].mxu0 %vm10619_vm1, %v19085_v3  ;;  %vm10797_vm1 = vmpackc.low %vm2599_vm7, %vm2583_vm6  ;;  %vm2533_vm6 = vcmp.eq.s32.totalorder %v19950_v19, %v19873_v50 }
 0x440   : > { %10622 = vmatprep.mubr.msk.bf16.mxu0 %vm10621_vm4, %v19085_v3  ;;  %vm2598_vm4 = vcmp.eq.s32.totalorder %v19958_v11, %v19875_v7  ;;  %v18167_v56 = vpop.f32.mrb[76].mxu1  ;;  %vm10629_vm10 = vmpackc.low %vm2533_vm6, %vm2517_vm8  ;;  %vm2548_vm6 = vcmp.eq.s32.totalorder %v19953_v41, %v19874_v29 }
 0x441   : > { %10796 = vmatmul.mubr.msk.bf16.gmra.mrb[180].mxu1 %vm10795_vm11, %v19085_v3  ;;  %19960 = vst [vmem:[#allocation10_spill] sm:$0xff] %v18167_v56  ;;  %v6374_v44 = vpop.f32.mrb[77].mxu1  ;;  %vm10799_vm7 = vmpackc.low %vm2598_vm4, %vm2582_vm9  ;;  %vm2532_vm11 = vcmp.eq.s32.totalorder %v19950_v19, %v19874_v29  ;;  %vm2549_vm4 = vcmp.eq.s32.totalorder %v19953_v41, %v19873_v50  ;;  %v19970_v41 = vld [vmem:[#allocation44_spill] sm:$0xff] }
 0x442   : > { %10798 = vmatprep.mubr.msk.bf16.mxu1 %vm10797_vm1, %v19085_v3  ;;  %v18177_v38 = vpop.f32.mrb[78].mxu1  ;;  %vm2614_vm1 = vcmp.eq.s32.totalorder %v19961_v23, %v19875_v7  ;;  %v19965_v44 = vld [vmem:[#allocation41_spill] sm:$0xff]  ;;  %vm10631_vm9 = vmpackc.low %vm2532_vm11, %vm2516_vm13  ;;  %vm2695_vm11 = vcmp.eq.s32.totalorder %v19970_v41, %v19872_v43 }
 0x443   : > { %19963 = vst [vmem:[#allocation53_spill] sm:$0xff] %v18177_v38  ;;  %v6377_v32 = vpop.f32.mrb[79].mxu1  ;;  %vm2647_vm3 = vcmp.eq.s32.totalorder %v19965_v44, %v19872_v43 }
 0x447   : > { %10624 = vmatmul.mubr.msk.bf16.gmra.mrb[52].mxu0 %vm10623_vm12, %v19085_v3  ;;  %vm10801_vm12 = vmpackc.low %vm2631_vm0, %vm2615_vm5  ;;  %vm2565_vm5 = vcmp.eq.s32.totalorder %v19954_v53, %v19873_v50 }
 0x448   : > { %10626 = vmatprep.mubr.msk.bf16.mxu0 %vm10625_vm15, %v19085_v3  ;;  %vm2630_vm15 = vcmp.eq.s32.totalorder %v19962_v59, %v19875_v7  ;;  %vm10633_vm8 = vmpackc.low %vm2565_vm5, %vm2549_vm4  ;;  %vm2580_vm5 = vcmp.eq.s32.totalorder %v19957_v57, %v19874_v29 }
 0x449   : > { %10800 = vmatmul.mubr.msk.bf16.gmra.mrb[184].mxu1 %vm10799_vm7, %v19085_v3  ;;  %vm10803_vm0 = vmpackc.low %vm2630_vm15, %vm2614_vm1  ;;  %vm2564_vm7 = vcmp.eq.s32.totalorder %v19954_v53, %v19874_v29  ;;  %vm2581_vm15 = vcmp.eq.s32.totalorder %v19957_v57, %v19873_v50  ;;  %v19974_v57 = vld [vmem:[#allocation46_spill] sm:$0xff] }
 0x44a   : > { %10802 = vmatprep.mubr.msk.bf16.mxu1 %vm10801_vm12, %v19085_v3  ;;  %vm2646_vm12 = vcmp.eq.s32.totalorder %v19965_v44, %v19875_v7  ;;  %vm10635_vm1 = vmpackc.low %vm2564_vm7, %vm2548_vm6  ;;  %vm2727_vm7 = vcmp.eq.s32.totalorder %v19974_v57, %v19872_v43 }
 0x44c   : > { %v18191_v32 = vpop.f32.mrb[80].mxu1 }
 0x44d   : > { %19964 = vst [vmem:[#allocation55_spill] sm:$0xff] %v18191_v32  ;;  %v6382_v38 = vpop.f32.mrb[81].mxu1 }
 0x44e   : > { %v18201_v19 = vpop.f32.mrb[82].mxu1  ;;  %v19969_v38 = vld [vmem:[#allocation43_spill] sm:$0xff] }
 0x44f   : > { %10628 = vmatmul.mubr.msk.bf16.gmra.mrb[56].mxu0 %vm10627_vm14, %v19085_v3  ;;  %19967 = vst [vmem:[#allocation54_spill] sm:$0xff] %v18201_v19  ;;  %v6385_v56 = vpop.f32.mrb[83].mxu1  ;;  %vm10805_vm14 = vmpackc.low %vm2663_vm2, %vm2647_vm3  ;;  %vm2679_vm13 = vcmp.eq.s32.totalorder %v19969_v38, %v19872_v43  ;;  %vm2597_vm3 = vcmp.eq.s32.totalorder %v19958_v11, %v19873_v50 }
 0x450   : > { %10630 = vmatprep.mubr.msk.bf16.mxu0 %vm10629_vm10, %v19085_v3  ;;  %vm2662_vm10 = vcmp.eq.s32.totalorder %v19966_v28, %v19875_v7  ;;  %vm10637_vm4 = vmpackc.low %vm2597_vm3, %vm2581_vm15  ;;  %vm2612_vm3 = vcmp.eq.s32.totalorder %v19961_v23, %v19874_v29 }
 0x451   : > { %10804 = vmatmul.mubr.msk.bf16.gmra.mrb[188].mxu1 %vm10803_vm0, %v19085_v3  ;;  %vm10807_vm2 = vmpackc.low %vm2662_vm10, %vm2646_vm12  ;;  %vm2596_vm0 = vcmp.eq.s32.totalorder %v19958_v11, %v19874_v29  ;;  %vm2613_vm10 = vcmp.eq.s32.totalorder %v19961_v23, %v19873_v50  ;;  %v19978_v23 = vld [vmem:[#allocation48_spill] sm:$0xff] }
 0x452   : > { %10806 = vmatprep.mubr.msk.bf16.mxu1 %vm10805_vm14, %v19085_v3  ;;  %vm2678_vm14 = vcmp.eq.s32.totalorder %v19969_v38, %v19875_v7  ;;  %vm10639_vm12 = vmpackc.low %vm2596_vm0, %vm2580_vm5  ;;  %vm2759_vm0 = vcmp.eq.s32.totalorder %v19978_v23, %v19872_v43 }
 0x454   : > { %v18215_v56 = vpop.f32.mrb[84].mxu1 }
 0x455   : > { %19968 = vst [vmem:[#allocation11_spill] sm:$0xff] %v18215_v56  ;;  %v6390_v19 = vpop.f32.mrb[85].mxu1 }
 0x456   : > { %v18225_v53 = vpop.f32.mrb[86].mxu1  ;;  %v19973_v19 = vld [vmem:[#allocation45_spill] sm:$0xff] }
 0x457   : > { %10632 = vmatmul.mubr.msk.bf16.gmra.mrb[60].mxu0 %vm10631_vm9, %v19085_v3  ;;  %19971 = vst [vmem:[#allocation12_spill] sm:$0xff] %v18225_v53  ;;  %v6393_v32 = vpop.f32.mrb[87].mxu1  ;;  %vm10809_vm9 = vmpackc.low %vm2695_vm11, %vm2679_vm13  ;;  %vm2711_vm6 = vcmp.eq.s32.totalorder %v19973_v19, %v19872_v43  ;;  %vm2629_vm13 = vcmp.eq.s32.totalorder %v19962_v59, %v19873_v50 }
 0x458   : > { %10634 = vmatprep.mubr.msk.bf16.mxu0 %vm10633_vm8, %v19085_v3  ;;  %vm2694_vm8 = vcmp.eq.s32.totalorder %v19970_v41, %v19875_v7  ;;  %vm10641_vm15 = vmpackc.low %vm2629_vm13, %vm2613_vm10  ;;  %vm2644_vm13 = vcmp.eq.s32.totalorder %v19965_v44, %v19874_v29 }
 0x459   : > { %10808 = vmatmul.mubr.msk.bf16.gmra.mrb[192].mxu1 %vm10807_vm2, %v19085_v3  ;;  %vm10811_vm11 = vmpackc.low %vm2694_vm8, %vm2678_vm14  ;;  %vm2628_vm2 = vcmp.eq.s32.totalorder %v19962_v59, %v19874_v29  ;;  %vm2645_vm8 = vcmp.eq.s32.totalorder %v19965_v44, %v19873_v50  ;;  %v19982_v44 = vld [vmem:[#allocation50_spill] sm:$0xff] }
 0x45a   : > { %10810 = vmatprep.mubr.msk.bf16.mxu1 %vm10809_vm9, %v19085_v3  ;;  %vm2710_vm9 = vcmp.eq.s32.totalorder %v19973_v19, %v19875_v7  ;;  %vm10643_vm14 = vmpackc.low %vm2628_vm2, %vm2612_vm3  ;;  %vm2791_vm2 = vcmp.eq.s32.totalorder %v19982_v44, %v19872_v43 }
 0x45c   : > { %v18239_v32 = vpop.f32.mrb[88].mxu1 }
 0x45d   : > { %19972 = vst [vmem:[#allocation57_spill] sm:$0xff] %v18239_v32  ;;  %v6398_v53 = vpop.f32.mrb[89].mxu1 }
 0x45e   : > { %v18249_v11 = vpop.f32.mrb[90].mxu1  ;;  %v19977_v53 = vld [vmem:[#allocation47_spill] sm:$0xff] }
 0x45f   : > { %10636 = vmatmul.mubr.msk.bf16.gmra.mrb[64].mxu0 %vm10635_vm1, %v19085_v3  ;;  %19975 = vst [vmem:[#allocation56_spill] sm:$0xff] %v18249_v11  ;;  %v6401_v56 = vpop.f32.mrb[91].mxu1  ;;  %vm10813_vm1 = vmpackc.low %vm2727_vm7, %vm2711_vm6  ;;  %vm2743_vm5 = vcmp.eq.s32.totalorder %v19977_v53, %v19872_v43  ;;  %vm2661_vm6 = vcmp.eq.s32.totalorder %v19966_v28, %v19873_v50 }
 0x460   : > { %10638 = vmatprep.mubr.msk.bf16.mxu0 %vm10637_vm4, %v19085_v3  ;;  %vm2726_vm4 = vcmp.eq.s32.totalorder %v19974_v57, %v19875_v7  ;;  %vm10645_vm10 = vmpackc.low %vm2661_vm6, %vm2645_vm8  ;;  %vm2676_vm6 = vcmp.eq.s32.totalorder %v19969_v38, %v19874_v29 }
 0x461   : > { %10812 = vmatmul.mubr.msk.bf16.gmra.mrb[196].mxu1 %vm10811_vm11, %v19085_v3  ;;  %vm10815_vm7 = vmpackc.low %vm2726_vm4, %vm2710_vm9  ;;  %vm2660_vm11 = vcmp.eq.s32.totalorder %v19966_v28, %v19874_v29  ;;  %vm2677_vm4 = vcmp.eq.s32.totalorder %v19969_v38, %v19873_v50  ;;  %v19985_v38 = vld [vmem:[#allocation52_spill] sm:$0xff] }
 0x462   : > { %10814 = vmatprep.mubr.msk.bf16.mxu1 %vm10813_vm1, %v19085_v3  ;;  %vm2742_vm1 = vcmp.eq.s32.totalorder %v19977_v53, %v19875_v7  ;;  %vm10647_vm9 = vmpackc.low %vm2660_vm11, %vm2644_vm13  ;;  %vm2823_vm11 = vcmp.eq.s32.totalorder %v19985_v38, %v19872_v43 }
 0x464   : > { %v18263_v56 = vpop.f32.mrb[92].mxu1 }
 0x465   : > { %19976 = vst [vmem:[#allocation17_spill] sm:$0xff] %v18263_v56  ;;  %v6406_v11 = vpop.f32.mrb[93].mxu1 }
 0x466   : > { %v18273_v59 = vpop.f32.mrb[94].mxu1  ;;  %v19981_v11 = vld [vmem:[#allocation49_spill] sm:$0xff] }
 0x467   : > { %10640 = vmatmul.mubr.msk.bf16.gmra.mrb[68].mxu0 %vm10639_vm12, %v19085_v3  ;;  %19979 = vst [vmem:[#allocation14_spill] sm:$0xff] %v18273_v59  ;;  %v6409_v32 = vpop.f32.mrb[95].mxu1  ;;  %vm10817_vm12 = vmpackc.low %vm2759_vm0, %vm2743_vm5  ;;  %vm2775_vm3 = vcmp.eq.s32.totalorder %v19981_v11, %v19872_v43  ;;  %vm2693_vm5 = vcmp.eq.s32.totalorder %v19970_v41, %v19873_v50 }
 0x468   : > { %10642 = vmatprep.mubr.msk.bf16.mxu0 %vm10641_vm15, %v19085_v3  ;;  %vm2758_vm15 = vcmp.eq.s32.totalorder %v19978_v23, %v19875_v7  ;;  %vm10649_vm8 = vmpackc.low %vm2693_vm5, %vm2677_vm4  ;;  %vm2708_vm5 = vcmp.eq.s32.totalorder %v19973_v19, %v19874_v29 }
 0x469   : > { %10816 = vmatmul.mubr.msk.bf16.gmra.mrb[200].mxu1 %vm10815_vm7, %v19085_v3  ;;  %vm10819_vm0 = vmpackc.low %vm2758_vm15, %vm2742_vm1  ;;  %vm2692_vm7 = vcmp.eq.s32.totalorder %v19970_v41, %v19874_v29  ;;  %vm2709_vm15 = vcmp.eq.s32.totalorder %v19973_v19, %v19873_v50 }
 0x46a   : > { %10818 = vmatprep.mubr.msk.bf16.mxu1 %vm10817_vm12, %v19085_v3  ;;  %vm2774_vm12 = vcmp.eq.s32.totalorder %v19981_v11, %v19875_v7  ;;  %vm10651_vm1 = vmpackc.low %vm2692_vm7, %vm2676_vm6  ;;  %vm2839_vm6 = vcmp.eq.s32.totalorder %v19529_v33, %v19872_v43  ;;  %vm2855_vm7 = vcmp.eq.s32.totalorder %v19530_v47, %v19872_v43 }
 0x46c   : > { %v18287_v32 = vpop.f32.mrb[96].mxu1 }
 0x46d   : > { %19980 = vst [vmem:[#allocation15_spill] sm:$0xff] %v18287_v32  ;;  %v6414_v59 = vpop.f32.mrb[97].mxu1 }
 0x46e   : > { %v18297_v28 = vpop.f32.mrb[98].mxu1  ;;  %v19984_v59 = vld [vmem:[#allocation51_spill] sm:$0xff] }
 0x46f   : > { %10644 = vmatmul.mubr.msk.bf16.gmra.mrb[72].mxu0 %vm10643_vm14, %v19085_v3  ;;  %19983 = vst [vmem:[#allocation18_spill] sm:$0xff] %v18297_v28  ;;  %v6417_v56 = vpop.f32.mrb[99].mxu1  ;;  %vm10821_vm14 = vmpackc.low %vm2791_vm2, %vm2775_vm3  ;;  %vm2807_vm13 = vcmp.eq.s32.totalorder %v19984_v59, %v19872_v43  ;;  %vm2725_vm3 = vcmp.eq.s32.totalorder %v19974_v57, %v19873_v50 }
 0x470   : > { %10646 = vmatprep.mubr.msk.bf16.mxu0 %vm10645_vm10, %v19085_v3  ;;  %vm2790_vm10 = vcmp.eq.s32.totalorder %v19982_v44, %v19875_v7  ;;  %vm10653_vm4 = vmpackc.low %vm2725_vm3, %vm2709_vm15  ;;  %vm2740_vm3 = vcmp.eq.s32.totalorder %v19977_v53, %v19874_v29 }
 0x471   : > { %10820 = vmatmul.mubr.msk.bf16.gmra.mrb[204].mxu1 %vm10819_vm0, %v19085_v3  ;;  %vm10823_vm2 = vmpackc.low %vm2790_vm10, %vm2774_vm12  ;;  %vm2724_vm0 = vcmp.eq.s32.totalorder %v19974_v57, %v19874_v29  ;;  %vm2741_vm10 = vcmp.eq.s32.totalorder %v19977_v53, %v19873_v50 }
 0x472   : > { %10822 = vmatprep.mubr.msk.bf16.mxu1 %vm10821_vm14, %v19085_v3  ;;  %vm2806_vm14 = vcmp.eq.s32.totalorder %v19984_v59, %v19875_v7  ;;  %vm10655_vm12 = vmpackc.low %vm2724_vm0, %vm2708_vm5  ;;  %vm2871_vm5 = vcmp.eq.s32.totalorder %v13871_v42, %v19872_v43  ;;  %vm2887_vm0 = vcmp.eq.s32.totalorder %v19531_v1, %v19872_v43 }
 0x474   : > { %v18311_v56 = vpop.f32.mrb[100].mxu1 }
 0x475   : > { %v6422_v28 = vpop.f32.mrb[101].mxu1 }
 0x476   : > { %v18321_v41 = vpop.f32.mrb[102].mxu1 }
 0x477   : > { %10648 = vmatmul.mubr.msk.bf16.gmra.mrb[76].mxu0 %vm10647_vm9, %v19085_v3  ;;  %v6425_v32 = vpop.f32.mrb[103].mxu1  ;;  %vm10825_vm9 = vmpackc.low %vm2823_vm11, %vm2807_vm13  ;;  %vm2757_vm13 = vcmp.eq.s32.totalorder %v19978_v23, %v19873_v50 }
 0x478   : > { %10650 = vmatprep.mubr.msk.bf16.mxu0 %vm10649_vm8, %v19085_v3  ;;  %vm2822_vm8 = vcmp.eq.s32.totalorder %v19985_v38, %v19875_v7  ;;  %vm10657_vm15 = vmpackc.low %vm2757_vm13, %vm2741_vm10  ;;  %vm2772_vm13 = vcmp.eq.s32.totalorder %v19981_v11, %v19874_v29 }
 0x479   : > { %10824 = vmatmul.mubr.msk.bf16.gmra.mrb[208].mxu1 %vm10823_vm2, %v19085_v3  ;;  %vm10827_vm11 = vmpackc.low %vm2822_vm8, %vm2806_vm14  ;;  %vm2756_vm2 = vcmp.eq.s32.totalorder %v19978_v23, %v19874_v29  ;;  %vm2773_vm8 = vcmp.eq.s32.totalorder %v19981_v11, %v19873_v50 }
 0x47a   : > { %10826 = vmatprep.mubr.msk.bf16.mxu1 %vm10825_vm9, %v19085_v3  ;;  %vm2838_vm9 = vcmp.eq.s32.totalorder %v19529_v33, %v19875_v7  ;;  %vm10659_vm14 = vmpackc.low %vm2756_vm2, %vm2740_vm3  ;;  %vm2903_vm3 = vcmp.eq.s32.totalorder %v19532_v62, %v19872_v43  ;;  %vm2919_vm2 = vcmp.eq.s32.totalorder %v19533_v24, %v19872_v43 }
 0x47c   : > { %v18335_v32 = vpop.f32.mrb[104].mxu1 }
 0x47d   : > { %v6430_v19 = vpop.f32.mrb[105].mxu1 }
 0x47e   : > { %v18345_v57 = vpop.f32.mrb[106].mxu1 }
 0x47f   : > { %10652 = vmatmul.mubr.msk.bf16.gmra.mrb[80].mxu0 %vm10651_vm1, %v19085_v3  ;;  %v6433_v28 = vpop.f32.mrb[107].mxu1  ;;  %vm10829_vm1 = vmpackc.low %vm2855_vm7, %vm2839_vm6  ;;  %vm2789_vm6 = vcmp.eq.s32.totalorder %v19982_v44, %v19873_v50 }
 0x480   : > { %10654 = vmatprep.mubr.msk.bf16.mxu0 %vm10653_vm4, %v19085_v3  ;;  %vm2854_vm4 = vcmp.eq.s32.totalorder %v19530_v47, %v19875_v7  ;;  %vm10661_vm10 = vmpackc.low %vm2789_vm6, %vm2773_vm8  ;;  %vm2804_vm6 = vcmp.eq.s32.totalorder %v19984_v59, %v19874_v29 }
 0x481   : > { %10828 = vmatmul.mubr.msk.bf16.gmra.mrb[212].mxu1 %vm10827_vm11, %v19085_v3  ;;  %vm10831_vm7 = vmpackc.low %vm2854_vm4, %vm2838_vm9  ;;  %vm2788_vm11 = vcmp.eq.s32.totalorder %v19982_v44, %v19874_v29  ;;  %vm2805_vm4 = vcmp.eq.s32.totalorder %v19984_v59, %v19873_v50 }
 0x482   : > { %10830 = vmatprep.mubr.msk.bf16.mxu1 %vm10829_vm1, %v19085_v3  ;;  %vm2870_vm1 = vcmp.eq.s32.totalorder %v13871_v42, %v19875_v7  ;;  %vm10663_vm9 = vmpackc.low %vm2788_vm11, %vm2772_vm13  ;;  %vm2935_vm13 = vcmp.eq.s32.totalorder %v14045_v45, %v19872_v43  ;;  %vm2951_vm11 = vcmp.eq.s32.totalorder %v14056_v0, %v19872_v43 }
 0x484   : > { %v18359_v19 = vpop.f32.mrb[108].mxu1 }
 0x485   : > { %v6438_v53 = vpop.f32.mrb[109].mxu1 }
 0x486   : > { %v18369_v23 = vpop.f32.mrb[110].mxu1 }
 0x487   : > { %10656 = vmatmul.mubr.msk.bf16.gmra.mrb[84].mxu0 %vm10655_vm12, %v19085_v3  ;;  %v6441_v28 = vpop.f32.mrb[111].mxu1  ;;  %vm10833_vm12 = vmpackc.low %vm2887_vm0, %vm2871_vm5  ;;  %vm2821_vm5 = vcmp.eq.s32.totalorder %v19985_v38, %v19873_v50 }
 0x488   : > { %10658 = vmatprep.mubr.msk.bf16.mxu0 %vm10657_vm15, %v19085_v3  ;;  %vm2886_vm15 = vcmp.eq.s32.totalorder %v19531_v1, %v19875_v7  ;;  %vm10665_vm8 = vmpackc.low %vm2821_vm5, %vm2805_vm4  ;;  %vm2836_vm5 = vcmp.eq.s32.totalorder %v19529_v33, %v19874_v29 }
 0x489   : > { %10832 = vmatmul.mubr.msk.bf16.gmra.mrb[216].mxu1 %vm10831_vm7, %v19085_v3  ;;  %vm10835_vm0 = vmpackc.low %vm2886_vm15, %vm2870_vm1  ;;  %vm2820_vm7 = vcmp.eq.s32.totalorder %v19985_v38, %v19874_v29  ;;  %vm2837_vm15 = vcmp.eq.s32.totalorder %v19529_v33, %v19873_v50 }
 0x48a   : > { %10834 = vmatprep.mubr.msk.bf16.mxu1 %vm10833_vm12, %v19085_v3  ;;  %vm2902_vm12 = vcmp.eq.s32.totalorder %v19532_v62, %v19875_v7  ;;  %vm10667_vm1 = vmpackc.low %vm2820_vm7, %vm2804_vm6  ;;  %vm2967_vm6 = vcmp.eq.s32.totalorder %v14114_v12, %v19872_v43  ;;  %vm2983_vm7 = vcmp.eq.s32.totalorder %v14129_v48, %v19872_v43 }
 0x48c   : > { %v18383_v53 = vpop.f32.mrb[112].mxu1 }
 0x48d   : > { %19986 = vst [vmem:[#allocation16_spill] sm:$0xff] %v18383_v53  ;;  %v6446_v11 = vpop.f32.mrb[113].mxu1 }
 0x48e   : > { %v18393_v44 = vpop.f32.mrb[114].mxu1 }
 0x48f   : > { %10660 = vmatmul.mubr.msk.bf16.gmra.mrb[88].mxu0 %vm10659_vm14, %v19085_v3  ;;  %19987 = vst [vmem:[#allocation13_spill] sm:$0xff] %v18393_v44  ;;  %v6449_v28 = vpop.f32.mrb[115].mxu1  ;;  %vm10837_vm14 = vmpackc.low %vm2919_vm2, %vm2903_vm3  ;;  %vm2853_vm3 = vcmp.eq.s32.totalorder %v19530_v47, %v19873_v50 }
 0x490   : > { %10662 = vmatprep.mubr.msk.bf16.mxu0 %vm10661_vm10, %v19085_v3  ;;  %vm2918_vm10 = vcmp.eq.s32.totalorder %v19533_v24, %v19875_v7  ;;  %vm10669_vm4 = vmpackc.low %vm2853_vm3, %vm2837_vm15  ;;  %vm2868_vm3 = vcmp.eq.s32.totalorder %v13871_v42, %v19874_v29 }
 0x491   : > { %10836 = vmatmul.mubr.msk.bf16.gmra.mrb[220].mxu1 %vm10835_vm0, %v19085_v3  ;;  %vm10839_vm2 = vmpackc.low %vm2918_vm10, %vm2902_vm12  ;;  %vm2852_vm0 = vcmp.eq.s32.totalorder %v19530_v47, %v19874_v29  ;;  %vm2869_vm10 = vcmp.eq.s32.totalorder %v13871_v42, %v19873_v50 }
 0x492   : > { %10838 = vmatprep.mubr.msk.bf16.mxu1 %vm10837_vm14, %v19085_v3  ;;  %vm2934_vm14 = vcmp.eq.s32.totalorder %v14045_v45, %v19875_v7  ;;  %vm10671_vm12 = vmpackc.low %vm2852_vm0, %vm2836_vm5  ;;  %vm2999_vm5 = vcmp.eq.s32.totalorder %v14219_v58, %v19872_v43  ;;  %vm3015_vm0 = vcmp.eq.s32.totalorder %v14230_v49, %v19872_v43 }
 0x494   : > { %v18407_v11 = vpop.f32.mrb[116].mxu1 }
 0x495   : > { %19988 = vst [vmem:[#allocation23_spill] sm:$0xff] %v18407_v11  ;;  %v6454_v59 = vpop.f32.mrb[117].mxu1 }
 0x496   : > { %v18417_v38 = vpop.f32.mrb[118].mxu1 }
 0x497   : > { %10664 = vmatmul.mubr.msk.bf16.gmra.mrb[92].mxu0 %vm10663_vm9, %v19085_v3  ;;  %19989 = vst [vmem:[#allocation24_spill] sm:$0xff] %v18417_v38  ;;  %v6457_v28 = vpop.f32.mrb[119].mxu1  ;;  %vm10841_vm9 = vmpackc.low %vm2951_vm11, %vm2935_vm13  ;;  %vm2885_vm13 = vcmp.eq.s32.totalorder %v19531_v1, %v19873_v50 }
 0x498   : > { %10666 = vmatprep.mubr.msk.bf16.mxu0 %vm10665_vm8, %v19085_v3  ;;  %vm2950_vm8 = vcmp.eq.s32.totalorder %v14056_v0, %v19875_v7  ;;  %vm10673_vm15 = vmpackc.low %vm2885_vm13, %vm2869_vm10  ;;  %vm2900_vm13 = vcmp.eq.s32.totalorder %v19532_v62, %v19874_v29 }
 0x499   : > { %10840 = vmatmul.mubr.msk.bf16.gmra.mrb[224].mxu1 %vm10839_vm2, %v19085_v3  ;;  %vm10843_vm11 = vmpackc.low %vm2950_vm8, %vm2934_vm14  ;;  %vm2884_vm2 = vcmp.eq.s32.totalorder %v19531_v1, %v19874_v29  ;;  %vm2901_vm8 = vcmp.eq.s32.totalorder %v19532_v62, %v19873_v50 }
 0x49a   : > { %10842 = vmatprep.mubr.msk.bf16.mxu1 %vm10841_vm9, %v19085_v3  ;;  %vm2966_vm9 = vcmp.eq.s32.totalorder %v14114_v12, %v19875_v7  ;;  %vm10675_vm14 = vmpackc.low %vm2884_vm2, %vm2868_vm3  ;;  %vm3031_vm3 = vcmp.eq.s32.totalorder %v14278_v34, %v19872_v43  ;;  %vm3047_vm2 = vcmp.eq.s32.totalorder %v14283_v51, %v19872_v43 }
 0x49c   : > { %v18431_v59 = vpop.f32.mrb[120].mxu1 }
 0x49d   : > { %19990 = vst [vmem:[#allocation58_spill] sm:$0xff] %v18431_v59  ;;  %v6462_v33 = vpop.f32.mrb[121].mxu1 }
 0x49e   : > { %v18441_v47 = vpop.f32.mrb[122].mxu1 }
 0x49f   : > { %10668 = vmatmul.mubr.msk.bf16.gmra.mrb[96].mxu0 %vm10667_vm1, %v19085_v3  ;;  %19991 = vst [vmem:[#allocation25_spill] sm:$0xff] %v18441_v47  ;;  %v6465_v28 = vpop.f32.mrb[123].mxu1  ;;  %vm10845_vm1 = vmpackc.low %vm2983_vm7, %vm2967_vm6  ;;  %vm2917_vm6 = vcmp.eq.s32.totalorder %v19533_v24, %v19873_v50 }
 0x4a0   : > { %10670 = vmatprep.mubr.msk.bf16.mxu0 %vm10669_vm4, %v19085_v3  ;;  %vm2982_vm4 = vcmp.eq.s32.totalorder %v14129_v48, %v19875_v7  ;;  %vm10677_vm10 = vmpackc.low %vm2917_vm6, %vm2901_vm8  ;;  %vm3030_vm6 = vcmp.eq.s32.totalorder %v14278_v34, %v19875_v7 }
 0x4a1   : > { %10844 = vmatmul.mubr.msk.bf16.gmra.mrb[228].mxu1 %vm10843_vm11, %v19085_v3  ;;  %vm10847_vm7 = vmpackc.low %vm2982_vm4, %vm2966_vm9  ;;  %vm2916_vm11 = vcmp.eq.s32.totalorder %v19533_v24, %v19874_v29  ;;  %vm2933_vm4 = vcmp.eq.s32.totalorder %v14045_v45, %v19873_v50 }
 0x4a2   : > { %10846 = vmatprep.mubr.msk.bf16.mxu1 %vm10845_vm1, %v19085_v3  ;;  %vm2998_vm1 = vcmp.eq.s32.totalorder %v14219_v58, %v19875_v7  ;;  %vm10679_vm9 = vmpackc.low %vm2916_vm11, %vm2900_vm13  ;;  %vm2965_vm13 = vcmp.eq.s32.totalorder %v14114_v12, %v19873_v50  ;;  %vm2981_vm11 = vcmp.eq.s32.totalorder %v14129_v48, %v19873_v50 }
 0x4a4   : > { %v18455_v33 = vpop.f32.mrb[124].mxu1 }
 0x4a5   : > { %19992 = vst [vmem:[#allocation26_spill] sm:$0xff] %v18455_v33  ;;  %v6470_v42 = vpop.f32.mrb[125].mxu1 }
 0x4a6   : > { %v18465_v1 = vpop.f32.mrb[126].mxu1 }
 0x4a7   : > { %10672 = vmatmul.mubr.msk.bf16.gmra.mrb[100].mxu0 %vm10671_vm12, %v19085_v3  ;;  %19993 = vst [vmem:[#allocation27_spill] sm:$0xff] %v18465_v1  ;;  %v6473_v28 = vpop.f32.mrb[127].mxu1  ;;  %vm10849_vm12 = vmpackc.low %vm3015_vm0, %vm2999_vm5  ;;  %vm2949_vm5 = vcmp.eq.s32.totalorder %v14056_v0, %v19873_v50 }
 0x4a8   : > { %10674 = vmatprep.mubr.msk.bf16.mxu0 %vm10673_vm15, %v19085_v3  ;;  %vm3014_vm15 = vcmp.eq.s32.totalorder %v14230_v49, %v19875_v7  ;;  %vm10681_vm8 = vmpackc.low %vm2949_vm5, %vm2933_vm4  ;;  %vm2997_vm4 = vcmp.eq.s32.totalorder %v14219_v58, %v19873_v50  ;;  %vm3013_vm5 = vcmp.eq.s32.totalorder %v14230_v49, %v19873_v50 }
 0x4a9   : > { %10848 = vmatmul.mubr.msk.bf16.gmra.mrb[232].mxu1 %vm10847_vm7, %v19085_v3  ;;  %vm10851_vm0 = vmpackc.low %vm3014_vm15, %vm2998_vm1  ;;  %vm3046_vm7 = vcmp.eq.s32.totalorder %v14283_v51, %v19875_v7 }
 0x4aa   : > { %10850 = vmatprep.mubr.msk.bf16.mxu1 %vm10849_vm12, %v19085_v3  ;;  %vm2932_vm12 = vcmp.eq.s32.totalorder %v14045_v45, %v19874_v29  ;;  %vm10855_vm1 = vmpackc.low %vm3046_vm7, %vm3030_vm6  ;;  %vm3012_vm6 = vcmp.eq.s32.totalorder %v14230_v49, %v19874_v29  ;;  %vm3029_vm7 = vcmp.eq.s32.totalorder %v14278_v34, %v19873_v50 }
 0x4ac   : > { %v7689_v42 = vpop.f32.mrb[128].mxu1 }
 0x4ad   : > { %v7691_v62 = vpop.f32.mrb[129].mxu1 }
 0x4ae   : > { %v7692_v24 = vpop.f32.mrb[130].mxu1 }
 0x4af   : > { %10676 = vmatmul.mubr.msk.bf16.gmra.mrb[104].mxu0 %vm10675_vm14, %v19085_v3  ;;  %v7694_v28 = vpop.f32.mrb[131].mxu1  ;;  %vm10853_vm14 = vmpackc.low %vm3047_vm2, %vm3031_vm3  ;;  %vm2964_vm2 = vcmp.eq.s32.totalorder %v14114_v12, %v19874_v29 }
 0x4b0   : > { %10678 = vmatprep.mubr.msk.bf16.mxu0 %vm10677_vm10, %v19085_v3  ;;  %vm2948_vm10 = vcmp.eq.s32.totalorder %v14056_v0, %v19874_v29  ;;  %vm10685_vm3 = vmpackc.low %vm2981_vm11, %vm2965_vm13  ;;  %vm3028_vm11 = vcmp.eq.s32.totalorder %v14278_v34, %v19874_v29 }
 0x4b1   : > { %10852 = vmatmul.mubr.msk.bf16.gmra.mrb[236].mxu1 %vm10851_vm0, %v19085_v3  ;;  %vm10683_vm15 = vmpackc.low %vm2948_vm10, %vm2932_vm12  ;;  %vm3045_vm12 = vcmp.eq.s32.totalorder %v14283_v51, %v19873_v50 }
 0x4b2   : > { %10854 = vmatprep.mubr.msk.bf16.mxu1 %vm10853_vm14, %v19085_v3  ;;  %vm10689_vm14 = vmpackc.low %vm3013_vm5, %vm2997_vm4  ;;  %vm2038_vm4 = vcmp.eq.s32.totalorder %v12011_v2, %v19875_v7  ;;  %vm2054_vm5 = vcmp.eq.s32.totalorder %v12016_v4, %v19875_v7 }
 0x4b3   : > { %vm10693_vm13 = vmpackc.low %vm3045_vm12, %vm3029_vm7  ;;  %vm2070_vm7 = vcmp.eq.s32.totalorder %v12035_v9, %v19875_v7  ;;  %vm2086_vm12 = vcmp.eq.s32.totalorder %v12040_v10, %v19875_v7 }
 0x4b4   : > { %v7697_v62 = vpop.f32.mrb[132].mxu1 }
 0x4b5   : > { %v7699_v28 = vpop.f32.mrb[133].mxu1 }
 0x4b6   : > { %v7700_v1 = vpop.f32.mrb[134].mxu1 }
 0x4b7   : > { %10680 = vmatmul.mubr.msk.bf16.gmra.mrb[108].mxu0 %vm10679_vm9, %v19085_v3  ;;  %v7702_v33 = vpop.f32.mrb[135].mxu1  ;;  %vm2980_vm9 = vcmp.eq.s32.totalorder %v14129_v48, %v19874_v29 }
 0x4b8   : > { %10682 = vmatprep.mubr.msk.bf16.mxu0 %vm10681_vm8, %v19085_v3  ;;  %vm10687_vm0 = vmpackc.low %vm2980_vm9, %vm2964_vm2  ;;  %vm2996_vm8 = vcmp.eq.s32.totalorder %v14219_v58, %v19874_v29 }
 0x4b9   : > { %10856 = vmatmul.mubr.msk.bf16.gmra.mrb[240].mxu1 %vm10855_vm1, %v19085_v3  ;;  %vm10691_vm10 = vmpackc.low %vm3012_vm6, %vm2996_vm8  ;;  %vm3044_vm1 = vcmp.eq.s32.totalorder %v14283_v51, %v19874_v29 }
 0x4ba   : > { %vm10695_vm2 = vmpackc.low %vm3044_vm1, %vm3028_vm11 }
 0x4bb   : > { %vm10731_vm8 = vmpackc.low %vm2054_vm5, %vm2038_vm4  ;;  %vm8097_vm4 = vcmask 64512   ;;  %vm8117_vm5 = vcmask 408576  }
 0x4bc   : > { %v18510_v45 = vpop.f32.mrb[136].mxu1  ;;  %vm10735_vm11 = vmpackc.low %vm2086_vm12, %vm2070_vm7  ;;  %vm8172_vm7 = vcmask 1040384   ;;  %vm8148_vm12 = vcmask 1014784  }
 0x4bd   : > { %v7707_v0 = vpop.f32.mrb[137].mxu1 }
 0x4be   : > { %v18516_v33 = vpop.f32.mrb[138].mxu1 }
 0x4bf   : > { %10684 = vmatmul.mubr.msk.bf16.gmra.mrb[112].mxu0 %vm10683_vm15, %v19085_v3  ;;  %v7710_v28 = vpop.f32.mrb[139].mxu1  ;;  %vm2039_vm15 = vcmp.eq.s32.totalorder %v12011_v2, %v19872_v43 }
 0x4c0   : > { %10686 = vmatprep.mubr.msk.bf16.mxu0 %vm10685_vm3, %v19085_v3  ;;  %vm2055_vm3 = vcmp.eq.s32.totalorder %v12016_v4, %v19872_v43 }
 0x4c1   : > { %vm10729_vm9 = vmpackc.low %vm2055_vm3, %vm2039_vm15  ;;  %vm2102_vm15 = vcmp.eq.s32.totalorder %v12057_v14, %v19875_v7  ;;  %vm2118_vm3 = vcmp.eq.s32.totalorder %v12063_v15, %v19875_v7 }
 0x4c4   : > { %v18524_v12 = vpop.f32.mrb[140].mxu1 }
 0x4c5   : > { %v7715_v0 = vpop.f32.mrb[141].mxu1 }
 0x4c6   : > { %v18531_v59 = vpop.f32.mrb[142].mxu1 }
 0x4c7   : > { %10688 = vmatmul.mubr.msk.bf16.gmra.mrb[116].mxu0 %vm10687_vm0, %v19085_v3  ;;  %v7718_v58 = vpop.f32.mrb[143].mxu1  ;;  %vm2071_vm0 = vcmp.eq.s32.totalorder %v12035_v9, %v19872_v43 }
 0x4c8   : > { %10690 = vmatprep.mubr.msk.bf16.mxu0 %vm10689_vm14, %v19085_v3  ;;  %vm2087_vm14 = vcmp.eq.s32.totalorder %v12040_v10, %v19872_v43 }
 0x4c9   : > { %vm10733_vm6 = vmpackc.low %vm2087_vm14, %vm2071_vm0  ;;  %vm8119_vm0 = vcmask 474112   ;;  %vm8127_vm14 = vcmask 1039360  }
 0x4ca   : > { %v7400_v48 = vpop.f32.mrb[12].mxu0 }
 0x4cb   : > { %v10944_v28 = vadd.f32 %v7400_v48, %v17672_v20  ;;  %v7402_v47 = vpop.f32.mrb[13].mxu0 }
 0x4cc   : > { %v7403_v38 = vpop.f32.mrb[14].mxu0  ;;  %v18540_v20 = vpop.f32.mrb[144].mxu1 }
 0x4cd   : > { %v10946_v49 = vadd.f32 %v7403_v38, %v17682_v31  ;;  %v10945_v11 = vadd.f32 %v10944_v28, %v7689_v42  ;;  %v7405_v44 = vpop.f32.mrb[15].mxu0  ;;  %v7723_v31 = vpop.f32.mrb[145].mxu1 }
 0x4ce   : > { %v18549_v42 = vpop.f32.mrb[146].mxu1 }
 0x4cf   : > { %v10947_v53 = vadd.f32 %v10946_v49, %v7692_v24  ;;  %10692 = vmatmul.mubr.msk.bf16.gmra.mrb[120].mxu0 %vm10691_vm10, %v19085_v3  ;;  %v7726_v51 = vpop.f32.mrb[147].mxu1  ;;  %vm2103_vm10 = vcmp.eq.s32.totalorder %v12057_v14, %v19872_v43 }
 0x4d0   : > { %10694 = vmatprep.mubr.msk.bf16.mxu0 %vm10693_vm13, %v19085_v3  ;;  %vm2119_vm13 = vcmp.eq.s32.totalorder %v12063_v15, %v19872_v43 }
 0x4d1   : > { %v18542_v50 = vpack.c.bf16 %v10947_v53, %v10945_v11  ;;  %vm10737_vm1 = vmpackc.low %vm2119_vm13, %vm2103_vm10  ;;  %vm8174_vm10 = vcmask 1041408   ;;  %vm8155_vm13 = vcmask 1006592  }
 0x4d2   : > { %v7408_v47 = vpop.f32.mrb[16].mxu0 }
 0x4d3   : > { %v10948_v44 = vadd.f32 %v7408_v47, %v17696_v30  ;;  %v7410_v38 = vpop.f32.mrb[17].mxu0 }
 0x4d4   : > { %v7411_v34 = vpop.f32.mrb[18].mxu0  ;;  %v18558_v30 = vpop.f32.mrb[148].mxu1 }
 0x4d5   : > { %v10950_v29 = vadd.f32 %v7411_v34, %v17706_v60  ;;  %v10949_v53 = vadd.f32 %v10948_v44, %v7697_v62  ;;  %v7413_v11 = vpop.f32.mrb[19].mxu0  ;;  %v7731_v60 = vpop.f32.mrb[149].mxu1 }
 0x4d6   : > { %v7732_v28 = vpop.f32.mrb[150].mxu1 }
 0x4d7   : > { %v10951_v24 = vadd.f32 %v10950_v29, %v7700_v1  ;;  %10696 = vmatmul.mubr.msk.bf16.gmra.mrb[124].mxu0 %vm10695_vm2, %v19085_v3  ;;  %v7734_v49 = vpop.f32.mrb[151].mxu1  ;;  %vm10739_vm2 = vmpackc.low %vm2118_vm3, %vm2102_vm15  ;;  %vm8178_vm15 = vcmask 1043456   ;;  %vm8180_vm3 = vcmask 1044480  }
 0x4d8   : > { %10730 = vmatprep.mubr.msk.bf16.mxu0 %vm10729_vm9, %v19085_v3 }
 0x4d9   : > { %v18560_v48 = vpack.c.bf16 %v10951_v24, %v10949_v53 }
 0x4da   : > { %v7416_v0 = vpop.f32.mrb[20].mxu0 }
 0x4db   : > { %v10952_v1 = vadd.f32 %v7416_v0, %v17720_v39  ;;  %v7418_v62 = vpop.f32.mrb[21].mxu0 }
 0x4dc   : > { %v7419_v58 = vpop.f32.mrb[22].mxu0  ;;  %v7737_v39 = vpop.f32.mrb[152].mxu1 }
 0x4dd   : > { %v10954_v4 = vadd.f32 %v7419_v58, %v17730_v46  ;;  %v10953_v47 = vadd.f32 %v10952_v1, %v18510_v45  ;;  %v7421_v31 = vpop.f32.mrb[23].mxu0  ;;  %v7739_v45 = vpop.f32.mrb[153].mxu1 }
 0x4de   : > { %v7740_v51 = vpop.f32.mrb[154].mxu1 }
 0x4df   : > { %v10955_v44 = vadd.f32 %v10954_v4, %v18516_v33  ;;  %10732 = vmatmul.mubr.msk.bf16.vlgmr.msra.gmra.mrb[0].mxu0 %vm10731_vm8, %v19085_v3  ;;  %v7742_v9 = vpop.f32.mrb[155].mxu1  ;;  %vm8134_vm8 = vcmask 1031168  }
 0x4e0   : > { %10734 = vmatprep.mubr.msk.bf16.mxu0 %vm10733_vm6, %v19085_v3  ;;  %vm8141_vm6 = vcmask 1022976  }
 0x4e1   : > { %v18576_v38 = vpack.c.bf16 %v10955_v44, %v10953_v47 }
 0x4e2   : > { %v7424_v46 = vpop.f32.mrb[24].mxu0 }
 0x4e3   : > { %v10956_v33 = vadd.f32 %v7424_v46, %v17750_v5  ;;  %v7426_v34 = vpop.f32.mrb[25].mxu0 }
 0x4e4   : > { %v7427_v29 = vpop.f32.mrb[26].mxu0  ;;  %v7745_v43 = vpop.f32.mrb[156].mxu1 }
 0x4e5   : > { %v10958_v10 = vadd.f32 %v7427_v29, %v17761_v54  ;;  %v10957_v53 = vadd.f32 %v10956_v33, %v18524_v12  ;;  %v7429_v11 = vpop.f32.mrb[27].mxu0  ;;  %v7747_v0 = vpop.f32.mrb[157].mxu1 }
 0x4e6   : > { %v7748_v1 = vpop.f32.mrb[158].mxu1 }
 0x4e7   : > { %v10959_v24 = vadd.f32 %v10958_v10, %v18531_v59  ;;  %10736 = vmatmul.mubr.msk.bf16.gmra.mrb[4].mxu0 %vm10735_vm11, %v19085_v3  ;;  %v7750_v62 = vpop.f32.mrb[159].mxu1  ;;  %vm8176_vm11 = vcmask 1042432  }
 0x4e8   : > { %10738 = vmatprep.mubr.msk.bf16.mxu0 %vm10737_vm1, %v19085_v3  ;;  %vm8162_vm1 = vcmask 998400  }
 0x4e9   : > { %v18592_v5 = vpack.c.bf16 %v10959_v24, %v10957_v53 }
 0x4ea   : > { %v7432_v54 = vpop.f32.mrb[28].mxu0 }
 0x4eb   : > { %v10960_v12 = vadd.f32 %v7432_v54, %v17788_v21  ;;  %v7434_v60 = vpop.f32.mrb[29].mxu0 }
 0x4ec   : > { %v7435_v59 = vpop.f32.mrb[30].mxu0  ;;  %v7753_v15 = vpop.f32.mrb[160].mxu1 }
 0x4ed   : > { %v10962_v58 = vadd.f32 %v7435_v59, %v17799_v37  ;;  %v10961_v49 = vadd.f32 %v10960_v12, %v18540_v20  ;;  %v7437_v14 = vpop.f32.mrb[31].mxu0  ;;  %v7755_v31 = vpop.f32.mrb[161].mxu1 }
 0x4ee   : > { %v7756_v46 = vpop.f32.mrb[162].mxu1 }
 0x4ef   : > { %v10963_v4 = vadd.f32 %v10962_v58, %v18549_v42  ;;  %10740 = vmatmul.mubr.msk.bf16.gmra.mrb[8].mxu0 %vm10739_vm2, %v19085_v3  ;;  %v7758_v33 = vpop.f32.mrb[163].mxu1  ;;  %vm8182_vm2 = vcmask 1045504  }
 0x4f1   : > { %v18599_v7 = vpack.c.bf16 %v10963_v4, %v10961_v49 }
 0x4f2   : > { %v7440_v47 = vpop.f32.mrb[32].mxu0 }
 0x4f3   : > { %v10964_v21 = vadd.f32 %v7440_v47, %v17826_v18  ;;  %v7442_v44 = vpop.f32.mrb[33].mxu0 }
 0x4f4   : > { %v7443_v45 = vpop.f32.mrb[34].mxu0  ;;  %v7761_v9 = vpop.f32.mrb[164].mxu1 }
 0x4f5   : > { %v10966_v37 = vadd.f32 %v7443_v45, %v17837_v26  ;;  %v10965_v20 = vadd.f32 %v10964_v21, %v18558_v30  ;;  %v7445_v34 = vpop.f32.mrb[35].mxu0  ;;  %v7763_v10 = vpop.f32.mrb[165].mxu1 }
 0x4f6   : > { %v7764_v18 = vpop.f32.mrb[166].mxu1 }
 0x4f7   : > { %v10967_v29 = vadd.f32 %v10966_v37, %v7732_v28  ;;  %v7766_v54 = vpop.f32.mrb[167].mxu1 }
 0x4f9   : > { %v7928_v42 = vpack.c.bf16 %v10967_v29, %v10965_v20 }
 0x4fa   : > { %v7448_v3 = vpop.f32.mrb[36].mxu0 }
 0x4fb   : > { %v10968_v53 = vadd.f32 %v7448_v3, %v17864_v22  ;;  %v7450_v11 = vpop.f32.mrb[37].mxu0  ;;  %7968 = vxpose.xlu0.c.b16.start [1/8] (narrow) %v7928_v42, 16  ;;  %10862 = vmatprep.subr.bf16.mxu1 %v7928_v42 }
 0x4fc   : > { %v7451_v24 = vpop.f32.mrb[38].mxu0  ;;  %v7769_v28 = vpop.f32.mrb[168].mxu1 }
 0x4fd   : > { %v10970_v0 = vadd.f32 %v7451_v24, %v17875_v8  ;;  %v10969_v12 = vadd.f32 %v10968_v53, %v7737_v39  ;;  %v7453_v26 = vpop.f32.mrb[39].mxu0  ;;  %v7771_v62 = vpop.f32.mrb[169].mxu1 }
 0x4fe   : > { %v7772_v22 = vpop.f32.mrb[170].mxu1 }
 0x4ff   : > { %v10971_v60 = vadd.f32 %v10970_v0, %v7740_v51  ;;  %v7774_v4 = vpop.f32.mrb[171].mxu1 }
 0x501   : > { %v18606_v30 = vpack.c.bf16 %v10971_v60, %v10969_v12 }
 0x502   : > { %v7456_v59 = vpop.f32.mrb[40].mxu0 }
 0x503   : > { %v10972_v58 = vadd.f32 %v7456_v59, %v17902_v27  ;;  %v7458_v49 = vpop.f32.mrb[41].mxu0  ;;  %7969 = vxpose.xlu0.c.b16.cont [2/8] (narrow) %v18606_v30, 16 }
 0x504   : > { %v7459_v14 = vpop.f32.mrb[42].mxu0  ;;  %v7777_v51 = vpop.f32.mrb[172].mxu1 }
 0x505   : > { %v10974_v47 = vadd.f32 %v7459_v14, %v17913_v17  ;;  %v10973_v31 = vadd.f32 %v10972_v58, %v7745_v43  ;;  %v7461_v8 = vpop.f32.mrb[43].mxu0  ;;  %v7779_v45 = vpop.f32.mrb[173].mxu1 }
 0x506   : > { %v7780_v27 = vpop.f32.mrb[174].mxu1 }
 0x507   : > { %v10975_v39 = vadd.f32 %v10974_v47, %v7748_v1  ;;  %v7782_v34 = vpop.f32.mrb[175].mxu1 }
 0x509   : > { %v18611_v21 = vpack.c.bf16 %v10975_v39, %v10973_v31 }
 0x50a   : > { %v7464_v44 = vpop.f32.mrb[44].mxu0 }
 0x50b   : > { %v10976_v33 = vadd.f32 %v7464_v44, %v17940_v35  ;;  %v7466_v37 = vpop.f32.mrb[45].mxu0  ;;  %7970 = vxpose.xlu0.c.b16.cont [3/8] (narrow) %v18611_v21, 16 }
 0x50c   : > { %v7467_v20 = vpop.f32.mrb[46].mxu0  ;;  %v7785_v1 = vpop.f32.mrb[176].mxu1 }
 0x50d   : > { %v10978_v29 = vadd.f32 %v7467_v20, %v17951_v13  ;;  %v10977_v42 = vadd.f32 %v10976_v33, %v7753_v15  ;;  %v7469_v17 = vpop.f32.mrb[47].mxu0  ;;  %v7787_v53 = vpop.f32.mrb[177].mxu1 }
 0x50e   : > { %v7788_v35 = vpop.f32.mrb[178].mxu1 }
 0x50f   : > { %v10979_v43 = vadd.f32 %v10978_v29, %v7756_v46  ;;  %v7790_v0 = vpop.f32.mrb[179].mxu1 }
 0x511   : > { %v18616_v3 = vpack.c.bf16 %v10979_v43, %v10977_v42 }
 0x512   : > { %v7472_v10 = vpop.f32.mrb[48].mxu0 }
 0x513   : > { %v10980_v11 = vadd.f32 %v7472_v10, %v17978_v55  ;;  %v7474_v24 = vpop.f32.mrb[49].mxu0  ;;  %7971 = vxpose.xlu0.c.b16.cont [4/8] (narrow) %v18616_v3, 16 }
 0x514   : > { %v7475_v54 = vpop.f32.mrb[50].mxu0  ;;  %v7793_v46 = vpop.f32.mrb[180].mxu1 }
 0x515   : > { %v10982_v12 = vadd.f32 %v7475_v54, %v17989_v52  ;;  %v10981_v26 = vadd.f32 %v10980_v11, %v7761_v9  ;;  %v7477_v13 = vpop.f32.mrb[51].mxu0  ;;  %v7795_v62 = vpop.f32.mrb[181].mxu1 }
 0x516   : > { %v7796_v55 = vpop.f32.mrb[182].mxu1 }
 0x517   : > { %v10983_v15 = vadd.f32 %v10982_v12, %v7764_v18  ;;  %v7798_v4 = vpop.f32.mrb[183].mxu1 }
 0x519   : > { %v18621_v60 = vpack.c.bf16 %v10983_v15, %v10981_v26 }
 0x51a   : > { %v7480_v59 = vpop.f32.mrb[52].mxu0 }
 0x51b   : > { %v10984_v58 = vadd.f32 %v7480_v59, %v18016_v16  ;;  %v7482_v49 = vpop.f32.mrb[53].mxu0  ;;  %7972 = vxpose.xlu0.c.b16.cont [5/8] (narrow) %v18621_v60, 16 }
 0x51c   : > { %v7483_v14 = vpop.f32.mrb[54].mxu0  ;;  %v7801_v18 = vpop.f32.mrb[184].mxu1  ;;  %v19994_v49 = vld [vmem:[#allocation22_spill] sm:$0xff] }
 0x51d   : > { %v10986_v47 = vadd.f32 %v7483_v14, %v18027_v61  ;;  %v10985_v31 = vadd.f32 %v10984_v58, %v7769_v28  ;;  %v7485_v52 = vpop.f32.mrb[55].mxu0  ;;  %v7803_v44 = vpop.f32.mrb[185].mxu1 }
 0x51e   : > { %v7804_v16 = vpop.f32.mrb[186].mxu1 }
 0x51f   : > { %v10987_v9 = vadd.f32 %v10986_v47, %v7772_v22  ;;  %v7806_v20 = vpop.f32.mrb[187].mxu1 }
 0x521   : > { %v18626_v8 = vpack.c.bf16 %v10987_v9, %v10985_v31  ;;  %v19995_v9 = vld [vmem:[#allocation20_spill] sm:$0xff] }
 0x522   : > { %v7488_v39 = vpop.f32.mrb[56].mxu0 }
 0x523   : > { %v10988_v45 = vadd.f32 %v7488_v39, %v18047_v6  ;;  %v7490_v33 = vpop.f32.mrb[57].mxu0  ;;  %7973 = vxpose.xlu0.c.b16.cont [6/8] (narrow) %v18626_v8, 16 }
 0x524   : > { %v7491_v37 = vpop.f32.mrb[58].mxu0  ;;  %v7809_v22 = vpop.f32.mrb[188].mxu1 }
 0x525   : > { %v10990_v34 = vadd.f32 %v7491_v37, %v18057_v36  ;;  %v10989_v29 = vadd.f32 %v10988_v45, %v7777_v51  ;;  %v7493_v61 = vpop.f32.mrb[59].mxu0  ;;  %v7811_v43 = vpop.f32.mrb[189].mxu1  ;;  %v19996_v37 = vld [vmem:[#allocation19_spill] sm:$0xff] }
 0x526   : > { %v7812_v6 = vpop.f32.mrb[190].mxu1  ;;  %v19997_v43 = vld [vmem:[#allocation21_spill] sm:$0xff] }
 0x527   : > { %v10991_v28 = vadd.f32 %v10990_v34, %v7780_v27  ;;  %v7814_v24 = vpop.f32.mrb[191].mxu1 }
 0x529   : > { %v18631_v42 = vpack.c.bf16 %v10991_v28, %v10989_v29 }
 0x52a   : > { %v7496_v17 = vpop.f32.mrb[60].mxu0 }
 0x52b   : > { %v10992_v10 = vadd.f32 %v7496_v17, %v18071_v63  ;;  %v7498_v53 = vpop.f32.mrb[61].mxu0  ;;  %7974 = vxpose.xlu0.c.b16.cont [7/8] (narrow) %v18631_v42, 16 }
 0x52c   : > { %v7499_v11 = vpop.f32.mrb[62].mxu0  ;;  %v7817_v27 = vpop.f32.mrb[192].mxu1 }
 0x52d   : > { %v10994_v54 = vadd.f32 %v7499_v11, %v18081_v40  ;;  %v10993_v0 = vadd.f32 %v10992_v10, %v7785_v1  ;;  %v7501_v36 = vpop.f32.mrb[63].mxu0  ;;  %v7819_v13 = vpop.f32.mrb[193].mxu1 }
 0x52e   : > { %v7820_v63 = vpop.f32.mrb[194].mxu1 }
 0x52f   : > { %v10995_v51 = vadd.f32 %v10994_v54, %v7788_v35  ;;  %v7822_v58 = vpop.f32.mrb[195].mxu1 }
 0x531   : > { %v18636_v12 = vpack.c.bf16 %v10995_v51, %v10993_v0  ;;  %v19998_v0 = vld [vmem:[#allocation9_spill] sm:$0xff] }
 0x532   : > { %v7504_v26 = vpop.f32.mrb[64].mxu0 }
 0x533   : > { %v10996_v15 = vadd.f32 %v7504_v26, %v18095_v25  ;;  %v7506_v59 = vpop.f32.mrb[65].mxu0  ;;  %7975 = vxpose.xlu0.c.b16.end [8/8] (narrow) %v18636_v12, 16 }
 0x534   : > { %v7507_v62 = vpop.f32.mrb[66].mxu0  ;;  %v7825_v47 = vpop.f32.mrb[196].mxu1 }
 0x535   : > { %v10998_v14 = vadd.f32 %v7507_v62, %v19994_v49  ;;  %v10997_v4 = vadd.f32 %v10996_v15, %v7793_v46  ;;  %v7509_v40 = vpop.f32.mrb[67].mxu0  ;;  %v7827_v52 = vpop.f32.mrb[197].mxu1  ;;  %v19999_v62 = vld [vmem:[#allocation10_spill] sm:$0xff] }
 0x536   : > { %v7828_v25 = vpop.f32.mrb[198].mxu1 }
 0x537   : > { %v10999_v1 = vadd.f32 %v10998_v14, %v7796_v55  ;;  %v7830_v33 = vpop.f32.mrb[199].mxu1 }
 0x538   : > { %v20001_v33 = vld [vmem:[#allocation55_spill] sm:$0xff] }
 0x539   : > { %v18641_v35 = vpack.c.bf16 %v10999_v1, %v10997_v4  ;;  %v20000_v1 = vld [vmem:[#allocation53_spill] sm:$0xff] }
 0x53a   : > { %v7512_v31 = vpop.f32.mrb[68].mxu0 }
 0x53b   : > { %v11000_v39 = vadd.f32 %v7512_v31, %v19995_v9  ;;  %v7514_v44 = vpop.f32.mrb[69].mxu0 }
 0x53c   : > { %v7515_v45 = vpop.f32.mrb[70].mxu0  ;;  %v7833_v46 = vpop.f32.mrb[200].mxu1 }
 0x53d   : > { %v11002_v20 = vadd.f32 %v7515_v45, %v19996_v37  ;;  %v11001_v34 = vadd.f32 %v11000_v39, %v7801_v18  ;;  %v7517_v29 = vpop.f32.mrb[71].mxu0  ;;  %v7835_v17 = vpop.f32.mrb[201].mxu1 }
 0x53e   : > { %v7836_v11 = vpop.f32.mrb[202].mxu1 }
 0x53f   : > { %v11003_v61 = vadd.f32 %v11002_v20, %v7804_v16  ;;  %v7838_v54 = vpop.f32.mrb[203].mxu1 }
 0x541   : > { %v18645_v28 = vpack.c.bf16 %v11003_v61, %v11001_v34 }
 0x542   : > { %v7520_v55 = vpop.f32.mrb[72].mxu0 }
 0x543   : > { %v11004_v10 = vadd.f32 %v7520_v55, %v19997_v43  ;;  %v7522_v53 = vpop.f32.mrb[73].mxu0  ;;  %v20002_v55 = vld [vmem:[#allocation54_spill] sm:$0xff] }
 0x544   : > { %v7523_v24 = vpop.f32.mrb[74].mxu0  ;;  %v7841_v18 = vpop.f32.mrb[204].mxu1 }
 0x545   : > { %v11006_v36 = vadd.f32 %v7523_v24, %v19998_v0  ;;  %v11005_v51 = vadd.f32 %v11004_v10, %v7809_v22  ;;  %v7525_v26 = vpop.f32.mrb[75].mxu0  ;;  %v7843_v59 = vpop.f32.mrb[205].mxu1  ;;  %v20003_v0 = vld [vmem:[#allocation11_spill] sm:$0xff] }
 0x546   : > { %v7844_v14 = vpop.f32.mrb[206].mxu1  ;;  %v20004_v59 = vld [vmem:[#allocation12_spill] sm:$0xff] }
 0x547   : > { %v11007_v13 = vadd.f32 %v11006_v36, %v7812_v6  ;;  %v7846_v40 = vpop.f32.mrb[207].mxu1 }
 0x549   : > { %v18649_v15 = vpack.c.bf16 %v11007_v13, %v11005_v51 }
 0x54a   : > { %v7528_v16 = vpop.f32.mrb[76].mxu0 }
 0x54b   : > { %v11008_v58 = vadd.f32 %v7528_v16, %v19999_v62  ;;  %v7530_v49 = vpop.f32.mrb[77].mxu0 }
 0x54c   : > { %v7531_v4 = vpop.f32.mrb[78].mxu0  ;;  %v7849_v22 = vpop.f32.mrb[208].mxu1 }
 0x54d   : > { %v11010_v31 = vadd.f32 %v7531_v4, %v20000_v1  ;;  %v11009_v52 = vadd.f32 %v11008_v58, %v7817_v27  ;;  %v7533_v9 = vpop.f32.mrb[79].mxu0  ;;  %v7851_v45 = vpop.f32.mrb[209].mxu1 }
 0x54e   : > { %v7852_v34 = vpop.f32.mrb[210].mxu1 }
 0x54f   : > { %v11011_v39 = vadd.f32 %v11010_v31, %v7820_v63  ;;  %v7854_v61 = vpop.f32.mrb[211].mxu1  ;;  %v20005_v31 = vld [vmem:[#allocation57_spill] sm:$0xff] }
 0x551   : > { %v18653_v44 = vpack.c.bf16 %v11011_v39, %v11009_v52 }
 0x552   : > { %v7536_v6 = vpop.f32.mrb[80].mxu0 }
 0x553   : > { %v11012_v37 = vadd.f32 %v7536_v6, %v20001_v33  ;;  %v7538_v20 = vpop.f32.mrb[81].mxu0  ;;  %v20006_v33 = vld [vmem:[#allocation56_spill] sm:$0xff] }
 0x554   : > { %v7539_v29 = vpop.f32.mrb[82].mxu0  ;;  %v7857_v27 = vpop.f32.mrb[212].mxu1 }
 0x555   : > { %v11014_v17 = vadd.f32 %v7539_v29, %v20002_v55  ;;  %v11013_v43 = vadd.f32 %v11012_v37, %v7825_v47  ;;  %v7541_v10 = vpop.f32.mrb[83].mxu0  ;;  %v7859_v54 = vpop.f32.mrb[213].mxu1 }
 0x556   : > { %v7860_v26 = vpop.f32.mrb[214].mxu1 }
 0x557   : > { %v11015_v53 = vadd.f32 %v11014_v17, %v7828_v25  ;;  %v7862_v16 = vpop.f32.mrb[215].mxu1 }
 0x559   : > { %v18657_v24 = vpack.c.bf16 %v11015_v53, %v11013_v43  ;;  %v20007_v43 = vld [vmem:[#allocation17_spill] sm:$0xff] }
 0x55a   : > { %v7544_v63 = vpop.f32.mrb[84].mxu0 }
 0x55b   : > { %v11016_v36 = vadd.f32 %v7544_v63, %v20003_v0  ;;  %v7546_v51 = vpop.f32.mrb[85].mxu0 }
 0x55c   : > { %v7547_v13 = vpop.f32.mrb[86].mxu0  ;;  %v7865_v47 = vpop.f32.mrb[216].mxu1 }
 0x55d   : > { %v11018_v62 = vadd.f32 %v7547_v13, %v20004_v59  ;;  %v11017_v58 = vadd.f32 %v11016_v36, %v7833_v46  ;;  %v7549_v49 = vpop.f32.mrb[87].mxu0  ;;  %v7867_v1 = vpop.f32.mrb[217].mxu1  ;;  %v20008_v36 = vld [vmem:[#allocation14_spill] sm:$0xff] }
 0x55e   : > { %v7868_v39 = vpop.f32.mrb[218].mxu1  ;;  %v20009_v49 = vld [vmem:[#allocation15_spill] sm:$0xff] }
 0x55f   : > { %v11019_v4 = vadd.f32 %v11018_v62, %v7836_v11  ;;  %v7870_v45 = vpop.f32.mrb[219].mxu1 }
 0x561   : > { %v18661_v40 = vpack.c.bf16 %v11019_v4, %v11017_v58 }
 0x562   : > { %v7552_v25 = vpop.f32.mrb[88].mxu0 }
 0x563   : > { %v11020_v52 = vadd.f32 %v7552_v25, %v20005_v31  ;;  %v7554_v9 = vpop.f32.mrb[89].mxu0 }
 0x564   : > { %v7555_v6 = vpop.f32.mrb[90].mxu0  ;;  %v7873_v46 = vpop.f32.mrb[220].mxu1  ;;  %v20010_v9 = vld [vmem:[#allocation18_spill] sm:$0xff] }
 0x565   : > { %v11022_v37 = vadd.f32 %v7555_v6, %v20006_v33  ;;  %v11021_v20 = vadd.f32 %v11020_v52, %v7841_v18  ;;  %v7557_v29 = vpop.f32.mrb[91].mxu0  ;;  %v7875_v17 = vpop.f32.mrb[221].mxu1 }
 0x566   : > { %v7876_v63 = vpop.f32.mrb[222].mxu1 }
 0x567   : > { %v11023_v61 = vadd.f32 %v11022_v37, %v7844_v14  ;;  %v7878_v0 = vpop.f32.mrb[223].mxu1 }
 0x569   : > { %v18665_v55 = vpack.c.bf16 %v11023_v61, %v11021_v20 }
 0x56a   : > { %v7560_v11 = vpop.f32.mrb[92].mxu0 }
 0x56b   : > { %v11024_v10 = vadd.f32 %v7560_v11, %v20007_v43  ;;  %v7562_v53 = vpop.f32.mrb[93].mxu0 }
 0x56c   : > { %v7563_v54 = vpop.f32.mrb[94].mxu0  ;;  %v7881_v18 = vpop.f32.mrb[224].mxu1 }
 0x56d   : > { %v11026_v51 = vadd.f32 %v7563_v54, %v20008_v36  ;;  %v11025_v13 = vadd.f32 %v11024_v10, %v7849_v22  ;;  %v7565_v16 = vpop.f32.mrb[95].mxu0  ;;  %v7883_v58 = vpop.f32.mrb[225].mxu1 }
 0x56e   : > { %v7884_v1 = vpop.f32.mrb[226].mxu1 }
 0x56f   : > { %v11027_v59 = vadd.f32 %v11026_v51, %v7852_v34  ;;  %v7886_v52 = vpop.f32.mrb[227].mxu1 }
 0x571   : > { %v18669_v62 = vpack.c.bf16 %v11027_v59, %v11025_v13 }
 0x572   : > { %v7568_v14 = vpop.f32.mrb[96].mxu0 }
 0x573   : > { %v11028_v4 = vadd.f32 %v7568_v14, %v20009_v49  ;;  %v7570_v25 = vpop.f32.mrb[97].mxu0 }
 0x574   : > { %v7571_v31 = vpop.f32.mrb[98].mxu0  ;;  %v7889_v22 = vpop.f32.mrb[228].mxu1 }
 0x575   : > { %v11030_v6 = vadd.f32 %v7571_v31, %v20010_v9  ;;  %v11029_v45 = vadd.f32 %v11028_v4, %v7857_v27  ;;  %v7573_v33 = vpop.f32.mrb[99].mxu0  ;;  %v7891_v29 = vpop.f32.mrb[229].mxu1 }
 0x576   : > { %v7892_v17 = vpop.f32.mrb[230].mxu1 }
 0x577   : > { %v11031_v37 = vadd.f32 %v11030_v6, %v7860_v26  ;;  %v7894_v10 = vpop.f32.mrb[231].mxu1 }
 0x578   : > { %v20011_v10 = vld [vmem:[#allocation16_spill] sm:$0xff] }
 0x579   : > { %v18673_v20 = vpack.c.bf16 %v11031_v37, %v11029_v45 }
 0x57a   : > { %v7576_v34 = vpop.f32.mrb[100].mxu0 }
 0x57b   : > { %v11032_v61 = vadd.f32 %v7576_v34, %v18311_v56  ;;  %v7578_v11 = vpop.f32.mrb[101].mxu0  ;;  %8000 = vxpose.xlu0.c.b16.start [1/8] (narrow) %v18673_v20, 16 }
 0x57c   : > { %v7579_v43 = vpop.f32.mrb[102].mxu0  ;;  %v7897_v51 = vpop.f32.mrb[232].mxu1 }
 0x57d   : > { %v11034_v53 = vadd.f32 %v7579_v43, %v18321_v41  ;;  %v11033_v54 = vadd.f32 %v11032_v61, %v7865_v47  ;;  %v7581_v0 = vpop.f32.mrb[103].mxu0  ;;  %v7976_v27 = vpop.trf.xlu0 }
 0x57e   : > { %8048 = vmatprep.mubr.bf16.mxu1 %v7976_v27  ;;  %v7899_v16 = vpop.f32.mrb[233].mxu1 }
 0x57f   : > { %v11035_v26 = vadd.f32 %v11034_v53, %v7868_v39  ;;  %v7900_v14 = vpop.f32.mrb[234].mxu1 }
 0x580   : > { %v7902_v49 = vpop.f32.mrb[235].mxu1 }
 0x581   : > { %v18678_v36 = vpack.c.bf16 %v11035_v26, %v11033_v54  ;;  %v20012_v26 = vld [vmem:[#allocation13_spill] sm:$0xff] }
 0x582   : > { %v7584_v13 = vpop.f32.mrb[104].mxu0 }
 0x583   : > { %v11036_v56 = vadd.f32 %v7584_v13, %v18335_v32  ;;  %v7586_v59 = vpop.f32.mrb[105].mxu0  ;;  %8001 = vxpose.xlu0.c.b16.cont [2/8] (narrow) %v18678_v36, 16 }
 0x584   : > { %v7587_v58 = vpop.f32.mrb[106].mxu0  ;;  %v7905_v39 = vpop.f32.mrb[236].mxu1  ;;  %v20013_v59 = vld [vmem:[#allocation23_spill] sm:$0xff] }
 0x585   : > { %v11038_v41 = vadd.f32 %v7587_v58, %v18345_v57  ;;  %v11037_v47 = vadd.f32 %v11036_v56, %v7873_v46  ;;  %v7589_v4 = vpop.f32.mrb[107].mxu0  ;;  %v7907_v9 = vpop.f32.mrb[237].mxu1 }
 0x586   : > { %v7908_v32 = vpop.f32.mrb[238].mxu1 }
 0x587   : > { %v11039_v25 = vadd.f32 %v11038_v41, %v7876_v63  ;;  %v7910_v37 = vpop.f32.mrb[239].mxu1 }
 0x589   : > { %v18683_v31 = vpack.c.bf16 %v11039_v25, %v11037_v47  ;;  %v20014_v47 = vld [vmem:[#allocation24_spill] sm:$0xff] }
 0x58a   : > { %v7592_v52 = vpop.f32.mrb[108].mxu0 }
 0x58b   : > { %v11040_v6 = vadd.f32 %v7592_v52, %v18359_v19  ;;  %v7594_v45 = vpop.f32.mrb[109].mxu0  ;;  %8002 = vxpose.xlu0.c.b16.cont [3/8] (narrow) %v18683_v31, 16 }
 0x58c   : > { %v7595_v33 = vpop.f32.mrb[110].mxu0  ;;  %v7913_v63 = vpop.f32.mrb[240].mxu1 }
 0x58d   : > { %v11042_v34 = vadd.f32 %v7595_v33, %v18369_v23  ;;  %v11041_v29 = vadd.f32 %v11040_v6, %v7881_v18  ;;  %v7597_v57 = vpop.f32.mrb[111].mxu0  ;;  %v7915_v43 = vpop.f32.mrb[241].mxu1 }
 0x58e   : > { %v7916_v19 = vpop.f32.mrb[242].mxu1 }
 0x58f   : > { %v11043_v46 = vadd.f32 %v11042_v34, %v7884_v1  ;;  %v7918_v27 = vpop.f32.mrb[243].mxu1  ;;  %v20016_v34 = vld [vmem:[#allocation25_spill] sm:$0xff] }
 0x591   : > { %v18688_v61 = vpack.c.bf16 %v11043_v46, %v11041_v29 }
 0x592   : > { %v7600_v11 = vpop.f32.mrb[112].mxu0 }
 0x593   : > { %v11044_v53 = vadd.f32 %v7600_v11, %v20011_v10  ;;  %v7602_v54 = vpop.f32.mrb[113].mxu0  ;;  %8003 = vxpose.xlu0.c.b16.cont [4/8] (narrow) %v18688_v61, 16 }
 0x594   : > { %v7603_v0 = vpop.f32.mrb[114].mxu0 }
 0x595   : > { %v11046_v13 = vadd.f32 %v7603_v0, %v20012_v26  ;;  %v11045_v16 = vadd.f32 %v11044_v53, %v7889_v22  ;;  %v7605_v23 = vpop.f32.mrb[115].mxu0  ;;  %v20015_v22 = vld [vmem:[#allocation58_spill] sm:$0xff]  ;;  %v20018_v0 = vld [vmem:[#allocation27_spill] sm:$0xff] }
 0x597   : > { %v11047_v18 = vadd.f32 %v11046_v13, %v7892_v17 }
 0x599   : > { %v18693_v56 = vpack.c.bf16 %v11047_v18, %v11045_v16 }
 0x59a   : > { %v7608_v1 = vpop.f32.mrb[116].mxu0 }
 0x59b   : > { %v11048_v58 = vadd.f32 %v7608_v1, %v20013_v59  ;;  %v7610_v49 = vpop.f32.mrb[117].mxu0  ;;  %8004 = vxpose.xlu0.c.b16.cont [5/8] (narrow) %v18693_v56, 16 }
 0x59c   : > { %v7611_v41 = vpop.f32.mrb[118].mxu0 }
 0x59d   : > { %v11050_v4 = vadd.f32 %v7611_v41, %v20014_v47  ;;  %v11049_v25 = vadd.f32 %v11048_v58, %v7897_v51  ;;  %v7613_v52 = vpop.f32.mrb[119].mxu0  ;;  %v20017_v51 = vld [vmem:[#allocation26_spill] sm:$0xff]  ;;  %v20020_v58 = vld [vmem:[#allocation60_spill] sm:$0xff] }
 0x59f   : > { %v11051_v9 = vadd.f32 %v11050_v4, %v7900_v14 }
 0x5a1   : > { %v18698_v6 = vpack.c.bf16 %v11051_v9, %v11049_v25  ;;  %v20022_v9 = vld [vmem:[#allocation62_spill] sm:$0xff] }
 0x5a2   : > { %v7616_v45 = vpop.f32.mrb[120].mxu0 }
 0x5a3   : > { %v11052_v33 = vadd.f32 %v7616_v45, %v20015_v22  ;;  %v7618_v17 = vpop.f32.mrb[121].mxu0  ;;  %8005 = vxpose.xlu0.c.b16.cont [6/8] (narrow) %v18698_v6, 16 }
 0x5a4   : > { %v7619_v37 = vpop.f32.mrb[122].mxu0 }
 0x5a5   : > { %v11054_v29 = vadd.f32 %v7619_v37, %v20016_v34  ;;  %v11053_v57 = vadd.f32 %v11052_v33, %v7905_v39  ;;  %v7621_v46 = vpop.f32.mrb[123].mxu0  ;;  %v20019_v39 = vld [vmem:[#allocation59_spill] sm:$0xff] }
 0x5a6   : > { %v20023_v37 = vld [vmem:[#allocation63_spill] sm:$0xff]  ;;  %v20024_v46 = vld [vmem:[#allocation64_spill] sm:$0xff] }
 0x5a7   : > { %v11055_v11 = vadd.f32 %v11054_v29, %v7908_v32 }
 0x5a9   : > { %v18703_v43 = vpack.c.bf16 %v11055_v11, %v11053_v57 }
 0x5aa   : > { %v7624_v10 = vpop.f32.mrb[124].mxu0 }
 0x5ab   : > { %v11056_v53 = vadd.f32 %v7624_v10, %v20017_v51  ;;  %v7626_v14 = vpop.f32.mrb[125].mxu0  ;;  %8006 = vxpose.xlu0.c.b16.cont [7/8] (narrow) %v18703_v43, 16 }
 0x5ac   : > { %v7627_v54 = vpop.f32.mrb[126].mxu0 }
 0x5ad   : > { %v11058_v27 = vadd.f32 %v7627_v54, %v20018_v0  ;;  %v11057_v26 = vadd.f32 %v11056_v53, %v7913_v63  ;;  %v7629_v13 = vpop.f32.mrb[127].mxu0  ;;  %v20021_v63 = vld [vmem:[#allocation61_spill] sm:$0xff] }
 0x5af   : > { %v11059_v16 = vadd.f32 %v11058_v27, %v7916_v19 }
 0x5b1   : > { %v18708_v23 = vpack.c.bf16 %v11059_v16, %v11057_v26 }
 0x5b2   : > { %v7665_v18 = vpop.f32.mrb[0].mxu0 }
 0x5b3   : > { %v10938_v1 = vadd.f32 %v7665_v18, %v20019_v39  ;;  %v7667_v32 = vpop.f32.mrb[1].mxu0  ;;  %8007 = vxpose.xlu0.c.b16.end [8/8] (narrow) %v18708_v23, 16 }
 0x5b4   : > { %v7668_v59 = vpop.f32.mrb[2].mxu0 }
 0x5b5   : > { %v10939_v49 = vadd.f32 %v7668_v59, %v20020_v58  ;;  %v7670_v41 = vpop.f32.mrb[3].mxu0 }
 0x5b7   : > { %v7920_v47 = vpack.c.bf16 %v10939_v49, %v10938_v1 }
 0x5b9   : > { %7952 = vxpose.xlu1.c.b16.start [1/8] (narrow) %v7920_v47, 16  ;;  %10863 = vmatpush3.bf16.msra.mxu1 %v7920_v47 }
 0x5ba   : > { %v7673_v4 = vpop.f32.mrb[4].mxu0  ;;  %10864 = vmatprep.subr.bf16.mxu1 %v18606_v30 }
 0x5bb   : > { %v10940_v19 = vadd.f32 %v7673_v4, %v20021_v63  ;;  %v7675_v25 = vpop.f32.mrb[5].mxu0 }
 0x5bc   : > { %v7676_v52 = vpop.f32.mrb[6].mxu0 }
 0x5bd   : > { %v10941_v45 = vadd.f32 %v7676_v52, %v20022_v9  ;;  %v7678_v22 = vpop.f32.mrb[7].mxu0 }
 0x5bf   : > { %v7921_v33 = vpack.c.bf16 %v10941_v45, %v10940_v19 }
 0x5c1   : > { %7953 = vxpose.xlu1.c.b16.cont [2/8] (narrow) %v7921_v33, 16  ;;  %10865 = vmatpush3.bf16.msra.mxu1 %v7921_v33 }
 0x5c2   : > { %v7681_v17 = vpop.f32.mrb[8].mxu0  ;;  %10866 = vmatprep.subr.bf16.mxu1 %v18611_v21 }
 0x5c3   : > { %v10942_v34 = vadd.f32 %v7681_v17, %v20023_v37  ;;  %v7683_v29 = vpop.f32.mrb[9].mxu0 }
 0x5c4   : > { %v7684_v57 = vpop.f32.mrb[10].mxu0 }
 0x5c5   : > { %v10943_v11 = vadd.f32 %v7684_v57, %v20024_v46  ;;  %v7686_v30 = vpop.f32.mrb[11].mxu0 }
 0x5c7   : > { %v7922_v10 = vpack.c.bf16 %v10943_v11, %v10942_v34 }
 0x5c9   : > { %7954 = vxpose.xlu1.c.b16.cont [3/8] (narrow) %v7922_v10, 16  ;;  %10867 = vmatpush3.bf16.msra.mxu1 %v7922_v10 }
 0x5ca   : > { %10868 = vmatprep.subr.bf16.mxu1 %v18616_v3 }
 0x5cd   : > { %7955 = vxpose.xlu1.c.b16.cont [4/8] (narrow) %v18542_v50, 16  ;;  %10869 = vmatpush3.bf16.msra.mxu1 %v18542_v50 }
 0x5ce   : > { %10870 = vmatprep.subr.bf16.mxu1 %v18621_v60 }
 0x5d1   : > { %7956 = vxpose.xlu1.c.b16.cont [5/8] (narrow) %v18560_v48, 16  ;;  %10871 = vmatpush3.bf16.msra.mxu1 %v18560_v48 }
 0x5d2   : > { %10872 = vmatprep.subr.bf16.mxu1 %v18626_v8 }
 0x5d5   : > { %7957 = vxpose.xlu1.c.b16.cont [6/8] (narrow) %v18576_v38, 16  ;;  %10873 = vmatpush3.bf16.msra.mxu1 %v18576_v38 }
 0x5d6   : > { %10874 = vmatprep.subr.bf16.mxu1 %v18631_v42  ;;  %v20025_v42 = vld [vmem:[#allocation8_spill] sm:$0xff] }
 0x5d7   : > { %vm1893_vm9 = vcmp.eq.s32.totalorder %v12011_v2, %v20025_v42 }
 0x5d9   : > { %7958 = vxpose.xlu1.c.b16.cont [7/8] (narrow) %v18592_v5, 16  ;;  %10875 = vmatpush3.bf16.msra.mxu1 %v18592_v5 }
 0x5da   : > { %10876 = vmatprep.subr.bf16.mxu1 %v18636_v12 }
 0x5dd   : > { %7959 = vxpose.xlu1.c.b16.end [8/8] (narrow) %v18599_v7, 16  ;;  %10877 = vmatpush3.bf16.msra.mxu1 %v18599_v7 }
 0x5de   : > { %10884 = vmatprep.subr.bf16.mxu1 %v18673_v20 }
 0x5e1   : > { %7984 = vxpose.xlu1.c.b16.start [1/8] (narrow) %v18641_v35, 16 }
 0x5e5   : > { %7985 = vxpose.xlu1.c.b16.cont [2/8] (narrow) %v18645_v28, 16 }
 0x5e9   : > { %7986 = vxpose.xlu1.c.b16.cont [3/8] (narrow) %v18649_v15, 16 }
 0x5ed   : > { %7987 = vxpose.xlu1.c.b16.cont [4/8] (narrow) %v18653_v44, 16 }
 0x5f1   : > { %7988 = vxpose.xlu1.c.b16.cont [5/8] (narrow) %v18657_v24, 16 }
 0x5f5   : > { %7989 = vxpose.xlu1.c.b16.cont [6/8] (narrow) %v18661_v40, 16 }
 0x5f9   : > { %7990 = vxpose.xlu1.c.b16.cont [7/8] (narrow) %v18665_v55, 16 }
 0x5fd   : > { %7991 = vxpose.xlu1.c.b16.end [8/8] (narrow) %v18669_v62, 16  ;;  %v8008_v50 = vpop.trf.xlu0 }
 0x627   : > { %v7960_v48 = vpop.trf.xlu1 }
 0x628   : > { %8049 = vmatmul.mubr.bf16.vlgmr.msra.gmra.mrb[244].mxu1 %v7960_v48 }
 0x629   : > { %10885 = vmatpush3.bf16.msra.mxu1 %v18641_v35  ;;  %8088 = vmatprep.mubr.bf16.mxu1 %v8008_v50 }
 0x62a   : > { %10886 = vmatprep.subr.bf16.mxu1 %v18678_v36 }
 0x62d   : > { %10887 = vmatpush3.bf16.msra.mxu1 %v18645_v28 }
 0x62e   : > { %10888 = vmatprep.subr.bf16.mxu1 %v18683_v31 }
 0x631   : > { %10889 = vmatpush3.bf16.msra.mxu1 %v18649_v15  ;;  %v11874_v15 = vmov 0.0  }
 0x632   : > { %10890 = vmatprep.subr.bf16.mxu1 %v18688_v61 }
 0x635   : > { %10891 = vmatpush3.bf16.msra.mxu1 %v18653_v44  ;;  %v8552_v44 = vsel %vm1893_vm9, 1.0, %v11874_v15  ;;  %vm8169_vm9 = vcmask 990208  }
 0x636   : > { %10892 = vmatprep.subr.bf16.mxu1 %v18693_v56 }
 0x639   : > { %10893 = vmatpush3.bf16.msra.mxu1 %v18657_v24 }
 0x63a   : > { %10894 = vmatprep.subr.bf16.mxu1 %v18698_v6 }
 0x63d   : > { %10895 = vmatpush3.bf16.msra.mxu1 %v18661_v40 }
 0x63e   : > { %10896 = vmatprep.subr.bf16.mxu1 %v18703_v43 }
 0x641   : > { %10897 = vmatpush3.bf16.msra.mxu1 %v18665_v55 }
 0x642   : > { %10898 = vmatprep.subr.bf16.mxu1 %v18708_v23 }
 0x645   : > { %10899 = vmatpush3.bf16.msra.mxu1 %v18669_v62 }
 0x647   : > { %v7992_v38 = vpop.trf.xlu1 }
 0x648   : > { %8089 = vmatmul.mubr.bf16.vlgmr.msra.gmra.mrb[248].mxu1 %v7992_v38 }
 0x6fb   : > { %v10878_v5 = vpop.f32.mrb[244].mxu1 }
 0x6fc   : > { %v10879_v7 = vpop.f32.mrb[245].mxu1 }
 0x6fd   : > { %v10880_v21 = vadd.f32 %v10879_v7, %v10878_v5  ;;  %v10881_v3 = vpop.f32.mrb[246].mxu1 }
 0x6fe   : > { %v10882_v60 = vpop.f32.mrb[247].mxu1 }
 0x71b   : > { %v10900_v8 = vpop.f32.mrb[248].mxu1 }
 0x71c   : > { %v10901_v12 = vpop.f32.mrb[249].mxu1 }
 0x71d   : > { %v10902_v35 = vadd.f32 %v10901_v12, %v10900_v8  ;;  %v10903_v28 = vpop.f32.mrb[250].mxu1 }
 0x71e   : > { %v10904_v24 = vpop.f32.mrb[251].mxu1 }
 0x71f   : > { %v8091_v40 = vadd.f32 %v10902_v35, %v10880_v21 }
 0x721   : > { %v8096_v55 = vmul.f32 %v8552_v44, %v8091_v40 }
 0x723   : > { %v8098_v62 = vsel %vm8097_vm4, %v8096_v55, 0.0  ;;  %vm8184_vm4 = vcmask 1046528  }
 0x724   : > { %8099 = vadd.xlane.f32.xlu0 %v8098_v62  ;;  %v8101_v20 = vrot.slane %v8098_v62, 4 }
 0x726   : > { %v8102_v36 = vadd.f32 %v8101_v20, %v8098_v62 }
 0x728   : > { %v8103_v31 = vrot.slane %v8102_v36, 2 }
 0x72a   : > { %v8104_v61 = vadd.f32 %v8103_v31, %v8102_v36 }
 0x72c   : > { %v8105_v56 = vrot.slane %v8104_v61, 1 }
 0x72e   : > { %v8106_v6 = vadd.f32 %v8105_v56, %v8104_v61 }
 0x730   : > { %v8109_v51 = vmax.f32 %v8106_v6, 1e-24 }
 0x73a   : > { %8132 = vrot.lane.b32.xlu0 %v11874_v15, %s11875_s17 }
 0x73e   : > { %8153 = vrot.lane.b32.xlu0 %v11874_v15, %s11877_s26 }
 0x742   : > { %8160 = vrot.lane.b32.xlu0 %v11874_v15, %s11879_s28 }
 0x746   : > { %8167 = vrot.lane.b32.xlu0 %v11874_v15, %s11881_s30 }
 0x7b1   : > { %v8100_v43 = vpop.xlane.xlu0 %8099 }
 0x7b2   : > { %v8107_v2 = vmax.f32 %v8100_v43, 1e-24 }
 0x7b4   : > { %11769 = vrsqrt.f32 %v8107_v2 }
 0x7b5   : > { %11771 = vrsqrt.f32 %v8109_v51  ;;  %v8133_v32 = vpop.permute.xlu0 %8132 }
 0x7b9   : > { %v8154_v58 = vpop.permute.xlu0 %8153 }
 0x7bd   : > { %v8161_v47 = vpop.permute.xlu0 %8160 }
 0x7be   : > { %v11770_v53 = vpop.eup %11769 }
 0x7bf   : > { %v8111_v14 = vmul.f32 %v11770_v53, %v8091_v40  ;;  %v11772_v54 = vpop.eup %11771 }
 0x7c1   : > { %v8112_v0 = vmul.f32 %v11772_v54, %v8111_v14  ;;  %v8168_v37 = vpop.permute.xlu0 %8167 }
 0x7c3   : > { %8114 = vrot.lane.b32.xlu1 %v8112_v0, %s11876_s25 }
 0x7c7   : > { %8125 = vrot.lane.b32.xlu1 %v11874_v15, %s11878_s27 }
 0x7cb   : > { %8139 = vrot.lane.b32.xlu1 %v11874_v15, %s11880_s29 }
 0x7cf   : > { %8146 = vrot.lane.b32.xlu1 %v11874_v15, %s11882_s2 }
 0x835   : > { %v8115_v27 = vpop.permute.xlu1 %8114 }
 0x836   : > { %v8118_v26 = vsel %vm8117_vm5, 0.0, %v8115_v27 }
 0x837   : > { %v8120_v13 = vsel %vm8119_vm0, %v8118_v26, 0.0 }
 0x838   : > { %8123 = vrot.lane.b32.xlu1 %v8120_v13, %s11878_s27 }
 0x839   : > { %v8126_v16 = vpop.permute.xlu1 %8125 }
 0x83c   : > { %8130 = vrot.lane.b32.xlu1 %v8120_v13, %s11875_s17 }
 0x83d   : > { %v8140_v23 = vpop.permute.xlu1 %8139 }
 0x840   : > { %8137 = vrot.lane.b32.xlu1 %v8120_v13, %s11880_s29 }
 0x841   : > { %v8147_v18 = vpop.permute.xlu1 %8146 }
 0x844   : > { %8144 = vrot.lane.b32.xlu1 %v8120_v13, %s11882_s2 }
 0x848   : > { %8151 = vrot.lane.b32.xlu1 %v8120_v13, %s11877_s26 }
 0x84c   : > { %8158 = vrot.lane.b32.xlu1 %v8120_v13, %s11879_s28 }
 0x850   : > { %8165 = vrot.lane.b32.xlu1 %v8120_v13, %s11881_s30 }
 0x8aa   : > { %v8124_v39 = vpop.permute.xlu1 %8123 }
 0x8ab   : > { %v8128_v4 = vsel %vm8127_vm14, %v8124_v39, %v8126_v16 }
 0x8ac   : > { %v8173_v25 = vsel %vm8172_vm7, %v8120_v13, %v8128_v4 }
 0x8ae   : > { %v8131_v1 = vpop.permute.xlu1 %8130 }
 0x8af   : > { %v8135_v63 = vsel %vm8134_vm8, %v8131_v1, %v8133_v32 }
 0x8b0   : > { %v8175_v45 = vsel %vm8174_vm10, %v8173_v25, %v8135_v63 }
 0x8b2   : > { %v8138_v59 = vpop.permute.xlu1 %8137 }
 0x8b3   : > { %v8142_v19 = vsel %vm8141_vm6, %v8138_v59, %v8140_v23 }
 0x8b4   : > { %v8177_v33 = vsel %vm8176_vm11, %v8175_v45, %v8142_v19 }
 0x8b6   : > { %v8145_v49 = vpop.permute.xlu1 %8144 }
 0x8b7   : > { %v8149_v52 = vsel %vm8148_vm12, %v8145_v49, %v8147_v18 }
 0x8b8   : > { %v8179_v34 = vsel %vm8178_vm15, %v8177_v33, %v8149_v52 }
 0x8ba   : > { %v8152_v41 = vpop.permute.xlu1 %8151 }
 0x8bb   : > { %v8156_v22 = vsel %vm8155_vm13, %v8152_v41, %v8154_v58 }
 0x8bc   : > { %v8181_v29 = vsel %vm8180_vm3, %v8179_v34, %v8156_v22 }
 0x8be   : > { %v8159_v9 = vpop.permute.xlu1 %8158 }
 0x8bf   : > { %v8163_v17 = vsel %vm8162_vm1, %v8159_v9, %v8161_v47 }
 0x8c0   : > { %v8183_v46 = vsel %vm8182_vm2, %v8181_v29, %v8163_v17 }
 0x8c2   : > { %v8166_v57 = vpop.permute.xlu1 %8165 }
 0x8c3   : > { %v8170_v11 = vsel %vm8169_vm9, %v8166_v57, %v8168_v37 }
 0x8c4   : > { %v8185_v30 = vsel %vm8184_vm4, %v8183_v46, %v8170_v11 }
 0x8c5   : > { %8186 = vst [vmem:[%s132_s5] sm:$0xff] %v8185_v30 }
 0x8c6   : > { %11816 = shalt.err (!%p11813_p4)
}
 0x8c7   : > { %s11817_s21 = scalar_lea.hbm %s18765_s16, 128  ;;  %s11821_s26 = scalar_lea.hbm %s18810_s1, 256 }
 0x8c8   : > { %p11818_p5 = scmp.ne.s32.totalorder %s18765_s16, %s11817_s21  ;;  %p11822_p0 = scmp.lt.u32.totalorder %s18765_s16, %s18810_s1 }
 0x8c9   : > { %p11823_p1 = scmp.lt.u32.totalorder %s11821_s26, %s11817_s21  ;;  %p11825_p6 = scmp.lt.u32.totalorder %s11817_s21, %s18765_s16 }
 0x8ca   : > { %p11819_p8 = pnand %p11818_p5, %p20026_p11 }
 0x8cb   : > { %p11824_p3 = por %p11823_p1, %p11822_p0 }
 0x8cc   : > { %p11820_p9 = pneg %p11819_p8 }
 0x8cd   : > { %p11826_p12 = por %p11825_p6, %p11824_p3 }
 0x8cf   : > { %p11827_p13 = pnand %p11826_p12, %p11820_p9 }
 0x8d1   : > { %11830 = shalt.err (!%p11827_p13)
}
 0x8d2   : > { %11714 = dma.vmem_to_hbm [thread:$0]  (%p20026_p11), %s18767_s11, 128, %s18765_s16, %s8188_s10  }
 0x8d3 PF: > { %s8213_s29 = sand.u32 1, %s11857_s6   ;;  %p20027_p7 = scmp.ne.s32.totalorder %s18990_s19, 0 }
 0x8d4   : > { %p20028_p10 = scmp.ge.s32.totalorder %s11869_s9, 2  ;;  %s8214_s30 = scalar_lea.sflag [#allocation4], %s8213_s29 }
 0x8d6   : > { %p11721_p2 = pnand %p20028_p10, %p20027_p7 }
 0x8d8   : > { %11852 = dma.done.wait (!%p11721_p2), %s8214_s30, 128  }
 0x8d9   : > { %11854 = vsyncadd (!%p11721_p2), %s8214_s30, 4294967168  ;;  %p14_p4 = scmp.ge.s32.totalorder %s11919_s12, 4   ;;  %s20029_s6 = smov %s11861_s7 }
 0x8da   : > { %s20030_s7 = smov %s11865_s8  ;;  %s20031_s8 = smov %s11931_s15 }
 0x8db   : > { %s20032_s9 = smov %s11919_s12  ;;  %16 = sbr.rel (!%p14_p4) target bundleno = 5 (0x5), region = 69 }
 0x8e2   :  { %8219 = vsyncpa [#allocation3], 1 }
 0x8e3   :  { %8221 = vsyncpa [#allocation3 + $0x1], 1 }
 0x8e4   :  { %8222 = vsyncpa [#allocation4], 1 }
 0x8e5   :  { %8224 = vsyncpa [#allocation4 + $0x1], 1 }

</bundles_post_ra>
